<compile_context>
chip_gen: v6e
topology: v6e:2x2x1
jax: 0.10.0
libtpu: 0.0.40
codegen_flags: <defaults>
</compile_context>

<pallas_src>
import functools

import jax
import jax.numpy as jnp
from jax.experimental import pallas as pl
from jax.experimental.pallas import tpu as pltpu

# ----------------------------------------------------------------------------
# "cfg" constants (mirroring the config values the PyTorch module reads).
# ----------------------------------------------------------------------------
MAX_LIMBS = 8           # cfg.MODEL.MAX_LIMBS            (seq_len)
LIMB_EMBED_SIZE = 32    # cfg.MODEL.LIMB_EMBED_SIZE      (d_model)
GNN_LAYER_NUM = 2       # cfg.MODEL.GNN.LAYER_NUM
DECODER_DIMS = [32]     # cfg.MODEL.GNN.DECODER_DIMS
EMBED_INIT = 0.1        # cfg.MODEL.TRANSFORMER.EMBED_INIT
DECODER_INIT = 0.01     # cfg.MODEL.TRANSFORMER.DECODER_INIT

LIMB_OBS_SIZE = 16      # obs_space['proprioceptive'].shape[0] // MAX_LIMBS
DECODER_OUT_DIM = 2     # decoder_out_dim
BATCH = 256             # PPO-style batch

# TODO(synk): hfield MLPObsEncoder / late-fusion branch omitted ('hfield' is
# not in cfg.ENV.KEYS_TO_KEEP for this config).


def _tensorcores_per_chip():
    """1 TensorCore per chip on v5e/v6e; 2 on v4/v5p megacore and v7x."""
    try:
        kind = jax.devices()[0].device_kind.lower()
    except Exception:
        return 1
    if any(tag in kind for tag in ("v7", "7x", "v5p", "v4")):
        return 2
    return 1


# ----------------------------------------------------------------------------
# Pallas kernel: full forward pass for tb batch elements per grid step.
#
# In-kernel layout (lane-dense, review "Option A"):
#   activations x : (D, L*tb)   lane index p = limb*tb + batch_in_step
#   adjacency     : (L*L, tb)   row index   r = i*L + j  (i = dst limb, j = src)
#   weights       : PyTorch (out_features, in_features)  -> y = W @ x + b
#   biases        : (out_features, 1)                    -> broadcast over lanes
# ----------------------------------------------------------------------------
def _gnn_model_kernel(obs_ref, adj_ref, *rest, n_gnn, n_dec, limbs, tb):
    n_params = 2 * (1 + n_gnn + n_dec)
    w = rest[:n_params]
    out_ref = rest[n_params]

    L = limbs
    x = obs_ref[...]                      # (O, L*tb)  dense lanes
    adj = adj_ref[...]                    # (L*L, tb)  dense lanes

    # limb_embed: x = W_e @ obs + b_e   -> (D, L*tb)
    x = jnp.dot(w[0][...], x, preferred_element_type=jnp.float32) + w[1][...]

    # GraphNeuralNetwork: per layer  x = relu(W_g @ (adj @ x) + b_g)
    # final_nonlinearity=True => ReLU after every layer including the last.
    idx = 2
    for _ in range(n_gnn):
        gw, gb = w[idx][...], w[idx + 1][...]
        idx += 2
        # Aggregation on the VPU over lane-tile-aligned (D, tb) slices:
        #   agg[:, i*tb:(i+1)*tb] = sum_j adj[i*L+j, :] * x[:, j*tb:(j+1)*tb]
        cols = []
        for i in range(L):
            acc = adj[i * L:i * L + 1, :] * x[:, 0:tb]
            for j in range(1, L):
                acc = acc + adj[i * L + j:i * L + j + 1, :] * x[:, j * tb:(j + 1) * tb]
            cols.append(acc)
        agg = jnp.concatenate(cols, axis=1)          # lane-tile aligned pieces
        x = jnp.maximum(
            jnp.dot(gw, agg, preferred_element_type=jnp.float32) + gb, 0.0)

    # decoder MLP: ReLU between layers, none after the last layer.
    for k in range(n_dec):
        dw, db = w[idx][...], w[idx + 1][...]
        idx += 2
        x = jnp.dot(dw, x, preferred_element_type=jnp.float32) + db
        if k < n_dec - 1:
            x = jnp.maximum(x, 0.0)

    # Final x is already the lane-dense output block (out_dim, L*tb):
    # no sublane->lane repack needed here (wrapper un-transposes).
    out_ref[...] = x.astype(out_ref.dtype)


def gnn_model_forward(obs, adj, params, *, max_batch_tile=1024, tensorcores=None):
    """obs: (B, L, O) f32, adj: (B, L, L) f32, params: flat list (PyTorch layout).

    Returns (output, None) where output has shape (B, L * decoder_out_dim).
    """
    B, L, O = obs.shape
    out_dim = params[-2].shape[0]       # last decoder weight: (out_dim, in_dim)
    n_gnn = GNN_LAYER_NUM
    n_dec = len(DECODER_DIMS) + 1

    # --- per-generation grid sizing -----------------------------------------
    # One grid step per TensorCore (whole batch in one step on v5e/v6e, B/2
    # per step on dual-core chips), lane-aligned to 128 and capped for VMEM.
    n_tc = tensorcores if tensorcores is not None else _tensorcores_per_chip()
    tb = -(-B // n_tc)                          # per-core share of the batch
    tb = max(128, ((tb + 127) // 128) * 128)    # lane-tile aligned
    tb = min(tb, max(128, max_batch_tile))      # VMEM headroom (v7x: 64 MiB)
    pad = (-B) % tb
    bp = B + pad
    n_steps = bp // tb

    if pad:
        obs = jnp.pad(obs, ((0, pad), (0, 0), (0, 0)))
        adj = jnp.pad(adj, ((0, pad), (0, 0), (0, 0)))

    # --- lane-dense input packing (layout plumbing in the wrapper) ----------
    #   obs_k[s, o, l*tb + b] = obs[s*tb + b, l, o]        -> (n_steps, O, L*tb)
    #   adj_k[s, i*L + j, b]  = adj[s*tb + b, i, j]        -> (n_steps, L*L, tb)
    obs_k = (obs.reshape(n_steps, tb, L, O)
                .transpose(0, 3, 2, 1)
                .reshape(n_steps, O, L * tb))
    adj_k = adj.reshape(n_steps, tb, L * L).transpose(0, 2, 1)

    # Weights stay in PyTorch (out, in) layout (kernel computes W @ x);
    # biases become column vectors (out, 1) so they broadcast along lanes.
    kparams = []
    for i in range(0, len(params), 2):
        kparams.append(params[i])
        kparams.append(jnp.transpose(params[i + 1]))   # (1, out) -> (out, 1)

    # Weights/biases: constant block index => fetched once, held resident.
    param_specs = [pl.BlockSpec(p.shape, lambda s: (0, 0)) for p in kparams]

    in_specs = [
        pl.BlockSpec((None, O, L * tb), lambda s: (s, 0, 0)),     # obs (packed)
        pl.BlockSpec((None, L * L, tb), lambda s: (s, 0, 0)),     # adj (packed)
    ] + param_specs

    out_specs = pl.BlockSpec((None, out_dim, L * tb), lambda s: (s, 0, 0))

    kernel = functools.partial(
        _gnn_model_kernel, n_gnn=n_gnn, n_dec=n_dec, limbs=L, tb=tb)

    out = pl.pallas_call(
        kernel,
        out_shape=jax.ShapeDtypeStruct((n_steps, out_dim, L * tb), jnp.float32),
        grid_spec=pltpu.PrefetchScalarGridSpec(
            num_scalar_prefetch=0,
            grid=(n_steps,),
            in_specs=in_specs,
            out_specs=out_specs,
        ),
        compiler_params=pltpu.CompilerParams(
            dimension_semantics=("parallel",),   # shards steps across TCs
        ),
    )(obs_k, adj_k, *kparams)

    # (n_steps, out_dim, L*tb) -> (Bp, L*out_dim); matches PyTorch's
    # output.reshape(batch_size, -1) ordering (limb-major, out_dim-minor).
    out = (out.reshape(n_steps, out_dim, L, tb)
              .transpose(0, 3, 2, 1)
              .reshape(bp, L * out_dim))
    if pad:
        out = out[:B]
    return out, None


# ----------------------------------------------------------------------------
# Deterministic parameter construction (mirrors __init__ / init_weights).
# ----------------------------------------------------------------------------
def make_params(key):
    def linear(key, out_f, in_f, w_range=None, zero_bias=False):
        kw, kb = jax.random.split(key)
        bound = 1.0 / jnp.sqrt(in_f)
        wr = w_range if w_range is not None else bound
        w = jax.random.uniform(kw, (out_f, in_f), jnp.float32, -wr, wr)
        if zero_bias:
            b = jnp.zeros((1, out_f), jnp.float32)
        else:
            b = jax.random.uniform(kb, (1, out_f), jnp.float32, -bound, bound)
        return w, b

    keys = jax.random.split(key, 1 + GNN_LAYER_NUM + len(DECODER_DIMS) + 1)
    params = []

    # limb_embed: Linear(limb_obs_size -> d_model), weight ~ U(-EMBED_INIT, EMBED_INIT)
    w, b = linear(keys[0], LIMB_EMBED_SIZE, LIMB_OBS_SIZE, w_range=EMBED_INIT)
    params += [w, b]

    # GNN layers: Linear(d_model -> d_model)
    for i in range(GNN_LAYER_NUM):
        w, b = linear(keys[1 + i], LIMB_EMBED_SIZE, LIMB_EMBED_SIZE)
        params += [w, b]

    # decoder MLP: [d_model] + DECODER_DIMS + [decoder_out_dim]
    dims = [LIMB_EMBED_SIZE] + DECODER_DIMS + [DECODER_OUT_DIM]
    for i, (din, dout) in enumerate(zip(dims[:-1], dims[1:])):
        is_last = i == len(dims) - 2
        w, b = linear(
            keys[1 + GNN_LAYER_NUM + i],
            dout,
            din,
            w_range=DECODER_INIT if is_last else None,
            zero_bias=is_last,
        )
        params += [w, b]

    return params


# ----------------------------------------------------------------------------
# Pure-JAX reference (same math) used to sanity-check the kernel.
# ----------------------------------------------------------------------------
def reference_forward(obs, adj, params):
    x = jnp.einsum("blo,do->bld", obs, params[0]) + params[1]
    idx = 2
    for _ in range(GNN_LAYER_NUM):
        gw, gb = params[idx], params[idx + 1]
        idx += 2
        x = jnp.einsum("bij,bjd->bid", adj, x)
        x = jnp.einsum("bld,ed->ble", x, gw) + gb
        x = jnp.maximum(x, 0.0)
    n_dec = len(DECODER_DIMS) + 1
    for i in range(n_dec):
        dw, db = params[idx], params[idx + 1]
        idx += 2
        x = jnp.einsum("bld,ed->ble", x, dw) + db
        if i < n_dec - 1:
            x = jnp.maximum(x, 0.0)
    return x.reshape(obs.shape[0], -1)


if __name__ == "__main__":
    root = jax.random.PRNGKey(0)
    k_obs, k_adj, k_par = jax.random.split(root, 3)

    obs = jax.random.normal(k_obs, (BATCH, MAX_LIMBS, LIMB_OBS_SIZE), jnp.float32)

    # Symmetric adjacency with self-loops (morphology_info['adjacency_matrix']).
    a = (jax.random.uniform(k_adj, (BATCH, MAX_LIMBS, MAX_LIMBS)) > 0.6).astype(jnp.float32)
    adj = jnp.clip(a + jnp.swapaxes(a, 1, 2) + jnp.eye(MAX_LIMBS)[None], 0.0, 1.0)

    params = make_params(k_par)

    out, _ = gnn_model_forward(obs, adj, params)
    out = jax.block_until_ready(out)

    ref = reference_forward(obs, adj, params)
    assert out.shape == (BATCH, MAX_LIMBS * DECODER_OUT_DIM), out.shape
    assert jnp.allclose(out, ref, atol=1e-4, rtol=1e-4), "mismatch vs reference"

    print("KERNEL_OK")
</pallas_src>

<mosaic_0001>
module attributes {stable_mosaic.version = 11 : i64} {
  func.func @_gnn_model_kernel(%arg0: i32, %arg1: memref<1x16x2048xf32, #tpu.memory_space<vmem>>, %arg2: memref<1x64x256xf32, #tpu.memory_space<vmem>>, %arg3: memref<32x16xf32, #tpu.memory_space<vmem>>, %arg4: memref<32x1xf32, #tpu.memory_space<vmem>>, %arg5: memref<32x32xf32, #tpu.memory_space<vmem>>, %arg6: memref<32x1xf32, #tpu.memory_space<vmem>>, %arg7: memref<32x32xf32, #tpu.memory_space<vmem>>, %arg8: memref<32x1xf32, #tpu.memory_space<vmem>>, %arg9: memref<32x32xf32, #tpu.memory_space<vmem>>, %arg10: memref<32x1xf32, #tpu.memory_space<vmem>>, %arg11: memref<2x32xf32, #tpu.memory_space<vmem>>, %arg12: memref<2x1xf32, #tpu.memory_space<vmem>>, %arg13: memref<1x2x2048xf32, #tpu.memory_space<vmem>>) attributes {dimension_semantics = [#tpu.dimension_semantics<parallel>], iteration_bounds = array<i64: 1>, scalar_prefetch = 0 : i64, scratch_operands = 0 : i64, tpu.core_type = #tpu.core_type<tc>, window_params = [{transform_indices = @transform_0, window_bounds = array<i64: 1, 16, 2048>}, {transform_indices = @transform_1, window_bounds = array<i64: 1, 64, 256>}, {pipeline_mode = #tpu.pipeline_mode<synchronous>, transform_indices = @transform_2, window_bounds = array<i64: 32, 16>}, {pipeline_mode = #tpu.pipeline_mode<synchronous>, transform_indices = @transform_3, window_bounds = array<i64: 32, 1>}, {pipeline_mode = #tpu.pipeline_mode<synchronous>, transform_indices = @transform_4, window_bounds = array<i64: 32, 32>}, {pipeline_mode = #tpu.pipeline_mode<synchronous>, transform_indices = @transform_5, window_bounds = array<i64: 32, 1>}, {pipeline_mode = #tpu.pipeline_mode<synchronous>, transform_indices = @transform_6, window_bounds = array<i64: 32, 32>}, {pipeline_mode = #tpu.pipeline_mode<synchronous>, transform_indices = @transform_7, window_bounds = array<i64: 32, 1>}, {pipeline_mode = #tpu.pipeline_mode<synchronous>, transform_indices = @transform_8, window_bounds = array<i64: 32, 32>}, {pipeline_mode = #tpu.pipeline_mode<synchronous>, transform_indices = @transform_9, window_bounds = array<i64: 32, 1>}, {pipeline_mode = #tpu.pipeline_mode<synchronous>, transform_indices = @transform_10, window_bounds = array<i64: 2, 32>}, {pipeline_mode = #tpu.pipeline_mode<synchronous>, transform_indices = @transform_11, window_bounds = array<i64: 2, 1>}, {transform_indices = @transform_12, window_bounds = array<i64: 1, 2, 2048>}]} {
    %c0 = arith.constant 0 : index
    %c0_0 = arith.constant 0 : index
    %c0_1 = arith.constant 0 : index
    %0 = vector.load %arg1[%c0, %c0_0, %c0_1] : memref<1x16x2048xf32, #tpu.memory_space<vmem>>, vector<1x16x2048xf32>
    %1 = vector.shape_cast %0 : vector<1x16x2048xf32> to vector<16x2048xf32>
    %c0_2 = arith.constant 0 : index
    %c0_3 = arith.constant 0 : index
    %c0_4 = arith.constant 0 : index
    %2 = vector.load %arg2[%c0_2, %c0_3, %c0_4] : memref<1x64x256xf32, #tpu.memory_space<vmem>>, vector<1x64x256xf32>
    %3 = vector.shape_cast %2 : vector<1x64x256xf32> to vector<64x256xf32>
    %c0_5 = arith.constant 0 : index
    %c0_6 = arith.constant 0 : index
    %4 = vector.load %arg3[%c0_5, %c0_6] : memref<32x16xf32, #tpu.memory_space<vmem>>, vector<32x16xf32>
    %cst = arith.constant dense<0.000000e+00> : vector<32x2048xf32>
    %5 = tpu.matmul %4, %1, %cst {dimension_numbers = #tpu.dot_dimension_numbers<[1], [0], [0], [1], [0, 0, 1, 1], [], []>} : vector<32x16xf32>, vector<16x2048xf32>, vector<32x2048xf32> -> vector<32x2048xf32>
    %c0_7 = arith.constant 0 : index
    %c0_8 = arith.constant 0 : index
    %6 = vector.load %arg4[%c0_7, %c0_8] : memref<32x1xf32, #tpu.memory_space<vmem>>, vector<32x1xf32>
    %7 = vector.broadcast %6 : vector<32x1xf32> to vector<32x2048xf32>
    %8 = arith.addf %5, %7 : vector<32x2048xf32>
    %c0_9 = arith.constant 0 : index
    %c0_10 = arith.constant 0 : index
    %9 = vector.load %arg5[%c0_9, %c0_10] : memref<32x32xf32, #tpu.memory_space<vmem>>, vector<32x32xf32>
    %c0_11 = arith.constant 0 : index
    %c0_12 = arith.constant 0 : index
    %10 = vector.load %arg6[%c0_11, %c0_12] : memref<32x1xf32, #tpu.memory_space<vmem>>, vector<32x1xf32>
    %11 = vector.extract_strided_slice %3 {offsets = [0, 0], sizes = [1, 256], strides = [1, 1]} : vector<64x256xf32> to vector<1x256xf32>
    %12 = vector.extract_strided_slice %8 {offsets = [0, 0], sizes = [32, 256], strides = [1, 1]} : vector<32x2048xf32> to vector<32x256xf32>
    %13 = vector.broadcast %11 : vector<1x256xf32> to vector<32x256xf32>
    %14 = arith.mulf %13, %12 : vector<32x256xf32>
    %15 = vector.extract_strided_slice %3 {offsets = [1, 0], sizes = [1, 256], strides = [1, 1]} : vector<64x256xf32> to vector<1x256xf32>
    %16 = vector.extract_strided_slice %8 {offsets = [0, 256], sizes = [32, 256], strides = [1, 1]} : vector<32x2048xf32> to vector<32x256xf32>
    %17 = vector.broadcast %15 : vector<1x256xf32> to vector<32x256xf32>
    %18 = arith.mulf %17, %16 : vector<32x256xf32>
    %19 = arith.addf %14, %18 : vector<32x256xf32>
    %20 = vector.extract_strided_slice %3 {offsets = [2, 0], sizes = [1, 256], strides = [1, 1]} : vector<64x256xf32> to vector<1x256xf32>
    %21 = vector.extract_strided_slice %8 {offsets = [0, 512], sizes = [32, 256], strides = [1, 1]} : vector<32x2048xf32> to vector<32x256xf32>
    %22 = vector.broadcast %20 : vector<1x256xf32> to vector<32x256xf32>
    %23 = arith.mulf %22, %21 : vector<32x256xf32>
    %24 = arith.addf %19, %23 : vector<32x256xf32>
    %25 = vector.extract_strided_slice %3 {offsets = [3, 0], sizes = [1, 256], strides = [1, 1]} : vector<64x256xf32> to vector<1x256xf32>
    %26 = vector.extract_strided_slice %8 {offsets = [0, 768], sizes = [32, 256], strides = [1, 1]} : vector<32x2048xf32> to vector<32x256xf32>
    %27 = vector.broadcast %25 : vector<1x256xf32> to vector<32x256xf32>
    %28 = arith.mulf %27, %26 : vector<32x256xf32>
    %29 = arith.addf %24, %28 : vector<32x256xf32>
    %30 = vector.extract_strided_slice %3 {offsets = [4, 0], sizes = [1, 256], strides = [1, 1]} : vector<64x256xf32> to vector<1x256xf32>
    %31 = vector.extract_strided_slice %8 {offsets = [0, 1024], sizes = [32, 256], strides = [1, 1]} : vector<32x2048xf32> to vector<32x256xf32>
    %32 = vector.broadcast %30 : vector<1x256xf32> to vector<32x256xf32>
    %33 = arith.mulf %32, %31 : vector<32x256xf32>
    %34 = arith.addf %29, %33 : vector<32x256xf32>
    %35 = vector.extract_strided_slice %3 {offsets = [5, 0], sizes = [1, 256], strides = [1, 1]} : vector<64x256xf32> to vector<1x256xf32>
    %36 = vector.extract_strided_slice %8 {offsets = [0, 1280], sizes = [32, 256], strides = [1, 1]} : vector<32x2048xf32> to vector<32x256xf32>
    %37 = vector.broadcast %35 : vector<1x256xf32> to vector<32x256xf32>
    %38 = arith.mulf %37, %36 : vector<32x256xf32>
    %39 = arith.addf %34, %38 : vector<32x256xf32>
    %40 = vector.extract_strided_slice %3 {offsets = [6, 0], sizes = [1, 256], strides = [1, 1]} : vector<64x256xf32> to vector<1x256xf32>
    %41 = vector.extract_strided_slice %8 {offsets = [0, 1536], sizes = [32, 256], strides = [1, 1]} : vector<32x2048xf32> to vector<32x256xf32>
    %42 = vector.broadcast %40 : vector<1x256xf32> to vector<32x256xf32>
    %43 = arith.mulf %42, %41 : vector<32x256xf32>
    %44 = arith.addf %39, %43 : vector<32x256xf32>
    %45 = vector.extract_strided_slice %3 {offsets = [7, 0], sizes = [1, 256], strides = [1, 1]} : vector<64x256xf32> to vector<1x256xf32>
    %46 = vector.extract_strided_slice %8 {offsets = [0, 1792], sizes = [32, 256], strides = [1, 1]} : vector<32x2048xf32> to vector<32x256xf32>
    %47 = vector.broadcast %45 : vector<1x256xf32> to vector<32x256xf32>
    %48 = arith.mulf %47, %46 : vector<32x256xf32>
    %49 = arith.addf %44, %48 : vector<32x256xf32>
    %50 = vector.extract_strided_slice %3 {offsets = [8, 0], sizes = [1, 256], strides = [1, 1]} : vector<64x256xf32> to vector<1x256xf32>
    %51 = vector.extract_strided_slice %8 {offsets = [0, 0], sizes = [32, 256], strides = [1, 1]} : vector<32x2048xf32> to vector<32x256xf32>
    %52 = vector.broadcast %50 : vector<1x256xf32> to vector<32x256xf32>
    %53 = arith.mulf %52, %51 : vector<32x256xf32>
    %54 = vector.extract_strided_slice %3 {offsets = [9, 0], sizes = [1, 256], strides = [1, 1]} : vector<64x256xf32> to vector<1x256xf32>
    %55 = vector.extract_strided_slice %8 {offsets = [0, 256], sizes = [32, 256], strides = [1, 1]} : vector<32x2048xf32> to vector<32x256xf32>
    %56 = vector.broadcast %54 : vector<1x256xf32> to vector<32x256xf32>
    %57 = arith.mulf %56, %55 : vector<32x256xf32>
    %58 = arith.addf %53, %57 : vector<32x256xf32>
    %59 = vector.extract_strided_slice %3 {offsets = [10, 0], sizes = [1, 256], strides = [1, 1]} : vector<64x256xf32> to vector<1x256xf32>
    %60 = vector.extract_strided_slice %8 {offsets = [0, 512], sizes = [32, 256], strides = [1, 1]} : vector<32x2048xf32> to vector<32x256xf32>
    %61 = vector.broadcast %59 : vector<1x256xf32> to vector<32x256xf32>
    %62 = arith.mulf %61, %60 : vector<32x256xf32>
    %63 = arith.addf %58, %62 : vector<32x256xf32>
    %64 = vector.extract_strided_slice %3 {offsets = [11, 0], sizes = [1, 256], strides = [1, 1]} : vector<64x256xf32> to vector<1x256xf32>
    %65 = vector.extract_strided_slice %8 {offsets = [0, 768], sizes = [32, 256], strides = [1, 1]} : vector<32x2048xf32> to vector<32x256xf32>
    %66 = vector.broadcast %64 : vector<1x256xf32> to vector<32x256xf32>
    %67 = arith.mulf %66, %65 : vector<32x256xf32>
    %68 = arith.addf %63, %67 : vector<32x256xf32>
    %69 = vector.extract_strided_slice %3 {offsets = [12, 0], sizes = [1, 256], strides = [1, 1]} : vector<64x256xf32> to vector<1x256xf32>
    %70 = vector.extract_strided_slice %8 {offsets = [0, 1024], sizes = [32, 256], strides = [1, 1]} : vector<32x2048xf32> to vector<32x256xf32>
    %71 = vector.broadcast %69 : vector<1x256xf32> to vector<32x256xf32>
    %72 = arith.mulf %71, %70 : vector<32x256xf32>
    %73 = arith.addf %68, %72 : vector<32x256xf32>
    %74 = vector.extract_strided_slice %3 {offsets = [13, 0], sizes = [1, 256], strides = [1, 1]} : vector<64x256xf32> to vector<1x256xf32>
    %75 = vector.extract_strided_slice %8 {offsets = [0, 1280], sizes = [32, 256], strides = [1, 1]} : vector<32x2048xf32> to vector<32x256xf32>
    %76 = vector.broadcast %74 : vector<1x256xf32> to vector<32x256xf32>
    %77 = arith.mulf %76, %75 : vector<32x256xf32>
    %78 = arith.addf %73, %77 : vector<32x256xf32>
    %79 = vector.extract_strided_slice %3 {offsets = [14, 0], sizes = [1, 256], strides = [1, 1]} : vector<64x256xf32> to vector<1x256xf32>
    %80 = vector.extract_strided_slice %8 {offsets = [0, 1536], sizes = [32, 256], strides = [1, 1]} : vector<32x2048xf32> to vector<32x256xf32>
    %81 = vector.broadcast %79 : vector<1x256xf32> to vector<32x256xf32>
    %82 = arith.mulf %81, %80 : vector<32x256xf32>
    %83 = arith.addf %78, %82 : vector<32x256xf32>
    %84 = vector.extract_strided_slice %3 {offsets = [15, 0], sizes = [1, 256], strides = [1, 1]} : vector<64x256xf32> to vector<1x256xf32>
    %85 = vector.extract_strided_slice %8 {offsets = [0, 1792], sizes = [32, 256], strides = [1, 1]} : vector<32x2048xf32> to vector<32x256xf32>
    %86 = vector.broadcast %84 : vector<1x256xf32> to vector<32x256xf32>
    %87 = arith.mulf %86, %85 : vector<32x256xf32>
    %88 = arith.addf %83, %87 : vector<32x256xf32>
    %89 = vector.extract_strided_slice %3 {offsets = [16, 0], sizes = [1, 256], strides = [1, 1]} : vector<64x256xf32> to vector<1x256xf32>
    %90 = vector.extract_strided_slice %8 {offsets = [0, 0], sizes = [32, 256], strides = [1, 1]} : vector<32x2048xf32> to vector<32x256xf32>
    %91 = vector.broadcast %89 : vector<1x256xf32> to vector<32x256xf32>
    %92 = arith.mulf %91, %90 : vector<32x256xf32>
    %93 = vector.extract_strided_slice %3 {offsets = [17, 0], sizes = [1, 256], strides = [1, 1]} : vector<64x256xf32> to vector<1x256xf32>
    %94 = vector.extract_strided_slice %8 {offsets = [0, 256], sizes = [32, 256], strides = [1, 1]} : vector<32x2048xf32> to vector<32x256xf32>
    %95 = vector.broadcast %93 : vector<1x256xf32> to vector<32x256xf32>
    %96 = arith.mulf %95, %94 : vector<32x256xf32>
    %97 = arith.addf %92, %96 : vector<32x256xf32>
    %98 = vector.extract_strided_slice %3 {offsets = [18, 0], sizes = [1, 256], strides = [1, 1]} : vector<64x256xf32> to vector<1x256xf32>
    %99 = vector.extract_strided_slice %8 {offsets = [0, 512], sizes = [32, 256], strides = [1, 1]} : vector<32x2048xf32> to vector<32x256xf32>
    %100 = vector.broadcast %98 : vector<1x256xf32> to vector<32x256xf32>
    %101 = arith.mulf %100, %99 : vector<32x256xf32>
    %102 = arith.addf %97, %101 : vector<32x256xf32>
    %103 = vector.extract_strided_slice %3 {offsets = [19, 0], sizes = [1, 256], strides = [1, 1]} : vector<64x256xf32> to vector<1x256xf32>
    %104 = vector.extract_strided_slice %8 {offsets = [0, 768], sizes = [32, 256], strides = [1, 1]} : vector<32x2048xf32> to vector<32x256xf32>
    %105 = vector.broadcast %103 : vector<1x256xf32> to vector<32x256xf32>
    %106 = arith.mulf %105, %104 : vector<32x256xf32>
    %107 = arith.addf %102, %106 : vector<32x256xf32>
    %108 = vector.extract_strided_slice %3 {offsets = [20, 0], sizes = [1, 256], strides = [1, 1]} : vector<64x256xf32> to vector<1x256xf32>
    %109 = vector.extract_strided_slice %8 {offsets = [0, 1024], sizes = [32, 256], strides = [1, 1]} : vector<32x2048xf32> to vector<32x256xf32>
    %110 = vector.broadcast %108 : vector<1x256xf32> to vector<32x256xf32>
    %111 = arith.mulf %110, %109 : vector<32x256xf32>
    %112 = arith.addf %107, %111 : vector<32x256xf32>
    %113 = vector.extract_strided_slice %3 {offsets = [21, 0], sizes = [1, 256], strides = [1, 1]} : vector<64x256xf32> to vector<1x256xf32>
    %114 = vector.extract_strided_slice %8 {offsets = [0, 1280], sizes = [32, 256], strides = [1, 1]} : vector<32x2048xf32> to vector<32x256xf32>
    %115 = vector.broadcast %113 : vector<1x256xf32> to vector<32x256xf32>
    %116 = arith.mulf %115, %114 : vector<32x256xf32>
    %117 = arith.addf %112, %116 : vector<32x256xf32>
    %118 = vector.extract_strided_slice %3 {offsets = [22, 0], sizes = [1, 256], strides = [1, 1]} : vector<64x256xf32> to vector<1x256xf32>
    %119 = vector.extract_strided_slice %8 {offsets = [0, 1536], sizes = [32, 256], strides = [1, 1]} : vector<32x2048xf32> to vector<32x256xf32>
    %120 = vector.broadcast %118 : vector<1x256xf32> to vector<32x256xf32>
    %121 = arith.mulf %120, %119 : vector<32x256xf32>
    %122 = arith.addf %117, %121 : vector<32x256xf32>
    %123 = vector.extract_strided_slice %3 {offsets = [23, 0], sizes = [1, 256], strides = [1, 1]} : vector<64x256xf32> to vector<1x256xf32>
    %124 = vector.extract_strided_slice %8 {offsets = [0, 1792], sizes = [32, 256], strides = [1, 1]} : vector<32x2048xf32> to vector<32x256xf32>
    %125 = vector.broadcast %123 : vector<1x256xf32> to vector<32x256xf32>
    %126 = arith.mulf %125, %124 : vector<32x256xf32>
    %127 = arith.addf %122, %126 : vector<32x256xf32>
    %128 = vector.extract_strided_slice %3 {offsets = [24, 0], sizes = [1, 256], strides = [1, 1]} : vector<64x256xf32> to vector<1x256xf32>
    %129 = vector.extract_strided_slice %8 {offsets = [0, 0], sizes = [32, 256], strides = [1, 1]} : vector<32x2048xf32> to vector<32x256xf32>
    %130 = vector.broadcast %128 : vector<1x256xf32> to vector<32x256xf32>
    %131 = arith.mulf %130, %129 : vector<32x256xf32>
    %132 = vector.extract_strided_slice %3 {offsets = [25, 0], sizes = [1, 256], strides = [1, 1]} : vector<64x256xf32> to vector<1x256xf32>
    %133 = vector.extract_strided_slice %8 {offsets = [0, 256], sizes = [32, 256], strides = [1, 1]} : vector<32x2048xf32> to vector<32x256xf32>
    %134 = vector.broadcast %132 : vector<1x256xf32> to vector<32x256xf32>
    %135 = arith.mulf %134, %133 : vector<32x256xf32>
    %136 = arith.addf %131, %135 : vector<32x256xf32>
    %137 = vector.extract_strided_slice %3 {offsets = [26, 0], sizes = [1, 256], strides = [1, 1]} : vector<64x256xf32> to vector<1x256xf32>
    %138 = vector.extract_strided_slice %8 {offsets = [0, 512], sizes = [32, 256], strides = [1, 1]} : vector<32x2048xf32> to vector<32x256xf32>
    %139 = vector.broadcast %137 : vector<1x256xf32> to vector<32x256xf32>
    %140 = arith.mulf %139, %138 : vector<32x256xf32>
    %141 = arith.addf %136, %140 : vector<32x256xf32>
    %142 = vector.extract_strided_slice %3 {offsets = [27, 0], sizes = [1, 256], strides = [1, 1]} : vector<64x256xf32> to vector<1x256xf32>
    %143 = vector.extract_strided_slice %8 {offsets = [0, 768], sizes = [32, 256], strides = [1, 1]} : vector<32x2048xf32> to vector<32x256xf32>
    %144 = vector.broadcast %142 : vector<1x256xf32> to vector<32x256xf32>
    %145 = arith.mulf %144, %143 : vector<32x256xf32>
    %146 = arith.addf %141, %145 : vector<32x256xf32>
    %147 = vector.extract_strided_slice %3 {offsets = [28, 0], sizes = [1, 256], strides = [1, 1]} : vector<64x256xf32> to vector<1x256xf32>
    %148 = vector.extract_strided_slice %8 {offsets = [0, 1024], sizes = [32, 256], strides = [1, 1]} : vector<32x2048xf32> to vector<32x256xf32>
    %149 = vector.broadcast %147 : vector<1x256xf32> to vector<32x256xf32>
    %150 = arith.mulf %149, %148 : vector<32x256xf32>
    %151 = arith.addf %146, %150 : vector<32x256xf32>
    %152 = vector.extract_strided_slice %3 {offsets = [29, 0], sizes = [1, 256], strides = [1, 1]} : vector<64x256xf32> to vector<1x256xf32>
    %153 = vector.extract_strided_slice %8 {offsets = [0, 1280], sizes = [32, 256], strides = [1, 1]} : vector<32x2048xf32> to vector<32x256xf32>
    %154 = vector.broadcast %152 : vector<1x256xf32> to vector<32x256xf32>
    %155 = arith.mulf %154, %153 : vector<32x256xf32>
    %156 = arith.addf %151, %155 : vector<32x256xf32>
    %157 = vector.extract_strided_slice %3 {offsets = [30, 0], sizes = [1, 256], strides = [1, 1]} : vector<64x256xf32> to vector<1x256xf32>
    %158 = vector.extract_strided_slice %8 {offsets = [0, 1536], sizes = [32, 256], strides = [1, 1]} : vector<32x2048xf32> to vector<32x256xf32>
    %159 = vector.broadcast %157 : vector<1x256xf32> to vector<32x256xf32>
    %160 = arith.mulf %159, %158 : vector<32x256xf32>
    %161 = arith.addf %156, %160 : vector<32x256xf32>
    %162 = vector.extract_strided_slice %3 {offsets = [31, 0], sizes = [1, 256], strides = [1, 1]} : vector<64x256xf32> to vector<1x256xf32>
    %163 = vector.extract_strided_slice %8 {offsets = [0, 1792], sizes = [32, 256], strides = [1, 1]} : vector<32x2048xf32> to vector<32x256xf32>
    %164 = vector.broadcast %162 : vector<1x256xf32> to vector<32x256xf32>
    %165 = arith.mulf %164, %163 : vector<32x256xf32>
    %166 = arith.addf %161, %165 : vector<32x256xf32>
    %167 = vector.extract_strided_slice %3 {offsets = [32, 0], sizes = [1, 256], strides = [1, 1]} : vector<64x256xf32> to vector<1x256xf32>
    %168 = vector.extract_strided_slice %8 {offsets = [0, 0], sizes = [32, 256], strides = [1, 1]} : vector<32x2048xf32> to vector<32x256xf32>
    %169 = vector.broadcast %167 : vector<1x256xf32> to vector<32x256xf32>
    %170 = arith.mulf %169, %168 : vector<32x256xf32>
    %171 = vector.extract_strided_slice %3 {offsets = [33, 0], sizes = [1, 256], strides = [1, 1]} : vector<64x256xf32> to vector<1x256xf32>
    %172 = vector.extract_strided_slice %8 {offsets = [0, 256], sizes = [32, 256], strides = [1, 1]} : vector<32x2048xf32> to vector<32x256xf32>
    %173 = vector.broadcast %171 : vector<1x256xf32> to vector<32x256xf32>
    %174 = arith.mulf %173, %172 : vector<32x256xf32>
    %175 = arith.addf %170, %174 : vector<32x256xf32>
    %176 = vector.extract_strided_slice %3 {offsets = [34, 0], sizes = [1, 256], strides = [1, 1]} : vector<64x256xf32> to vector<1x256xf32>
    %177 = vector.extract_strided_slice %8 {offsets = [0, 512], sizes = [32, 256], strides = [1, 1]} : vector<32x2048xf32> to vector<32x256xf32>
    %178 = vector.broadcast %176 : vector<1x256xf32> to vector<32x256xf32>
    %179 = arith.mulf %178, %177 : vector<32x256xf32>
    %180 = arith.addf %175, %179 : vector<32x256xf32>
    %181 = vector.extract_strided_slice %3 {offsets = [35, 0], sizes = [1, 256], strides = [1, 1]} : vector<64x256xf32> to vector<1x256xf32>
    %182 = vector.extract_strided_slice %8 {offsets = [0, 768], sizes = [32, 256], strides = [1, 1]} : vector<32x2048xf32> to vector<32x256xf32>
    %183 = vector.broadcast %181 : vector<1x256xf32> to vector<32x256xf32>
    %184 = arith.mulf %183, %182 : vector<32x256xf32>
    %185 = arith.addf %180, %184 : vector<32x256xf32>
    %186 = vector.extract_strided_slice %3 {offsets = [36, 0], sizes = [1, 256], strides = [1, 1]} : vector<64x256xf32> to vector<1x256xf32>
    %187 = vector.extract_strided_slice %8 {offsets = [0, 1024], sizes = [32, 256], strides = [1, 1]} : vector<32x2048xf32> to vector<32x256xf32>
    %188 = vector.broadcast %186 : vector<1x256xf32> to vector<32x256xf32>
    %189 = arith.mulf %188, %187 : vector<32x256xf32>
    %190 = arith.addf %185, %189 : vector<32x256xf32>
    %191 = vector.extract_strided_slice %3 {offsets = [37, 0], sizes = [1, 256], strides = [1, 1]} : vector<64x256xf32> to vector<1x256xf32>
    %192 = vector.extract_strided_slice %8 {offsets = [0, 1280], sizes = [32, 256], strides = [1, 1]} : vector<32x2048xf32> to vector<32x256xf32>
    %193 = vector.broadcast %191 : vector<1x256xf32> to vector<32x256xf32>
    %194 = arith.mulf %193, %192 : vector<32x256xf32>
    %195 = arith.addf %190, %194 : vector<32x256xf32>
    %196 = vector.extract_strided_slice %3 {offsets = [38, 0], sizes = [1, 256], strides = [1, 1]} : vector<64x256xf32> to vector<1x256xf32>
    %197 = vector.extract_strided_slice %8 {offsets = [0, 1536], sizes = [32, 256], strides = [1, 1]} : vector<32x2048xf32> to vector<32x256xf32>
    %198 = vector.broadcast %196 : vector<1x256xf32> to vector<32x256xf32>
    %199 = arith.mulf %198, %197 : vector<32x256xf32>
    %200 = arith.addf %195, %199 : vector<32x256xf32>
    %201 = vector.extract_strided_slice %3 {offsets = [39, 0], sizes = [1, 256], strides = [1, 1]} : vector<64x256xf32> to vector<1x256xf32>
    %202 = vector.extract_strided_slice %8 {offsets = [0, 1792], sizes = [32, 256], strides = [1, 1]} : vector<32x2048xf32> to vector<32x256xf32>
    %203 = vector.broadcast %201 : vector<1x256xf32> to vector<32x256xf32>
    %204 = arith.mulf %203, %202 : vector<32x256xf32>
    %205 = arith.addf %200, %204 : vector<32x256xf32>
    %206 = vector.extract_strided_slice %3 {offsets = [40, 0], sizes = [1, 256], strides = [1, 1]} : vector<64x256xf32> to vector<1x256xf32>
    %207 = vector.extract_strided_slice %8 {offsets = [0, 0], sizes = [32, 256], strides = [1, 1]} : vector<32x2048xf32> to vector<32x256xf32>
    %208 = vector.broadcast %206 : vector<1x256xf32> to vector<32x256xf32>
    %209 = arith.mulf %208, %207 : vector<32x256xf32>
    %210 = vector.extract_strided_slice %3 {offsets = [41, 0], sizes = [1, 256], strides = [1, 1]} : vector<64x256xf32> to vector<1x256xf32>
    %211 = vector.extract_strided_slice %8 {offsets = [0, 256], sizes = [32, 256], strides = [1, 1]} : vector<32x2048xf32> to vector<32x256xf32>
    %212 = vector.broadcast %210 : vector<1x256xf32> to vector<32x256xf32>
    %213 = arith.mulf %212, %211 : vector<32x256xf32>
    %214 = arith.addf %209, %213 : vector<32x256xf32>
    %215 = vector.extract_strided_slice %3 {offsets = [42, 0], sizes = [1, 256], strides = [1, 1]} : vector<64x256xf32> to vector<1x256xf32>
    %216 = vector.extract_strided_slice %8 {offsets = [0, 512], sizes = [32, 256], strides = [1, 1]} : vector<32x2048xf32> to vector<32x256xf32>
    %217 = vector.broadcast %215 : vector<1x256xf32> to vector<32x256xf32>
    %218 = arith.mulf %217, %216 : vector<32x256xf32>
    %219 = arith.addf %214, %218 : vector<32x256xf32>
    %220 = vector.extract_strided_slice %3 {offsets = [43, 0], sizes = [1, 256], strides = [1, 1]} : vector<64x256xf32> to vector<1x256xf32>
    %221 = vector.extract_strided_slice %8 {offsets = [0, 768], sizes = [32, 256], strides = [1, 1]} : vector<32x2048xf32> to vector<32x256xf32>
    %222 = vector.broadcast %220 : vector<1x256xf32> to vector<32x256xf32>
    %223 = arith.mulf %222, %221 : vector<32x256xf32>
    %224 = arith.addf %219, %223 : vector<32x256xf32>
    %225 = vector.extract_strided_slice %3 {offsets = [44, 0], sizes = [1, 256], strides = [1, 1]} : vector<64x256xf32> to vector<1x256xf32>
    %226 = vector.extract_strided_slice %8 {offsets = [0, 1024], sizes = [32, 256], strides = [1, 1]} : vector<32x2048xf32> to vector<32x256xf32>
    %227 = vector.broadcast %225 : vector<1x256xf32> to vector<32x256xf32>
    %228 = arith.mulf %227, %226 : vector<32x256xf32>
    %229 = arith.addf %224, %228 : vector<32x256xf32>
    %230 = vector.extract_strided_slice %3 {offsets = [45, 0], sizes = [1, 256], strides = [1, 1]} : vector<64x256xf32> to vector<1x256xf32>
    %231 = vector.extract_strided_slice %8 {offsets = [0, 1280], sizes = [32, 256], strides = [1, 1]} : vector<32x2048xf32> to vector<32x256xf32>
    %232 = vector.broadcast %230 : vector<1x256xf32> to vector<32x256xf32>
    %233 = arith.mulf %232, %231 : vector<32x256xf32>
    %234 = arith.addf %229, %233 : vector<32x256xf32>
    %235 = vector.extract_strided_slice %3 {offsets = [46, 0], sizes = [1, 256], strides = [1, 1]} : vector<64x256xf32> to vector<1x256xf32>
    %236 = vector.extract_strided_slice %8 {offsets = [0, 1536], sizes = [32, 256], strides = [1, 1]} : vector<32x2048xf32> to vector<32x256xf32>
    %237 = vector.broadcast %235 : vector<1x256xf32> to vector<32x256xf32>
    %238 = arith.mulf %237, %236 : vector<32x256xf32>
    %239 = arith.addf %234, %238 : vector<32x256xf32>
    %240 = vector.extract_strided_slice %3 {offsets = [47, 0], sizes = [1, 256], strides = [1, 1]} : vector<64x256xf32> to vector<1x256xf32>
    %241 = vector.extract_strided_slice %8 {offsets = [0, 1792], sizes = [32, 256], strides = [1, 1]} : vector<32x2048xf32> to vector<32x256xf32>
    %242 = vector.broadcast %240 : vector<1x256xf32> to vector<32x256xf32>
    %243 = arith.mulf %242, %241 : vector<32x256xf32>
    %244 = arith.addf %239, %243 : vector<32x256xf32>
    %245 = vector.extract_strided_slice %3 {offsets = [48, 0], sizes = [1, 256], strides = [1, 1]} : vector<64x256xf32> to vector<1x256xf32>
    %246 = vector.extract_strided_slice %8 {offsets = [0, 0], sizes = [32, 256], strides = [1, 1]} : vector<32x2048xf32> to vector<32x256xf32>
    %247 = vector.broadcast %245 : vector<1x256xf32> to vector<32x256xf32>
    %248 = arith.mulf %247, %246 : vector<32x256xf32>
    %249 = vector.extract_strided_slice %3 {offsets = [49, 0], sizes = [1, 256], strides = [1, 1]} : vector<64x256xf32> to vector<1x256xf32>
    %250 = vector.extract_strided_slice %8 {offsets = [0, 256], sizes = [32, 256], strides = [1, 1]} : vector<32x2048xf32> to vector<32x256xf32>
    %251 = vector.broadcast %249 : vector<1x256xf32> to vector<32x256xf32>
    %252 = arith.mulf %251, %250 : vector<32x256xf32>
    %253 = arith.addf %248, %252 : vector<32x256xf32>
    %254 = vector.extract_strided_slice %3 {offsets = [50, 0], sizes = [1, 256], strides = [1, 1]} : vector<64x256xf32> to vector<1x256xf32>
    %255 = vector.extract_strided_slice %8 {offsets = [0, 512], sizes = [32, 256], strides = [1, 1]} : vector<32x2048xf32> to vector<32x256xf32>
    %256 = vector.broadcast %254 : vector<1x256xf32> to vector<32x256xf32>
    %257 = arith.mulf %256, %255 : vector<32x256xf32>
    %258 = arith.addf %253, %257 : vector<32x256xf32>
    %259 = vector.extract_strided_slice %3 {offsets = [51, 0], sizes = [1, 256], strides = [1, 1]} : vector<64x256xf32> to vector<1x256xf32>
    %260 = vector.extract_strided_slice %8 {offsets = [0, 768], sizes = [32, 256], strides = [1, 1]} : vector<32x2048xf32> to vector<32x256xf32>
    %261 = vector.broadcast %259 : vector<1x256xf32> to vector<32x256xf32>
    %262 = arith.mulf %261, %260 : vector<32x256xf32>
    %263 = arith.addf %258, %262 : vector<32x256xf32>
    %264 = vector.extract_strided_slice %3 {offsets = [52, 0], sizes = [1, 256], strides = [1, 1]} : vector<64x256xf32> to vector<1x256xf32>
    %265 = vector.extract_strided_slice %8 {offsets = [0, 1024], sizes = [32, 256], strides = [1, 1]} : vector<32x2048xf32> to vector<32x256xf32>
    %266 = vector.broadcast %264 : vector<1x256xf32> to vector<32x256xf32>
    %267 = arith.mulf %266, %265 : vector<32x256xf32>
    %268 = arith.addf %263, %267 : vector<32x256xf32>
    %269 = vector.extract_strided_slice %3 {offsets = [53, 0], sizes = [1, 256], strides = [1, 1]} : vector<64x256xf32> to vector<1x256xf32>
    %270 = vector.extract_strided_slice %8 {offsets = [0, 1280], sizes = [32, 256], strides = [1, 1]} : vector<32x2048xf32> to vector<32x256xf32>
    %271 = vector.broadcast %269 : vector<1x256xf32> to vector<32x256xf32>
    %272 = arith.mulf %271, %270 : vector<32x256xf32>
    %273 = arith.addf %268, %272 : vector<32x256xf32>
    %274 = vector.extract_strided_slice %3 {offsets = [54, 0], sizes = [1, 256], strides = [1, 1]} : vector<64x256xf32> to vector<1x256xf32>
    %275 = vector.extract_strided_slice %8 {offsets = [0, 1536], sizes = [32, 256], strides = [1, 1]} : vector<32x2048xf32> to vector<32x256xf32>
    %276 = vector.broadcast %274 : vector<1x256xf32> to vector<32x256xf32>
    %277 = arith.mulf %276, %275 : vector<32x256xf32>
    %278 = arith.addf %273, %277 : vector<32x256xf32>
    %279 = vector.extract_strided_slice %3 {offsets = [55, 0], sizes = [1, 256], strides = [1, 1]} : vector<64x256xf32> to vector<1x256xf32>
    %280 = vector.extract_strided_slice %8 {offsets = [0, 1792], sizes = [32, 256], strides = [1, 1]} : vector<32x2048xf32> to vector<32x256xf32>
    %281 = vector.broadcast %279 : vector<1x256xf32> to vector<32x256xf32>
    %282 = arith.mulf %281, %280 : vector<32x256xf32>
    %283 = arith.addf %278, %282 : vector<32x256xf32>
    %284 = vector.extract_strided_slice %3 {offsets = [56, 0], sizes = [1, 256], strides = [1, 1]} : vector<64x256xf32> to vector<1x256xf32>
    %285 = vector.extract_strided_slice %8 {offsets = [0, 0], sizes = [32, 256], strides = [1, 1]} : vector<32x2048xf32> to vector<32x256xf32>
    %286 = vector.broadcast %284 : vector<1x256xf32> to vector<32x256xf32>
    %287 = arith.mulf %286, %285 : vector<32x256xf32>
    %288 = vector.extract_strided_slice %3 {offsets = [57, 0], sizes = [1, 256], strides = [1, 1]} : vector<64x256xf32> to vector<1x256xf32>
    %289 = vector.extract_strided_slice %8 {offsets = [0, 256], sizes = [32, 256], strides = [1, 1]} : vector<32x2048xf32> to vector<32x256xf32>
    %290 = vector.broadcast %288 : vector<1x256xf32> to vector<32x256xf32>
    %291 = arith.mulf %290, %289 : vector<32x256xf32>
    %292 = arith.addf %287, %291 : vector<32x256xf32>
    %293 = vector.extract_strided_slice %3 {offsets = [58, 0], sizes = [1, 256], strides = [1, 1]} : vector<64x256xf32> to vector<1x256xf32>
    %294 = vector.extract_strided_slice %8 {offsets = [0, 512], sizes = [32, 256], strides = [1, 1]} : vector<32x2048xf32> to vector<32x256xf32>
    %295 = vector.broadcast %293 : vector<1x256xf32> to vector<32x256xf32>
    %296 = arith.mulf %295, %294 : vector<32x256xf32>
    %297 = arith.addf %292, %296 : vector<32x256xf32>
    %298 = vector.extract_strided_slice %3 {offsets = [59, 0], sizes = [1, 256], strides = [1, 1]} : vector<64x256xf32> to vector<1x256xf32>
    %299 = vector.extract_strided_slice %8 {offsets = [0, 768], sizes = [32, 256], strides = [1, 1]} : vector<32x2048xf32> to vector<32x256xf32>
    %300 = vector.broadcast %298 : vector<1x256xf32> to vector<32x256xf32>
    %301 = arith.mulf %300, %299 : vector<32x256xf32>
    %302 = arith.addf %297, %301 : vector<32x256xf32>
    %303 = vector.extract_strided_slice %3 {offsets = [60, 0], sizes = [1, 256], strides = [1, 1]} : vector<64x256xf32> to vector<1x256xf32>
    %304 = vector.extract_strided_slice %8 {offsets = [0, 1024], sizes = [32, 256], strides = [1, 1]} : vector<32x2048xf32> to vector<32x256xf32>
    %305 = vector.broadcast %303 : vector<1x256xf32> to vector<32x256xf32>
    %306 = arith.mulf %305, %304 : vector<32x256xf32>
    %307 = arith.addf %302, %306 : vector<32x256xf32>
    %308 = vector.extract_strided_slice %3 {offsets = [61, 0], sizes = [1, 256], strides = [1, 1]} : vector<64x256xf32> to vector<1x256xf32>
    %309 = vector.extract_strided_slice %8 {offsets = [0, 1280], sizes = [32, 256], strides = [1, 1]} : vector<32x2048xf32> to vector<32x256xf32>
    %310 = vector.broadcast %308 : vector<1x256xf32> to vector<32x256xf32>
    %311 = arith.mulf %310, %309 : vector<32x256xf32>
    %312 = arith.addf %307, %311 : vector<32x256xf32>
    %313 = vector.extract_strided_slice %3 {offsets = [62, 0], sizes = [1, 256], strides = [1, 1]} : vector<64x256xf32> to vector<1x256xf32>
    %314 = vector.extract_strided_slice %8 {offsets = [0, 1536], sizes = [32, 256], strides = [1, 1]} : vector<32x2048xf32> to vector<32x256xf32>
    %315 = vector.broadcast %313 : vector<1x256xf32> to vector<32x256xf32>
    %316 = arith.mulf %315, %314 : vector<32x256xf32>
    %317 = arith.addf %312, %316 : vector<32x256xf32>
    %318 = vector.extract_strided_slice %3 {offsets = [63, 0], sizes = [1, 256], strides = [1, 1]} : vector<64x256xf32> to vector<1x256xf32>
    %319 = vector.extract_strided_slice %8 {offsets = [0, 1792], sizes = [32, 256], strides = [1, 1]} : vector<32x2048xf32> to vector<32x256xf32>
    %320 = vector.broadcast %318 : vector<1x256xf32> to vector<32x256xf32>
    %321 = arith.mulf %320, %319 : vector<32x256xf32>
    %322 = arith.addf %317, %321 : vector<32x256xf32>
    %323 = tpu.concatenate %49, %88, %127, %166, %205, %244, %283, %322 in 1 : vector<32x256xf32>, vector<32x256xf32>, vector<32x256xf32>, vector<32x256xf32>, vector<32x256xf32>, vector<32x256xf32>, vector<32x256xf32>, vector<32x256xf32> -> vector<32x2048xf32>
    %cst_13 = arith.constant dense<0.000000e+00> : vector<32x2048xf32>
    %324 = tpu.matmul %9, %323, %cst_13 {dimension_numbers = #tpu.dot_dimension_numbers<[1], [0], [0], [1], [0, 0, 1, 1], [], []>} : vector<32x32xf32>, vector<32x2048xf32>, vector<32x2048xf32> -> vector<32x2048xf32>
    %325 = vector.broadcast %10 : vector<32x1xf32> to vector<32x2048xf32>
    %326 = arith.addf %324, %325 : vector<32x2048xf32>
    %cst_14 = arith.constant 0.000000e+00 : f32
    %327 = vector.broadcast %cst_14 : f32 to vector<32x2048xf32>
    %328 = arith.maximumf %326, %327 : vector<32x2048xf32>
    %c0_15 = arith.constant 0 : index
    %c0_16 = arith.constant 0 : index
    %329 = vector.load %arg7[%c0_15, %c0_16] : memref<32x32xf32, #tpu.memory_space<vmem>>, vector<32x32xf32>
    %c0_17 = arith.constant 0 : index
    %c0_18 = arith.constant 0 : index
    %330 = vector.load %arg8[%c0_17, %c0_18] : memref<32x1xf32, #tpu.memory_space<vmem>>, vector<32x1xf32>
    %331 = vector.extract_strided_slice %3 {offsets = [0, 0], sizes = [1, 256], strides = [1, 1]} : vector<64x256xf32> to vector<1x256xf32>
    %332 = vector.extract_strided_slice %328 {offsets = [0, 0], sizes = [32, 256], strides = [1, 1]} : vector<32x2048xf32> to vector<32x256xf32>
    %333 = vector.broadcast %331 : vector<1x256xf32> to vector<32x256xf32>
    %334 = arith.mulf %333, %332 : vector<32x256xf32>
    %335 = vector.extract_strided_slice %3 {offsets = [1, 0], sizes = [1, 256], strides = [1, 1]} : vector<64x256xf32> to vector<1x256xf32>
    %336 = vector.extract_strided_slice %328 {offsets = [0, 256], sizes = [32, 256], strides = [1, 1]} : vector<32x2048xf32> to vector<32x256xf32>
    %337 = vector.broadcast %335 : vector<1x256xf32> to vector<32x256xf32>
    %338 = arith.mulf %337, %336 : vector<32x256xf32>
    %339 = arith.addf %334, %338 : vector<32x256xf32>
    %340 = vector.extract_strided_slice %3 {offsets = [2, 0], sizes = [1, 256], strides = [1, 1]} : vector<64x256xf32> to vector<1x256xf32>
    %341 = vector.extract_strided_slice %328 {offsets = [0, 512], sizes = [32, 256], strides = [1, 1]} : vector<32x2048xf32> to vector<32x256xf32>
    %342 = vector.broadcast %340 : vector<1x256xf32> to vector<32x256xf32>
    %343 = arith.mulf %342, %341 : vector<32x256xf32>
    %344 = arith.addf %339, %343 : vector<32x256xf32>
    %345 = vector.extract_strided_slice %3 {offsets = [3, 0], sizes = [1, 256], strides = [1, 1]} : vector<64x256xf32> to vector<1x256xf32>
    %346 = vector.extract_strided_slice %328 {offsets = [0, 768], sizes = [32, 256], strides = [1, 1]} : vector<32x2048xf32> to vector<32x256xf32>
    %347 = vector.broadcast %345 : vector<1x256xf32> to vector<32x256xf32>
    %348 = arith.mulf %347, %346 : vector<32x256xf32>
    %349 = arith.addf %344, %348 : vector<32x256xf32>
    %350 = vector.extract_strided_slice %3 {offsets = [4, 0], sizes = [1, 256], strides = [1, 1]} : vector<64x256xf32> to vector<1x256xf32>
    %351 = vector.extract_strided_slice %328 {offsets = [0, 1024], sizes = [32, 256], strides = [1, 1]} : vector<32x2048xf32> to vector<32x256xf32>
    %352 = vector.broadcast %350 : vector<1x256xf32> to vector<32x256xf32>
    %353 = arith.mulf %352, %351 : vector<32x256xf32>
    %354 = arith.addf %349, %353 : vector<32x256xf32>
    %355 = vector.extract_strided_slice %3 {offsets = [5, 0], sizes = [1, 256], strides = [1, 1]} : vector<64x256xf32> to vector<1x256xf32>
    %356 = vector.extract_strided_slice %328 {offsets = [0, 1280], sizes = [32, 256], strides = [1, 1]} : vector<32x2048xf32> to vector<32x256xf32>
    %357 = vector.broadcast %355 : vector<1x256xf32> to vector<32x256xf32>
    %358 = arith.mulf %357, %356 : vector<32x256xf32>
    %359 = arith.addf %354, %358 : vector<32x256xf32>
    %360 = vector.extract_strided_slice %3 {offsets = [6, 0], sizes = [1, 256], strides = [1, 1]} : vector<64x256xf32> to vector<1x256xf32>
    %361 = vector.extract_strided_slice %328 {offsets = [0, 1536], sizes = [32, 256], strides = [1, 1]} : vector<32x2048xf32> to vector<32x256xf32>
    %362 = vector.broadcast %360 : vector<1x256xf32> to vector<32x256xf32>
    %363 = arith.mulf %362, %361 : vector<32x256xf32>
    %364 = arith.addf %359, %363 : vector<32x256xf32>
    %365 = vector.extract_strided_slice %3 {offsets = [7, 0], sizes = [1, 256], strides = [1, 1]} : vector<64x256xf32> to vector<1x256xf32>
    %366 = vector.extract_strided_slice %328 {offsets = [0, 1792], sizes = [32, 256], strides = [1, 1]} : vector<32x2048xf32> to vector<32x256xf32>
    %367 = vector.broadcast %365 : vector<1x256xf32> to vector<32x256xf32>
    %368 = arith.mulf %367, %366 : vector<32x256xf32>
    %369 = arith.addf %364, %368 : vector<32x256xf32>
    %370 = vector.extract_strided_slice %3 {offsets = [8, 0], sizes = [1, 256], strides = [1, 1]} : vector<64x256xf32> to vector<1x256xf32>
    %371 = vector.extract_strided_slice %328 {offsets = [0, 0], sizes = [32, 256], strides = [1, 1]} : vector<32x2048xf32> to vector<32x256xf32>
    %372 = vector.broadcast %370 : vector<1x256xf32> to vector<32x256xf32>
    %373 = arith.mulf %372, %371 : vector<32x256xf32>
    %374 = vector.extract_strided_slice %3 {offsets = [9, 0], sizes = [1, 256], strides = [1, 1]} : vector<64x256xf32> to vector<1x256xf32>
    %375 = vector.extract_strided_slice %328 {offsets = [0, 256], sizes = [32, 256], strides = [1, 1]} : vector<32x2048xf32> to vector<32x256xf32>
    %376 = vector.broadcast %374 : vector<1x256xf32> to vector<32x256xf32>
    %377 = arith.mulf %376, %375 : vector<32x256xf32>
    %378 = arith.addf %373, %377 : vector<32x256xf32>
    %379 = vector.extract_strided_slice %3 {offsets = [10, 0], sizes = [1, 256], strides = [1, 1]} : vector<64x256xf32> to vector<1x256xf32>
    %380 = vector.extract_strided_slice %328 {offsets = [0, 512], sizes = [32, 256], strides = [1, 1]} : vector<32x2048xf32> to vector<32x256xf32>
    %381 = vector.broadcast %379 : vector<1x256xf32> to vector<32x256xf32>
    %382 = arith.mulf %381, %380 : vector<32x256xf32>
    %383 = arith.addf %378, %382 : vector<32x256xf32>
    %384 = vector.extract_strided_slice %3 {offsets = [11, 0], sizes = [1, 256], strides = [1, 1]} : vector<64x256xf32> to vector<1x256xf32>
    %385 = vector.extract_strided_slice %328 {offsets = [0, 768], sizes = [32, 256], strides = [1, 1]} : vector<32x2048xf32> to vector<32x256xf32>
    %386 = vector.broadcast %384 : vector<1x256xf32> to vector<32x256xf32>
    %387 = arith.mulf %386, %385 : vector<32x256xf32>
    %388 = arith.addf %383, %387 : vector<32x256xf32>
    %389 = vector.extract_strided_slice %3 {offsets = [12, 0], sizes = [1, 256], strides = [1, 1]} : vector<64x256xf32> to vector<1x256xf32>
    %390 = vector.extract_strided_slice %328 {offsets = [0, 1024], sizes = [32, 256], strides = [1, 1]} : vector<32x2048xf32> to vector<32x256xf32>
    %391 = vector.broadcast %389 : vector<1x256xf32> to vector<32x256xf32>
    %392 = arith.mulf %391, %390 : vector<32x256xf32>
    %393 = arith.addf %388, %392 : vector<32x256xf32>
    %394 = vector.extract_strided_slice %3 {offsets = [13, 0], sizes = [1, 256], strides = [1, 1]} : vector<64x256xf32> to vector<1x256xf32>
    %395 = vector.extract_strided_slice %328 {offsets = [0, 1280], sizes = [32, 256], strides = [1, 1]} : vector<32x2048xf32> to vector<32x256xf32>
    %396 = vector.broadcast %394 : vector<1x256xf32> to vector<32x256xf32>
    %397 = arith.mulf %396, %395 : vector<32x256xf32>
    %398 = arith.addf %393, %397 : vector<32x256xf32>
    %399 = vector.extract_strided_slice %3 {offsets = [14, 0], sizes = [1, 256], strides = [1, 1]} : vector<64x256xf32> to vector<1x256xf32>
    %400 = vector.extract_strided_slice %328 {offsets = [0, 1536], sizes = [32, 256], strides = [1, 1]} : vector<32x2048xf32> to vector<32x256xf32>
    %401 = vector.broadcast %399 : vector<1x256xf32> to vector<32x256xf32>
    %402 = arith.mulf %401, %400 : vector<32x256xf32>
    %403 = arith.addf %398, %402 : vector<32x256xf32>
    %404 = vector.extract_strided_slice %3 {offsets = [15, 0], sizes = [1, 256], strides = [1, 1]} : vector<64x256xf32> to vector<1x256xf32>
    %405 = vector.extract_strided_slice %328 {offsets = [0, 1792], sizes = [32, 256], strides = [1, 1]} : vector<32x2048xf32> to vector<32x256xf32>
    %406 = vector.broadcast %404 : vector<1x256xf32> to vector<32x256xf32>
    %407 = arith.mulf %406, %405 : vector<32x256xf32>
    %408 = arith.addf %403, %407 : vector<32x256xf32>
    %409 = vector.extract_strided_slice %3 {offsets = [16, 0], sizes = [1, 256], strides = [1, 1]} : vector<64x256xf32> to vector<1x256xf32>
    %410 = vector.extract_strided_slice %328 {offsets = [0, 0], sizes = [32, 256], strides = [1, 1]} : vector<32x2048xf32> to vector<32x256xf32>
    %411 = vector.broadcast %409 : vector<1x256xf32> to vector<32x256xf32>
    %412 = arith.mulf %411, %410 : vector<32x256xf32>
    %413 = vector.extract_strided_slice %3 {offsets = [17, 0], sizes = [1, 256], strides = [1, 1]} : vector<64x256xf32> to vector<1x256xf32>
    %414 = vector.extract_strided_slice %328 {offsets = [0, 256], sizes = [32, 256], strides = [1, 1]} : vector<32x2048xf32> to vector<32x256xf32>
    %415 = vector.broadcast %413 : vector<1x256xf32> to vector<32x256xf32>
    %416 = arith.mulf %415, %414 : vector<32x256xf32>
    %417 = arith.addf %412, %416 : vector<32x256xf32>
    %418 = vector.extract_strided_slice %3 {offsets = [18, 0], sizes = [1, 256], strides = [1, 1]} : vector<64x256xf32> to vector<1x256xf32>
    %419 = vector.extract_strided_slice %328 {offsets = [0, 512], sizes = [32, 256], strides = [1, 1]} : vector<32x2048xf32> to vector<32x256xf32>
    %420 = vector.broadcast %418 : vector<1x256xf32> to vector<32x256xf32>
    %421 = arith.mulf %420, %419 : vector<32x256xf32>
    %422 = arith.addf %417, %421 : vector<32x256xf32>
    %423 = vector.extract_strided_slice %3 {offsets = [19, 0], sizes = [1, 256], strides = [1, 1]} : vector<64x256xf32> to vector<1x256xf32>
    %424 = vector.extract_strided_slice %328 {offsets = [0, 768], sizes = [32, 256], strides = [1, 1]} : vector<32x2048xf32> to vector<32x256xf32>
    %425 = vector.broadcast %423 : vector<1x256xf32> to vector<32x256xf32>
    %426 = arith.mulf %425, %424 : vector<32x256xf32>
    %427 = arith.addf %422, %426 : vector<32x256xf32>
    %428 = vector.extract_strided_slice %3 {offsets = [20, 0], sizes = [1, 256], strides = [1, 1]} : vector<64x256xf32> to vector<1x256xf32>
    %429 = vector.extract_strided_slice %328 {offsets = [0, 1024], sizes = [32, 256], strides = [1, 1]} : vector<32x2048xf32> to vector<32x256xf32>
    %430 = vector.broadcast %428 : vector<1x256xf32> to vector<32x256xf32>
    %431 = arith.mulf %430, %429 : vector<32x256xf32>
    %432 = arith.addf %427, %431 : vector<32x256xf32>
    %433 = vector.extract_strided_slice %3 {offsets = [21, 0], sizes = [1, 256], strides = [1, 1]} : vector<64x256xf32> to vector<1x256xf32>
    %434 = vector.extract_strided_slice %328 {offsets = [0, 1280], sizes = [32, 256], strides = [1, 1]} : vector<32x2048xf32> to vector<32x256xf32>
    %435 = vector.broadcast %433 : vector<1x256xf32> to vector<32x256xf32>
    %436 = arith.mulf %435, %434 : vector<32x256xf32>
    %437 = arith.addf %432, %436 : vector<32x256xf32>
    %438 = vector.extract_strided_slice %3 {offsets = [22, 0], sizes = [1, 256], strides = [1, 1]} : vector<64x256xf32> to vector<1x256xf32>
    %439 = vector.extract_strided_slice %328 {offsets = [0, 1536], sizes = [32, 256], strides = [1, 1]} : vector<32x2048xf32> to vector<32x256xf32>
    %440 = vector.broadcast %438 : vector<1x256xf32> to vector<32x256xf32>
    %441 = arith.mulf %440, %439 : vector<32x256xf32>
    %442 = arith.addf %437, %441 : vector<32x256xf32>
    %443 = vector.extract_strided_slice %3 {offsets = [23, 0], sizes = [1, 256], strides = [1, 1]} : vector<64x256xf32> to vector<1x256xf32>
    %444 = vector.extract_strided_slice %328 {offsets = [0, 1792], sizes = [32, 256], strides = [1, 1]} : vector<32x2048xf32> to vector<32x256xf32>
    %445 = vector.broadcast %443 : vector<1x256xf32> to vector<32x256xf32>
    %446 = arith.mulf %445, %444 : vector<32x256xf32>
    %447 = arith.addf %442, %446 : vector<32x256xf32>
    %448 = vector.extract_strided_slice %3 {offsets = [24, 0], sizes = [1, 256], strides = [1, 1]} : vector<64x256xf32> to vector<1x256xf32>
    %449 = vector.extract_strided_slice %328 {offsets = [0, 0], sizes = [32, 256], strides = [1, 1]} : vector<32x2048xf32> to vector<32x256xf32>
    %450 = vector.broadcast %448 : vector<1x256xf32> to vector<32x256xf32>
    %451 = arith.mulf %450, %449 : vector<32x256xf32>
    %452 = vector.extract_strided_slice %3 {offsets = [25, 0], sizes = [1, 256], strides = [1, 1]} : vector<64x256xf32> to vector<1x256xf32>
    %453 = vector.extract_strided_slice %328 {offsets = [0, 256], sizes = [32, 256], strides = [1, 1]} : vector<32x2048xf32> to vector<32x256xf32>
    %454 = vector.broadcast %452 : vector<1x256xf32> to vector<32x256xf32>
    %455 = arith.mulf %454, %453 : vector<32x256xf32>
    %456 = arith.addf %451, %455 : vector<32x256xf32>
    %457 = vector.extract_strided_slice %3 {offsets = [26, 0], sizes = [1, 256], strides = [1, 1]} : vector<64x256xf32> to vector<1x256xf32>
    %458 = vector.extract_strided_slice %328 {offsets = [0, 512], sizes = [32, 256], strides = [1, 1]} : vector<32x2048xf32> to vector<32x256xf32>
    %459 = vector.broadcast %457 : vector<1x256xf32> to vector<32x256xf32>
    %460 = arith.mulf %459, %458 : vector<32x256xf32>
    %461 = arith.addf %456, %460 : vector<32x256xf32>
    %462 = vector.extract_strided_slice %3 {offsets = [27, 0], sizes = [1, 256], strides = [1, 1]} : vector<64x256xf32> to vector<1x256xf32>
    %463 = vector.extract_strided_slice %328 {offsets = [0, 768], sizes = [32, 256], strides = [1, 1]} : vector<32x2048xf32> to vector<32x256xf32>
    %464 = vector.broadcast %462 : vector<1x256xf32> to vector<32x256xf32>
    %465 = arith.mulf %464, %463 : vector<32x256xf32>
    %466 = arith.addf %461, %465 : vector<32x256xf32>
    %467 = vector.extract_strided_slice %3 {offsets = [28, 0], sizes = [1, 256], strides = [1, 1]} : vector<64x256xf32> to vector<1x256xf32>
    %468 = vector.extract_strided_slice %328 {offsets = [0, 1024], sizes = [32, 256], strides = [1, 1]} : vector<32x2048xf32> to vector<32x256xf32>
    %469 = vector.broadcast %467 : vector<1x256xf32> to vector<32x256xf32>
    %470 = arith.mulf %469, %468 : vector<32x256xf32>
    %471 = arith.addf %466, %470 : vector<32x256xf32>
    %472 = vector.extract_strided_slice %3 {offsets = [29, 0], sizes = [1, 256], strides = [1, 1]} : vector<64x256xf32> to vector<1x256xf32>
    %473 = vector.extract_strided_slice %328 {offsets = [0, 1280], sizes = [32, 256], strides = [1, 1]} : vector<32x2048xf32> to vector<32x256xf32>
    %474 = vector.broadcast %472 : vector<1x256xf32> to vector<32x256xf32>
    %475 = arith.mulf %474, %473 : vector<32x256xf32>
    %476 = arith.addf %471, %475 : vector<32x256xf32>
    %477 = vector.extract_strided_slice %3 {offsets = [30, 0], sizes = [1, 256], strides = [1, 1]} : vector<64x256xf32> to vector<1x256xf32>
    %478 = vector.extract_strided_slice %328 {offsets = [0, 1536], sizes = [32, 256], strides = [1, 1]} : vector<32x2048xf32> to vector<32x256xf32>
    %479 = vector.broadcast %477 : vector<1x256xf32> to vector<32x256xf32>
    %480 = arith.mulf %479, %478 : vector<32x256xf32>
    %481 = arith.addf %476, %480 : vector<32x256xf32>
    %482 = vector.extract_strided_slice %3 {offsets = [31, 0], sizes = [1, 256], strides = [1, 1]} : vector<64x256xf32> to vector<1x256xf32>
    %483 = vector.extract_strided_slice %328 {offsets = [0, 1792], sizes = [32, 256], strides = [1, 1]} : vector<32x2048xf32> to vector<32x256xf32>
    %484 = vector.broadcast %482 : vector<1x256xf32> to vector<32x256xf32>
    %485 = arith.mulf %484, %483 : vector<32x256xf32>
    %486 = arith.addf %481, %485 : vector<32x256xf32>
    %487 = vector.extract_strided_slice %3 {offsets = [32, 0], sizes = [1, 256], strides = [1, 1]} : vector<64x256xf32> to vector<1x256xf32>
    %488 = vector.extract_strided_slice %328 {offsets = [0, 0], sizes = [32, 256], strides = [1, 1]} : vector<32x2048xf32> to vector<32x256xf32>
    %489 = vector.broadcast %487 : vector<1x256xf32> to vector<32x256xf32>
    %490 = arith.mulf %489, %488 : vector<32x256xf32>
    %491 = vector.extract_strided_slice %3 {offsets = [33, 0], sizes = [1, 256], strides = [1, 1]} : vector<64x256xf32> to vector<1x256xf32>
    %492 = vector.extract_strided_slice %328 {offsets = [0, 256], sizes = [32, 256], strides = [1, 1]} : vector<32x2048xf32> to vector<32x256xf32>
    %493 = vector.broadcast %491 : vector<1x256xf32> to vector<32x256xf32>
    %494 = arith.mulf %493, %492 : vector<32x256xf32>
    %495 = arith.addf %490, %494 : vector<32x256xf32>
    %496 = vector.extract_strided_slice %3 {offsets = [34, 0], sizes = [1, 256], strides = [1, 1]} : vector<64x256xf32> to vector<1x256xf32>
    %497 = vector.extract_strided_slice %328 {offsets = [0, 512], sizes = [32, 256], strides = [1, 1]} : vector<32x2048xf32> to vector<32x256xf32>
    %498 = vector.broadcast %496 : vector<1x256xf32> to vector<32x256xf32>
    %499 = arith.mulf %498, %497 : vector<32x256xf32>
    %500 = arith.addf %495, %499 : vector<32x256xf32>
    %501 = vector.extract_strided_slice %3 {offsets = [35, 0], sizes = [1, 256], strides = [1, 1]} : vector<64x256xf32> to vector<1x256xf32>
    %502 = vector.extract_strided_slice %328 {offsets = [0, 768], sizes = [32, 256], strides = [1, 1]} : vector<32x2048xf32> to vector<32x256xf32>
    %503 = vector.broadcast %501 : vector<1x256xf32> to vector<32x256xf32>
    %504 = arith.mulf %503, %502 : vector<32x256xf32>
    %505 = arith.addf %500, %504 : vector<32x256xf32>
    %506 = vector.extract_strided_slice %3 {offsets = [36, 0], sizes = [1, 256], strides = [1, 1]} : vector<64x256xf32> to vector<1x256xf32>
    %507 = vector.extract_strided_slice %328 {offsets = [0, 1024], sizes = [32, 256], strides = [1, 1]} : vector<32x2048xf32> to vector<32x256xf32>
    %508 = vector.broadcast %506 : vector<1x256xf32> to vector<32x256xf32>
    %509 = arith.mulf %508, %507 : vector<32x256xf32>
    %510 = arith.addf %505, %509 : vector<32x256xf32>
    %511 = vector.extract_strided_slice %3 {offsets = [37, 0], sizes = [1, 256], strides = [1, 1]} : vector<64x256xf32> to vector<1x256xf32>
    %512 = vector.extract_strided_slice %328 {offsets = [0, 1280], sizes = [32, 256], strides = [1, 1]} : vector<32x2048xf32> to vector<32x256xf32>
    %513 = vector.broadcast %511 : vector<1x256xf32> to vector<32x256xf32>
    %514 = arith.mulf %513, %512 : vector<32x256xf32>
    %515 = arith.addf %510, %514 : vector<32x256xf32>
    %516 = vector.extract_strided_slice %3 {offsets = [38, 0], sizes = [1, 256], strides = [1, 1]} : vector<64x256xf32> to vector<1x256xf32>
    %517 = vector.extract_strided_slice %328 {offsets = [0, 1536], sizes = [32, 256], strides = [1, 1]} : vector<32x2048xf32> to vector<32x256xf32>
    %518 = vector.broadcast %516 : vector<1x256xf32> to vector<32x256xf32>
    %519 = arith.mulf %518, %517 : vector<32x256xf32>
    %520 = arith.addf %515, %519 : vector<32x256xf32>
    %521 = vector.extract_strided_slice %3 {offsets = [39, 0], sizes = [1, 256], strides = [1, 1]} : vector<64x256xf32> to vector<1x256xf32>
    %522 = vector.extract_strided_slice %328 {offsets = [0, 1792], sizes = [32, 256], strides = [1, 1]} : vector<32x2048xf32> to vector<32x256xf32>
    %523 = vector.broadcast %521 : vector<1x256xf32> to vector<32x256xf32>
    %524 = arith.mulf %523, %522 : vector<32x256xf32>
    %525 = arith.addf %520, %524 : vector<32x256xf32>
    %526 = vector.extract_strided_slice %3 {offsets = [40, 0], sizes = [1, 256], strides = [1, 1]} : vector<64x256xf32> to vector<1x256xf32>
    %527 = vector.extract_strided_slice %328 {offsets = [0, 0], sizes = [32, 256], strides = [1, 1]} : vector<32x2048xf32> to vector<32x256xf32>
    %528 = vector.broadcast %526 : vector<1x256xf32> to vector<32x256xf32>
    %529 = arith.mulf %528, %527 : vector<32x256xf32>
    %530 = vector.extract_strided_slice %3 {offsets = [41, 0], sizes = [1, 256], strides = [1, 1]} : vector<64x256xf32> to vector<1x256xf32>
    %531 = vector.extract_strided_slice %328 {offsets = [0, 256], sizes = [32, 256], strides = [1, 1]} : vector<32x2048xf32> to vector<32x256xf32>
    %532 = vector.broadcast %530 : vector<1x256xf32> to vector<32x256xf32>
    %533 = arith.mulf %532, %531 : vector<32x256xf32>
    %534 = arith.addf %529, %533 : vector<32x256xf32>
    %535 = vector.extract_strided_slice %3 {offsets = [42, 0], sizes = [1, 256], strides = [1, 1]} : vector<64x256xf32> to vector<1x256xf32>
    %536 = vector.extract_strided_slice %328 {offsets = [0, 512], sizes = [32, 256], strides = [1, 1]} : vector<32x2048xf32> to vector<32x256xf32>
    %537 = vector.broadcast %535 : vector<1x256xf32> to vector<32x256xf32>
    %538 = arith.mulf %537, %536 : vector<32x256xf32>
    %539 = arith.addf %534, %538 : vector<32x256xf32>
    %540 = vector.extract_strided_slice %3 {offsets = [43, 0], sizes = [1, 256], strides = [1, 1]} : vector<64x256xf32> to vector<1x256xf32>
    %541 = vector.extract_strided_slice %328 {offsets = [0, 768], sizes = [32, 256], strides = [1, 1]} : vector<32x2048xf32> to vector<32x256xf32>
    %542 = vector.broadcast %540 : vector<1x256xf32> to vector<32x256xf32>
    %543 = arith.mulf %542, %541 : vector<32x256xf32>
    %544 = arith.addf %539, %543 : vector<32x256xf32>
    %545 = vector.extract_strided_slice %3 {offsets = [44, 0], sizes = [1, 256], strides = [1, 1]} : vector<64x256xf32> to vector<1x256xf32>
    %546 = vector.extract_strided_slice %328 {offsets = [0, 1024], sizes = [32, 256], strides = [1, 1]} : vector<32x2048xf32> to vector<32x256xf32>
    %547 = vector.broadcast %545 : vector<1x256xf32> to vector<32x256xf32>
    %548 = arith.mulf %547, %546 : vector<32x256xf32>
    %549 = arith.addf %544, %548 : vector<32x256xf32>
    %550 = vector.extract_strided_slice %3 {offsets = [45, 0], sizes = [1, 256], strides = [1, 1]} : vector<64x256xf32> to vector<1x256xf32>
    %551 = vector.extract_strided_slice %328 {offsets = [0, 1280], sizes = [32, 256], strides = [1, 1]} : vector<32x2048xf32> to vector<32x256xf32>
    %552 = vector.broadcast %550 : vector<1x256xf32> to vector<32x256xf32>
    %553 = arith.mulf %552, %551 : vector<32x256xf32>
    %554 = arith.addf %549, %553 : vector<32x256xf32>
    %555 = vector.extract_strided_slice %3 {offsets = [46, 0], sizes = [1, 256], strides = [1, 1]} : vector<64x256xf32> to vector<1x256xf32>
    %556 = vector.extract_strided_slice %328 {offsets = [0, 1536], sizes = [32, 256], strides = [1, 1]} : vector<32x2048xf32> to vector<32x256xf32>
    %557 = vector.broadcast %555 : vector<1x256xf32> to vector<32x256xf32>
    %558 = arith.mulf %557, %556 : vector<32x256xf32>
    %559 = arith.addf %554, %558 : vector<32x256xf32>
    %560 = vector.extract_strided_slice %3 {offsets = [47, 0], sizes = [1, 256], strides = [1, 1]} : vector<64x256xf32> to vector<1x256xf32>
    %561 = vector.extract_strided_slice %328 {offsets = [0, 1792], sizes = [32, 256], strides = [1, 1]} : vector<32x2048xf32> to vector<32x256xf32>
    %562 = vector.broadcast %560 : vector<1x256xf32> to vector<32x256xf32>
    %563 = arith.mulf %562, %561 : vector<32x256xf32>
    %564 = arith.addf %559, %563 : vector<32x256xf32>
    %565 = vector.extract_strided_slice %3 {offsets = [48, 0], sizes = [1, 256], strides = [1, 1]} : vector<64x256xf32> to vector<1x256xf32>
    %566 = vector.extract_strided_slice %328 {offsets = [0, 0], sizes = [32, 256], strides = [1, 1]} : vector<32x2048xf32> to vector<32x256xf32>
    %567 = vector.broadcast %565 : vector<1x256xf32> to vector<32x256xf32>
    %568 = arith.mulf %567, %566 : vector<32x256xf32>
    %569 = vector.extract_strided_slice %3 {offsets = [49, 0], sizes = [1, 256], strides = [1, 1]} : vector<64x256xf32> to vector<1x256xf32>
    %570 = vector.extract_strided_slice %328 {offsets = [0, 256], sizes = [32, 256], strides = [1, 1]} : vector<32x2048xf32> to vector<32x256xf32>
    %571 = vector.broadcast %569 : vector<1x256xf32> to vector<32x256xf32>
    %572 = arith.mulf %571, %570 : vector<32x256xf32>
    %573 = arith.addf %568, %572 : vector<32x256xf32>
    %574 = vector.extract_strided_slice %3 {offsets = [50, 0], sizes = [1, 256], strides = [1, 1]} : vector<64x256xf32> to vector<1x256xf32>
    %575 = vector.extract_strided_slice %328 {offsets = [0, 512], sizes = [32, 256], strides = [1, 1]} : vector<32x2048xf32> to vector<32x256xf32>
    %576 = vector.broadcast %574 : vector<1x256xf32> to vector<32x256xf32>
    %577 = arith.mulf %576, %575 : vector<32x256xf32>
    %578 = arith.addf %573, %577 : vector<32x256xf32>
    %579 = vector.extract_strided_slice %3 {offsets = [51, 0], sizes = [1, 256], strides = [1, 1]} : vector<64x256xf32> to vector<1x256xf32>
    %580 = vector.extract_strided_slice %328 {offsets = [0, 768], sizes = [32, 256], strides = [1, 1]} : vector<32x2048xf32> to vector<32x256xf32>
    %581 = vector.broadcast %579 : vector<1x256xf32> to vector<32x256xf32>
    %582 = arith.mulf %581, %580 : vector<32x256xf32>
    %583 = arith.addf %578, %582 : vector<32x256xf32>
    %584 = vector.extract_strided_slice %3 {offsets = [52, 0], sizes = [1, 256], strides = [1, 1]} : vector<64x256xf32> to vector<1x256xf32>
    %585 = vector.extract_strided_slice %328 {offsets = [0, 1024], sizes = [32, 256], strides = [1, 1]} : vector<32x2048xf32> to vector<32x256xf32>
    %586 = vector.broadcast %584 : vector<1x256xf32> to vector<32x256xf32>
    %587 = arith.mulf %586, %585 : vector<32x256xf32>
    %588 = arith.addf %583, %587 : vector<32x256xf32>
    %589 = vector.extract_strided_slice %3 {offsets = [53, 0], sizes = [1, 256], strides = [1, 1]} : vector<64x256xf32> to vector<1x256xf32>
    %590 = vector.extract_strided_slice %328 {offsets = [0, 1280], sizes = [32, 256], strides = [1, 1]} : vector<32x2048xf32> to vector<32x256xf32>
    %591 = vector.broadcast %589 : vector<1x256xf32> to vector<32x256xf32>
    %592 = arith.mulf %591, %590 : vector<32x256xf32>
    %593 = arith.addf %588, %592 : vector<32x256xf32>
    %594 = vector.extract_strided_slice %3 {offsets = [54, 0], sizes = [1, 256], strides = [1, 1]} : vector<64x256xf32> to vector<1x256xf32>
    %595 = vector.extract_strided_slice %328 {offsets = [0, 1536], sizes = [32, 256], strides = [1, 1]} : vector<32x2048xf32> to vector<32x256xf32>
    %596 = vector.broadcast %594 : vector<1x256xf32> to vector<32x256xf32>
    %597 = arith.mulf %596, %595 : vector<32x256xf32>
    %598 = arith.addf %593, %597 : vector<32x256xf32>
    %599 = vector.extract_strided_slice %3 {offsets = [55, 0], sizes = [1, 256], strides = [1, 1]} : vector<64x256xf32> to vector<1x256xf32>
    %600 = vector.extract_strided_slice %328 {offsets = [0, 1792], sizes = [32, 256], strides = [1, 1]} : vector<32x2048xf32> to vector<32x256xf32>
    %601 = vector.broadcast %599 : vector<1x256xf32> to vector<32x256xf32>
    %602 = arith.mulf %601, %600 : vector<32x256xf32>
    %603 = arith.addf %598, %602 : vector<32x256xf32>
    %604 = vector.extract_strided_slice %3 {offsets = [56, 0], sizes = [1, 256], strides = [1, 1]} : vector<64x256xf32> to vector<1x256xf32>
    %605 = vector.extract_strided_slice %328 {offsets = [0, 0], sizes = [32, 256], strides = [1, 1]} : vector<32x2048xf32> to vector<32x256xf32>
    %606 = vector.broadcast %604 : vector<1x256xf32> to vector<32x256xf32>
    %607 = arith.mulf %606, %605 : vector<32x256xf32>
    %608 = vector.extract_strided_slice %3 {offsets = [57, 0], sizes = [1, 256], strides = [1, 1]} : vector<64x256xf32> to vector<1x256xf32>
    %609 = vector.extract_strided_slice %328 {offsets = [0, 256], sizes = [32, 256], strides = [1, 1]} : vector<32x2048xf32> to vector<32x256xf32>
    %610 = vector.broadcast %608 : vector<1x256xf32> to vector<32x256xf32>
    %611 = arith.mulf %610, %609 : vector<32x256xf32>
    %612 = arith.addf %607, %611 : vector<32x256xf32>
    %613 = vector.extract_strided_slice %3 {offsets = [58, 0], sizes = [1, 256], strides = [1, 1]} : vector<64x256xf32> to vector<1x256xf32>
    %614 = vector.extract_strided_slice %328 {offsets = [0, 512], sizes = [32, 256], strides = [1, 1]} : vector<32x2048xf32> to vector<32x256xf32>
    %615 = vector.broadcast %613 : vector<1x256xf32> to vector<32x256xf32>
    %616 = arith.mulf %615, %614 : vector<32x256xf32>
    %617 = arith.addf %612, %616 : vector<32x256xf32>
    %618 = vector.extract_strided_slice %3 {offsets = [59, 0], sizes = [1, 256], strides = [1, 1]} : vector<64x256xf32> to vector<1x256xf32>
    %619 = vector.extract_strided_slice %328 {offsets = [0, 768], sizes = [32, 256], strides = [1, 1]} : vector<32x2048xf32> to vector<32x256xf32>
    %620 = vector.broadcast %618 : vector<1x256xf32> to vector<32x256xf32>
    %621 = arith.mulf %620, %619 : vector<32x256xf32>
    %622 = arith.addf %617, %621 : vector<32x256xf32>
    %623 = vector.extract_strided_slice %3 {offsets = [60, 0], sizes = [1, 256], strides = [1, 1]} : vector<64x256xf32> to vector<1x256xf32>
    %624 = vector.extract_strided_slice %328 {offsets = [0, 1024], sizes = [32, 256], strides = [1, 1]} : vector<32x2048xf32> to vector<32x256xf32>
    %625 = vector.broadcast %623 : vector<1x256xf32> to vector<32x256xf32>
    %626 = arith.mulf %625, %624 : vector<32x256xf32>
    %627 = arith.addf %622, %626 : vector<32x256xf32>
    %628 = vector.extract_strided_slice %3 {offsets = [61, 0], sizes = [1, 256], strides = [1, 1]} : vector<64x256xf32> to vector<1x256xf32>
    %629 = vector.extract_strided_slice %328 {offsets = [0, 1280], sizes = [32, 256], strides = [1, 1]} : vector<32x2048xf32> to vector<32x256xf32>
    %630 = vector.broadcast %628 : vector<1x256xf32> to vector<32x256xf32>
    %631 = arith.mulf %630, %629 : vector<32x256xf32>
    %632 = arith.addf %627, %631 : vector<32x256xf32>
    %633 = vector.extract_strided_slice %3 {offsets = [62, 0], sizes = [1, 256], strides = [1, 1]} : vector<64x256xf32> to vector<1x256xf32>
    %634 = vector.extract_strided_slice %328 {offsets = [0, 1536], sizes = [32, 256], strides = [1, 1]} : vector<32x2048xf32> to vector<32x256xf32>
    %635 = vector.broadcast %633 : vector<1x256xf32> to vector<32x256xf32>
    %636 = arith.mulf %635, %634 : vector<32x256xf32>
    %637 = arith.addf %632, %636 : vector<32x256xf32>
    %638 = vector.extract_strided_slice %3 {offsets = [63, 0], sizes = [1, 256], strides = [1, 1]} : vector<64x256xf32> to vector<1x256xf32>
    %639 = vector.extract_strided_slice %328 {offsets = [0, 1792], sizes = [32, 256], strides = [1, 1]} : vector<32x2048xf32> to vector<32x256xf32>
    %640 = vector.broadcast %638 : vector<1x256xf32> to vector<32x256xf32>
    %641 = arith.mulf %640, %639 : vector<32x256xf32>
    %642 = arith.addf %637, %641 : vector<32x256xf32>
    %643 = tpu.concatenate %369, %408, %447, %486, %525, %564, %603, %642 in 1 : vector<32x256xf32>, vector<32x256xf32>, vector<32x256xf32>, vector<32x256xf32>, vector<32x256xf32>, vector<32x256xf32>, vector<32x256xf32>, vector<32x256xf32> -> vector<32x2048xf32>
    %cst_19 = arith.constant dense<0.000000e+00> : vector<32x2048xf32>
    %644 = tpu.matmul %329, %643, %cst_19 {dimension_numbers = #tpu.dot_dimension_numbers<[1], [0], [0], [1], [0, 0, 1, 1], [], []>} : vector<32x32xf32>, vector<32x2048xf32>, vector<32x2048xf32> -> vector<32x2048xf32>
    %645 = vector.broadcast %330 : vector<32x1xf32> to vector<32x2048xf32>
    %646 = arith.addf %644, %645 : vector<32x2048xf32>
    %cst_20 = arith.constant 0.000000e+00 : f32
    %647 = vector.broadcast %cst_20 : f32 to vector<32x2048xf32>
    %648 = arith.maximumf %646, %647 : vector<32x2048xf32>
    %c0_21 = arith.constant 0 : index
    %c0_22 = arith.constant 0 : index
    %649 = vector.load %arg9[%c0_21, %c0_22] : memref<32x32xf32, #tpu.memory_space<vmem>>, vector<32x32xf32>
    %c0_23 = arith.constant 0 : index
    %c0_24 = arith.constant 0 : index
    %650 = vector.load %arg10[%c0_23, %c0_24] : memref<32x1xf32, #tpu.memory_space<vmem>>, vector<32x1xf32>
    %cst_25 = arith.constant dense<0.000000e+00> : vector<32x2048xf32>
    %651 = tpu.matmul %649, %648, %cst_25 {dimension_numbers = #tpu.dot_dimension_numbers<[1], [0], [0], [1], [0, 0, 1, 1], [], []>} : vector<32x32xf32>, vector<32x2048xf32>, vector<32x2048xf32> -> vector<32x2048xf32>
    %652 = vector.broadcast %650 : vector<32x1xf32> to vector<32x2048xf32>
    %653 = arith.addf %651, %652 : vector<32x2048xf32>
    %cst_26 = arith.constant 0.000000e+00 : f32
    %654 = vector.broadcast %cst_26 : f32 to vector<32x2048xf32>
    %655 = arith.maximumf %653, %654 : vector<32x2048xf32>
    %c0_27 = arith.constant 0 : index
    %c0_28 = arith.constant 0 : index
    %656 = vector.load %arg11[%c0_27, %c0_28] : memref<2x32xf32, #tpu.memory_space<vmem>>, vector<2x32xf32>
    %c0_29 = arith.constant 0 : index
    %c0_30 = arith.constant 0 : index
    %657 = vector.load %arg12[%c0_29, %c0_30] : memref<2x1xf32, #tpu.memory_space<vmem>>, vector<2x1xf32>
    %cst_31 = arith.constant dense<0.000000e+00> : vector<2x2048xf32>
    %658 = tpu.matmul %656, %655, %cst_31 {dimension_numbers = #tpu.dot_dimension_numbers<[1], [0], [0], [1], [0, 0, 1, 1], [], []>} : vector<2x32xf32>, vector<32x2048xf32>, vector<2x2048xf32> -> vector<2x2048xf32>
    %659 = vector.broadcast %657 : vector<2x1xf32> to vector<2x2048xf32>
    %660 = arith.addf %658, %659 : vector<2x2048xf32>
    %c0_32 = arith.constant 0 : index
    %c0_33 = arith.constant 0 : index
    %c0_34 = arith.constant 0 : index
    %661 = vector.load %arg13[%c0_32, %c0_33, %c0_34] : memref<1x2x2048xf32, #tpu.memory_space<vmem>>, vector<1x2x2048xf32>
    %662 = vector.shape_cast %661 : vector<1x2x2048xf32> to vector<2x2048xf32>
    %663 = vector.shape_cast %660 : vector<2x2048xf32> to vector<1x2x2048xf32>
    tpu.vector_store %arg13[%c0_32, %c0_33, %c0_34], %663 {strides = array<i32>} : memref<1x2x2048xf32, #tpu.memory_space<vmem>>, vector<1x2x2048xf32>,
    return
  }
  func.func @transform_0(%arg0: i32) -> (i32, i32, i32) {
    %c0_i32 = arith.constant 0 : i32
    %c0_i32_0 = arith.constant 0 : i32
    %c0_i32_1 = arith.constant 0 : i32
    return %arg0, %c0_i32, %c0_i32_0 : i32, i32, i32
  }
  func.func @transform_1(%arg0: i32) -> (i32, i32, i32) {
    %c0_i32 = arith.constant 0 : i32
    %c0_i32_0 = arith.constant 0 : i32
    %c0_i32_1 = arith.constant 0 : i32
    return %arg0, %c0_i32, %c0_i32_0 : i32, i32, i32
  }
  func.func @transform_2(%arg0: i32) -> (i32, i32) {
    %c0_i32 = arith.constant 0 : i32
    %c0_i32_0 = arith.constant 0 : i32
    %c0_i32_1 = arith.constant 0 : i32
    return %c0_i32, %c0_i32_0 : i32, i32
  }
  func.func @transform_3(%arg0: i32) -> (i32, i32) {
    %c0_i32 = arith.constant 0 : i32
    %c0_i32_0 = arith.constant 0 : i32
    %c0_i32_1 = arith.constant 0 : i32
    return %c0_i32, %c0_i32_0 : i32, i32
  }
  func.func @transform_4(%arg0: i32) -> (i32, i32) {
    %c0_i32 = arith.constant 0 : i32
    %c0_i32_0 = arith.constant 0 : i32
    %c0_i32_1 = arith.constant 0 : i32
    return %c0_i32, %c0_i32_0 : i32, i32
  }
  func.func @transform_5(%arg0: i32) -> (i32, i32) {
    %c0_i32 = arith.constant 0 : i32
    %c0_i32_0 = arith.constant 0 : i32
    %c0_i32_1 = arith.constant 0 : i32
    return %c0_i32, %c0_i32_0 : i32, i32
  }
  func.func @transform_6(%arg0: i32) -> (i32, i32) {
    %c0_i32 = arith.constant 0 : i32
    %c0_i32_0 = arith.constant 0 : i32
    %c0_i32_1 = arith.constant 0 : i32
    return %c0_i32, %c0_i32_0 : i32, i32
  }
  func.func @transform_7(%arg0: i32) -> (i32, i32) {
    %c0_i32 = arith.constant 0 : i32
    %c0_i32_0 = arith.constant 0 : i32
    %c0_i32_1 = arith.constant 0 : i32
    return %c0_i32, %c0_i32_0 : i32, i32
  }
  func.func @transform_8(%arg0: i32) -> (i32, i32) {
    %c0_i32 = arith.constant 0 : i32
    %c0_i32_0 = arith.constant 0 : i32
    %c0_i32_1 = arith.constant 0 : i32
    return %c0_i32, %c0_i32_0 : i32, i32
  }
  func.func @transform_9(%arg0: i32) -> (i32, i32) {
    %c0_i32 = arith.constant 0 : i32
    %c0_i32_0 = arith.constant 0 : i32
    %c0_i32_1 = arith.constant 0 : i32
    return %c0_i32, %c0_i32_0 : i32, i32
  }
  func.func @transform_10(%arg0: i32) -> (i32, i32) {
    %c0_i32 = arith.constant 0 : i32
    %c0_i32_0 = arith.constant 0 : i32
    %c0_i32_1 = arith.constant 0 : i32
    return %c0_i32, %c0_i32_0 : i32, i32
  }
  func.func @transform_11(%arg0: i32) -> (i32, i32) {
    %c0_i32 = arith.constant 0 : i32
    %c0_i32_0 = arith.constant 0 : i32
    %c0_i32_1 = arith.constant 0 : i32
    return %c0_i32, %c0_i32_0 : i32, i32
  }
  func.func @transform_12(%arg0: i32) -> (i32, i32, i32) {
    %c0_i32 = arith.constant 0 : i32
    %c0_i32_0 = arith.constant 0 : i32
    %c0_i32_1 = arith.constant 0 : i32
    return %arg0, %c0_i32, %c0_i32_0 : i32, i32, i32
  }
}

</mosaic_0001>

<bundles_post_ra>
// kernel: tpu_custom_call.1
= control target key start
LH: loop header
LB: loop body
LE: loop exit
PB: predicated region body
PF: predicated region fallthrough
CT: control target
= control target key end

     0   :  { %17 = vsyncpa [#allocation3], 0  ;;  %s10746_s0 = inlined_call_operand.hbm [shape: f32[1,16,2048], index: 0, kind: input, shape index: {}]   ;;  %s10747_s1 = inlined_call_operand.vmem [shape: f32[1,64,256], index: 1, kind: input, shape index: {}]   ;;  %s10748_s2 = inlined_call_operand.vmem [shape: f32[32,16], index: 2, kind: input, shape index: {}]   ;;  %s10749_s3 = inlined_call_operand.vmem [shape: f32[32,1], index: 3, kind: input, shape index: {}]   ;;  %s10750_s4 = inlined_call_operand.vmem [shape: f32[32,32], index: 4, kind: input, shape index: {}]   ;;  %s10751_s5 = inlined_call_operand.vmem [shape: f32[32,1], index: 5, kind: input, shape index: {}]   ;;  %s10752_s6 = inlined_call_operand.vmem [shape: f32[32,32], index: 6, kind: input, shape index: {}]   ;;  %s10753_s7 = inlined_call_operand.vmem [shape: f32[32,1], index: 7, kind: input, shape index: {}]   ;;  %s10754_s8 = inlined_call_operand.hbm [shape: f32[32,32], index: 8, kind: input, shape index: {}]   ;;  %s10755_s9 = inlined_call_operand.vmem [shape: f32[32,1], index: 9, kind: input, shape index: {}]   ;;  %s10756_s10 = inlined_call_operand.vmem [shape: f32[2,32], index: 10, kind: input, shape index: {}]   ;;  %s10757_s11 = inlined_call_operand.vmem [shape: f32[2,1], index: 11, kind: input, shape index: {}]   ;;  %s10758_s12 = inlined_call_operand.hbm [shape: f32[1,2,2048], index: 12, kind: output, shape index: {}]  }
   0x1   :  { %18 = vsyncpa [#allocation6], 0 }
   0x2   :  { %19 = vsyncpa [#allocation4], 0  ;;  %s6659_s21 = smov [#allocation2]  }
   0x3   :  { %s25_s22 = sshll.u32 %s6659_s21, 4  ;;  %s26_s22 = int_to_ptr.vmem [resolvable:$true] %s25_s22 }
   0x4   :  { %s6601_s23 = scalar_lea.vmem %s26_s22, 4096  ;;  %p6606_p1 = scmp.lt.s32.totalorder %s26_s22, %s26_s22 }
   0x5   :  { %p6602_p0 = scmp.ne.s32.totalorder %s26_s22, %s6601_s23  ;;  %p6607_p2 = scmp.lt.s32.totalorder %s6601_s23, %s6601_s23 }
   0x7   :  { %p6608_p3 = por %p6607_p2, %p6606_p1 }
   0x9   :  { %p6609_p4 = pnand %p6608_p3, %p6602_p0 }
   0xb   :  { %6612 = shalt.err (!%p6609_p4)
}
   0xc   :  { %s6660_s24 = smov 2048   ;;  %s6661_s25 = smov 128  }
   0xd   :  { %31 = dma.hbm_to_vmem [thread:$0]  %s10746_s0, 4096, %s26_s22, [#allocation3], %s6660_s24, %s6660_s24, %s6661_s25  }
   0xe   :  { %s6662_s28 = smov [#allocation5]  }
   0xf   :  { %s51_s29 = sshll.u32 %s6662_s28, 4  ;;  %s52_s29 = int_to_ptr.vmem [resolvable:$true] %s51_s29 }
  0x10   :  { %s6621_s30 = scalar_lea.vmem %s52_s29, 512  ;;  %p6626_p6 = scmp.lt.s32.totalorder %s52_s29, %s52_s29 }
  0x11   :  { %p6622_p5 = scmp.ne.s32.totalorder %s52_s29, %s6621_s30  ;;  %p6627_p7 = scmp.lt.s32.totalorder %s6621_s30, %s6621_s30 }
  0x13   :  { %p6628_p8 = por %p6627_p7, %p6626_p6 }
  0x15   :  { %p6629_p9 = pnand %p6628_p8, %p6622_p5 }
  0x17   :  { %6632 = shalt.err (!%p6629_p9)
}
  0x18   :  { %s6663_s13 = smov 8  }
  0x19   :  { %57 = dma.hbm_to_vmem [thread:$0]  %s10754_s8, 512, %s52_s29, [#allocation6], %s6661_s25, %s6661_s25, %s6663_s13  }
  0x1a   :  { %6653 = dma.done.wait [#allocation3], 4096  }
  0x1b   :  { %6654 = vsyncadd [#allocation3], 4294963200 }
  0x1c   :  { %6655 = dma.done.wait [#allocation6], 512  }
  0x1d   :  { %6656 = vsyncadd [#allocation6], 4294966784  ;;  %v10759_v0 = vmov 0.0   ;;  %v6665_v1 = vmov 0   ;;  %v87_v2 = vld [vmem:[#allocation2 + $0x88] sm:$0xff]  ;;  %v89_v3 = vld [vmem:[#allocation2 + $0x98] sm:$0xff]  ;;  %v879_v55 = vlaneseq }
  0x1e   :  { %223 = vmatprep.mubr.f32.mxu0 %v10759_v0  ;;  %312 = vmatprep.mubr.f32.mxu1 %v10759_v0  ;;  %v86_v4 = vld [vmem:[#allocation2 + $0x80] sm:$0xff]  ;;  %v88_v5 = vld [vmem:[#allocation2 + $0x90] sm:$0xff]  ;;  %v71_v6 = vld [vmem:[#allocation2 + $0x8] sm:$0xff]  ;;  %vm146_vm0 = vcmask 130048   ;;  %vm2371_vm1 = vcmask 261120  }
  0x1f   :  { %6584 = vset.pattern.permute.xlu1 %v6665_v1  ;;  %6583 = vset.pattern.permute.xlu0 %v6665_v1  ;;  %v73_v7 = vld [vmem:[#allocation2 + $0x18] sm:$0xff]  ;;  %v70_v8 = vld [vmem:[#allocation2] sm:$0xff]  ;;  %v72_v9 = vld [vmem:[#allocation2 + $0x10] sm:$0xff]  ;;  %v6908_v56 = vshrl.u32 %v879_v55, 7 }
  0x20   :  { %187 = vmatprep.subr.mxu0 %v87_v2  ;;  %276 = vmatprep.subr.mxu1 %v89_v3  ;;  %v6744_v10 = vld [vmem:[%s10748_s2] sm:$0xff]  ;;  %v91_v11 = vld [vmem:[#allocation2 + $0xa8] sm:$0xff]  ;;  %v93_v12 = vld [vmem:[#allocation2 + $0xb8] sm:$0xff] }
  0x21   :  { %188 = vmatpush1.msra.mxu0 %v86_v4  ;;  %277 = vmatpush1.msra.mxu1 %v88_v5  ;;  %v90_v13 = vld [vmem:[#allocation2 + $0xa0] sm:$0xff]  ;;  %v92_v14 = vld [vmem:[#allocation2 + $0xb0] sm:$0xff]  ;;  %v6755_v15 = vld [vmem:[%s10748_s2 + $0x8] sm:$0xff]  ;;  %11551 = vst [vmem:[#allocation11_spill] sm:$0xff] %v6908_v56  ;;  %v6911_v57 = vsub.s32 0, %v6908_v56  ;;  %v6914_v58 = vsub.s32 1, %v6908_v56 }
  0x22   :  { %189 = vmatprep.subr.mxu0 %v71_v6  ;;  %278 = vmatprep.subr.mxu1 %v73_v7  ;;  %v75_v16 = vld [vmem:[#allocation2 + $0x28] sm:$0xff]  ;;  %v77_v17 = vld [vmem:[#allocation2 + $0x38] sm:$0xff]  ;;  %v74_v18 = vld [vmem:[#allocation2 + $0x20] sm:$0xff]  ;;  %v6926_v62 = vsub.s32 2, %v6908_v56  ;;  %v6929_v63 = vsub.s32 3, %v6908_v56  ;;  %v6950_v7 = vsub.s32 4, %v6908_v56 }
  0x23   :  { %190 = vmatpush1.msra.mxu0 %v70_v8  ;;  %279 = vmatpush1.msra.mxu1 %v72_v9  ;;  %v76_v19 = vld [vmem:[#allocation2 + $0x30] sm:$0xff]  ;;  %v95_v21 = vld [vmem:[#allocation2 + $0xc8] sm:$0xff]  ;;  %v97_v22 = vld [vmem:[#allocation2 + $0xd8] sm:$0xff]  ;;  %11552 = vst [vmem:[#allocation12_spill] sm:$0xff] %v6911_v57  ;;  %v6956_v9 = vsub.s32 5, %v6908_v56 }
  0x24   :  { %6438 = vmatmul.mubr.msk.f32.vlgmr.msra.gmra.mxu0 %vm146_vm0, %v6744_v10  ;;  %6442 = vmatmul.mubr.msk.f32.vlgmr.msra.gmra.mxu1 %vm146_vm0, %v6744_v10  ;;  %v6766_v20 = vld [vmem:[%s10748_s2 + $0x10] sm:$0xff]  ;;  %v123_v23 = vld [vmem:[%s10749_s3 + $0x8] sm:$0xff]  ;;  %v125_v24 = vld [vmem:[%s10749_s3 + $0x18] sm:$0xff]  ;;  %11553 = vst [vmem:[#allocation13_spill] sm:$0xff] %v6914_v58 }
  0x25   :  { %229 = vmatprep.mubr.f32.mxu0 %v10759_v0  ;;  %318 = vmatprep.mubr.f32.mxu1 %v10759_v0  ;;  %v6783_v25 = vld [vmem:[%s10748_s2 + $0x18] sm:$0xff]  ;;  %v122_v26 = vld [vmem:[%s10749_s3] sm:$0xff]  ;;  %v124_v27 = vld [vmem:[%s10749_s3 + $0x10] sm:$0xff]  ;;  %11554 = vst [vmem:[#allocation14_spill] sm:$0xff] %v6926_v62 }
  0x26   :  { %365 = vmatprep.subr.mxu0 %v91_v11  ;;  %454 = vmatprep.subr.mxu1 %v93_v12  ;;  %v94_v28 = vld [vmem:[#allocation2 + $0xc0] sm:$0xff]  ;;  %v96_v29 = vld [vmem:[#allocation2 + $0xd0] sm:$0xff]  ;;  %v79_v30 = vld [vmem:[#allocation2 + $0x48] sm:$0xff]  ;;  %11555 = vst [vmem:[#allocation15_spill] sm:$0xff] %v6929_v63 }
  0x27   :  { %366 = vmatpush1.msra.mxu0 %v90_v13  ;;  %455 = vmatpush1.msra.mxu1 %v92_v14  ;;  %v81_v31 = vld [vmem:[#allocation2 + $0x58] sm:$0xff]  ;;  %v78_v32 = vld [vmem:[#allocation2 + $0x40] sm:$0xff]  ;;  %v80_v33 = vld [vmem:[#allocation2 + $0x50] sm:$0xff]  ;;  %11561 = vst [vmem:[#allocation21_spill] sm:$0xff] %v6950_v7 }
  0x28   :  { %6439 = vmatmul.mubr.msk.f32.gmra.mxu0 %vm146_vm0, %v6755_v15  ;;  %6443 = vmatmul.mubr.msk.f32.gmra.mxu1 %vm146_vm0, %v6755_v15  ;;  %v99_v34 = vld [vmem:[#allocation2 + $0xe8] sm:$0xff]  ;;  %v101_v35 = vld [vmem:[#allocation2 + $0xf8] sm:$0xff]  ;;  %v877_v37 = vld [vmem:[%s10751_s5 + $0x10] sm:$0xff]  ;;  %11563 = vst [vmem:[#allocation23_spill] sm:$0xff] %v6956_v9 }
  0x29   :  { %235 = vmatprep.mubr.f32.mxu0 %v10759_v0  ;;  %324 = vmatprep.mubr.f32.mxu1 %v10759_v0  ;;  %v878_v36 = vld [vmem:[%s10751_s5 + $0x18] sm:$0xff]  ;;  %v876_v38 = vld [vmem:[%s10751_s5 + $0x8] sm:$0xff]  ;;  %v875_v39 = vld [vmem:[%s10751_s5] sm:$0xff] }
  0x2a   :  { %367 = vmatprep.subr.mxu0 %v75_v16  ;;  %456 = vmatprep.subr.mxu1 %v77_v17  ;;  %v98_v40 = vld [vmem:[#allocation2 + $0xe0] sm:$0xff]  ;;  %v100_v41 = vld [vmem:[#allocation2 + $0xf0] sm:$0xff]  ;;  %v83_v42 = vld [vmem:[#allocation2 + $0x68] sm:$0xff]  ;;  %v6980_v17 = vsub.s32 7, %v6908_v56 }
  0x2b   :  { %368 = vmatpush1.msra.mxu0 %v74_v18  ;;  %457 = vmatpush1.msra.mxu1 %v76_v19  ;;  %v85_v43 = vld [vmem:[#allocation2 + $0x78] sm:$0xff]  ;;  %v82_v44 = vld [vmem:[#allocation2 + $0x60] sm:$0xff]  ;;  %v84_v45 = vld [vmem:[#allocation2 + $0x70] sm:$0xff] }
  0x2c   :  { %6440 = vmatmul.mubr.msk.f32.gmra.mxu0 %vm146_vm0, %v6766_v20  ;;  %6444 = vmatmul.mubr.msk.f32.gmra.mxu1 %vm146_vm0, %v6766_v20  ;;  %v3167_v46 = vld [vmem:[%s10753_s7 + $0x18] sm:$0xff]  ;;  %v3166_v47 = vld [vmem:[%s10753_s7 + $0x10] sm:$0xff]  ;;  %v3165_v48 = vld [vmem:[%s10753_s7 + $0x8] sm:$0xff]  ;;  %11571 = vst [vmem:[#allocation31_spill] sm:$0xff] %v6980_v17 }
  0x2d   :  { %241 = vmatprep.mubr.f32.mxu0 %v10759_v0  ;;  %330 = vmatprep.mubr.f32.mxu1 %v10759_v0  ;;  %v3164_v49 = vld [vmem:[%s10753_s7] sm:$0xff]  ;;  %v4943_v50 = vld [vmem:[%s10755_s9 + $0x18] sm:$0xff]  ;;  %v4942_v51 = vld [vmem:[%s10755_s9 + $0x10] sm:$0xff] }
  0x2e   :  { %543 = vmatprep.subr.mxu0 %v95_v21  ;;  %632 = vmatprep.subr.mxu1 %v97_v22  ;;  %v4941_v52 = vld [vmem:[%s10755_s9 + $0x8] sm:$0xff]  ;;  %v4940_v53 = vld [vmem:[%s10755_s9] sm:$0xff]  ;;  %v104_v60 = vld [vmem:[%s10747_s1 + $0x10] sm:$0xff] }
  0x2f   :  { %133 = vperm.xlu1 %6584, %v123_v23   ;;  %143 = vperm.xlu0 %6583, %v125_v24   ;;  %v5753_v54 = vld [vmem:[%s10757_s11] sm:$0x3]  ;;  %v103_v61 = vld [vmem:[%s10747_s1 + $0x8] sm:$0xff]  ;;  %v105_v1 = vld [vmem:[%s10747_s1 + $0x18] sm:$0xff]  ;;  %v6941_v4 = vrot.slane %v104_v60, %v6911_v57  ;;  %v6953_v8 = vrot.slane %v104_v60, %v6914_v58  ;;  %v6977_v16 = vrot.slane %v104_v60, %v6926_v62 }
  0x30   :  { %6441 = vmatmul.mubr.msk.f32.gmra.mxu0 %vm146_vm0, %v6783_v25  ;;  %6445 = vmatmul.mubr.msk.f32.gmra.mxu1 %vm146_vm0, %v6783_v25  ;;  %v102_v59 = vld [vmem:[%s10747_s1] sm:$0xff]  ;;  %v6944_v5 = vrot.slane %v103_v61, %v6911_v57  ;;  %v6947_v6 = vrot.slane %v103_v61, %v6914_v58  ;;  %v6962_v11 = vrot.slane %v105_v1, %v6914_v58 }
  0x31   :  { %401 = vmatprep.mubr.f32.mxu0 %v10759_v0  ;;  %490 = vmatprep.mubr.f32.mxu1 %v10759_v0  ;;  %v6935_v2 = vrot.slane %v102_v59, %v6911_v57  ;;  %v6938_v3 = vrot.slane %v102_v59, %v6914_v58  ;;  %11558 = vst [vmem:[#allocation18_spill] sm:$0xff] %v6941_v4  ;;  %11562 = vst [vmem:[#allocation22_spill] sm:$0xff] %v6953_v8 }
  0x32   :  { %11559 = vst [vmem:[#allocation19_spill] sm:$0xff] %v6944_v5  ;;  %11560 = vst [vmem:[#allocation20_spill] sm:$0xff] %v6947_v6  ;;  %v6965_v12 = vrot.slane %v102_v59, %v6926_v62  ;;  %v6968_v13 = vrot.slane %v103_v61, %v6926_v62  ;;  %v6971_v14 = vrot.slane %v103_v61, %v6929_v63 }
  0x33   :  { %128 = vperm.xlu1 %6584, %v122_v26   ;;  %138 = vperm.xlu0 %6583, %v124_v27   ;;  %11556 = vst [vmem:[#allocation16_spill] sm:$0xff] %v6935_v2  ;;  %11557 = vst [vmem:[#allocation17_spill] sm:$0xff] %v6938_v3  ;;  %v6983_v18 = vrot.slane %v105_v1, %v6926_v62  ;;  %v6986_v19 = vrot.slane %v105_v1, %v6929_v63 }
  0x34   :  { %6446 = vmatmul.mubr.msk.f32.vlgmr.msra.gmra.mxu0 %vm146_vm0, %v6744_v10  ;;  %6450 = vmatmul.mubr.msk.f32.vlgmr.msra.gmra.mxu1 %vm146_vm0, %v6744_v10  ;;  %11565 = vst [vmem:[#allocation25_spill] sm:$0xff] %v6962_v11  ;;  %11566 = vst [vmem:[#allocation26_spill] sm:$0xff] %v6965_v12  ;;  %v6992_v21 = vrot.slane %v103_v61, %v6950_v7  ;;  %v6995_v22 = vrot.slane %v102_v59, %v6950_v7 }
  0x35   :  { %407 = vmatprep.mubr.f32.mxu0 %v10759_v0  ;;  %496 = vmatprep.mubr.f32.mxu1 %v10759_v0  ;;  %11567 = vst [vmem:[#allocation27_spill] sm:$0xff] %v6968_v13  ;;  %11568 = vst [vmem:[#allocation28_spill] sm:$0xff] %v6971_v14  ;;  %v6998_v23 = vrot.slane %v104_v60, %v6929_v63  ;;  %v7001_v24 = vrot.slane %v104_v60, %v6950_v7 }
  0x36   :  { %544 = vmatpush1.msra.mxu0 %v94_v28  ;;  %633 = vmatpush1.msra.mxu1 %v96_v29  ;;  %11570 = vst [vmem:[#allocation30_spill] sm:$0xff] %v6977_v16  ;;  %11572 = vst [vmem:[#allocation32_spill] sm:$0xff] %v6983_v18  ;;  %v7006_v26 = vrot.slane %v103_v61, %v6956_v9  ;;  %v7009_v27 = vrot.slane %v105_v1, %v6950_v7 }
  0x37   :  { %545 = vmatprep.subr.mxu0 %v79_v30  ;;  %634 = vmatprep.subr.mxu1 %v81_v31  ;;  %11573 = vst [vmem:[#allocation33_spill] sm:$0xff] %v6986_v19  ;;  %11575 = vst [vmem:[#allocation35_spill] sm:$0xff] %v6992_v21  ;;  %v7012_v28 = vrot.slane %v105_v1, %v6956_v9  ;;  %v7015_v29 = vrot.slane %v102_v59, %v6956_v9  ;;  %v107_v30 = vld [vmem:[%s10747_s1 + $0x28] sm:$0xff]  ;;  %v109_v31 = vld [vmem:[%s10747_s1 + $0x38] sm:$0xff] }
  0x38   :  { %6447 = vmatmul.mubr.msk.f32.gmra.mxu0 %vm146_vm0, %v6755_v15  ;;  %6451 = vmatmul.mubr.msk.f32.gmra.mxu1 %vm146_vm0, %v6755_v15  ;;  %11576 = vst [vmem:[#allocation36_spill] sm:$0xff] %v6995_v22  ;;  %11577 = vst [vmem:[#allocation37_spill] sm:$0xff] %v6998_v23  ;;  %v7096_v55 = vrot.slane %v107_v30, %v6950_v7 }
  0x39   :  { %413 = vmatprep.mubr.f32.mxu0 %v10759_v0  ;;  %502 = vmatprep.mubr.f32.mxu1 %v10759_v0  ;;  %11578 = vst [vmem:[#allocation38_spill] sm:$0xff] %v7001_v24  ;;  %11579 = vst [vmem:[#allocation39_spill] sm:$0xff] %v7006_v26 }
  0x3a   :  { %546 = vmatpush1.msra.mxu0 %v78_v32  ;;  %635 = vmatpush1.msra.mxu1 %v80_v33  ;;  %11580 = vst [vmem:[#allocation40_spill] sm:$0xff] %v7009_v27  ;;  %11581 = vst [vmem:[#allocation41_spill] sm:$0xff] %v7012_v28 }
  0x3b   :  { %721 = vmatprep.subr.mxu0 %v99_v34  ;;  %810 = vmatprep.subr.mxu1 %v101_v35  ;;  %11582 = vst [vmem:[#allocation42_spill] sm:$0xff] %v7015_v29  ;;  %v7030_v34 = vrot.slane %v104_v60, %v6956_v9  ;;  %11603 = vst [vmem:[#allocation63_spill] sm:$0xff] %v7096_v55 }
  0x3c   :  { %6448 = vmatmul.mubr.msk.f32.gmra.mxu0 %vm146_vm0, %v6766_v20  ;;  %6452 = vmatmul.mubr.msk.f32.gmra.mxu1 %vm146_vm0, %v6766_v20 }
  0x3d   :  { %419 = vmatprep.mubr.f32.mxu0 %v10759_v0  ;;  %508 = vmatprep.mubr.f32.mxu1 %v10759_v0  ;;  %11585 = vst [vmem:[#allocation45_spill] sm:$0xff] %v7030_v34 }
  0x3e   :  { %2368 = vperm.xlu0 %6583, %v878_v36   ;;  %2363 = vperm.xlu1 %6584, %v877_v37   ;;  %v106_v36 = vld [vmem:[%s10747_s1 + $0x20] sm:$0xff]  ;;  %v7041_v37 = vld [vmem:[%s10747_s1 + $0x30] sm:$0xff] }
  0x40   :  { %6449 = vmatmul.mubr.msk.f32.gmra.mxu0 %vm146_vm0, %v6783_v25  ;;  %6453 = vmatmul.mubr.msk.f32.gmra.mxu1 %vm146_vm0, %v6783_v25 }
  0x41   :  { %579 = vmatprep.mubr.f32.mxu0 %v10759_v0  ;;  %668 = vmatprep.mubr.f32.mxu1 %v10759_v0 }
  0x42   :  { %2358 = vperm.xlu0 %6583, %v876_v38   ;;  %2353 = vperm.xlu1 %6584, %v875_v39   ;;  %v7044_v38 = vrot.slane %v103_v61, %v6980_v17 }
  0x44   :  { %6454 = vmatmul.mubr.msk.f32.vlgmr.msra.gmra.mxu0 %vm146_vm0, %v6744_v10  ;;  %6458 = vmatmul.mubr.msk.f32.vlgmr.msra.gmra.mxu1 %vm146_vm0, %v6744_v10  ;;  %11587 = vst [vmem:[#allocation47_spill] sm:$0xff] %v7044_v38 }
  0x45   :  { %585 = vmatprep.mubr.f32.mxu0 %v10759_v0  ;;  %674 = vmatprep.mubr.f32.mxu1 %v10759_v0 }
  0x46   :  { %722 = vmatpush1.msra.mxu0 %v98_v40  ;;  %811 = vmatpush1.msra.mxu1 %v100_v41  ;;  %v7050_v40 = vrot.slane %v105_v1, %v6980_v17  ;;  %v7053_v41 = vrot.slane %v102_v59, %v6980_v17 }
  0x47   :  { %723 = vmatprep.subr.mxu0 %v83_v42  ;;  %812 = vmatprep.subr.mxu1 %v85_v43  ;;  %v7056_v42 = vrot.slane %v104_v60, %v6980_v17  ;;  %v7059_v43 = vrot.slane %v107_v30, %v6911_v57 }
  0x48   :  { %6455 = vmatmul.mubr.msk.f32.gmra.mxu0 %vm146_vm0, %v6755_v15  ;;  %6459 = vmatmul.mubr.msk.f32.gmra.mxu1 %vm146_vm0, %v6755_v15  ;;  %11589 = vst [vmem:[#allocation49_spill] sm:$0xff] %v7050_v40  ;;  %11590 = vst [vmem:[#allocation50_spill] sm:$0xff] %v7053_v41 }
  0x49   :  { %591 = vmatprep.mubr.f32.mxu0 %v10759_v0  ;;  %680 = vmatprep.mubr.f32.mxu1 %v10759_v0  ;;  %11591 = vst [vmem:[#allocation51_spill] sm:$0xff] %v7056_v42  ;;  %11592 = vst [vmem:[#allocation52_spill] sm:$0xff] %v7059_v43 }
  0x4a   :  { %724 = vmatpush1.msra.mxu0 %v82_v44  ;;  %813 = vmatpush1.msra.mxu1 %v84_v45  ;;  %v7062_v44 = vrot.slane %v107_v30, %v6914_v58  ;;  %v7065_v45 = vrot.slane %v109_v31, %v6911_v57 }
  0x4b   :  { %4145 = vperm.xlu0 %6583, %v3167_v46   ;;  %4140 = vperm.xlu1 %6584, %v3166_v47   ;;  %v7068_v46 = vrot.slane %v109_v31, %v6914_v58  ;;  %v7071_v47 = vrot.slane %v106_v36, %v6911_v57 }
  0x4c   :  { %6456 = vmatmul.mubr.msk.f32.gmra.mxu0 %vm146_vm0, %v6766_v20  ;;  %6460 = vmatmul.mubr.msk.f32.gmra.mxu1 %vm146_vm0, %v6766_v20  ;;  %11593 = vst [vmem:[#allocation53_spill] sm:$0xff] %v7062_v44  ;;  %11594 = vst [vmem:[#allocation54_spill] sm:$0xff] %v7065_v45 }
  0x4d   :  { %597 = vmatprep.mubr.f32.mxu0 %v10759_v0  ;;  %686 = vmatprep.mubr.f32.mxu1 %v10759_v0  ;;  %11595 = vst [vmem:[#allocation55_spill] sm:$0xff] %v7068_v46  ;;  %11596 = vst [vmem:[#allocation56_spill] sm:$0xff] %v7071_v47 }
  0x4f   :  { %4135 = vperm.xlu0 %6583, %v3165_v48   ;;  %4130 = vperm.xlu1 %6584, %v3164_v49   ;;  %v7074_v48 = vrot.slane %v106_v36, %v6914_v58  ;;  %v7078_v49 = vrot.slane %v7041_v37, %v6911_v57 }
  0x50   :  { %6457 = vmatmul.mubr.msk.f32.gmra.mxu0 %vm146_vm0, %v6783_v25  ;;  %6461 = vmatmul.mubr.msk.f32.gmra.mxu1 %vm146_vm0, %v6783_v25 }
  0x51   :  { %757 = vmatprep.mubr.f32.mxu0 %v10759_v0  ;;  %846 = vmatprep.mubr.f32.mxu1 %v10759_v0  ;;  %11597 = vst [vmem:[#allocation57_spill] sm:$0xff] %v7074_v48  ;;  %11598 = vst [vmem:[#allocation58_spill] sm:$0xff] %v7078_v49 }
  0x53   :  { %4961 = vperm.xlu0 %6583, %v4943_v50   ;;  %4956 = vperm.xlu1 %6584, %v4942_v51   ;;  %v7081_v50 = vrot.slane %v107_v30, %v6926_v62  ;;  %v7084_v51 = vrot.slane %v107_v30, %v6929_v63 }
  0x54   :  { %6462 = vmatmul.mubr.msk.f32.vlgmr.msra.gmra.mxu0 %vm146_vm0, %v6744_v10  ;;  %6466 = vmatmul.mubr.msk.f32.vlgmr.msra.gmra.mxu1 %vm146_vm0, %v6744_v10  ;;  %v6959_v10 = vrot.slane %v105_v1, %v6911_v57  ;;  %v7120_v57 = vrot.slane %v7041_v37, %v6926_v62 }
  0x55   :  { %763 = vmatprep.mubr.f32.mxu0 %v10759_v0  ;;  %852 = vmatprep.mubr.f32.mxu1 %v10759_v0  ;;  %11599 = vst [vmem:[#allocation59_spill] sm:$0xff] %v7081_v50  ;;  %11600 = vst [vmem:[#allocation60_spill] sm:$0xff] %v7084_v51 }
  0x56   :  { %11564 = vst [vmem:[#allocation24_spill] sm:$0xff] %v6959_v10  ;;  %11610 = vst [vmem:[#allocation70_spill] sm:$0xff] %v7120_v57  ;;  %v7142_v57 = vrot.slane %v109_v31, %v6980_v17 }
  0x57   :  { %4951 = vperm.xlu0 %6583, %v4941_v52   ;;  %4946 = vperm.xlu1 %6584, %v4940_v53   ;;  %v7087_v52 = vrot.slane %v109_v31, %v6926_v62  ;;  %v7091_v53 = vrot.slane %v7041_v37, %v6914_v58  ;;  %v7116_v58 = vrot.slane %v106_v36, %v6929_v63 }
  0x58   :  { %6463 = vmatmul.mubr.msk.f32.gmra.mxu0 %vm146_vm0, %v6755_v15  ;;  %6467 = vmatmul.mubr.msk.f32.gmra.mxu1 %vm146_vm0, %v6755_v15  ;;  %v6974_v15 = vsub.s32 6, %v6908_v56  ;;  %v7113_v56 = vrot.slane %v107_v30, %v6980_v17  ;;  %11617 = vst [vmem:[#allocation77_spill] sm:$0xff] %v7142_v57 }
  0x59   :  { %769 = vmatprep.mubr.f32.mxu0 %v10759_v0  ;;  %858 = vmatprep.mubr.f32.mxu1 %v10759_v0  ;;  %11601 = vst [vmem:[#allocation61_spill] sm:$0xff] %v7087_v52  ;;  %11602 = vst [vmem:[#allocation62_spill] sm:$0xff] %v7091_v53 }
  0x5a   :  { %11569 = vst [vmem:[#allocation29_spill] sm:$0xff] %v6974_v15  ;;  %v7024_v32 = vrot.slane %v103_v61, %v6974_v15  ;;  %v7027_v33 = vrot.slane %v102_v59, %v6974_v15  ;;  %v7033_v35 = vrot.slane %v104_v60, %v6974_v15  ;;  %v7047_v39 = vrot.slane %v105_v1, %v6974_v15 }
  0x5b   :  { %5756 = vperm.xlu0 %6583, %v5753_v54   ;;  %v7102_v60 = vrot.slane %v109_v31, %v6929_v63  ;;  %v7105_v61 = vrot.slane %v106_v36, %v6926_v62  ;;  %11608 = vst [vmem:[#allocation68_spill] sm:$0xff] %v7113_v56  ;;  %11609 = vst [vmem:[#allocation69_spill] sm:$0xff] %v7116_v58 }
  0x5c   :  { %6464 = vmatmul.mubr.msk.f32.gmra.mxu0 %vm146_vm0, %v6766_v20  ;;  %6468 = vmatmul.mubr.msk.f32.gmra.mxu1 %vm146_vm0, %v6766_v20  ;;  %v6989_v20 = vrot.slane %v102_v59, %v6929_v63  ;;  %11583 = vst [vmem:[#allocation43_spill] sm:$0xff] %v7024_v32  ;;  %11584 = vst [vmem:[#allocation44_spill] sm:$0xff] %v7027_v33  ;;  %v7099_v59 = vrot.slane %v107_v30, %v6956_v9 }
  0x5d   :  { %775 = vmatprep.mubr.f32.mxu0 %v10759_v0  ;;  %864 = vmatprep.mubr.f32.mxu1 %v10759_v0  ;;  %11586 = vst [vmem:[#allocation46_spill] sm:$0xff] %v7033_v35  ;;  %11588 = vst [vmem:[#allocation48_spill] sm:$0xff] %v7047_v39 }
  0x5e   :  { %11574 = vst [vmem:[#allocation34_spill] sm:$0xff] %v6989_v20  ;;  %11604 = vst [vmem:[#allocation64_spill] sm:$0xff] %v7099_v59 }
  0x5f   :  { %11605 = vst [vmem:[#allocation65_spill] sm:$0xff] %v7102_v60  ;;  %11606 = vst [vmem:[#allocation66_spill] sm:$0xff] %v7105_v61  ;;  %v7123_v60 = vrot.slane %v109_v31, %v6950_v7  ;;  %v7126_v61 = vrot.slane %v109_v31, %v6956_v9 }
  0x60   :  { %6465 = vmatmul.mubr.msk.f32.gmra.mxu0 %vm146_vm0, %v6783_v25  ;;  %6469 = vmatmul.mubr.msk.f32.gmra.mxu1 %vm146_vm0, %v6783_v25 }
  0x61   :  { %2448 = vmatprep.mubr.f32.mxu0 %v10759_v0  ;;  %2537 = vmatprep.mubr.f32.mxu1 %v10759_v0  ;;  %v7110_v0 = vrot.slane %v107_v30, %v6974_v15  ;;  %11611 = vst [vmem:[#allocation71_spill] sm:$0xff] %v7123_v60  ;;  %11612 = vst [vmem:[#allocation72_spill] sm:$0xff] %v7126_v61  ;;  %v7133_v30 = vrot.slane %v7041_v37, %v6929_v63 }
  0x62   :  { %v7145_v60 = vrot.slane %v106_v36, %v6950_v7  ;;  %v7151_v63 = vrot.slane %v106_v36, %v6974_v15 }
  0x63   :  { %11607 = vst [vmem:[#allocation67_spill] sm:$0xff] %v7110_v0  ;;  %v7129_v0 = vrot.slane %v109_v31, %v6974_v15  ;;  %11614 = vst [vmem:[#allocation74_spill] sm:$0xff] %v7133_v30 }
  0x64   :  { %11618 = vst [vmem:[#allocation78_spill] sm:$0xff] %v7145_v60  ;;  %11620 = vst [vmem:[#allocation80_spill] sm:$0xff] %v7151_v63 }
  0x65   :  { %11613 = vst [vmem:[#allocation73_spill] sm:$0xff] %v7129_v0  ;;  %v7148_v0 = vrot.slane %v106_v36, %v6956_v9 }
  0x67   :  { %11619 = vst [vmem:[#allocation79_spill] sm:$0xff] %v7148_v0 }
  0xaa   :  { %v7003_v25 = vpop.permute.xlu1 %133  ;;  %v7107_v1 = vpop.permute.xlu0 %143 }
  0xae   :  { %v7093_v54 = vpop.permute.xlu1 %128  ;;  %v7188_v59 = vpop.permute.xlu0 %138 }
  0xe4   :  { %v225_v53 = vpop.f32.mrf.mxu0  ;;  %v314_v49 = vpop.f32.mrf.mxu1 }
  0xe5   :  { %v7136_v58 = vadd.f32 %v225_v53, %v7093_v54  ;;  %v7139_v62 = vadd.f32 %v314_v49, %v7093_v54  ;;  %v7154_v53 = vrot.slane %v106_v36, %v6980_v17  ;;  %v7158_v49 = vrot.slane %v7041_v37, %v6950_v7 }
  0xe6   :  { %v227_v61 = vpop.f32.mrf.mxu0  ;;  %v316_v56 = vpop.f32.mrf.mxu1 }
  0xe7   :  { %11615 = vst [vmem:[#allocation75_spill] sm:$0xff] %v7136_v58  ;;  %11616 = vst [vmem:[#allocation76_spill] sm:$0xff] %v7139_v62  ;;  %v7161_v31 = vadd.f32 %v227_v61, %v7093_v54  ;;  %v7164_v30 = vadd.f32 %v316_v56, %v7093_v54  ;;  %v887_v60 = vmul.f32 %v6935_v2, %v7136_v58 }
  0xe8   :  { %11621 = vst [vmem:[#allocation81_spill] sm:$0xff] %v7154_v53  ;;  %11622 = vst [vmem:[#allocation82_spill] sm:$0xff] %v7158_v49  ;;  %v903_v0 = vmul.f32 %v6938_v3, %v7139_v62  ;;  %v231_v63 = vpop.f32.mrf.mxu0  ;;  %v320_v57 = vpop.f32.mrf.mxu1  ;;  %v1071_v36 = vmul.f32 %v6941_v4, %v7136_v58  ;;  %v1087_v7 = vmul.f32 %v6953_v8, %v7139_v62 }
  0xe9   :  { %11623 = vst [vmem:[#allocation83_spill] sm:$0xff] %v7161_v31  ;;  %11624 = vst [vmem:[#allocation84_spill] sm:$0xff] %v7164_v30  ;;  %v7176_v61 = vrot.slane %v7041_v37, %v6956_v9  ;;  %v7180_v56 = vrot.slane %v7041_v37, %v6974_v15  ;;  %v7183_v49 = vadd.f32 %v231_v63, %v7003_v25 }
  0xea   :  { %v7186_v53 = vadd.f32 %v320_v57, %v7003_v25  ;;  %v888_v52 = vmul.f32 %v6944_v5, %v7161_v31  ;;  %v904_v46 = vmul.f32 %v6947_v6, %v7164_v30  ;;  %v233_v9 = vpop.f32.mrf.mxu0  ;;  %v1072_v15 = vmul.f32 %v6959_v10, %v7161_v31 }
  0xeb   :  { %11625 = vst [vmem:[#allocation85_spill] sm:$0xff] %v7176_v61  ;;  %11626 = vst [vmem:[#allocation86_spill] sm:$0xff] %v7180_v56  ;;  %v322_v61 = vpop.f32.mrf.mxu1  ;;  %v1088_v63 = vmul.f32 %v6962_v11, %v7164_v30  ;;  %v7198_v56 = vadd.f32 %v903_v0, %v887_v60  ;;  %v7202_v57 = vrot.slane %v7041_v37, %v6980_v17 }
  0xec   :  { %11627 = vst [vmem:[#allocation87_spill] sm:$0xff] %v7183_v49  ;;  %11628 = vst [vmem:[#allocation88_spill] sm:$0xff] %v7186_v53  ;;  %v7205_v45 = vadd.f32 %v233_v9, %v7003_v25  ;;  %v7208_v55 = vadd.f32 %v322_v61, %v7003_v25  ;;  %v889_v51 = vmul.f32 %v6935_v2, %v7183_v49  ;;  %v237_v48 = vpop.f32.mrf.mxu0 }
  0xed   :  { %11629 = vst [vmem:[#allocation89_spill] sm:$0xff] %v7202_v57  ;;  %v905_v31 = vmul.f32 %v6938_v3, %v7186_v53  ;;  %v326_v30 = vpop.f32.mrf.mxu1  ;;  %v1073_v0 = vmul.f32 %v6941_v4, %v7183_v49  ;;  %v1089_v37 = vmul.f32 %v6953_v8, %v7186_v53  ;;  %v7218_v60 = vadd.f32 %v904_v46, %v888_v52 }
  0xee   :  { %11630 = vst [vmem:[#allocation90_spill] sm:$0xff] %v7205_v45  ;;  %11631 = vst [vmem:[#allocation91_spill] sm:$0xff] %v7208_v55  ;;  %v7220_v9 = vadd.f32 %v1087_v7, %v1071_v36  ;;  %v7223_v61 = vadd.f32 %v237_v48, %v7188_v59  ;;  %v7226_v17 = vadd.f32 %v326_v30, %v7188_v59  ;;  %v239_v49 = vpop.f32.mrf.mxu0 }
  0xef   :  { %v890_v57 = vmul.f32 %v6944_v5, %v7205_v45  ;;  %v906_v62 = vmul.f32 %v6947_v6, %v7208_v55  ;;  %v328_v47 = vpop.f32.mrf.mxu1  ;;  %v1074_v46 = vmul.f32 %v6959_v10, %v7205_v45  ;;  %v1090_v7 = vmul.f32 %v6962_v11, %v7208_v55 }
  0xf0   :  { %11632 = vst [vmem:[#allocation92_spill] sm:$0xff] %v7223_v61  ;;  %11633 = vst [vmem:[#allocation93_spill] sm:$0xff] %v7226_v17  ;;  %v7236_v52 = vadd.f32 %v905_v31, %v889_v51  ;;  %v7238_v48 = vadd.f32 %v1088_v63, %v1072_v15  ;;  %v7241_v30 = vadd.f32 %v239_v49, %v7188_v59  ;;  %v243_v45 = vpop.f32.mrf.mxu0 }
  0xf1   :  { %v7244_v36 = vadd.f32 %v328_v47, %v7188_v59  ;;  %v891_v53 = vmul.f32 %v6935_v2, %v7223_v61  ;;  %v907_v58 = vmul.f32 %v6938_v3, %v7226_v17  ;;  %v332_v50 = vpop.f32.mrf.mxu1  ;;  %v1075_v51 = vmul.f32 %v6941_v4, %v7223_v61 }
  0xf2   :  { %11634 = vst [vmem:[#allocation94_spill] sm:$0xff] %v7241_v30  ;;  %v1091_v15 = vmul.f32 %v6953_v8, %v7226_v17  ;;  %v7254_v31 = vadd.f32 %v906_v62, %v890_v57  ;;  %v7256_v49 = vadd.f32 %v1089_v37, %v1073_v0  ;;  %v7259_v47 = vadd.f32 %v243_v45, %v7107_v1  ;;  %v245_v61 = vpop.f32.mrf.mxu0 }
  0xf3   :  { %11635 = vst [vmem:[#allocation95_spill] sm:$0xff] %v7244_v36  ;;  %v7262_v63 = vadd.f32 %v332_v50, %v7107_v1  ;;  %v892_v55 = vmul.f32 %v6944_v5, %v7241_v30  ;;  %v908_v44 = vmul.f32 %v6947_v6, %v7244_v36  ;;  %v334_v43 = vpop.f32.mrf.mxu1  ;;  %v1076_v62 = vmul.f32 %v6959_v10, %v7241_v30 }
  0xf4   :  { %11636 = vst [vmem:[#allocation96_spill] sm:$0xff] %v7259_v47  ;;  %v1092_v57 = vmul.f32 %v6962_v11, %v7244_v36  ;;  %v7272_v0 = vadd.f32 %v907_v58, %v891_v53  ;;  %v7274_v45 = vadd.f32 %v1090_v7, %v1074_v46  ;;  %v7277_v50 = vadd.f32 %v245_v61, %v7107_v1  ;;  %v403_v30 = vpop.f32.mrf.mxu0 }
  0xf5   :  { %11637 = vst [vmem:[#allocation97_spill] sm:$0xff] %v7262_v63  ;;  %v7280_v37 = vadd.f32 %v334_v43, %v7107_v1  ;;  %v893_v17 = vmul.f32 %v6935_v2, %v7259_v47  ;;  %v909_v40 = vmul.f32 %v6938_v3, %v7262_v63  ;;  %v492_v39 = vpop.f32.mrf.mxu1  ;;  %v1077_v58 = vmul.f32 %v6941_v4, %v7259_v47 }
  0xf6   :  { %11638 = vst [vmem:[#allocation98_spill] sm:$0xff] %v7277_v50  ;;  %v1093_v53 = vmul.f32 %v6953_v8, %v7262_v63  ;;  %v7290_v46 = vadd.f32 %v908_v44, %v892_v55  ;;  %v7292_v61 = vadd.f32 %v1091_v15, %v1075_v51  ;;  %v7295_v43 = vadd.f32 %v403_v30, %v7093_v54  ;;  %v405_v4 = vpop.f32.mrf.mxu0 }
  0xf7   :  { %11639 = vst [vmem:[#allocation99_spill] sm:$0xff] %v7280_v37  ;;  %v7298_v7 = vadd.f32 %v492_v39, %v7093_v54  ;;  %v894_v3 = vmul.f32 %v6944_v5, %v7277_v50  ;;  %v910_v2 = vmul.f32 %v6947_v6, %v7280_v37  ;;  %v494_v36 = vpop.f32.mrf.mxu1  ;;  %v1078_v44 = vmul.f32 %v6959_v10, %v7277_v50 }
  0xf8   :  { %11640 = vst [vmem:[#allocation100_spill] sm:$0xff] %v7295_v43  ;;  %v1094_v55 = vmul.f32 %v6962_v11, %v7280_v37  ;;  %v7308_v51 = vadd.f32 %v909_v40, %v893_v17  ;;  %v7310_v30 = vadd.f32 %v1092_v57, %v1076_v62  ;;  %v7313_v39 = vadd.f32 %v405_v4, %v7093_v54  ;;  %v409_v5 = vpop.f32.mrf.mxu0 }
  0xf9   :  { %11641 = vst [vmem:[#allocation101_spill] sm:$0xff] %v7298_v7  ;;  %v7316_v15 = vadd.f32 %v494_v36, %v7093_v54  ;;  %v7318_v8 = vadd.f32 %v1093_v53, %v1077_v58  ;;  %v927_v6 = vmul.f32 %v6965_v12, %v7295_v43  ;;  %v498_v10 = vpop.f32.mrf.mxu1  ;;  %v7322_v63 = vadd.f32 %v910_v2, %v894_v3 }
  0xfa   :  { %11642 = vst [vmem:[#allocation102_spill] sm:$0xff] %v7313_v39  ;;  %v7324_v11 = vadd.f32 %v1094_v55, %v1078_v44  ;;  %v7328_v17 = vmul.f32 %v6989_v20, %v7298_v7  ;;  %v1111_v4 = vmul.f32 %v6977_v16, %v7295_v43  ;;  %v7333_v40 = vadd.f32 %v409_v5, %v7003_v25  ;;  %v411_v3 = vpop.f32.mrf.mxu0 }
  0xfb   :  { %11643 = vst [vmem:[#allocation103_spill] sm:$0xff] %v7316_v15  ;;  %v7336_v36 = vadd.f32 %v498_v10, %v7003_v25  ;;  %v928_v62 = vmul.f32 %v6968_v13, %v7313_v39  ;;  %v7342_v2 = vmul.f32 %v6998_v23, %v7298_v7  ;;  %v500_v57 = vpop.f32.mrf.mxu1  ;;  %v7346_v58 = vmul.f32 %v6971_v14, %v7316_v15 }
  0xfc   :  { %11644 = vst [vmem:[#allocation104_spill] sm:$0xff] %v7328_v17  ;;  %11645 = vst [vmem:[#allocation105_spill] sm:$0xff] %v7333_v40  ;;  %v1112_v5 = vmul.f32 %v6983_v18, %v7313_v39  ;;  %v7352_v10 = vmul.f32 %v6986_v19, %v7316_v15  ;;  %v7355_v53 = vadd.f32 %v927_v6, %v7198_v56  ;;  %v415_v39 = vpop.f32.mrf.mxu0 }
  0xfd   :  { %11646 = vst [vmem:[#allocation106_spill] sm:$0xff] %v7336_v36  ;;  %11647 = vst [vmem:[#allocation107_spill] sm:$0xff] %v7342_v2  ;;  %v7358_v44 = vadd.f32 %v411_v3, %v7003_v25  ;;  %v7361_v55 = vadd.f32 %v500_v57, %v7003_v25  ;;  %v929_v7 = vmul.f32 %v6965_v12, %v7333_v40  ;;  %v504_v47 = vpop.f32.mrf.mxu1 }
  0xfe   :  { %11648 = vst [vmem:[#allocation108_spill] sm:$0xff] %v7346_v58  ;;  %11649 = vst [vmem:[#allocation109_spill] sm:$0xff] %v7352_v10  ;;  %v7366_v43 = vadd.f32 %v1111_v4, %v7220_v9  ;;  %v7370_v15 = vmul.f32 %v6989_v20, %v7336_v36  ;;  %v1113_v6 = vmul.f32 %v6977_v16, %v7333_v40  ;;  %v417_v40 = vpop.f32.mrf.mxu0 }
  0xff   :  { %11650 = vst [vmem:[#allocation110_spill] sm:$0xff] %v7355_v53  ;;  %11651 = vst [vmem:[#allocation111_spill] sm:$0xff] %v7358_v44  ;;  %v7376_v56 = vmul.f32 %v6998_v23, %v7336_v36  ;;  %v7379_v3 = vadd.f32 %v928_v62, %v7218_v60  ;;  %v7382_v57 = vadd.f32 %v415_v39, %v7188_v59  ;;  %v506_v50 = vpop.f32.mrf.mxu1 }
 0x100   :  { %11652 = vst [vmem:[#allocation112_spill] sm:$0xff] %v7361_v55  ;;  %11653 = vst [vmem:[#allocation113_spill] sm:$0xff] %v7366_v43  ;;  %v7385_v9 = vadd.f32 %v504_v47, %v7188_v59  ;;  %v930_v4 = vmul.f32 %v6968_v13, %v7358_v44  ;;  %v7390_v37 = vadd.f32 %v1112_v5, %v7238_v48 }
 0x101   :  { %11654 = vst [vmem:[#allocation114_spill] sm:$0xff] %v7382_v57  ;;  %v7394_v36 = vmul.f32 %v6971_v14, %v7361_v55  ;;  %v1114_v60 = vmul.f32 %v6983_v18, %v7358_v44  ;;  %v7400_v39 = vmul.f32 %v6986_v19, %v7361_v55  ;;  %v7403_v47 = vadd.f32 %v929_v7, %v7236_v52  ;;  %v421_v44 = vpop.f32.mrf.mxu0  ;;  %v510_v43 = vpop.f32.mrf.mxu1 }
 0x102   :  { %11655 = vst [vmem:[#allocation115_spill] sm:$0xff] %v7385_v9  ;;  %11656 = vst [vmem:[#allocation116_spill] sm:$0xff] %v7390_v37  ;;  %v7406_v62 = vadd.f32 %v417_v40, %v7188_v59  ;;  %v7409_v48 = vadd.f32 %v506_v50, %v7188_v59  ;;  %v931_v5 = vmul.f32 %v6965_v12, %v7382_v57 }
 0x103   :  { %v7414_v2 = vadd.f32 %v1113_v6, %v7256_v49  ;;  %v955_v55 = vmul.f32 %v6989_v20, %v7385_v9  ;;  %v1115_v52 = vmul.f32 %v6977_v16, %v7382_v57  ;;  %v1139_v7 = vmul.f32 %v6998_v23, %v7385_v9  ;;  %v423_v53 = vpop.f32.mrf.mxu0  ;;  %v512_v10 = vpop.f32.mrf.mxu1 }
 0x104   :  { %11657 = vst [vmem:[#allocation117_spill] sm:$0xff] %v7406_v62  ;;  %11658 = vst [vmem:[#allocation118_spill] sm:$0xff] %v7409_v48  ;;  %v938_v50 = vadd.f32 %v930_v4, %v7254_v31  ;;  %v7424_v40 = vadd.f32 %v421_v44, %v7107_v1  ;;  %v7427_v17 = vadd.f32 %v510_v43, %v7107_v1 }
 0x105   :  { %v932_v49 = vmul.f32 %v6968_v13, %v7406_v62  ;;  %v1122_v6 = vadd.f32 %v1114_v60, %v7274_v45  ;;  %v956_v57 = vmul.f32 %v6971_v14, %v7409_v48  ;;  %v1116_v9 = vmul.f32 %v6983_v18, %v7406_v62  ;;  %v581_v37 = vpop.f32.mrf.mxu0  ;;  %v670_v58 = vpop.f32.mrf.mxu1 }
 0x106   :  { %11659 = vst [vmem:[#allocation119_spill] sm:$0xff] %v7424_v40  ;;  %11660 = vst [vmem:[#allocation120_spill] sm:$0xff] %v7427_v17  ;;  %v1140_v31 = vmul.f32 %v6986_v19, %v7409_v48  ;;  %v939_v44 = vadd.f32 %v931_v5, %v7272_v0  ;;  %v7440_v43 = vadd.f32 %v423_v53, %v7107_v1 }
 0x107   :  { %v7443_v4 = vadd.f32 %v512_v10, %v7107_v1  ;;  %v933_v45 = vmul.f32 %v6965_v12, %v7424_v40  ;;  %v1123_v60 = vadd.f32 %v1115_v52, %v7292_v61  ;;  %v957_v62 = vmul.f32 %v6989_v20, %v7427_v17  ;;  %v583_v20 = vpop.f32.mrf.mxu0  ;;  %v672_v12 = vpop.f32.mrf.mxu1 }
 0x108   :  { %11661 = vst [vmem:[#allocation121_spill] sm:$0xff] %v7440_v43  ;;  %v1117_v48 = vmul.f32 %v6977_v16, %v7424_v40  ;;  %v1141_v0 = vmul.f32 %v6998_v23, %v7427_v17  ;;  %v940_v53 = vadd.f32 %v932_v49, %v7290_v46  ;;  %v7456_v10 = vadd.f32 %v581_v37, %v7093_v54 }
 0x109   :  { %11662 = vst [vmem:[#allocation122_spill] sm:$0xff] %v7443_v4  ;;  %v7459_v5 = vadd.f32 %v670_v58, %v7093_v54  ;;  %v934_v61 = vmul.f32 %v6968_v13, %v7440_v43  ;;  %v1124_v52 = vadd.f32 %v1116_v9, %v7310_v30  ;;  %v958_v16 = vmul.f32 %v6971_v14, %v7443_v4  ;;  %v587_v13 = vpop.f32.mrf.mxu0  ;;  %v676_v14 = vpop.f32.mrf.mxu1 }
 0x10a   :  { %11663 = vst [vmem:[#allocation123_spill] sm:$0xff] %v7456_v10  ;;  %v1118_v23 = vmul.f32 %v6983_v18, %v7440_v43  ;;  %v941_v46 = vadd.f32 %v933_v45, %v7308_v51  ;;  %v1125_v37 = vadd.f32 %v1117_v48, %v7318_v8  ;;  %v7471_v58 = vadd.f32 %v583_v20, %v7093_v54 }
 0x10b   :  { %11664 = vst [vmem:[#allocation124_spill] sm:$0xff] %v7459_v5  ;;  %v7474_v49 = vadd.f32 %v672_v12, %v7093_v54  ;;  %v942_v30 = vadd.f32 %v934_v61, %v7322_v63  ;;  %v1142_v9 = vmul.f32 %v6986_v19, %v7443_v4  ;;  %v964_v8 = vadd.f32 %v956_v57, %v940_v53  ;;  %v589_v45 = vpop.f32.mrf.mxu0  ;;  %v678_v61 = vpop.f32.mrf.mxu1 }
 0x10c   :  { %11665 = vst [vmem:[#allocation125_spill] sm:$0xff] %v7471_v58  ;;  %v1126_v17 = vadd.f32 %v1118_v23, %v7324_v11  ;;  %v7480_v18 = vadd.f32 %v957_v62, %v941_v46  ;;  %v7482_v51 = vadd.f32 %v1141_v0, %v1125_v37  ;;  %v7485_v20 = vadd.f32 %v587_v13, %v7003_v25 }
 0x10d   :  { %11666 = vst [vmem:[#allocation126_spill] sm:$0xff] %v7474_v49  ;;  %v7488_v12 = vadd.f32 %v676_v14, %v7003_v25  ;;  %v7490_v48 = vadd.f32 %v958_v16, %v942_v30  ;;  %v1148_v63 = vadd.f32 %v1140_v31, %v1124_v52  ;;  %v963_v40 = vadd.f32 %v955_v55, %v939_v44  ;;  %v593_v57 = vpop.f32.mrf.mxu0  ;;  %v682_v31 = vpop.f32.mrf.mxu1 }
 0x10e   :  { %11667 = vst [vmem:[#allocation127_spill] sm:$0xff] %v7485_v20  ;;  %v7492_v19 = vadd.f32 %v1142_v9, %v1126_v17  ;;  %v1147_v11 = vadd.f32 %v1139_v7, %v1123_v60  ;;  %v962_v23 = vadd.f32 %v7394_v36, %v938_v50  ;;  %v7496_v62 = vadd.f32 %v589_v45, %v7003_v25 }
 0x10f   :  { %11668 = vst [vmem:[#allocation128_spill] sm:$0xff] %v7488_v12  ;;  %v7499_v13 = vadd.f32 %v678_v61, %v7003_v25  ;;  %v1146_v14 = vadd.f32 %v7400_v39, %v1122_v6  ;;  %v977_v16 = vmul.f32 %v6995_v22, %v7485_v20  ;;  %v961_v17 = vadd.f32 %v7370_v15, %v7403_v47  ;;  %v595_v47 = vpop.f32.mrf.mxu0  ;;  %v684_v44 = vpop.f32.mrf.mxu1 }
 0x110   :  { %11669 = vst [vmem:[#allocation129_spill] sm:$0xff] %v7496_v62  ;;  %v7508_v55 = vmul.f32 %v7015_v29, %v7488_v12  ;;  %v1145_v36 = vadd.f32 %v7376_v56, %v7414_v2  ;;  %v1161_v7 = vmul.f32 %v7001_v24, %v7485_v20  ;;  %v7515_v39 = vadd.f32 %v593_v57, %v7188_v59 }
 0x111   :  { %11670 = vst [vmem:[#allocation130_spill] sm:$0xff] %v7499_v13  ;;  %v7518_v50 = vadd.f32 %v682_v31, %v7188_v59  ;;  %v978_v6 = vmul.f32 %v6992_v21, %v7496_v62  ;;  %v7524_v15 = vmul.f32 %v7030_v34, %v7488_v12  ;;  %v7528_v2 = vmul.f32 %v7006_v26, %v7499_v13  ;;  %v599_v30 = vpop.f32.mrf.mxu0  ;;  %v688_v9 = vpop.f32.mrf.mxu1 }
 0x112   :  { %11671 = vst [vmem:[#allocation131_spill] sm:$0xff] %v7515_v39  ;;  %v1162_v56 = vmul.f32 %v7009_v27, %v7496_v62  ;;  %v7534_v60 = vmul.f32 %v7012_v28, %v7499_v13  ;;  %v7536_v0 = vadd.f32 %v977_v16, %v961_v17  ;;  %v7539_v53 = vadd.f32 %v595_v47, %v7188_v59 }
 0x113   :  { %11672 = vst [vmem:[#allocation132_spill] sm:$0xff] %v7518_v50  ;;  %v7542_v52 = vadd.f32 %v684_v44, %v7188_v59  ;;  %v979_v46 = vmul.f32 %v6995_v22, %v7515_v39  ;;  %v7546_v37 = vadd.f32 %v1161_v7, %v1145_v36  ;;  %v1003_v45 = vmul.f32 %v7015_v29, %v7518_v50  ;;  %v601_v47 = vpop.f32.mrf.mxu0  ;;  %v690_v44 = vpop.f32.mrf.mxu1 }
 0x114   :  { %11673 = vst [vmem:[#allocation133_spill] sm:$0xff] %v7539_v53  ;;  %v1163_v61 = vmul.f32 %v7001_v24, %v7515_v39  ;;  %v1187_v16 = vmul.f32 %v7030_v34, %v7518_v50  ;;  %v986_v57 = vadd.f32 %v978_v6, %v962_v23  ;;  %v7555_v31 = vadd.f32 %v599_v30, %v7107_v1 }
 0x115   :  { %11674 = vst [vmem:[#allocation134_spill] sm:$0xff] %v7542_v52  ;;  %v7558_v17 = vadd.f32 %v688_v9, %v7107_v1  ;;  %v980_v36 = vmul.f32 %v6992_v21, %v7539_v53  ;;  %v1170_v7 = vadd.f32 %v1162_v56, %v1146_v14  ;;  %v1004_v12 = vmul.f32 %v7006_v26, %v7542_v52  ;;  %v759_v13 = vpop.f32.mrf.mxu0  ;;  %v848_v62 = vpop.f32.mrf.mxu1 }
 0x116   :  { %11675 = vst [vmem:[#allocation135_spill] sm:$0xff] %v7555_v31  ;;  %v1164_v20 = vmul.f32 %v7009_v27, %v7539_v53  ;;  %v1188_v23 = vmul.f32 %v7012_v28, %v7542_v52  ;;  %v987_v6 = vadd.f32 %v979_v46, %v963_v40  ;;  %v7569_v30 = vadd.f32 %v601_v47, %v7107_v1 }
 0x117   :  { %11676 = vst [vmem:[#allocation136_spill] sm:$0xff] %v7558_v17  ;;  %v7572_v9 = vadd.f32 %v690_v44, %v7107_v1  ;;  %v981_v14 = vmul.f32 %v6995_v22, %v7555_v31  ;;  %v1171_v56 = vadd.f32 %v1163_v61, %v1147_v11  ;;  %v1005_v50 = vmul.f32 %v7015_v29, %v7558_v17  ;;  %v761_v52 = vpop.f32.mrf.mxu0  ;;  %v850_v53 = vpop.f32.mrf.mxu1 }
 0x118   :  { %11677 = vst [vmem:[#allocation137_spill] sm:$0xff] %v7569_v30  ;;  %v1165_v39 = vmul.f32 %v7001_v24, %v7555_v31  ;;  %v1189_v40 = vmul.f32 %v7030_v34, %v7558_v17  ;;  %v988_v46 = vadd.f32 %v980_v36, %v964_v8  ;;  %v7583_v47 = vadd.f32 %v759_v13, %v7093_v54 }
 0x119   :  { %11678 = vst [vmem:[#allocation138_spill] sm:$0xff] %v7572_v9  ;;  %v7586_v44 = vadd.f32 %v848_v62, %v7093_v54  ;;  %v982_v11 = vmul.f32 %v6992_v21, %v7569_v30  ;;  %v1172_v61 = vadd.f32 %v1164_v20, %v1148_v63  ;;  %v1006_v4 = vmul.f32 %v7006_v26, %v7572_v9  ;;  %v765_v17 = vpop.f32.mrf.mxu0  ;;  %v854_v43 = vpop.f32.mrf.mxu1 }
 0x11a   :  { %11679 = vst [vmem:[#allocation139_spill] sm:$0xff] %v7583_v47  ;;  %v1166_v31 = vmul.f32 %v7009_v27, %v7569_v30  ;;  %v989_v8 = vadd.f32 %v981_v14, %v7480_v18  ;;  %v1173_v13 = vadd.f32 %v1165_v39, %v7482_v51  ;;  %v7597_v36 = vadd.f32 %v761_v52, %v7093_v54 }
 0x11b   :  { %11680 = vst [vmem:[#allocation140_spill] sm:$0xff] %v7586_v44  ;;  %v7600_v62 = vadd.f32 %v850_v53, %v7093_v54  ;;  %v990_v20 = vadd.f32 %v982_v11, %v7490_v48  ;;  %v1190_v63 = vmul.f32 %v7012_v28, %v7572_v9  ;;  %v1012_v51 = vadd.f32 %v1004_v12, %v988_v46  ;;  %v767_v52 = vpop.f32.mrf.mxu0  ;;  %v856_v14 = vpop.f32.mrf.mxu1 }
 0x11c   :  { %11681 = vst [vmem:[#allocation141_spill] sm:$0xff] %v7597_v36  ;;  %v1174_v34 = vadd.f32 %v1166_v31, %v7492_v19  ;;  %v7606_v30 = vadd.f32 %v1005_v50, %v989_v8  ;;  %v7608_v18 = vadd.f32 %v1189_v40, %v1173_v13  ;;  %v7611_v39 = vadd.f32 %v765_v17, %v7003_v25 }
 0x11d   :  { %11682 = vst [vmem:[#allocation142_spill] sm:$0xff] %v7600_v62  ;;  %v7614_v54 = vadd.f32 %v854_v43, %v7003_v25  ;;  %v7616_v53 = vadd.f32 %v1006_v4, %v990_v20  ;;  %v1196_v48 = vadd.f32 %v1188_v23, %v1172_v61  ;;  %v1011_v9 = vadd.f32 %v1003_v45, %v987_v6  ;;  %v771_v4 = vpop.f32.mrf.mxu0  ;;  %v860_v17 = vpop.f32.mrf.mxu1  ;;  %v11690_v6 = vld [vmem:[#allocation49_spill] sm:$0xff] }
 0x11e   :  { %11683 = vst [vmem:[#allocation143_spill] sm:$0xff] %v7611_v39  ;;  %v1198_v11 = vadd.f32 %v1190_v63, %v1174_v34  ;;  %v1195_v24 = vadd.f32 %v1187_v16, %v1171_v56  ;;  %v1010_v19 = vadd.f32 %v7528_v2, %v986_v57  ;;  %v7620_v50 = vadd.f32 %v767_v52, %v7003_v25 }
 0x11f   :  { %11684 = vst [vmem:[#allocation144_spill] sm:$0xff] %v7614_v54  ;;  %v7623_v12 = vadd.f32 %v856_v14, %v7003_v25  ;;  %v1194_v31 = vadd.f32 %v7534_v60, %v1170_v7  ;;  %v1025_v43 = vmul.f32 %v7027_v33, %v7611_v39  ;;  %v1009_v34 = vadd.f32 %v7508_v55, %v7536_v0  ;;  %v773_v0 = vpop.f32.mrf.mxu0  ;;  %v862_v7 = vpop.f32.mrf.mxu1 }
 0x120   :  { %11685 = vst [vmem:[#allocation145_spill] sm:$0xff] %v7620_v50  ;;  %v1049_v45 = vmul.f32 %v7053_v41, %v7614_v54  ;;  %v1193_v2 = vadd.f32 %v7524_v15, %v7546_v37  ;;  %v1209_v25 = vmul.f32 %v7033_v35, %v7611_v39  ;;  %v7637_v16 = vadd.f32 %v771_v4, %v7188_v59  ;;  %v11689_v37 = vld [vmem:[#allocation48_spill] sm:$0xff] }
 0x121   :  { %11686 = vst [vmem:[#allocation146_spill] sm:$0xff] %v7623_v12  ;;  %v7640_v60 = vadd.f32 %v860_v17, %v7188_v59  ;;  %v1026_v57 = vmul.f32 %v7024_v32, %v7620_v50  ;;  %v1233_v55 = vmul.f32 %v7056_v42, %v7614_v54  ;;  %v1050_v15 = vmul.f32 %v7044_v38, %v7623_v12  ;;  %v777_v20 = vpop.f32.mrf.mxu0  ;;  %v866_v63 = vpop.f32.mrf.mxu1 }
 0x122   :  { %11687 = vst [vmem:[#allocation147_spill] sm:$0xff] %v7637_v16  ;;  %v1210_v23 = vmul.f32 %v11689_v37, %v7620_v50  ;;  %v1234_v56 = vmul.f32 %v11690_v6, %v7623_v12  ;;  %v1033_v40 = vadd.f32 %v1025_v43, %v1009_v34  ;;  %v7653_v46 = vadd.f32 %v773_v0, %v7188_v59 }
 0x123   :  { %11688 = vst [vmem:[#allocation148_spill] sm:$0xff] %v7640_v60  ;;  %v7656_v61 = vadd.f32 %v862_v7, %v7188_v59  ;;  %v1027_v8 = vmul.f32 %v7027_v33, %v7637_v16  ;;  %v1217_v13 = vadd.f32 %v1209_v25, %v1193_v2  ;;  %v1051_v52 = vmul.f32 %v7053_v41, %v7640_v60  ;;  %v779_v25 = vpop.f32.mrf.mxu0  ;;  %v868_v0 = vpop.f32.mrf.mxu1 }
 0x124   :  { %11691 = vst [vmem:[#allocation149_spill] sm:$0xff] %v7653_v46  ;;  %v1211_v14 = vmul.f32 %v7033_v35, %v7637_v16  ;;  %v1235_v43 = vmul.f32 %v7056_v42, %v7640_v60  ;;  %v1034_v4 = vadd.f32 %v1026_v57, %v1010_v19  ;;  %v7667_v17 = vadd.f32 %v777_v20, %v7107_v1 }
 0x125   :  { %11692 = vst [vmem:[#allocation150_spill] sm:$0xff] %v7656_v61  ;;  %v7670_v59 = vadd.f32 %v866_v63, %v7107_v1  ;;  %v1028_v34 = vmul.f32 %v7024_v32, %v7653_v46  ;;  %v1218_v2 = vadd.f32 %v1210_v23, %v1194_v31  ;;  %v1052_v7 = vmul.f32 %v7044_v38, %v7656_v61 }
 0x126   :  { %11693 = vst [vmem:[#allocation151_spill] sm:$0xff] %v7667_v17  ;;  %v1212_v54 = vmul.f32 %v11689_v37, %v7653_v46  ;;  %v1236_v19 = vmul.f32 %v11690_v6, %v7656_v61  ;;  %v1035_v57 = vadd.f32 %v1027_v8, %v1011_v9  ;;  %v7681_v20 = vadd.f32 %v779_v25, %v7107_v1 }
 0x127   :  { %11694 = vst [vmem:[#allocation152_spill] sm:$0xff] %v7670_v59  ;;  %v7684_v63 = vadd.f32 %v868_v0, %v7107_v1  ;;  %v1029_v31 = vmul.f32 %v7027_v33, %v7667_v17  ;;  %v1219_v23 = vadd.f32 %v1211_v14, %v1195_v24  ;;  %v1053_v39 = vmul.f32 %v7053_v41, %v7670_v59 }
 0x128   :  { %11695 = vst [vmem:[#allocation153_spill] sm:$0xff] %v7681_v20  ;;  %v1213_v12 = vmul.f32 %v7033_v35, %v7667_v17  ;;  %v1036_v50 = vadd.f32 %v1028_v34, %v1012_v51  ;;  %v1220_v60 = vadd.f32 %v1212_v54, %v1196_v48  ;;  %v1030_v9 = vmul.f32 %v7024_v32, %v7681_v20 }
 0x129   :  { %11696 = vst [vmem:[#allocation154_spill] sm:$0xff] %v7684_v63  ;;  %v1054_v8 = vmul.f32 %v7044_v38, %v7684_v63  ;;  %v1214_v1 = vmul.f32 %v11689_v37, %v7681_v20  ;;  %v1237_v24 = vmul.f32 %v7056_v42, %v7670_v59  ;;  %v1238_v14 = vmul.f32 %v11690_v6, %v7684_v63  ;;  %v11697_v63 = vld [vmem:[#allocation108_spill] sm:$0xff] }
 0x12a   :  { %v1037_v25 = vadd.f32 %v1029_v31, %v7606_v30  ;;  %v1221_v51 = vadd.f32 %v1213_v12, %v7608_v18  ;;  %v1060_v54 = vadd.f32 %v1052_v7, %v1036_v50  ;;  %v1038_v48 = vadd.f32 %v1030_v9, %v7616_v53  ;;  %v11699_v50 = vld [vmem:[#allocation109_spill] sm:$0xff]  ;;  %v11703_v7 = vld [vmem:[#allocation50_spill] sm:$0xff]  ;;  %v11705_v31 = vld [vmem:[#allocation107_spill] sm:$0xff] }
 0x12b   :  { %v1222_v34 = vadd.f32 %v1214_v1, %v1198_v11  ;;  %v1244_v0 = vadd.f32 %v1236_v19, %v1220_v60  ;;  %v1059_v16 = vadd.f32 %v1051_v52, %v1035_v57  ;;  %v1243_v17 = vadd.f32 %v1235_v43, %v1219_v23  ;;  %v11698_v11 = vld [vmem:[#allocation116_spill] sm:$0xff]  ;;  %v11707_v9 = vld [vmem:[#allocation45_spill] sm:$0xff] }
 0x12c   :  { %v1061_v61 = vadd.f32 %v1053_v39, %v1037_v25  ;;  %v1245_v46 = vadd.f32 %v1237_v24, %v1221_v51  ;;  %v1058_v20 = vadd.f32 %v1050_v15, %v1034_v4  ;;  %v1062_v35 = vadd.f32 %v1054_v8, %v1038_v48  ;;  %v11700_v15 = vld [vmem:[#allocation110_spill] sm:$0xff]  ;;  %v11710_v25 = vld [vmem:[#allocation52_spill] sm:$0xff] }
 0x12d   :  { %v1246_v41 = vadd.f32 %v1238_v14, %v1222_v34  ;;  %v1242_v59 = vadd.f32 %v1234_v56, %v1218_v2  ;;  %v1057_v42 = vadd.f32 %v1049_v45, %v1033_v40  ;;  %v1241_v44 = vadd.f32 %v1233_v55, %v1217_v13  ;;  %v11701_v56 = vld [vmem:[#allocation104_spill] sm:$0xff]  ;;  %v11709_v14 = vld [vmem:[#allocation98_spill] sm:$0xff]  ;;  %v11711_v34 = vld [vmem:[#allocation99_spill] sm:$0xff] }
 0x12e   :  { %v960_v30 = vadd.f32 %v11697_v63, %v7379_v3  ;;  %v976_v18 = vmul.f32 %v6992_v21, %v7471_v58  ;;  %v1000_v53 = vmul.f32 %v7006_v26, %v7474_v49  ;;  %2408 = vmatprep.subr.mxu0 %v1062_v35  ;;  %v1024_v39 = vmul.f32 %v7024_v32, %v7597_v36  ;;  %v11702_v2 = vld [vmem:[#allocation140_spill] sm:$0xff]  ;;  %v11704_v63 = vld [vmem:[#allocation113_spill] sm:$0xff]  ;;  %v11737_v32 = vld [vmem:[#allocation71_spill] sm:$0xff] }
 0x12f   :  { %2497 = vmatprep.subr.mxu1 %v1246_v41  ;;  %v1144_v12 = vadd.f32 %v11699_v50, %v11698_v11  ;;  %v1160_v45 = vmul.f32 %v7009_v27, %v7471_v58  ;;  %2409 = vmatpush1.msra.mxu0 %v1061_v61  ;;  %v1048_v60 = vmul.f32 %v7044_v38, %v7600_v62  ;;  %v11715_v50 = vld [vmem:[#allocation51_spill] sm:$0xff]  ;;  %v11741_v26 = vld [vmem:[#allocation73_spill] sm:$0xff]  ;;  %v11743_v27 = vld [vmem:[#allocation66_spill] sm:$0xff] }
 0x130   :  { %2498 = vmatpush1.msra.mxu1 %v1245_v46  ;;  %v984_v3 = vadd.f32 %v976_v18, %v960_v30  ;;  %v1184_v55 = vmul.f32 %v7012_v28, %v7474_v49  ;;  %2410 = vmatprep.subr.mxu0 %v1060_v54  ;;  %v1208_v41 = vmul.f32 %v11689_v37, %v7597_v36  ;;  %v11713_v18 = vld [vmem:[#allocation121_spill] sm:$0xff] }
 0x131   :  { %2499 = vmatprep.subr.mxu1 %v1244_v0  ;;  %v1168_v35 = vadd.f32 %v1160_v45, %v1144_v12  ;;  %v959_v40 = vadd.f32 %v11701_v56, %v11700_v15  ;;  %2411 = vmatpush1.msra.mxu0 %v1059_v16  ;;  %v975_v46 = vmul.f32 %v6995_v22, %v7456_v10  ;;  %v11712_v0 = vld [vmem:[#allocation53_spill] sm:$0xff]  ;;  %v11716_v45 = vld [vmem:[#allocation75_spill] sm:$0xff]  ;;  %v11746_v22 = vld [vmem:[#allocation120_spill] sm:$0xff] }
 0x132   :  { %2500 = vmatpush1.msra.mxu1 %v1243_v17  ;;  %v1008_v61 = vadd.f32 %v1000_v53, %v984_v3  ;;  %v999_v13 = vmul.f32 %v7015_v29, %v7459_v5  ;;  %2412 = vmatprep.subr.mxu0 %v1058_v20  ;;  %v1232_v43 = vmul.f32 %v11690_v6, %v7600_v62  ;;  %v11714_v53 = vld [vmem:[#allocation59_spill] sm:$0xff]  ;;  %v11717_v3 = vld [vmem:[#allocation56_spill] sm:$0xff]  ;;  %v11766_v62 = vld [vmem:[#allocation117_spill] sm:$0xff] }
 0x133   :  { %2501 = vmatprep.subr.mxu1 %v1242_v59  ;;  %v1192_v52 = vadd.f32 %v1184_v55, %v1168_v35  ;;  %v1023_v4 = vmul.f32 %v7027_v33, %v7583_v47  ;;  %2413 = vmatpush1.msra.mxu0 %v1057_v42  ;;  %v983_v17 = vadd.f32 %v975_v46, %v959_v40  ;;  %v11706_v59 = vld [vmem:[#allocation38_spill] sm:$0xff]  ;;  %v11719_v55 = vld [vmem:[#allocation76_spill] sm:$0xff]  ;;  %v11720_v35 = vld [vmem:[#allocation57_spill] sm:$0xff] }
 0x134   :  { %2502 = vmatpush1.msra.mxu1 %v1241_v44  ;;  %v1032_v16 = vadd.f32 %v1024_v39, %v1008_v61  ;;  %v1047_v19 = vmul.f32 %v11703_v7, %v11702_v2  ;;  %v1143_v20 = vadd.f32 %v11705_v31, %v11704_v63  ;;  %v1159_v23 = vmul.f32 %v11706_v59, %v7456_v10  ;;  %v11708_v42 = vld [vmem:[#allocation46_spill] sm:$0xff]  ;;  %v11723_v61 = vld [vmem:[#allocation60_spill] sm:$0xff]  ;;  %v11728_v63 = vld [vmem:[#allocation55_spill] sm:$0xff] }
 0x135   :  { %v1216_v57 = vadd.f32 %v1208_v41, %v1192_v52  ;;  %v1183_v8 = vmul.f32 %v11707_v9, %v7459_v5  ;;  %v1007_v24 = vadd.f32 %v999_v13, %v983_v17  ;;  %v1207_v44 = vmul.f32 %v11708_v42, %v7583_v47  ;;  %v11722_v40 = vld [vmem:[#allocation122_spill] sm:$0xff]  ;;  %v11724_v13 = vld [vmem:[#allocation137_spill] sm:$0xff]  ;;  %v11725_v52 = vld [vmem:[#allocation63_spill] sm:$0xff] }
 0x136   :  { %v1056_v1 = vadd.f32 %v1048_v60, %v1032_v16  ;;  %v1262_v51 = vmul.f32 %v11710_v25, %v11709_v14  ;;  %v1167_v48 = vadd.f32 %v1159_v23, %v1143_v20  ;;  %v1278_v30 = vmul.f32 %v11712_v0, %v11711_v34  ;;  %v7766_v16 = vld [vmem:[%s10750_s4] sm:$0xff]  ;;  %v11727_v17 = vld [vmem:[#allocation54_spill] sm:$0xff]  ;;  %v11729_v20 = vld [vmem:[#allocation61_spill] sm:$0xff] }
 0x137   :  { %v1240_v54 = vadd.f32 %v1232_v43, %v1216_v57  ;;  %v1302_v39 = vmul.f32 %v11714_v53, %v11713_v18  ;;  %v1031_v11 = vadd.f32 %v1023_v4, %v1007_v24  ;;  %v1231_v12 = vmul.f32 %v11715_v50, %v11702_v2  ;;  %11726 = vst [vmem:[#allocation109_spill] sm:$0xff] %v7766_v16  ;;  %v11730_v24 = vld [vmem:[#allocation138_spill] sm:$0xff]  ;;  %v11735_v50 = vld [vmem:[#allocation68_spill] sm:$0xff]  ;;  %v11736_v7 = vld [vmem:[#allocation65_spill] sm:$0xff] }
 0x138   :  { %2414 = vmatprep.subr.mxu0 %v1056_v1  ;;  %v7753_v60 = vmul.f32 %v11717_v3, %v11716_v45  ;;  %v7757_v41 = vmul.f32 %v11720_v35, %v11719_v55  ;;  %v1191_v15 = vadd.f32 %v1183_v8, %v1167_v48  ;;  %v1286_v56 = vadd.f32 %v1278_v30, %v1262_v51  ;;  %v11731_v51 = vld [vmem:[#allocation64_spill] sm:$0xff]  ;;  %v11733_v48 = vld [vmem:[#allocation67_spill] sm:$0xff]  ;;  %v11755_v47 = vld [vmem:[#allocation70_spill] sm:$0xff] }
 0x139   :  { %2503 = vmatprep.subr.mxu1 %v1240_v54  ;;  %v1326_v46 = vmul.f32 %v11723_v61, %v11722_v40  ;;  %v1350_v43 = vmul.f32 %v11725_v52, %v11724_v13  ;;  %v1055_v4 = vadd.f32 %v1047_v19, %v1031_v11  ;;  %v1446_v57 = vmul.f32 %v11727_v17, %v11709_v14  ;;  %v11732_v19 = vld [vmem:[#allocation153_spill] sm:$0xff]  ;;  %v11734_v11 = vld [vmem:[#allocation154_spill] sm:$0xff]  ;;  %v11742_v29 = vld [vmem:[#allocation119_spill] sm:$0xff] }
 0x13a   :  { %11718 = vst [vmem:[#allocation108_spill] sm:$0xff] %v7753_v60  ;;  %11721 = vst [vmem:[#allocation116_spill] sm:$0xff] %v7757_v41  ;;  %v1462_v31 = vmul.f32 %v11728_v63, %v11711_v34  ;;  %v1486_v23 = vmul.f32 %v11729_v20, %v11713_v18  ;;  %v1215_v8 = vadd.f32 %v1207_v44, %v1191_v15  ;;  %v11753_v34 = vld [vmem:[#allocation136_spill] sm:$0xff]  ;;  %v11754_v14 = vld [vmem:[#allocation79_spill] sm:$0xff] }
 0x13b   :  { %v1310_v1 = vadd.f32 %v1302_v39, %v1286_v56  ;;  %v1374_v54 = vmul.f32 %v11731_v51, %v11730_v24  ;;  %v1398_v30 = vmul.f32 %v11733_v48, %v11732_v19  ;;  %2415 = vmatpush1.msra.mxu0 %v1055_v4  ;;  %v1422_v6 = vmul.f32 %v11735_v50, %v11734_v11  ;;  %v11738_v39 = vld [vmem:[#allocation96_spill] sm:$0xff]  ;;  %v11739_v56 = vld [vmem:[#allocation97_spill] sm:$0xff] }
 0x13c   :  { %v1470_v38 = vadd.f32 %v1462_v31, %v1446_v57  ;;  %v1510_v37 = vmul.f32 %v11736_v7, %v11722_v40  ;;  %v1534_v42 = vmul.f32 %v11737_v32, %v11724_v13  ;;  %v1239_v33 = vadd.f32 %v1231_v12, %v1215_v8  ;;  %6470 = vmatmul.mubr.msk.f32.vlgmr.msra.gmra.mxu0 %vm2371_vm1, %v7766_v16  ;;  %v11740_v57 = vld [vmem:[#allocation72_spill] sm:$0xff]  ;;  %v11747_v13 = vld [vmem:[#allocation69_spill] sm:$0xff]  ;;  %v11750_v40 = vld [vmem:[#allocation78_spill] sm:$0xff] }
 0x13d   :  { %v1334_v44 = vadd.f32 %v1326_v46, %v1310_v1  ;;  %v1261_v15 = vmul.f32 %v11717_v3, %v11738_v39  ;;  %v1277_v4 = vmul.f32 %v11720_v35, %v11739_v56  ;;  %v1558_v31 = vmul.f32 %v11740_v57, %v11730_v24  ;;  %v11745_v1 = vld [vmem:[#allocation77_spill] sm:$0xff]  ;;  %v11749_v24 = vld [vmem:[#allocation135_spill] sm:$0xff] }
 0x13e   :  { %v1494_v28 = vadd.f32 %v1486_v23, %v1470_v38  ;;  %v1582_v9 = vmul.f32 %v11741_v26, %v11732_v19  ;;  %v1301_v12 = vmul.f32 %v11743_v27, %v11742_v29  ;;  %v11744_v8 = vmov 0.0   ;;  %2504 = vmatpush1.msra.mxu1 %v1239_v33  ;;  %v7804_v23 = vld [vmem:[%s10750_s4 + $0x8] sm:$0xff] }
 0x13f   :  { %2454 = vmatprep.mubr.f32.mxu0 %v11744_v8  ;;  %v1358_v46 = vadd.f32 %v1350_v43, %v1334_v44  ;;  %v1606_v21 = vmul.f32 %v11745_v1, %v11734_v11  ;;  %v1285_v59 = vadd.f32 %v1277_v4, %v1261_v15  ;;  %v1325_v38 = vmul.f32 %v11747_v13, %v11746_v22  ;;  %v11751_v43 = vld [vmem:[#allocation58_spill] sm:$0xff] }
 0x140   :  { %11748 = vst [vmem:[#allocation110_spill] sm:$0xff] %v7804_v23  ;;  %6474 = vmatmul.mubr.msk.f32.vlgmr.msra.gmra.mxu1 %vm2371_vm1, %v7766_v16  ;;  %v1518_v19 = vadd.f32 %v1510_v37, %v1494_v28  ;;  %v1349_v33 = vmul.f32 %v11750_v40, %v11749_v24  ;;  %v1445_v44 = vmul.f32 %v11751_v43, %v11738_v39  ;;  %v11752_v15 = vld [vmem:[#allocation62_spill] sm:$0xff]  ;;  %v11756_v37 = vld [vmem:[#allocation151_spill] sm:$0xff]  ;;  %v11757_v16 = vld [vmem:[#allocation80_spill] sm:$0xff] }
 0x141   :  { %v1461_v4 = vmul.f32 %v11752_v15, %v11739_v56  ;;  %v1382_v11 = vadd.f32 %v1374_v54, %v1358_v46  ;;  %v1309_v18 = vadd.f32 %v1301_v12, %v1285_v59  ;;  %v1373_v2 = vmul.f32 %v11754_v14, %v11753_v34  ;;  %2543 = vmatprep.mubr.f32.mxu1 %v11744_v8  ;;  %v11758_v39 = vld [vmem:[#allocation74_spill] sm:$0xff]  ;;  %v11759_v12 = vld [vmem:[#allocation152_spill] sm:$0xff]  ;;  %v11760_v46 = vld [vmem:[#allocation81_spill] sm:$0xff] }
 0x142   :  { %v1485_v55 = vmul.f32 %v11755_v47, %v11742_v29  ;;  %v1542_v28 = vadd.f32 %v1534_v42, %v1518_v19  ;;  %v1397_v45 = vmul.f32 %v11757_v16, %v11756_v37  ;;  %v1509_v10 = vmul.f32 %v11758_v39, %v11746_v22  ;;  %6471 = vmatmul.mubr.msk.f32.gmra.mxu0 %vm2371_vm1, %v7804_v23  ;;  %v11761_v29 = vld [vmem:[#allocation82_spill] sm:$0xff]  ;;  %v7833_v42 = vld [vmem:[%s10750_s4 + $0x10] sm:$0xff] }
 0x143   :  { %v1469_v5 = vadd.f32 %v1461_v4, %v1445_v44  ;;  %v1406_v59 = vadd.f32 %v1398_v30, %v1382_v11  ;;  %v1333_v54 = vadd.f32 %v1325_v38, %v1309_v18  ;;  %v1421_v56 = vmul.f32 %v11760_v46, %v11759_v12  ;;  %2460 = vmatprep.mubr.f32.mxu0 %v11744_v8  ;;  %v11763_v4 = vld [vmem:[#allocation94_spill] sm:$0xff]  ;;  %v11764_v30 = vld [vmem:[#allocation95_spill] sm:$0xff] }
 0x144   :  { %v1533_v41 = vmul.f32 %v11761_v29, %v11749_v24  ;;  %11762 = vst [vmem:[#allocation104_spill] sm:$0xff] %v7833_v42  ;;  %v1566_v19 = vadd.f32 %v1558_v31, %v1542_v28  ;;  %v1260_v22 = vmul.f32 %v11710_v25, %v11763_v4  ;;  %v1276_v18 = vmul.f32 %v11712_v0, %v11764_v30  ;;  %v11765_v24 = vld [vmem:[#allocation85_spill] sm:$0xff]  ;;  %v11767_v31 = vld [vmem:[#allocation86_spill] sm:$0xff] }
 0x145   :  { %v1493_v44 = vadd.f32 %v1485_v55, %v1469_v5  ;;  %6475 = vmatmul.mubr.msk.f32.gmra.mxu1 %vm2371_vm1, %v7804_v23  ;;  %v1430_v11 = vadd.f32 %v1422_v6, %v1406_v59  ;;  %v1357_v38 = vadd.f32 %v1349_v33, %v1333_v54  ;;  %v1557_v60 = vmul.f32 %v11765_v24, %v11753_v34  ;;  %v11768_v33 = vld [vmem:[#allocation89_spill] sm:$0xff]  ;;  %v11769_v54 = vld [vmem:[#allocation118_spill] sm:$0xff] }
 0x146   :  { %v1300_v36 = vmul.f32 %v11714_v53, %v11766_v62  ;;  %2549 = vmatprep.mubr.f32.mxu1 %v11744_v8  ;;  %v1590_v5 = vadd.f32 %v1582_v9, %v1566_v19  ;;  %v1581_v28 = vmul.f32 %v11767_v31, %v11756_v37  ;;  %v1284_v49 = vadd.f32 %v1276_v18, %v1260_v22  ;;  %v11770_v23 = vld [vmem:[#allocation133_spill] sm:$0xff] }
 0x147   :  { %v1517_v55 = vadd.f32 %v1509_v10, %v1493_v44  ;;  %6472 = vmatmul.mubr.msk.f32.gmra.mxu0 %vm2371_vm1, %v7833_v42  ;;  %2586 = vmatprep.subr.mxu0 %v1430_v11  ;;  %v1381_v6 = vadd.f32 %v1373_v2, %v1357_v38  ;;  %v1605_v59 = vmul.f32 %v11768_v33, %v11759_v12  ;;  %v11771_v2 = vld [vmem:[#allocation134_spill] sm:$0xff] }
 0x148   :  { %v1324_v34 = vmul.f32 %v11723_v61, %v11769_v54  ;;  %v1348_v58 = vmul.f32 %v11725_v52, %v11770_v23  ;;  %v1614_v9 = vadd.f32 %v1606_v21, %v1590_v5  ;;  %v1308_v19 = vadd.f32 %v1300_v36, %v1284_v49  ;;  %2466 = vmatprep.mubr.f32.mxu0 %v11744_v8  ;;  %v7870_v21 = vld [vmem:[%s10750_s4 + $0x18] sm:$0xff] }
 0x149   :  { %v1541_v10 = vadd.f32 %v1533_v41, %v1517_v55  ;;  %v1444_v22 = vmul.f32 %v11727_v17, %v11763_v4  ;;  %6476 = vmatmul.mubr.msk.f32.gmra.mxu1 %vm2371_vm1, %v7833_v42  ;;  %v1405_v44 = vadd.f32 %v1397_v45, %v1381_v6  ;;  %v1372_v18 = vmul.f32 %v11731_v51, %v11771_v2  ;;  %v11773_v45 = vld [vmem:[#allocation149_spill] sm:$0xff]  ;;  %v11774_v5 = vld [vmem:[#allocation150_spill] sm:$0xff] }
 0x14a   :  { %v1460_v11 = vmul.f32 %v11728_v63, %v11764_v30  ;;  %v1484_v38 = vmul.f32 %v11729_v20, %v11766_v62  ;;  %11772 = vst [vmem:[#allocation113_spill] sm:$0xff] %v7870_v21  ;;  %2675 = vmatprep.subr.mxu1 %v1614_v9  ;;  %v1332_v36 = vadd.f32 %v1324_v34, %v1308_v19 }
 0x14b   :  { %v1565_v49 = vadd.f32 %v1557_v60, %v1541_v10  ;;  %v1396_v41 = vmul.f32 %v11733_v48, %v11773_v45  ;;  %v1420_v55 = vmul.f32 %v11735_v50, %v11774_v5  ;;  %v1429_v6 = vadd.f32 %v1421_v56, %v1405_v44  ;;  %2555 = vmatprep.mubr.f32.mxu1 %v11744_v8  ;;  %v11775_v60 = vld [vmem:[#allocation92_spill] sm:$0xff]  ;;  %v11776_v10 = vld [vmem:[#allocation93_spill] sm:$0xff] }
 0x14c   :  { %v1468_v12 = vadd.f32 %v1460_v11, %v1444_v22  ;;  %v1508_v62 = vmul.f32 %v11736_v7, %v11769_v54  ;;  %v1532_v30 = vmul.f32 %v11737_v32, %v11770_v23  ;;  %v1356_v9 = vadd.f32 %v1348_v58, %v1332_v36  ;;  %6473 = vmatmul.mubr.msk.f32.gmra.mxu0 %vm2371_vm1, %v7870_v21  ;;  %v11777_v11 = vld [vmem:[#allocation114_spill] sm:$0xff]  ;;  %v11778_v23 = vld [vmem:[#allocation115_spill] sm:$0xff] }
 0x14d   :  { %v1589_v4 = vadd.f32 %v1581_v28, %v1565_v49  ;;  %v1259_v34 = vmul.f32 %v11717_v3, %v11775_v60  ;;  %v1275_v19 = vmul.f32 %v11720_v35, %v11776_v10  ;;  %2587 = vmatpush1.msra.mxu0 %v1429_v6  ;;  %v1556_v22 = vmul.f32 %v11740_v57, %v11771_v2 }
 0x14e   :  { %v1492_v56 = vadd.f32 %v1484_v38, %v1468_v12  ;;  %v1580_v44 = vmul.f32 %v11741_v26, %v11773_v45  ;;  %v1299_v58 = vmul.f32 %v11743_v27, %v11777_v11  ;;  %v1380_v49 = vadd.f32 %v1372_v18, %v1356_v9  ;;  %6477 = vmatmul.mubr.msk.f32.gmra.mxu1 %vm2371_vm1, %v7870_v21  ;;  %v11779_v38 = vld [vmem:[#allocation131_spill] sm:$0xff]  ;;  %v11782_v21 = vld [vmem:[#allocation148_spill] sm:$0xff] }
 0x14f   :  { %v1613_v28 = vadd.f32 %v1605_v59, %v1589_v4  ;;  %v1283_v36 = vadd.f32 %v1275_v19, %v1259_v34  ;;  %v1323_v54 = vmul.f32 %v11747_v13, %v11778_v23  ;;  %v1604_v12 = vmul.f32 %v11745_v1, %v11774_v5  ;;  %2626 = vmatprep.mubr.f32.mxu0 %v11744_v8  ;;  %v11780_v34 = vld [vmem:[#allocation132_spill] sm:$0xff] }
 0x150   :  { %v1516_v6 = vadd.f32 %v1508_v62, %v1492_v56  ;;  %v1347_v2 = vmul.f32 %v11750_v40, %v11779_v38  ;;  %v1443_v45 = vmul.f32 %v11751_v43, %v11775_v60  ;;  %v1404_v4 = vadd.f32 %v1396_v41, %v1380_v49  ;;  %v11781_v56 = vld [vmem:[#allocation147_spill] sm:$0xff]  ;;  %2715 = vmatprep.mubr.f32.mxu1 %v11744_v8 }
 0x151   :  { %2676 = vmatpush1.msra.mxu1 %v1613_v28  ;;  %v1307_v59 = vadd.f32 %v1299_v58, %v1283_v36  ;;  %v1459_v18 = vmul.f32 %v11752_v15, %v11776_v10  ;;  %v1483_v62 = vmul.f32 %v11755_v47, %v11777_v11  ;;  %v1371_v19 = vmul.f32 %v11754_v14, %v11780_v34  ;;  %v11784_v10 = vld [vmem:[#allocation91_spill] sm:$0xff] }
 0x152   :  { %v1540_v9 = vadd.f32 %v1532_v30, %v1516_v6  ;;  %v1395_v5 = vmul.f32 %v11757_v16, %v11781_v56  ;;  %v1419_v60 = vmul.f32 %v11760_v46, %v11782_v21  ;;  %v1428_v41 = vadd.f32 %v1420_v55, %v1404_v4  ;;  %v11783_v6 = vld [vmem:[#allocation90_spill] sm:$0xff] }
 0x153   :  { %v1331_v58 = vadd.f32 %v1323_v54, %v1307_v59  ;;  %v1467_v28 = vadd.f32 %v1459_v18, %v1443_v45  ;;  %v1507_v49 = vmul.f32 %v11758_v39, %v11778_v23  ;;  %v1531_v30 = vmul.f32 %v11761_v29, %v11779_v38  ;;  %v11785_v45 = vld [vmem:[#allocation111_spill] sm:$0xff]  ;;  %v11786_v23 = vld [vmem:[#allocation112_spill] sm:$0xff] }
 0x154   :  { %v1564_v36 = vadd.f32 %v1556_v22, %v1540_v9  ;;  %v1258_v11 = vmul.f32 %v11710_v25, %v11783_v6  ;;  %v1274_v37 = vmul.f32 %v11712_v0, %v11784_v10  ;;  %2588 = vmatprep.subr.mxu0 %v1428_v41  ;;  %v1555_v54 = vmul.f32 %v11765_v24, %v11780_v34 }
 0x155   :  { %v1355_v42 = vadd.f32 %v1347_v2, %v1331_v58  ;;  %v1491_v46 = vadd.f32 %v1483_v62, %v1467_v28  ;;  %v1298_v55 = vmul.f32 %v11714_v53, %v11785_v45  ;;  %v1579_v22 = vmul.f32 %v11767_v31, %v11781_v56  ;;  %v11787_v62 = vld [vmem:[#allocation129_spill] sm:$0xff] }
 0x156   :  { %v1588_v4 = vadd.f32 %v1580_v44, %v1564_v36  ;;  %v1603_v59 = vmul.f32 %v11768_v33, %v11782_v21  ;;  %v1282_v18 = vadd.f32 %v1274_v37, %v1258_v11  ;;  %v1322_v2 = vmul.f32 %v11723_v61, %v11786_v23  ;;  %v11788_v21 = vld [vmem:[#allocation130_spill] sm:$0xff]  ;;  %v11789_v11 = vld [vmem:[#allocation145_spill] sm:$0xff] }
 0x157   :  { %v1379_v9 = vadd.f32 %v1371_v19, %v1355_v42  ;;  %v1515_v38 = vadd.f32 %v1507_v49, %v1491_v46  ;;  %v1346_v41 = vmul.f32 %v11725_v52, %v11787_v62  ;;  %v1442_v44 = vmul.f32 %v11727_v17, %v11783_v6  ;;  %v11790_v19 = vld [vmem:[#allocation146_spill] sm:$0xff] }
 0x158   :  { %v1612_v58 = vadd.f32 %v1604_v12, %v1588_v4  ;;  %v1306_v28 = vadd.f32 %v1298_v55, %v1282_v18  ;;  %v1458_v36 = vmul.f32 %v11728_v63, %v11784_v10  ;;  %v1370_v37 = vmul.f32 %v11731_v51, %v11788_v21 }
 0x159   :  { %v1403_v56 = vadd.f32 %v1395_v5, %v1379_v9  ;;  %v1539_v34 = vadd.f32 %v1531_v30, %v1515_v38  ;;  %v1482_v46 = vmul.f32 %v11729_v20, %v11785_v45  ;;  %v1394_v12 = vmul.f32 %v11733_v48, %v11789_v11  ;;  %v11791_v45 = vld [vmem:[#allocation87_spill] sm:$0xff] }
 0x15a   :  { %2677 = vmatprep.subr.mxu1 %v1612_v58  ;;  %v1330_v42 = vadd.f32 %v1322_v2, %v1306_v28  ;;  %v1418_v49 = vmul.f32 %v11735_v50, %v11790_v19  ;;  %v1466_v55 = vadd.f32 %v1458_v36, %v1442_v44  ;;  %v1506_v5 = vmul.f32 %v11736_v7, %v11786_v23  ;;  %v11792_v58 = vld [vmem:[#allocation88_spill] sm:$0xff] }
 0x15b   :  { %v1427_v4 = vadd.f32 %v1419_v60, %v1403_v56  ;;  %v1563_v18 = vadd.f32 %v1555_v54, %v1539_v34  ;;  %v1530_v38 = vmul.f32 %v11737_v32, %v11787_v62  ;;  %v1257_v2 = vmul.f32 %v11717_v3, %v11791_v45  ;;  %v11793_v56 = vld [vmem:[#allocation105_spill] sm:$0xff] }
 0x15c   :  { %v1354_v30 = vadd.f32 %v1346_v41, %v1330_v42  ;;  %v1490_v9 = vadd.f32 %v1482_v46, %v1466_v55  ;;  %v1273_v28 = vmul.f32 %v11720_v35, %v11792_v58  ;;  %v1554_v60 = vmul.f32 %v11740_v57, %v11788_v21  ;;  %v11794_v46 = vld [vmem:[#allocation106_spill] sm:$0xff] }
 0x15d   :  { %2589 = vmatpush1.msra.mxu0 %v1427_v4  ;;  %v1587_v10 = vadd.f32 %v1579_v22, %v1563_v18  ;;  %v1578_v34 = vmul.f32 %v11741_v26, %v11789_v11  ;;  %v1297_v54 = vmul.f32 %v11743_v27, %v11793_v56  ;;  %v1321_v42 = vmul.f32 %v11747_v13, %v11794_v46  ;;  %v11795_v22 = vld [vmem:[#allocation127_spill] sm:$0xff] }
 0x15e   :  { %v1378_v44 = vadd.f32 %v1370_v37, %v1354_v30  ;;  %v1514_v41 = vadd.f32 %v1506_v5, %v1490_v9  ;;  %v1281_v36 = vadd.f32 %v1273_v28, %v1257_v2  ;;  %v1602_v4 = vmul.f32 %v11745_v1, %v11790_v19  ;;  %v11796_v5 = vld [vmem:[#allocation128_spill] sm:$0xff]  ;;  %v11800_v19 = vld [vmem:[#allocation83_spill] sm:$0xff] }
 0x15f   :  { %v1611_v55 = vadd.f32 %v1603_v59, %v1587_v10  ;;  %v1345_v18 = vmul.f32 %v11750_v40, %v11795_v22  ;;  %v1441_v35 = vmul.f32 %v11751_v43, %v11791_v45  ;;  %v1457_v37 = vmul.f32 %v11752_v15, %v11792_v58  ;;  %v11797_v10 = vld [vmem:[#allocation143_spill] sm:$0xff]  ;;  %v11801_v45 = vld [vmem:[#allocation84_spill] sm:$0xff] }
 0x160   :  { %v1402_v3 = vadd.f32 %v1394_v12, %v1378_v44  ;;  %v1538_v11 = vadd.f32 %v1530_v38, %v1514_v41  ;;  %v1305_v21 = vadd.f32 %v1297_v54, %v1281_v36  ;;  %v1369_v30 = vmul.f32 %v11754_v14, %v11796_v5  ;;  %v11798_v44 = vld [vmem:[#allocation144_spill] sm:$0xff]  ;;  %v11799_v41 = vld [vmem:[#allocation81_spill] sm:$0xff] }
 0x161   :  { %2678 = vmatpush1.msra.mxu1 %v1611_v55  ;;  %v1393_v59 = vmul.f32 %v11757_v16, %v11797_v10  ;;  %v1481_v9 = vmul.f32 %v11755_v47, %v11793_v56  ;;  %v1505_v2 = vmul.f32 %v11758_v39, %v11794_v46  ;;  %v1465_v54 = vadd.f32 %v1457_v37, %v1441_v35 }
 0x162   :  { %v1426_v28 = vadd.f32 %v1418_v49, %v1402_v3  ;;  %v1562_v12 = vadd.f32 %v1554_v60, %v1538_v11  ;;  %v1329_v38 = vadd.f32 %v1321_v42, %v1305_v21  ;;  %v1417_v36 = vmul.f32 %v11799_v41, %v11798_v44  ;;  %v11802_v3 = vld [vmem:[#allocation102_spill] sm:$0xff] }
 0x163   :  { %v1529_v55 = vmul.f32 %v11761_v29, %v11795_v22  ;;  %v1256_v58 = vmul.f32 %v11710_v25, %v11800_v19  ;;  %v1272_v62 = vmul.f32 %v11712_v0, %v11801_v45  ;;  %v1489_v46 = vadd.f32 %v1481_v9, %v1465_v54  ;;  %v11804_v9 = vld [vmem:[#allocation125_spill] sm:$0xff] }
 0x164   :  { %2590 = vmatprep.subr.mxu0 %v1426_v28  ;;  %v1586_v56 = vadd.f32 %v1578_v34, %v1562_v12  ;;  %v1353_v23 = vadd.f32 %v1345_v18, %v1329_v38  ;;  %v1296_v21 = vmul.f32 %v11714_v53, %v11802_v3  ;;  %v1553_v35 = vmul.f32 %v11765_v24, %v11796_v5  ;;  %v11803_v28 = vld [vmem:[#allocation103_spill] sm:$0xff] }
 0x165   :  { %v1577_v11 = vmul.f32 %v11767_v31, %v11797_v10  ;;  %v1601_v49 = vmul.f32 %v11768_v33, %v11798_v44  ;;  %v1280_v60 = vadd.f32 %v1272_v62, %v1256_v58  ;;  %v1513_v0 = vadd.f32 %v1505_v2, %v1489_v46  ;;  %v11805_v62 = vld [vmem:[#allocation126_spill] sm:$0xff]  ;;  %v11806_v46 = vld [vmem:[#allocation141_spill] sm:$0xff] }
 0x166   :  { %v1610_v42 = vadd.f32 %v1602_v4, %v1586_v56  ;;  %v1377_v37 = vadd.f32 %v1369_v30, %v1353_v23  ;;  %v1320_v34 = vmul.f32 %v11723_v61, %v11803_v28  ;;  %v1344_v12 = vmul.f32 %v11725_v52, %v11804_v9  ;;  %v11807_v30 = vld [vmem:[#allocation142_spill] sm:$0xff] }
 0x167   :  { %v1304_v18 = vadd.f32 %v1296_v21, %v1280_v60  ;;  %v1440_v38 = vmul.f32 %v11727_v17, %v11800_v19  ;;  %v1456_v54 = vmul.f32 %v11728_v63, %v11801_v45  ;;  %v1537_v25 = vadd.f32 %v1529_v55, %v1513_v0  ;;  %v11888_v10 = vld [vmem:[#allocation114_spill] sm:$0xff] }
 0x168   :  { %2679 = vmatprep.subr.mxu1 %v1610_v42  ;;  %v1401_v53 = vadd.f32 %v1393_v59, %v1377_v37  ;;  %v1368_v23 = vmul.f32 %v11731_v51, %v11805_v62  ;;  %v1480_v58 = vmul.f32 %v11729_v20, %v11802_v3  ;;  %v1392_v4 = vmul.f32 %v11733_v48, %v11806_v46  ;;  %v11808_v37 = vld [vmem:[#allocation108_spill] sm:$0xff] }
 0x169   :  { %v1328_v56 = vadd.f32 %v1320_v34, %v1304_v18  ;;  %v1416_v2 = vmul.f32 %v11735_v50, %v11807_v30  ;;  %v1464_v21 = vadd.f32 %v1456_v54, %v1440_v38  ;;  %v1561_v52 = vadd.f32 %v1553_v35, %v1537_v25  ;;  %v11809_v51 = vld [vmem:[#allocation116_spill] sm:$0xff] }
 0x16a   :  { %v1425_v60 = vadd.f32 %v1417_v36, %v1401_v53  ;;  %v1504_v59 = vmul.f32 %v11736_v7, %v11803_v28  ;;  %v1528_v0 = vmul.f32 %v11737_v32, %v11804_v9  ;;  %v1279_v34 = vadd.f32 %v11809_v51, %v11808_v37  ;;  %v11810_v18 = vld [vmem:[#allocation100_spill] sm:$0xff]  ;;  %v11811_v36 = vld [vmem:[#allocation101_spill] sm:$0xff] }
 0x16b   :  { %v1352_v55 = vadd.f32 %v1344_v12, %v1328_v56  ;;  %v1488_v42 = vadd.f32 %v1480_v58, %v1464_v21  ;;  %v1295_v48 = vmul.f32 %v11743_v27, %v11810_v18  ;;  %v1585_v61 = vadd.f32 %v1577_v11, %v1561_v52  ;;  %v11812_v58 = vld [vmem:[#allocation123_spill] sm:$0xff]  ;;  %v11813_v21 = vld [vmem:[#allocation124_spill] sm:$0xff] }
 0x16c   :  { %2591 = vmatpush1.msra.mxu0 %v1425_v60  ;;  %v1552_v53 = vmul.f32 %v11740_v57, %v11805_v62  ;;  %v1576_v25 = vmul.f32 %v11741_v26, %v11806_v46  ;;  %v1319_v35 = vmul.f32 %v11747_v13, %v11811_v36  ;;  %v1343_v51 = vmul.f32 %v11750_v40, %v11812_v58  ;;  %v11814_v52 = vld [vmem:[#allocation75_spill] sm:$0xff]  ;;  %v11815_v37 = vld [vmem:[#allocation76_spill] sm:$0xff]  ;;  %v11829_v40 = vld [vmem:[#allocation21_spill] sm:$0xff] }
 0x16d   :  { %v1376_v38 = vadd.f32 %v1368_v23, %v1352_v55  ;;  %v1512_v12 = vadd.f32 %v1504_v59, %v1488_v42  ;;  %v1303_v54 = vadd.f32 %v1295_v48, %v1279_v34  ;;  %v1609_v56 = vadd.f32 %v1601_v49, %v1585_v61  ;;  %v111_v48 = vld [vmem:[%s10747_s1 + $0x48] sm:$0xff] }
 0x16e   :  { %v1367_v60 = vmul.f32 %v11754_v14, %v11813_v21  ;;  %v1439_v11 = vmul.f32 %v11751_v43, %v11814_v52  ;;  %v1455_v50 = vmul.f32 %v11752_v15, %v11815_v37  ;;  %v1479_v23 = vmul.f32 %v11755_v47, %v11810_v18  ;;  %v11842_v15 = vld [vmem:[#allocation109_spill] sm:$0xff]  ;;  %v11843_v43 = vld [vmem:[#allocation138_spill] sm:$0xff]  ;;  %v11860_v52 = vld [vmem:[#allocation120_spill] sm:$0xff] }
 0x16f   :  { %v1400_v26 = vadd.f32 %v1392_v4, %v1376_v38  ;;  %v1536_v57 = vadd.f32 %v1528_v0, %v1512_v12  ;;  %v1327_v32 = vadd.f32 %v1319_v35, %v1303_v54  ;;  %2680 = vmatpush1.msra.mxu1 %v1609_v56  ;;  %v1600_v61 = vmul.f32 %v11745_v1, %v11807_v30  ;;  %v11816_v0 = vld [vmem:[#allocation139_spill] sm:$0xff]  ;;  %v11817_v12 = vld [vmem:[#allocation12_spill] sm:$0xff]  ;;  %v11819_v56 = vld [vmem:[#allocation13_spill] sm:$0xff] }
 0x170   :  { %v1463_v49 = vadd.f32 %v1455_v50, %v1439_v11  ;;  %v1503_v59 = vmul.f32 %v11758_v39, %v11811_v36  ;;  %v1391_v34 = vmul.f32 %v11757_v16, %v11816_v0  ;;  %v1527_v38 = vmul.f32 %v11761_v29, %v11812_v58  ;;  %v11821_v1 = vld [vmem:[#allocation140_spill] sm:$0xff] }
 0x171   :  { %v1424_v55 = vadd.f32 %v1416_v2, %v1400_v26  ;;  %v1560_v42 = vadd.f32 %v1552_v53, %v1536_v57  ;;  %v1351_v4 = vadd.f32 %v1343_v51, %v1327_v32  ;;  %v8047_v54 = vrot.slane %v111_v48, %v11817_v12  ;;  %v11822_v32 = vld [vmem:[#allocation14_spill] sm:$0xff] }
 0x172   :  { %v1487_v35 = vadd.f32 %v1479_v23, %v1463_v49  ;;  %v8050_v14 = vrot.slane %v111_v48, %v11819_v56  ;;  %v1415_v26 = vmul.f32 %v11799_v41, %v11821_v1  ;;  %v8055_v57 = vrot.slane %v111_v48, %v11822_v32  ;;  %v11824_v51 = vld [vmem:[#allocation98_spill] sm:$0xff]  ;;  %v11825_v49 = vld [vmem:[#allocation99_spill] sm:$0xff] }
 0x173   :  { %11818 = vst [vmem:[#allocation107_spill] sm:$0xff] %v8047_v54  ;;  %2592 = vmatprep.subr.mxu0 %v1424_v55  ;;  %v1584_v50 = vadd.f32 %v1576_v25, %v1560_v42  ;;  %v1375_v11 = vadd.f32 %v1367_v60, %v1351_v4  ;;  %v1551_v53 = vmul.f32 %v11765_v24, %v11813_v21  ;;  %v113_v25 = vld [vmem:[%s10747_s1 + $0x58] sm:$0xff]  ;;  %v11826_v42 = vld [vmem:[#allocation121_spill] sm:$0xff]  ;;  %v11827_v41 = vld [vmem:[#allocation15_spill] sm:$0xff] }
 0x174   :  { %11820 = vst [vmem:[#allocation108_spill] sm:$0xff] %v8050_v14  ;;  %11823 = vst [vmem:[#allocation116_spill] sm:$0xff] %v8055_v57  ;;  %v1511_v2 = vadd.f32 %v1503_v59, %v1487_v35  ;;  %v1630_v23 = vmul.f32 %v8047_v54, %v11824_v51  ;;  %v1646_v16 = vmul.f32 %v8050_v14, %v11825_v49 }
 0x175   :  { %v1608_v60 = vadd.f32 %v1600_v61, %v1584_v50  ;;  %v1399_v55 = vadd.f32 %v1391_v34, %v1375_v11  ;;  %v1670_v4 = vmul.f32 %v8055_v57, %v11826_v42  ;;  %v8069_v59 = vrot.slane %v111_v48, %v11827_v41  ;;  %v11831_v34 = vld [vmem:[#allocation122_spill] sm:$0xff] }
 0x176   :  { %v1535_v35 = vadd.f32 %v1527_v38, %v1511_v2  ;;  %v1575_v24 = vmul.f32 %v11767_v31, %v11816_v0  ;;  %v1654_v29 = vadd.f32 %v1646_v16, %v1630_v23  ;;  %v8074_v39 = vrot.slane %v111_v48, %v11829_v40  ;;  %v11833_v2 = vld [vmem:[#allocation137_spill] sm:$0xff]  ;;  %v11835_v23 = vld [vmem:[#allocation23_spill] sm:$0xff] }
 0x177   :  { %11828 = vst [vmem:[#allocation155_spill] sm:$0xff] %v8069_v59  ;;  %2681 = vmatprep.subr.mxu1 %v1608_v60  ;;  %v1423_v13 = vadd.f32 %v1415_v26, %v1399_v55  ;;  %v1599_v61 = vmul.f32 %v11768_v33, %v11821_v1  ;;  %v1694_v50 = vmul.f32 %v8069_v59, %v11831_v34  ;;  %v11837_v60 = vld [vmem:[#allocation29_spill] sm:$0xff] }
 0x178   :  { %11830 = vst [vmem:[#allocation156_spill] sm:$0xff] %v8074_v39  ;;  %v8081_v11 = vrot.slane %v113_v25, %v11817_v12  ;;  %v1559_v47 = vadd.f32 %v1551_v53, %v1535_v35  ;;  %v1678_v38 = vadd.f32 %v1670_v4, %v1654_v29  ;;  %v1718_v31 = vmul.f32 %v8074_v39, %v11833_v2  ;;  %v11840_v4 = vld [vmem:[#allocation31_spill] sm:$0xff] }
 0x179   :  { %v8086_v16 = vrot.slane %v113_v25, %v11819_v56  ;;  %2593 = vmatpush1.msra.mxu0 %v1423_v13  ;;  %v8089_v26 = vrot.slane %v111_v48, %v11835_v23  ;;  %v8092_v55 = vrot.slane %v111_v48, %v11837_v60  ;;  %v8097_v7 = vrot.slane %v113_v25, %v11822_v32 }
 0x17a   :  { %11832 = vst [vmem:[#allocation157_spill] sm:$0xff] %v8081_v11  ;;  %v1814_v33 = vmul.f32 %v8081_v11, %v11824_v51  ;;  %v1583_v29 = vadd.f32 %v1575_v24, %v1559_v47  ;;  %v1702_v53 = vadd.f32 %v1694_v50, %v1678_v38  ;;  %v8100_v35 = vrot.slane %v111_v48, %v11840_v4  ;;  %v110_v24 = vld [vmem:[%s10747_s1 + $0x40] sm:$0xff]  ;;  %v11846_v38 = vld [vmem:[#allocation153_spill] sm:$0xff]  ;;  %v11847_v51 = vld [vmem:[#allocation154_spill] sm:$0xff] }
 0x17b   :  { %11834 = vst [vmem:[#allocation158_spill] sm:$0xff] %v8086_v16  ;;  %11836 = vst [vmem:[#allocation159_spill] sm:$0xff] %v8089_v26  ;;  %v1830_v13 = vmul.f32 %v8086_v16, %v11825_v49  ;;  %6478 = vmatmul.mubr.msk.f32.vlgmr.msra.gmra.mxu0 %vm2371_vm1, %v11842_v15  ;;  %v1742_v27 = vmul.f32 %v8089_v26, %v11843_v43  ;;  %v1854_v20 = vmul.f32 %v8097_v7, %v11826_v42 }
 0x17c   :  { %11838 = vst [vmem:[#allocation160_spill] sm:$0xff] %v8092_v55  ;;  %11839 = vst [vmem:[#allocation161_spill] sm:$0xff] %v8097_v7  ;;  %v8111_v63 = vrot.slane %v113_v25, %v11827_v41  ;;  %v8114_v47 = vrot.slane %v113_v25, %v11829_v40  ;;  %2632 = vmatprep.mubr.f32.mxu0 %v11744_v8  ;;  %v1607_v48 = vadd.f32 %v1599_v61, %v1583_v29 }
 0x17d   :  { %11841 = vst [vmem:[#allocation162_spill] sm:$0xff] %v8100_v35  ;;  %v1726_v50 = vadd.f32 %v1718_v31, %v1702_v53  ;;  %v1766_v17 = vmul.f32 %v8092_v55, %v11846_v38  ;;  %v1838_v49 = vadd.f32 %v1830_v13, %v1814_v33  ;;  %v1790_v42 = vmul.f32 %v8100_v35, %v11847_v51 }
 0x17e   :  { %11844 = vst [vmem:[#allocation109_spill] sm:$0xff] %v8111_v63  ;;  %11845 = vst [vmem:[#allocation163_spill] sm:$0xff] %v8114_v47  ;;  %v1878_v1 = vmul.f32 %v8111_v63, %v11831_v34  ;;  %v1902_v0 = vmul.f32 %v8114_v47, %v11833_v2  ;;  %v8129_v21 = vrot.slane %v113_v25, %v11835_v23  ;;  %2682 = vmatpush1.msra.mxu1 %v1607_v48  ;;  %v11854_v48 = vld [vmem:[#allocation96_spill] sm:$0xff]  ;;  %v11855_v2 = vld [vmem:[#allocation97_spill] sm:$0xff] }
 0x17f   :  { %v1750_v58 = vadd.f32 %v1742_v27, %v1726_v50  ;;  %v1862_v61 = vadd.f32 %v1854_v20, %v1838_v49  ;;  %v8132_v31 = vrot.slane %v110_v24, %v11817_v12  ;;  %v8135_v33 = vrot.slane %v110_v24, %v11819_v56  ;;  %6482 = vmatmul.mubr.msk.f32.vlgmr.msra.gmra.mxu1 %vm2371_vm1, %v11842_v15  ;;  %v112_v34 = vld [vmem:[%s10747_s1 + $0x50] sm:$0xff] }
 0x180   :  { %11848 = vst [vmem:[#allocation164_spill] sm:$0xff] %v8129_v21  ;;  %v1926_v29 = vmul.f32 %v8129_v21, %v11843_v43  ;;  %v8140_v53 = vrot.slane %v113_v25, %v11837_v60  ;;  %v8145_v13 = vrot.slane %v110_v24, %v11822_v32  ;;  %v8148_v27 = vrot.slane %v110_v24, %v11827_v41 }
 0x181   :  { %11849 = vst [vmem:[#allocation165_spill] sm:$0xff] %v8132_v31  ;;  %11850 = vst [vmem:[#allocation166_spill] sm:$0xff] %v8135_v33  ;;  %v1774_v20 = vadd.f32 %v1766_v17, %v1750_v58  ;;  %v1886_v49 = vadd.f32 %v1878_v1, %v1862_v61  ;;  %v1629_v50 = vmul.f32 %v8132_v31, %v11854_v48  ;;  %2721 = vmatprep.mubr.f32.mxu1 %v11744_v8  ;;  %v11857_v17 = vld [vmem:[#allocation119_spill] sm:$0xff]  ;;  %v11859_v61 = vld [vmem:[#allocation110_spill] sm:$0xff] }
 0x182   :  { %11851 = vst [vmem:[#allocation167_spill] sm:$0xff] %v8140_v53  ;;  %11852 = vst [vmem:[#allocation168_spill] sm:$0xff] %v8145_v13  ;;  %v1645_v43 = vmul.f32 %v8135_v33, %v11855_v2  ;;  %v1950_v15 = vmul.f32 %v8140_v53, %v11846_v38  ;;  %v8161_v36 = vrot.slane %v113_v25, %v11840_v4  ;;  %6479 = vmatmul.mubr.msk.f32.gmra.mxu0 %vm2371_vm1, %v11859_v61  ;;  %v11861_v38 = vld [vmem:[#allocation135_spill] sm:$0xff] }
 0x183   :  { %11853 = vst [vmem:[#allocation169_spill] sm:$0xff] %v8148_v27  ;;  %v1669_v1 = vmul.f32 %v8145_v13, %v11857_v17  ;;  %v8166_v58 = vrot.slane %v110_v24, %v11829_v40  ;;  %v1798_v30 = vadd.f32 %v1790_v42, %v1774_v20  ;;  %v1910_v18 = vadd.f32 %v1902_v0, %v1886_v49 }
 0x184   :  { %11856 = vst [vmem:[#allocation170_spill] sm:$0xff] %v8161_v36  ;;  %v1653_v37 = vadd.f32 %v1645_v43, %v1629_v50  ;;  %v1693_v46 = vmul.f32 %v8148_v27, %v11860_v52  ;;  %2638 = vmatprep.mubr.f32.mxu0 %v11744_v8  ;;  %v1974_v25 = vmul.f32 %v8161_v36, %v11847_v51 }
 0x185   :  { %11858 = vst [vmem:[#allocation171_spill] sm:$0xff] %v8166_v58  ;;  %v1717_v62 = vmul.f32 %v8166_v58, %v11861_v38  ;;  %v8178_v9 = vrot.slane %v112_v34, %v11817_v12  ;;  %v8181_v28 = vrot.slane %v112_v34, %v11819_v56  ;;  %6483 = vmatmul.mubr.msk.f32.gmra.mxu1 %vm2371_vm1, %v11859_v61  ;;  %v11881_v12 = vld [vmem:[#allocation118_spill] sm:$0xff] }
 0x186   :  { %2764 = vmatprep.subr.mxu0 %v1798_v30  ;;  %v1934_v43 = vadd.f32 %v1926_v29, %v1910_v18  ;;  %v1677_v0 = vadd.f32 %v1669_v1, %v1653_v37  ;;  %v8186_v42 = vrot.slane %v110_v24, %v11835_v23  ;;  %v8189_v20 = vrot.slane %v112_v34, %v11822_v32  ;;  %v11868_v37 = vld [vmem:[#allocation136_spill] sm:$0xff] }
 0x187   :  { %11862 = vst [vmem:[#allocation110_spill] sm:$0xff] %v8178_v9  ;;  %11863 = vst [vmem:[#allocation172_spill] sm:$0xff] %v8181_v28  ;;  %v8192_v49 = vrot.slane %v110_v24, %v11837_v60  ;;  %v1813_v50 = vmul.f32 %v8178_v9, %v11854_v48  ;;  %v1829_v51 = vmul.f32 %v8181_v28, %v11855_v2  ;;  %2727 = vmatprep.mubr.f32.mxu1 %v11744_v8  ;;  %v11869_v32 = vld [vmem:[#allocation104_spill] sm:$0xff] }
 0x188   :  { %11864 = vst [vmem:[#allocation173_spill] sm:$0xff] %v8186_v42  ;;  %11865 = vst [vmem:[#allocation174_spill] sm:$0xff] %v8189_v20  ;;  %v8199_v61 = vrot.slane %v112_v34, %v11827_v41  ;;  %v1958_v30 = vadd.f32 %v1950_v15, %v1934_v43  ;;  %v1701_v18 = vadd.f32 %v1693_v46, %v1677_v0  ;;  %6480 = vmatmul.mubr.msk.f32.gmra.mxu0 %vm2371_vm1, %v11869_v32  ;;  %v11872_v43 = vld [vmem:[#allocation151_spill] sm:$0xff] }
 0x189   :  { %11866 = vst [vmem:[#allocation175_spill] sm:$0xff] %v8192_v49  ;;  %v1741_v29 = vmul.f32 %v8186_v42, %v11868_v37  ;;  %v1853_v1 = vmul.f32 %v8189_v20, %v11857_v17  ;;  %v8209_v48 = vrot.slane %v110_v24, %v11840_v4  ;;  %v1837_v2 = vadd.f32 %v1829_v51, %v1813_v50 }
 0x18a   :  { %11867 = vst [vmem:[#allocation176_spill] sm:$0xff] %v8199_v61  ;;  %v1877_v41 = vmul.f32 %v8199_v61, %v11860_v52  ;;  %v8214_v56 = vrot.slane %v112_v34, %v11829_v40  ;;  %6484 = vmatmul.mubr.msk.f32.gmra.mxu1 %vm2371_vm1, %v11869_v32  ;;  %v1982_v46 = vadd.f32 %v1974_v25, %v1958_v30  ;;  %v11875_v52 = vld [vmem:[#allocation94_spill] sm:$0xff]  ;;  %v11877_v30 = vld [vmem:[#allocation95_spill] sm:$0xff] }
 0x18b   :  { %11870 = vst [vmem:[#allocation104_spill] sm:$0xff] %v8209_v48  ;;  %v1725_v15 = vadd.f32 %v1717_v62, %v1701_v18  ;;  %v1765_v0 = vmul.f32 %v8192_v49, %v11872_v43  ;;  %v8221_v17 = vrot.slane %v112_v34, %v11835_v23  ;;  %2644 = vmatprep.mubr.f32.mxu0 %v11744_v8 }
 0x18c   :  { %11871 = vst [vmem:[#allocation177_spill] sm:$0xff] %v8214_v56  ;;  %v1861_v51 = vadd.f32 %v1853_v1, %v1837_v2  ;;  %v1901_v24 = vmul.f32 %v8214_v56, %v11861_v38  ;;  %v8227_v50 = vrot.slane %v112_v34, %v11837_v60  ;;  %v1628_v32 = vmul.f32 %v8047_v54, %v11875_v52  ;;  %v11878_v2 = vld [vmem:[#allocation117_spill] sm:$0xff]  ;;  %v11879_v38 = vld [vmem:[#allocation152_spill] sm:$0xff] }
 0x18d   :  { %11873 = vst [vmem:[#allocation178_spill] sm:$0xff] %v8221_v17  ;;  %2733 = vmatprep.mubr.f32.mxu1 %v11744_v8  ;;  %2853 = vmatprep.subr.mxu1 %v1982_v46  ;;  %v1749_v62 = vadd.f32 %v1741_v29, %v1725_v15  ;;  %v8233_v25 = vrot.slane %v112_v34, %v11840_v4  ;;  %v11880_v29 = vld [vmem:[#allocation113_spill] sm:$0xff] }
 0x18e   :  { %11874 = vst [vmem:[#allocation179_spill] sm:$0xff] %v8227_v50  ;;  %v1644_v18 = vmul.f32 %v8050_v14, %v11877_v30  ;;  %v1668_v1 = vmul.f32 %v8055_v57, %v11878_v2  ;;  %v1789_v60 = vmul.f32 %v8209_v48, %v11879_v38  ;;  %v1885_v23 = vadd.f32 %v1877_v41, %v1861_v51 }
 0x18f   :  { %11876 = vst [vmem:[#allocation180_spill] sm:$0xff] %v8233_v25  ;;  %v1925_v40 = vmul.f32 %v8221_v17, %v11868_v37  ;;  %v1949_v46 = vmul.f32 %v8227_v50, %v11872_v43  ;;  %6481 = vmatmul.mubr.msk.f32.gmra.mxu0 %vm2371_vm1, %v11880_v29  ;;  %v1773_v34 = vadd.f32 %v1765_v0, %v1749_v62  ;;  %v11883_v37 = vld [vmem:[#allocation134_spill] sm:$0xff] }
 0x190   :  { %v1973_v15 = vmul.f32 %v8233_v25, %v11879_v38  ;;  %v1652_v4 = vadd.f32 %v1644_v18, %v1628_v32  ;;  %v1692_v3 = vmul.f32 %v8069_v59, %v11881_v12  ;;  %6485 = vmatmul.mubr.msk.f32.gmra.mxu1 %vm2371_vm1, %v11880_v29  ;;  %v1909_v41 = vadd.f32 %v1901_v24, %v1885_v23  ;;  %v11882_v18 = vld [vmem:[#allocation133_spill] sm:$0xff] }
 0x191   :  { %v1812_v51 = vmul.f32 %v8081_v11, %v11875_v52  ;;  %v1828_v43 = vmul.f32 %v8086_v16, %v11877_v30  ;;  %v1852_v0 = vmul.f32 %v8097_v7, %v11878_v2  ;;  %2804 = vmatprep.mubr.f32.mxu0 %v11744_v8  ;;  %v1797_v62 = vadd.f32 %v1789_v60, %v1773_v34  ;;  %v11884_v24 = vld [vmem:[#allocation149_spill] sm:$0xff]  ;;  %v11885_v30 = vld [vmem:[#allocation150_spill] sm:$0xff] }
 0x192   :  { %v1676_v32 = vadd.f32 %v1668_v1, %v1652_v4  ;;  %v1716_v38 = vmul.f32 %v8074_v39, %v11882_v18  ;;  %v1740_v29 = vmul.f32 %v8089_v26, %v11883_v37  ;;  %2893 = vmatprep.mubr.f32.mxu1 %v11744_v8  ;;  %v1933_v23 = vadd.f32 %v1925_v40, %v1909_v41  ;;  %v11886_v4 = vld [vmem:[#allocation92_spill] sm:$0xff]  ;;  %v11887_v34 = vld [vmem:[#allocation93_spill] sm:$0xff] }
 0x193   :  { %v1764_v52 = vmul.f32 %v8092_v55, %v11884_v24  ;;  %v1788_v44 = vmul.f32 %v8100_v35, %v11885_v30  ;;  %v1836_v2 = vadd.f32 %v1828_v43, %v1812_v51  ;;  %2765 = vmatpush1.msra.mxu0 %v1797_v62  ;;  %v1876_v60 = vmul.f32 %v8111_v63, %v11881_v12  ;;  %v11889_v62 = vld [vmem:[#allocation115_spill] sm:$0xff] }
 0x194   :  { %v1700_v45 = vadd.f32 %v1692_v3, %v1676_v32  ;;  %v1627_v1 = vmul.f32 %v8132_v31, %v11886_v4  ;;  %v1643_v19 = vmul.f32 %v8135_v33, %v11887_v34  ;;  %v1957_v8 = vadd.f32 %v1949_v46, %v1933_v23 }
 0x195   :  { %v1860_v40 = vadd.f32 %v1852_v0, %v1836_v2  ;;  %v1900_v41 = vmul.f32 %v8114_v47, %v11882_v18  ;;  %v1667_v5 = vmul.f32 %v8145_v13, %v11888_v10  ;;  %v1924_v3 = vmul.f32 %v8129_v21, %v11883_v37  ;;  %v11890_v2 = vld [vmem:[#allocation131_spill] sm:$0xff] }
 0x196   :  { %v1724_v43 = vadd.f32 %v1716_v38, %v1700_v45  ;;  %v1651_v51 = vadd.f32 %v1643_v19, %v1627_v1  ;;  %v1691_v32 = vmul.f32 %v8148_v27, %v11889_v62  ;;  %v1981_v12 = vadd.f32 %v1973_v15, %v1957_v8  ;;  %v11891_v15 = vld [vmem:[#allocation132_spill] sm:$0xff] }
 0x197   :  { %v1884_v22 = vadd.f32 %v1876_v60, %v1860_v40  ;;  %v1948_v46 = vmul.f32 %v8140_v53, %v11884_v24  ;;  %v1715_v0 = vmul.f32 %v8166_v58, %v11890_v2  ;;  %v1811_v45 = vmul.f32 %v8178_v9, %v11886_v4  ;;  %v11892_v4 = vld [vmem:[#allocation147_spill] sm:$0xff] }
 0x198   :  { %v1748_v23 = vadd.f32 %v1740_v29, %v1724_v43  ;;  %v1675_v18 = vadd.f32 %v1667_v5, %v1651_v51  ;;  %v1827_v38 = vmul.f32 %v8181_v28, %v11887_v34  ;;  %2854 = vmatpush1.msra.mxu1 %v1981_v12  ;;  %v1972_v8 = vmul.f32 %v8161_v36, %v11885_v30 }
 0x199   :  { %v1908_v19 = vadd.f32 %v1900_v41, %v1884_v22  ;;  %v1739_v60 = vmul.f32 %v8186_v42, %v11891_v15  ;;  %v1851_v1 = vmul.f32 %v8189_v20, %v11888_v10  ;;  %v1875_v43 = vmul.f32 %v8199_v61, %v11889_v62  ;;  %v11893_v10 = vld [vmem:[#allocation91_spill] sm:$0xff] }
 0x19a   :  { %v1772_v40 = vadd.f32 %v1764_v52, %v1748_v23  ;;  %v1699_v29 = vadd.f32 %v1691_v32, %v1675_v18  ;;  %v1835_v5 = vadd.f32 %v1827_v38, %v1811_v45  ;;  %v1763_v12 = vmul.f32 %v8192_v49, %v11892_v4  ;;  %v11894_v32 = vld [vmem:[#allocation148_spill] sm:$0xff]  ;;  %v11895_v45 = vld [vmem:[#allocation111_spill] sm:$0xff] }
 0x19b   :  { %v1932_v51 = vadd.f32 %v1924_v3, %v1908_v19  ;;  %v1899_v22 = vmul.f32 %v8214_v56, %v11890_v2  ;;  %v1626_v41 = vmul.f32 %v8047_v54, %v11783_v6  ;;  %v1642_v52 = vmul.f32 %v8050_v14, %v11893_v10 }
 0x19c   :  { %v1796_v34 = vadd.f32 %v1788_v44, %v1772_v40  ;;  %v1723_v30 = vadd.f32 %v1715_v0, %v1699_v29  ;;  %v1859_v24 = vadd.f32 %v1851_v1, %v1835_v5  ;;  %v1787_v23 = vmul.f32 %v8209_v48, %v11894_v32  ;;  %v11896_v40 = vld [vmem:[#allocation112_spill] sm:$0xff]  ;;  %v11897_v29 = vld [vmem:[#allocation129_spill] sm:$0xff] }
 0x19d   :  { %v1956_v18 = vadd.f32 %v1948_v46, %v1932_v51  ;;  %v1923_v3 = vmul.f32 %v8221_v17, %v11891_v15  ;;  %v1666_v38 = vmul.f32 %v8055_v57, %v11895_v45  ;;  %v1947_v44 = vmul.f32 %v8227_v50, %v11892_v4 }
 0x19e   :  { %2766 = vmatprep.subr.mxu0 %v1796_v34  ;;  %v1747_v19 = vadd.f32 %v1739_v60, %v1723_v30  ;;  %v1883_v2 = vadd.f32 %v1875_v43, %v1859_v24  ;;  %v1650_v0 = vadd.f32 %v1642_v52, %v1626_v41  ;;  %v1690_v46 = vmul.f32 %v8069_v59, %v11896_v40  ;;  %v11898_v34 = vld [vmem:[#allocation130_spill] sm:$0xff]  ;;  %v11899_v60 = vld [vmem:[#allocation145_spill] sm:$0xff] }
 0x19f   :  { %v1980_v1 = vadd.f32 %v1972_v8, %v1956_v18  ;;  %v1714_v5 = vmul.f32 %v8074_v39, %v11897_v29  ;;  %v1810_v51 = vmul.f32 %v8081_v11, %v11783_v6  ;;  %v1826_v30 = vmul.f32 %v8086_v16, %v11893_v10 }
 0x1a0   :  { %v1771_v15 = vadd.f32 %v1763_v12, %v1747_v19  ;;  %v1907_v62 = vadd.f32 %v1899_v22, %v1883_v2  ;;  %v1674_v37 = vadd.f32 %v1666_v38, %v1650_v0  ;;  %v1971_v24 = vmul.f32 %v8233_v25, %v11894_v32  ;;  %v11900_v19 = vld [vmem:[#allocation87_spill] sm:$0xff] }
 0x1a1   :  { %2855 = vmatprep.subr.mxu1 %v1980_v1  ;;  %v1738_v8 = vmul.f32 %v8089_v26, %v11898_v34  ;;  %v1762_v43 = vmul.f32 %v8092_v55, %v11899_v60  ;;  %v1850_v41 = vmul.f32 %v8097_v7, %v11895_v45  ;;  %v1834_v22 = vadd.f32 %v1826_v30, %v1810_v51  ;;  %v11901_v1 = vld [vmem:[#allocation88_spill] sm:$0xff]  ;;  %v11904_v51 = vld [vmem:[#allocation106_spill] sm:$0xff] }
 0x1a2   :  { %v1795_v52 = vadd.f32 %v1787_v23, %v1771_v15  ;;  %v1931_v12 = vadd.f32 %v1923_v3, %v1907_v62  ;;  %v1698_v2 = vadd.f32 %v1690_v46, %v1674_v37  ;;  %v1874_v18 = vmul.f32 %v8111_v63, %v11896_v40  ;;  %v11902_v15 = vld [vmem:[#allocation105_spill] sm:$0xff]  ;;  %v11903_v62 = vld [vmem:[#allocation146_spill] sm:$0xff] }
 0x1a3   :  { %v1898_v38 = vmul.f32 %v8114_v47, %v11897_v29  ;;  %v1625_v0 = vmul.f32 %v8132_v31, %v11900_v19  ;;  %v1641_v32 = vmul.f32 %v8135_v33, %v11901_v1  ;;  %v1858_v45 = vadd.f32 %v1850_v41, %v1834_v22  ;;  %v11905_v41 = vld [vmem:[#allocation127_spill] sm:$0xff] }
 0x1a4   :  { %2767 = vmatpush1.msra.mxu0 %v1795_v52  ;;  %v1955_v10 = vadd.f32 %v1947_v44, %v1931_v12  ;;  %v1722_v6 = vadd.f32 %v1714_v5, %v1698_v2  ;;  %v1665_v37 = vmul.f32 %v8145_v13, %v11902_v15  ;;  %v1786_v23 = vmul.f32 %v8100_v35, %v11903_v62 }
 0x1a5   :  { %v1922_v3 = vmul.f32 %v8129_v21, %v11898_v34  ;;  %v1649_v46 = vadd.f32 %v1641_v32, %v1625_v0  ;;  %v1689_v30 = vmul.f32 %v8148_v27, %v11904_v51  ;;  %v1882_v4 = vadd.f32 %v1874_v18, %v1858_v45 }
 0x1a6   :  { %v1979_v29 = vadd.f32 %v1971_v24, %v1955_v10  ;;  %v1746_v40 = vadd.f32 %v1738_v8, %v1722_v6  ;;  %v1946_v44 = vmul.f32 %v8140_v53, %v11899_v60  ;;  %v1713_v52 = vmul.f32 %v8166_v58, %v11905_v41  ;;  %v11906_v24 = vld [vmem:[#allocation128_spill] sm:$0xff] }
 0x1a7   :  { %v1673_v5 = vadd.f32 %v1665_v37, %v1649_v46  ;;  %v1809_v12 = vmul.f32 %v8178_v9, %v11900_v19  ;;  %v1825_v2 = vmul.f32 %v8181_v28, %v11901_v1  ;;  %v1906_v22 = vadd.f32 %v1898_v38, %v1882_v4  ;;  %v11907_v1 = vld [vmem:[#allocation143_spill] sm:$0xff] }
 0x1a8   :  { %2856 = vmatpush1.msra.mxu1 %v1979_v29  ;;  %v1770_v32 = vadd.f32 %v1762_v43, %v1746_v40  ;;  %v1970_v6 = vmul.f32 %v8161_v36, %v11903_v62  ;;  %v1849_v10 = vmul.f32 %v8189_v20, %v11902_v15  ;;  %v1737_v8 = vmul.f32 %v8186_v42, %v11906_v24  ;;  %v11908_v38 = vld [vmem:[#allocation83_spill] sm:$0xff] }
 0x1a9   :  { %v1697_v45 = vadd.f32 %v1689_v30, %v1673_v5  ;;  %v1833_v18 = vadd.f32 %v1825_v2, %v1809_v12  ;;  %v1873_v0 = vmul.f32 %v8199_v61, %v11904_v51  ;;  %v1930_v46 = vadd.f32 %v1922_v3, %v1906_v22  ;;  %v11909_v5 = vld [vmem:[#allocation84_spill] sm:$0xff] }
 0x1aa   :  { %v1794_v37 = vadd.f32 %v1786_v23, %v1770_v32  ;;  %v1761_v40 = vmul.f32 %v8192_v49, %v11907_v1  ;;  %v1897_v4 = vmul.f32 %v8214_v56, %v11905_v41  ;;  %v1624_v30 = vmul.f32 %v8047_v54, %v11908_v38  ;;  %v11910_v2 = vld [vmem:[#allocation144_spill] sm:$0xff]  ;;  %v11911_v32 = vld [vmem:[#allocation102_spill] sm:$0xff]  ;;  %v11912_v54 = vld [vmem:[#allocation103_spill] sm:$0xff] }
 0x1ab   :  { %v1721_v29 = vadd.f32 %v1713_v52, %v1697_v45  ;;  %v1857_v43 = vadd.f32 %v1849_v10, %v1833_v18  ;;  %v1640_v62 = vmul.f32 %v8050_v14, %v11909_v5  ;;  %v1954_v12 = vadd.f32 %v1946_v44, %v1930_v46  ;;  %v11913_v44 = vld [vmem:[#allocation125_spill] sm:$0xff] }
 0x1ac   :  { %2768 = vmatprep.subr.mxu0 %v1794_v37  ;;  %v1785_v23 = vmul.f32 %v8209_v48, %v11910_v2  ;;  %v1921_v3 = vmul.f32 %v8221_v17, %v11906_v24  ;;  %v1664_v22 = vmul.f32 %v8055_v57, %v11911_v32  ;;  %v1945_v10 = vmul.f32 %v8227_v50, %v11907_v1  ;;  %v11955_v57 = vld [vmem:[#allocation154_spill] sm:$0xff] }
 0x1ad   :  { %v1745_v41 = vadd.f32 %v1737_v8, %v1721_v29  ;;  %v1881_v52 = vadd.f32 %v1873_v0, %v1857_v43  ;;  %v1648_v45 = vadd.f32 %v1640_v62, %v1624_v30  ;;  %v1978_v18 = vadd.f32 %v1970_v6, %v1954_v12  ;;  %v11914_v6 = vld [vmem:[#allocation126_spill] sm:$0xff]  ;;  %v11915_v29 = vld [vmem:[#allocation141_spill] sm:$0xff] }
 0x1ae   :  { %v1688_v37 = vmul.f32 %v8069_v59, %v11912_v54  ;;  %v1712_v46 = vmul.f32 %v8074_v39, %v11913_v44  ;;  %v1808_v14 = vmul.f32 %v8081_v11, %v11908_v38  ;;  %v1824_v8 = vmul.f32 %v8086_v16, %v11909_v5  ;;  %v11996_v1 = vld [vmem:[#allocation114_spill] sm:$0xff] }
 0x1af   :  { %v1769_v24 = vadd.f32 %v1761_v40, %v1745_v41  ;;  %v1905_v51 = vadd.f32 %v1897_v4, %v1881_v52  ;;  %v1672_v15 = vadd.f32 %v1664_v22, %v1648_v45  ;;  %2857 = vmatprep.subr.mxu1 %v1978_v18  ;;  %v1969_v62 = vmul.f32 %v8233_v25, %v11910_v2  ;;  %v11916_v45 = vld [vmem:[#allocation75_spill] sm:$0xff] }
 0x1b0   :  { %v1736_v0 = vmul.f32 %v8089_v26, %v11914_v6  ;;  %v1760_v43 = vmul.f32 %v8092_v55, %v11915_v29  ;;  %v1848_v30 = vmul.f32 %v8097_v7, %v11911_v32  ;;  %v1832_v4 = vadd.f32 %v1824_v8, %v1808_v14  ;;  %v11917_v26 = vld [vmem:[#allocation76_spill] sm:$0xff]  ;;  %v11919_v14 = vld [vmem:[#allocation142_spill] sm:$0xff] }
 0x1b1   :  { %v1793_v12 = vadd.f32 %v1785_v23, %v1769_v24  ;;  %v1929_v41 = vadd.f32 %v1921_v3, %v1905_v51  ;;  %v1696_v40 = vadd.f32 %v1688_v37, %v1672_v15  ;;  %v1872_v22 = vmul.f32 %v8111_v63, %v11912_v54  ;;  %v11918_v24 = vld [vmem:[#allocation100_spill] sm:$0xff]  ;;  %v11920_v37 = vld [vmem:[#allocation101_spill] sm:$0xff]  ;;  %v11991_v32 = vld [vmem:[#allocation134_spill] sm:$0xff] }
 0x1b2   :  { %v1896_v52 = vmul.f32 %v8114_v47, %v11913_v44  ;;  %v1623_v18 = vmul.f32 %v8132_v31, %v11916_v45  ;;  %v1639_v39 = vmul.f32 %v8135_v33, %v11917_v26  ;;  %v1856_v7 = vadd.f32 %v1848_v30, %v1832_v4  ;;  %v11921_v30 = vld [vmem:[#allocation123_spill] sm:$0xff]  ;;  %v11950_v63 = vld [vmem:[#allocation153_spill] sm:$0xff] }
 0x1b3   :  { %2769 = vmatpush1.msra.mxu0 %v1793_v12  ;;  %v1953_v55 = vadd.f32 %v1945_v10, %v1929_v41  ;;  %v1720_v16 = vadd.f32 %v1712_v46, %v1696_v40  ;;  %v1663_v15 = vmul.f32 %v8145_v13, %v11918_v24  ;;  %v1784_v51 = vmul.f32 %v8100_v35, %v11919_v14 }
 0x1b4   :  { %v1920_v23 = vmul.f32 %v8129_v21, %v11914_v6  ;;  %v1647_v3 = vadd.f32 %v1639_v39, %v1623_v18  ;;  %v1687_v8 = vmul.f32 %v8148_v27, %v11920_v37  ;;  %v1880_v33 = vadd.f32 %v1872_v22, %v1856_v7 }
 0x1b5   :  { %v1977_v47 = vadd.f32 %v1969_v62, %v1953_v55  ;;  %v1744_v31 = vadd.f32 %v1736_v0, %v1720_v16  ;;  %v1944_v10 = vmul.f32 %v8140_v53, %v11915_v29  ;;  %v1711_v12 = vmul.f32 %v8166_v58, %v11921_v30  ;;  %v115_v55 = vld [vmem:[%s10747_s1 + $0x68] sm:$0xff]  ;;  %v11969_v29 = vld [vmem:[#allocation135_spill] sm:$0xff] }
 0x1b6   :  { %v1671_v46 = vadd.f32 %v1663_v15, %v1647_v3  ;;  %v1807_v41 = vmul.f32 %v8178_v9, %v11916_v45  ;;  %v1823_v40 = vmul.f32 %v8181_v28, %v11917_v26  ;;  %v1904_v4 = vadd.f32 %v1896_v52, %v1880_v33  ;;  %v11922_v0 = vld [vmem:[#allocation124_spill] sm:$0xff] }
 0x1b7   :  { %2858 = vmatpush1.msra.mxu1 %v1977_v47  ;;  %v1768_v39 = vadd.f32 %v1760_v43, %v1744_v31  ;;  %v1968_v16 = vmul.f32 %v8161_v36, %v11919_v14  ;;  %v1847_v7 = vmul.f32 %v8189_v20, %v11918_v24  ;;  %v1735_v22 = vmul.f32 %v8186_v42, %v11922_v0  ;;  %v11923_v43 = vld [vmem:[#allocation139_spill] sm:$0xff]  ;;  %v11924_v53 = vld [vmem:[#allocation12_spill] sm:$0xff]  ;;  %v11936_v42 = vld [vmem:[#allocation21_spill] sm:$0xff] }
 0x1b8   :  { %v1695_v62 = vadd.f32 %v1687_v8, %v1671_v46  ;;  %v1831_v18 = vadd.f32 %v1823_v40, %v1807_v41  ;;  %v1871_v47 = vmul.f32 %v8199_v61, %v11920_v37  ;;  %v1928_v33 = vadd.f32 %v1920_v23, %v1904_v4  ;;  %v11926_v8 = vld [vmem:[#allocation13_spill] sm:$0xff]  ;;  %v11928_v40 = vld [vmem:[#allocation140_spill] sm:$0xff]  ;;  %v11934_v61 = vld [vmem:[#allocation15_spill] sm:$0xff] }
 0x1b9   :  { %v1792_v31 = vadd.f32 %v1784_v51, %v1768_v39  ;;  %v1759_v52 = vmul.f32 %v8192_v49, %v11923_v43  ;;  %v1895_v15 = vmul.f32 %v8214_v56, %v11921_v30  ;;  %v8435_v35 = vrot.slane %v115_v55, %v11924_v53  ;;  %v11929_v39 = vld [vmem:[#allocation14_spill] sm:$0xff]  ;;  %v11968_v26 = vld [vmem:[#allocation120_spill] sm:$0xff] }
 0x1ba   :  { %v1719_v3 = vadd.f32 %v1711_v12, %v1695_v62  ;;  %v1855_v36 = vadd.f32 %v1847_v7, %v1831_v18  ;;  %v8438_v46 = vrot.slane %v115_v55, %v11926_v8  ;;  %v1952_v41 = vadd.f32 %v1944_v10, %v1928_v33  ;;  %v11931_v7 = vld [vmem:[#allocation98_spill] sm:$0xff]  ;;  %v11932_v18 = vld [vmem:[#allocation99_spill] sm:$0xff] }
 0x1bb   :  { %11925 = vst [vmem:[#allocation113_spill] sm:$0xff] %v8435_v35  ;;  %2770 = vmatprep.subr.mxu0 %v1792_v31  ;;  %v1783_v51 = vmul.f32 %v8209_v48, %v11928_v40  ;;  %v1919_v23 = vmul.f32 %v8221_v17, %v11922_v0  ;;  %v8445_v4 = vrot.slane %v115_v55, %v11929_v39  ;;  %v117_v10 = vld [vmem:[%s10747_s1 + $0x78] sm:$0xff]  ;;  %v11933_v17 = vld [vmem:[#allocation121_spill] sm:$0xff]  ;;  %v11954_v59 = vmov 0.0  }
 0x1bc   :  { %11927 = vst [vmem:[#allocation130_spill] sm:$0xff] %v8438_v46  ;;  %v1743_v49 = vadd.f32 %v1735_v22, %v1719_v3  ;;  %v1879_v12 = vadd.f32 %v1871_v47, %v1855_v36  ;;  %v1998_v62 = vmul.f32 %v8435_v35, %v11931_v7  ;;  %v2014_v56 = vmul.f32 %v8438_v46, %v11932_v18 }
 0x1bd   :  { %11930 = vst [vmem:[#allocation145_spill] sm:$0xff] %v8445_v4  ;;  %v1976_v31 = vadd.f32 %v1968_v16, %v1952_v41  ;;  %v1943_v33 = vmul.f32 %v8227_v50, %v11923_v43  ;;  %v2038_v48 = vmul.f32 %v8445_v4, %v11933_v17  ;;  %v8459_v22 = vrot.slane %v115_v55, %v11934_v61  ;;  %v11938_v16 = vld [vmem:[#allocation122_spill] sm:$0xff] }
 0x1be   :  { %v1767_v36 = vadd.f32 %v1759_v52, %v1743_v49  ;;  %v1903_v47 = vadd.f32 %v1895_v15, %v1879_v12  ;;  %v2022_v3 = vadd.f32 %v2014_v56, %v1998_v62  ;;  %v8462_v20 = vrot.slane %v115_v55, %v11936_v42  ;;  %v11941_v56 = vld [vmem:[#allocation137_spill] sm:$0xff]  ;;  %v11942_v12 = vld [vmem:[#allocation23_spill] sm:$0xff] }
 0x1bf   :  { %11935 = vst [vmem:[#allocation87_spill] sm:$0xff] %v8459_v22  ;;  %2859 = vmatprep.subr.mxu1 %v1976_v31  ;;  %v1967_v28 = vmul.f32 %v8233_v25, %v11928_v40  ;;  %v2062_v41 = vmul.f32 %v8459_v22, %v11938_v16  ;;  %v8469_v50 = vrot.slane %v117_v10, %v11924_v53  ;;  %v11944_v31 = vld [vmem:[#allocation29_spill] sm:$0xff] }
 0x1c0   :  { %11937 = vst [vmem:[#allocation12_spill] sm:$0xff] %v8462_v20  ;;  %v8472_v58 = vrot.slane %v117_v10, %v11926_v8  ;;  %v1791_v9 = vadd.f32 %v1783_v51, %v1767_v36  ;;  %v1927_v49 = vadd.f32 %v1919_v23, %v1903_v47  ;;  %v2046_v52 = vadd.f32 %v2038_v48, %v2022_v3  ;;  %v11946_v23 = vld [vmem:[#allocation31_spill] sm:$0xff]  ;;  %v11949_v47 = vld [vmem:[#allocation138_spill] sm:$0xff] }
 0x1c1   :  { %11939 = vst [vmem:[#allocation13_spill] sm:$0xff] %v8469_v50  ;;  %v2086_v15 = vmul.f32 %v8462_v20, %v11941_v56  ;;  %v8477_v62 = vrot.slane %v115_v55, %v11942_v12  ;;  %v8480_v25 = vrot.slane %v115_v55, %v11944_v31  ;;  %v2182_v27 = vmul.f32 %v8469_v50, %v11931_v7 }
 0x1c2   :  { %11940 = vst [vmem:[#allocation14_spill] sm:$0xff] %v8472_v58  ;;  %v2198_v21 = vmul.f32 %v8472_v58, %v11932_v18  ;;  %2771 = vmatpush1.msra.mxu0 %v1791_v9  ;;  %v1951_v13 = vadd.f32 %v1943_v33, %v1927_v49  ;;  %v2070_v51 = vadd.f32 %v2062_v41, %v2046_v52  ;;  %v8505_v9 = vld [vmem:[%s10750_s4] sm:$0xff] }
 0x1c3   :  { %11943 = vst [vmem:[#allocation98_spill] sm:$0xff] %v8477_v62  ;;  %11945 = vst [vmem:[#allocation99_spill] sm:$0xff] %v8480_v25  ;;  %v8487_v48 = vrot.slane %v115_v55, %v11946_v23  ;;  %v8490_v36 = vrot.slane %v117_v10, %v11929_v39  ;;  %v2110_v3 = vmul.f32 %v8477_v62, %v11949_v47  ;;  %6486 = vmatmul.mubr.msk.f32.vlgmr.msra.gmra.mxu0 %vm2371_vm1, %v8505_v9  ;;  %v114_v55 = vld [vmem:[%s10747_s1 + $0x60] sm:$0xff] }
 0x1c4   :  { %v2134_v11 = vmul.f32 %v8480_v25, %v11950_v63  ;;  %v8497_v7 = vrot.slane %v117_v10, %v11934_v61  ;;  %v8500_v18 = vrot.slane %v117_v10, %v11936_v42  ;;  %11953 = vst [vmem:[#allocation137_spill] sm:$0xff] %v8505_v9  ;;  %v1975_v33 = vadd.f32 %v1967_v28, %v1951_v13 }
 0x1c5   :  { %11947 = vst [vmem:[#allocation121_spill] sm:$0xff] %v8487_v48  ;;  %11948 = vst [vmem:[#allocation15_spill] sm:$0xff] %v8490_v36  ;;  %v2094_v41 = vadd.f32 %v2086_v15, %v2070_v51  ;;  %v2206_v49 = vadd.f32 %v2198_v21, %v2182_v27  ;;  %v2222_v52 = vmul.f32 %v8490_v36, %v11933_v17  ;;  %2810 = vmatprep.mubr.f32.mxu0 %v11954_v59 }
 0x1c6   :  { %11951 = vst [vmem:[#allocation21_spill] sm:$0xff] %v8497_v7  ;;  %11952 = vst [vmem:[#allocation122_spill] sm:$0xff] %v8500_v18  ;;  %v2158_v40 = vmul.f32 %v8487_v48, %v11955_v57  ;;  %v2246_v43 = vmul.f32 %v8497_v7, %v11938_v16  ;;  %v2270_v0 = vmul.f32 %v8500_v18, %v11941_v56  ;;  %2860 = vmatpush1.msra.mxu1 %v1975_v33  ;;  %v11962_v33 = vld [vmem:[#allocation96_spill] sm:$0xff] }
 0x1c7   :  { %v8522_v30 = vrot.slane %v117_v10, %v11942_v12  ;;  %v2118_v28 = vadd.f32 %v2110_v3, %v2094_v41  ;;  %v2230_v21 = vadd.f32 %v2222_v52, %v2206_v49  ;;  %v8525_v13 = vrot.slane %v114_v55, %v11924_v53  ;;  %6490 = vmatmul.mubr.msk.f32.vlgmr.msra.gmra.mxu1 %vm2371_vm1, %v8505_v9  ;;  %v11963_v49 = vld [vmem:[#allocation97_spill] sm:$0xff] }
 0x1c8   :  { %v8528_v27 = vrot.slane %v114_v55, %v11926_v8  ;;  %v8533_v16 = vrot.slane %v117_v10, %v11944_v31  ;;  %v8538_v56 = vrot.slane %v114_v55, %v11929_v39  ;;  %v8541_v15 = vrot.slane %v114_v55, %v11934_v61  ;;  %v116_v52 = vld [vmem:[%s10747_s1 + $0x70] sm:$0xff]  ;;  %2899 = vmatprep.mubr.f32.mxu1 %v11954_v59 }
 0x1c9   :  { %11956 = vst [vmem:[#allocation23_spill] sm:$0xff] %v8522_v30  ;;  %11957 = vst [vmem:[#allocation29_spill] sm:$0xff] %v8525_v13  ;;  %v2294_v17 = vmul.f32 %v8522_v30, %v11949_v47  ;;  %v2142_v51 = vadd.f32 %v2134_v11, %v2118_v28  ;;  %v2254_v3 = vadd.f32 %v2246_v43, %v2230_v21  ;;  %v11965_v11 = vld [vmem:[#allocation119_spill] sm:$0xff]  ;;  %v8564_v21 = vld [vmem:[%s10750_s4 + $0x8] sm:$0xff] }
 0x1ca   :  { %11958 = vst [vmem:[#allocation31_spill] sm:$0xff] %v8528_v27  ;;  %11959 = vst [vmem:[#allocation138_spill] sm:$0xff] %v8533_v16  ;;  %v1997_v41 = vmul.f32 %v8525_v13, %v11962_v33  ;;  %v2013_v47 = vmul.f32 %v8528_v27, %v11963_v49  ;;  %v2318_v9 = vmul.f32 %v8533_v16, %v11950_v63  ;;  %6487 = vmatmul.mubr.msk.f32.gmra.mxu0 %vm2371_vm1, %v8564_v21 }
 0x1cb   :  { %11960 = vst [vmem:[#allocation153_spill] sm:$0xff] %v8538_v56  ;;  %11961 = vst [vmem:[#allocation154_spill] sm:$0xff] %v8541_v15  ;;  %v8554_v37 = vrot.slane %v117_v10, %v11946_v23  ;;  %v2037_v43 = vmul.f32 %v8538_v56, %v11965_v11  ;;  %v8559_v28 = vrot.slane %v114_v55, %v11936_v42  ;;  %2816 = vmatprep.mubr.f32.mxu0 %v11954_v59 }
 0x1cc   :  { %11967 = vst [vmem:[#allocation119_spill] sm:$0xff] %v8564_v21  ;;  %v2166_v14 = vadd.f32 %v2158_v40, %v2142_v51  ;;  %v2278_v24 = vadd.f32 %v2270_v0, %v2254_v3  ;;  %v2021_v63 = vadd.f32 %v2013_v47, %v1997_v41  ;;  %v2061_v10 = vmul.f32 %v8541_v15, %v11968_v26 }
 0x1cd   :  { %11964 = vst [vmem:[#allocation96_spill] sm:$0xff] %v8554_v37  ;;  %11966 = vst [vmem:[#allocation97_spill] sm:$0xff] %v8559_v28  ;;  %v2342_v45 = vmul.f32 %v8554_v37, %v11955_v57  ;;  %v2085_v6 = vmul.f32 %v8559_v28, %v11969_v29  ;;  %v8576_v44 = vrot.slane %v116_v52, %v11924_v53  ;;  %6491 = vmatmul.mubr.msk.f32.gmra.mxu1 %vm2371_vm1, %v8564_v21 }
 0x1ce   :  { %v8579_v54 = vrot.slane %v116_v52, %v11926_v8  ;;  %2942 = vmatprep.subr.mxu0 %v2166_v14  ;;  %v2302_v0 = vadd.f32 %v2294_v17, %v2278_v24  ;;  %v2045_v40 = vadd.f32 %v2037_v43, %v2021_v63  ;;  %v8584_v51 = vrot.slane %v114_v55, %v11942_v12  ;;  %v11976_v17 = vld [vmem:[#allocation136_spill] sm:$0xff] }
 0x1cf   :  { %11970 = vst [vmem:[#allocation120_spill] sm:$0xff] %v8576_v44  ;;  %v8587_v57 = vrot.slane %v116_v52, %v11929_v39  ;;  %v8590_v3 = vrot.slane %v114_v55, %v11944_v31  ;;  %v2181_v53 = vmul.f32 %v8576_v44, %v11962_v33  ;;  %v8597_v41 = vrot.slane %v116_v52, %v11934_v61  ;;  %v8607_v33 = vld [vmem:[%s10750_s4 + $0x10] sm:$0xff] }
 0x1d0   :  { %11971 = vst [vmem:[#allocation135_spill] sm:$0xff] %v8579_v54  ;;  %11972 = vst [vmem:[#allocation181_spill] sm:$0xff] %v8584_v51  ;;  %v2197_v8 = vmul.f32 %v8579_v54, %v11963_v49  ;;  %2905 = vmatprep.mubr.f32.mxu1 %v11954_v59  ;;  %v2326_v24 = vadd.f32 %v2318_v9, %v2302_v0  ;;  %v2069_v14 = vadd.f32 %v2061_v10, %v2045_v40  ;;  %v11980_v10 = vld [vmem:[#allocation151_spill] sm:$0xff] }
 0x1d1   :  { %11973 = vst [vmem:[#allocation182_spill] sm:$0xff] %v8587_v57  ;;  %11974 = vst [vmem:[#allocation183_spill] sm:$0xff] %v8590_v3  ;;  %v2109_v39 = vmul.f32 %v8584_v51, %v11976_v17  ;;  %v2221_v47 = vmul.f32 %v8587_v57, %v11965_v11  ;;  %6488 = vmatmul.mubr.msk.f32.gmra.mxu0 %vm2371_vm1, %v8607_v33  ;;  %v8612_v61 = vrot.slane %v114_v55, %v11946_v23 }
 0x1d2   :  { %11975 = vst [vmem:[#allocation184_spill] sm:$0xff] %v8597_v41  ;;  %11977 = vst [vmem:[#allocation136_spill] sm:$0xff] %v8607_v33  ;;  %v2205_v49 = vadd.f32 %v2197_v8, %v2181_v53  ;;  %v2245_v9 = vmul.f32 %v8597_v41, %v11968_v26  ;;  %v8617_v43 = vrot.slane %v116_v52, %v11936_v42  ;;  %6492 = vmatmul.mubr.msk.f32.gmra.mxu1 %vm2371_vm1, %v8607_v33  ;;  %v11983_v53 = vld [vmem:[#allocation94_spill] sm:$0xff] }
 0x1d3   :  { %11978 = vst [vmem:[#allocation185_spill] sm:$0xff] %v8612_v61  ;;  %v2350_v11 = vadd.f32 %v2342_v45, %v2326_v24  ;;  %v2093_v63 = vadd.f32 %v2085_v6, %v2069_v14  ;;  %v2133_v0 = vmul.f32 %v8590_v3, %v11980_v10  ;;  %v8624_v40 = vrot.slane %v116_v52, %v11942_v12  ;;  %v11985_v12 = vld [vmem:[#allocation95_spill] sm:$0xff]  ;;  %v11986_v14 = vld [vmem:[#allocation117_spill] sm:$0xff] }
 0x1d4   :  { %11979 = vst [vmem:[#allocation186_spill] sm:$0xff] %v8617_v43  ;;  %2822 = vmatprep.mubr.f32.mxu0 %v11954_v59  ;;  %v2229_v55 = vadd.f32 %v2221_v47, %v2205_v49  ;;  %v2269_v26 = vmul.f32 %v8617_v43, %v11969_v29  ;;  %v8630_v42 = vrot.slane %v116_v52, %v11944_v31  ;;  %v11987_v29 = vld [vmem:[#allocation152_spill] sm:$0xff] }
 0x1d5   :  { %11981 = vst [vmem:[#allocation151_spill] sm:$0xff] %v8624_v40  ;;  %v1996_v8 = vmul.f32 %v8435_v35, %v11983_v53  ;;  %2911 = vmatprep.mubr.f32.mxu1 %v11954_v59  ;;  %3031 = vmatprep.subr.mxu1 %v2350_v11  ;;  %v2117_v6 = vadd.f32 %v2109_v39, %v2093_v63 }
 0x1d6   :  { %11982 = vst [vmem:[#allocation187_spill] sm:$0xff] %v8630_v42  ;;  %v8636_v45 = vrot.slane %v116_v52, %v11946_v23  ;;  %v2012_v24 = vmul.f32 %v8438_v46, %v11985_v12  ;;  %v2036_v47 = vmul.f32 %v8445_v4, %v11986_v14  ;;  %v2157_v31 = vmul.f32 %v8612_v61, %v11987_v29  ;;  %v8651_v23 = vld [vmem:[%s10750_s4 + $0x18] sm:$0xff] }
 0x1d7   :  { %v2253_v49 = vadd.f32 %v2245_v9, %v2229_v55  ;;  %v2293_v33 = vmul.f32 %v8624_v40, %v11976_v17  ;;  %v2317_v11 = vmul.f32 %v8630_v42, %v11980_v10  ;;  %11988 = vst [vmem:[#allocation95_spill] sm:$0xff] %v8651_v23  ;;  %6489 = vmatmul.mubr.msk.f32.gmra.mxu0 %vm2371_vm1, %v8651_v23  ;;  %v11989_v9 = vld [vmem:[#allocation118_spill] sm:$0xff] }
 0x1d8   :  { %11984 = vst [vmem:[#allocation94_spill] sm:$0xff] %v8636_v45  ;;  %v2141_v52 = vadd.f32 %v2133_v0, %v2117_v6  ;;  %v2341_v39 = vmul.f32 %v8636_v45, %v11987_v29  ;;  %v2020_v63 = vadd.f32 %v2012_v24, %v1996_v8  ;;  %v2060_v55 = vmul.f32 %v8459_v22, %v11989_v9  ;;  %v11990_v24 = vld [vmem:[#allocation133_spill] sm:$0xff] }
 0x1d9   :  { %6493 = vmatmul.mubr.msk.f32.gmra.mxu1 %vm2371_vm1, %v8651_v23  ;;  %v2277_v17 = vadd.f32 %v2269_v26, %v2253_v49  ;;  %v2180_v10 = vmul.f32 %v8469_v50, %v11983_v53  ;;  %v2196_v21 = vmul.f32 %v8472_v58, %v11985_v12  ;;  %v2220_v0 = vmul.f32 %v8490_v36, %v11986_v14  ;;  %v11992_v53 = vld [vmem:[#allocation149_spill] sm:$0xff]  ;;  %v11993_v12 = vld [vmem:[#allocation150_spill] sm:$0xff] }
 0x1da   :  { %2982 = vmatprep.mubr.f32.mxu0 %v11954_v59  ;;  %v2165_v6 = vadd.f32 %v2157_v31, %v2141_v52  ;;  %v2044_v8 = vadd.f32 %v2036_v47, %v2020_v63  ;;  %v2084_v29 = vmul.f32 %v8462_v20, %v11990_v24  ;;  %v2108_v23 = vmul.f32 %v8477_v62, %v11991_v32  ;;  %v11994_v31 = vld [vmem:[#allocation92_spill] sm:$0xff]  ;;  %v11995_v63 = vld [vmem:[#allocation93_spill] sm:$0xff] }
 0x1db   :  { %3071 = vmatprep.mubr.f32.mxu1 %v11954_v59  ;;  %v2301_v26 = vadd.f32 %v2293_v33, %v2277_v17  ;;  %v2132_v49 = vmul.f32 %v8480_v25, %v11992_v53  ;;  %v2156_v2 = vmul.f32 %v8487_v48, %v11993_v12  ;;  %v2204_v14 = vadd.f32 %v2196_v21, %v2180_v10 }
 0x1dc   :  { %2943 = vmatpush1.msra.mxu0 %v2165_v6  ;;  %v2068_v5 = vadd.f32 %v2060_v55, %v2044_v8  ;;  %v2244_v47 = vmul.f32 %v8497_v7, %v11989_v9  ;;  %v1995_v52 = vmul.f32 %v8525_v13, %v11994_v31  ;;  %v2011_v38 = vmul.f32 %v8528_v27, %v11995_v63  ;;  %v11997_v9 = vld [vmem:[#allocation115_spill] sm:$0xff] }
 0x1dd   :  { %v2325_v59 = vadd.f32 %v2317_v11, %v2301_v26  ;;  %v2228_v33 = vadd.f32 %v2220_v0, %v2204_v14  ;;  %v2268_v17 = vmul.f32 %v8500_v18, %v11990_v24  ;;  %v2035_v48 = vmul.f32 %v8538_v56, %v11996_v1  ;;  %v11998_v0 = vld [vmem:[#allocation131_spill] sm:$0xff] }
 0x1de   :  { %v2092_v21 = vadd.f32 %v2084_v29, %v2068_v5  ;;  %v2292_v55 = vmul.f32 %v8522_v30, %v11991_v32  ;;  %v2019_v10 = vadd.f32 %v2011_v38, %v1995_v52  ;;  %v2059_v6 = vmul.f32 %v8541_v15, %v11997_v9 }
 0x1df   :  { %v2349_v8 = vadd.f32 %v2341_v39, %v2325_v59  ;;  %v2252_v13 = vadd.f32 %v2244_v47, %v2228_v33  ;;  %v2316_v11 = vmul.f32 %v8533_v16, %v11992_v53  ;;  %v2083_v26 = vmul.f32 %v8559_v28, %v11998_v0  ;;  %v11999_v39 = vld [vmem:[#allocation132_spill] sm:$0xff]  ;;  %v12000_v33 = vld [vmem:[#allocation147_spill] sm:$0xff] }
 0x1e0   :  { %v2116_v24 = vadd.f32 %v2108_v23, %v2092_v21  ;;  %v2043_v14 = vadd.f32 %v2035_v48, %v2019_v10  ;;  %v2179_v5 = vmul.f32 %v8576_v44, %v11994_v31  ;;  %v2195_v32 = vmul.f32 %v8579_v54, %v11995_v63 }
 0x1e1   :  { %3032 = vmatpush1.msra.mxu1 %v2349_v8  ;;  %v2276_v38 = vadd.f32 %v2268_v17, %v2252_v13  ;;  %v2340_v59 = vmul.f32 %v8554_v37, %v11993_v12  ;;  %v2107_v29 = vmul.f32 %v8584_v51, %v11999_v39  ;;  %v2219_v53 = vmul.f32 %v8587_v57, %v11996_v1  ;;  %v12001_v12 = vld [vmem:[#allocation90_spill] sm:$0xff]  ;;  %v12002_v1 = vld [vmem:[#allocation91_spill] sm:$0xff] }
 0x1e2   :  { %v2140_v47 = vadd.f32 %v2132_v49, %v2116_v24  ;;  %v2067_v23 = vadd.f32 %v2059_v6, %v2043_v14  ;;  %v2203_v48 = vadd.f32 %v2195_v32, %v2179_v5  ;;  %v2243_v31 = vmul.f32 %v8597_v41, %v11997_v9  ;;  %v12003_v24 = vld [vmem:[#allocation148_spill] sm:$0xff]  ;;  %v12004_v14 = vld [vmem:[#allocation111_spill] sm:$0xff] }
 0x1e3   :  { %v2300_v52 = vadd.f32 %v2292_v55, %v2276_v38  ;;  %v2131_v63 = vmul.f32 %v8590_v3, %v12000_v33  ;;  %v2267_v13 = vmul.f32 %v8617_v43, %v11998_v0  ;;  %v1994_v17 = vmul.f32 %v8435_v35, %v12001_v12 }
 0x1e4   :  { %v2164_v21 = vadd.f32 %v2156_v2, %v2140_v47  ;;  %v2091_v10 = vadd.f32 %v2083_v26, %v2067_v23  ;;  %v2227_v8 = vadd.f32 %v2219_v53, %v2203_v48  ;;  %v2010_v49 = vmul.f32 %v8438_v46, %v12002_v1  ;;  %v12005_v53 = vld [vmem:[#allocation112_spill] sm:$0xff]  ;;  %v12006_v47 = vld [vmem:[#allocation129_spill] sm:$0xff] }
 0x1e5   :  { %v2324_v6 = vadd.f32 %v2316_v11, %v2300_v52  ;;  %v2155_v9 = vmul.f32 %v8612_v61, %v12003_v24  ;;  %v2291_v55 = vmul.f32 %v8624_v40, %v11999_v39  ;;  %v2034_v5 = vmul.f32 %v8445_v4, %v12004_v14 }
 0x1e6   :  { %2944 = vmatprep.subr.mxu0 %v2164_v21  ;;  %v2115_v0 = vadd.f32 %v2107_v29, %v2091_v10  ;;  %v2251_v32 = vadd.f32 %v2243_v31, %v2227_v8  ;;  %v2315_v2 = vmul.f32 %v8630_v42, %v12000_v33  ;;  %v2018_v26 = vadd.f32 %v2010_v49, %v1994_v17 }
 0x1e7   :  { %v2348_v38 = vadd.f32 %v2340_v59, %v2324_v6  ;;  %v2058_v11 = vmul.f32 %v8459_v22, %v12005_v53  ;;  %v2082_v23 = vmul.f32 %v8462_v20, %v12006_v47  ;;  %v2178_v39 = vmul.f32 %v8469_v50, %v12001_v12  ;;  %v12008_v6 = vld [vmem:[#allocation88_spill] sm:$0xff] }
 0x1e8   :  { %v2139_v48 = vadd.f32 %v2131_v63, %v2115_v0  ;;  %v2275_v52 = vadd.f32 %v2267_v13, %v2251_v32  ;;  %v2042_v4 = vadd.f32 %v2034_v5, %v2018_v26  ;;  %v2194_v29 = vmul.f32 %v8472_v58, %v12002_v1  ;;  %v12007_v1 = vld [vmem:[#allocation29_spill] sm:$0xff] }
 0x1e9   :  { %3033 = vmatprep.subr.mxu1 %v2348_v38  ;;  %v2339_v31 = vmul.f32 %v8636_v45, %v12003_v24  ;;  %v2106_v59 = vmul.f32 %v8477_v62, %v11898_v34  ;;  %v2130_v33 = vmul.f32 %v8480_v25, %v11899_v60  ;;  %v2218_v17 = vmul.f32 %v8490_v36, %v12004_v14  ;;  %v12011_v32 = vld [vmem:[#allocation121_spill] sm:$0xff] }
 0x1ea   :  { %v2163_v12 = vadd.f32 %v2155_v9, %v2139_v48  ;;  %v2299_v63 = vadd.f32 %v2291_v55, %v2275_v52  ;;  %v2066_v13 = vadd.f32 %v2058_v11, %v2042_v4  ;;  %v2202_v21 = vadd.f32 %v2194_v29, %v2178_v39  ;;  %v12009_v9 = vld [vmem:[#allocation105_spill] sm:$0xff]  ;;  %v12010_v55 = vld [vmem:[#allocation146_spill] sm:$0xff]  ;;  %v12013_v29 = vld [vmem:[#allocation127_spill] sm:$0xff] }
 0x1eb   :  { %v2242_v10 = vmul.f32 %v8497_v7, %v12005_v53  ;;  %v2266_v8 = vmul.f32 %v8500_v18, %v12006_v47  ;;  %v1993_v49 = vmul.f32 %v12007_v1, %v11900_v19  ;;  %v2009_v24 = vmul.f32 %v8528_v27, %v12008_v6  ;;  %v12012_v11 = vld [vmem:[#allocation106_spill] sm:$0xff] }
 0x1ec   :  { %2945 = vmatpush1.msra.mxu0 %v2163_v12  ;;  %v2323_v5 = vadd.f32 %v2315_v2, %v2299_v63  ;;  %v2090_v0 = vadd.f32 %v2082_v23, %v2066_v13  ;;  %v2226_v14 = vadd.f32 %v2218_v17, %v2202_v21  ;;  %v2033_v4 = vmul.f32 %v8538_v56, %v12009_v9  ;;  %v12014_v21 = vld [vmem:[#allocation128_spill] sm:$0xff] }
 0x1ed   :  { %v2154_v26 = vmul.f32 %v12011_v32, %v12010_v55  ;;  %v2290_v38 = vmul.f32 %v8522_v30, %v11898_v34  ;;  %v2017_v53 = vadd.f32 %v2009_v24, %v1993_v49  ;;  %v2057_v47 = vmul.f32 %v8541_v15, %v12012_v11 }
 0x1ee   :  { %v2347_v39 = vadd.f32 %v2339_v31, %v2323_v5  ;;  %v2114_v48 = vadd.f32 %v2106_v59, %v2090_v0  ;;  %v2250_v52 = vadd.f32 %v2242_v10, %v2226_v14  ;;  %v2314_v2 = vmul.f32 %v8533_v16, %v11899_v60 }
 0x1ef   :  { %v2041_v23 = vadd.f32 %v2033_v4, %v2017_v53  ;;  %v2081_v17 = vmul.f32 %v8559_v28, %v12013_v29  ;;  %v2177_v12 = vmul.f32 %v8576_v44, %v11900_v19  ;;  %v2193_v34 = vmul.f32 %v8579_v54, %v12008_v6  ;;  %v12015_v6 = vld [vmem:[#allocation143_spill] sm:$0xff] }
 0x1f0   :  { %3034 = vmatpush1.msra.mxu1 %v2347_v39  ;;  %v2138_v63 = vadd.f32 %v2130_v33, %v2114_v48  ;;  %v2274_v13 = vadd.f32 %v2266_v8, %v2250_v52  ;;  %v2338_v31 = vmul.f32 %v8554_v37, %v12010_v55  ;;  %v2217_v59 = vmul.f32 %v8587_v57, %v12009_v9  ;;  %v12016_v4 = vld [vmem:[#allocation83_spill] sm:$0xff]  ;;  %v12017_v55 = vld [vmem:[#allocation84_spill] sm:$0xff]  ;;  %v12020_v48 = vld [vmem:[#allocation145_spill] sm:$0xff] }
 0x1f1   :  { %v2065_v60 = vadd.f32 %v2057_v47, %v2041_v23  ;;  %v2105_v10 = vmul.f32 %v8584_v51, %v12014_v21  ;;  %v2201_v49 = vadd.f32 %v2193_v34, %v2177_v12  ;;  %v2241_v19 = vmul.f32 %v8597_v41, %v12012_v11  ;;  %v12018_v39 = vld [vmem:[#allocation144_spill] sm:$0xff]  ;;  %v12019_v11 = vld [vmem:[#allocation102_spill] sm:$0xff] }
 0x1f2   :  { %v2162_v24 = vadd.f32 %v2154_v26, %v2138_v63  ;;  %v2298_v5 = vadd.f32 %v2290_v38, %v2274_v13  ;;  %v2129_v33 = vmul.f32 %v8590_v3, %v12015_v6  ;;  %v2265_v8 = vmul.f32 %v8617_v43, %v12013_v29  ;;  %v12021_v63 = vld [vmem:[#allocation103_spill] sm:$0xff] }
 0x1f3   :  { %v2089_v0 = vadd.f32 %v2081_v17, %v2065_v60  ;;  %v2225_v14 = vadd.f32 %v2217_v59, %v2201_v49  ;;  %v1992_v9 = vmul.f32 %v8435_v35, %v12016_v4  ;;  %v2008_v53 = vmul.f32 %v8438_v46, %v12017_v55  ;;  %v12088_v35 = vld [vmem:[#allocation30_spill] sm:$0xff] }
 0x1f4   :  { %2946 = vmatprep.subr.mxu0 %v2162_v24  ;;  %v2322_v47 = vadd.f32 %v2314_v2, %v2298_v5  ;;  %v2153_v26 = vmul.f32 %v8612_v61, %v12018_v39  ;;  %v2289_v38 = vmul.f32 %v8624_v40, %v12014_v21  ;;  %v2032_v52 = vmul.f32 %v12020_v48, %v12019_v11  ;;  %v12022_v2 = vld [vmem:[#allocation125_spill] sm:$0xff] }
 0x1f5   :  { %v2113_v23 = vadd.f32 %v2105_v10, %v2089_v0  ;;  %v2249_v29 = vadd.f32 %v2241_v19, %v2225_v14  ;;  %v2313_v17 = vmul.f32 %v8630_v42, %v12015_v6  ;;  %v2016_v12 = vadd.f32 %v2008_v53, %v1992_v9  ;;  %v12024_v6 = vld [vmem:[#allocation141_spill] sm:$0xff] }
 0x1f6   :  { %v2346_v34 = vadd.f32 %v2338_v31, %v2322_v47  ;;  %v2056_v13 = vmul.f32 %v8459_v22, %v12021_v63  ;;  %v2080_v59 = vmul.f32 %v8462_v20, %v12022_v2  ;;  %v2176_v60 = vmul.f32 %v8469_v50, %v12016_v4  ;;  %v12023_v31 = vld [vmem:[#allocation126_spill] sm:$0xff]  ;;  %v12025_v47 = vld [vmem:[#allocation75_spill] sm:$0xff] }
 0x1f7   :  { %v2137_v21 = vadd.f32 %v2129_v33, %v2113_v23  ;;  %v2273_v49 = vadd.f32 %v2265_v8, %v2249_v29  ;;  %v2040_v24 = vadd.f32 %v2032_v52, %v2016_v12  ;;  %v2192_v10 = vmul.f32 %v8472_v58, %v12017_v55  ;;  %v12026_v52 = vld [vmem:[#allocation76_spill] sm:$0xff]  ;;  %v12085_v58 = vld [vmem:[#allocation18_spill] sm:$0xff] }
 0x1f8   :  { %3035 = vmatprep.subr.mxu1 %v2346_v34  ;;  %v2337_v19 = vmul.f32 %v8636_v45, %v12018_v39  ;;  %v2104_v5 = vmul.f32 %v8477_v62, %v12023_v31  ;;  %v2128_v0 = vmul.f32 %v8480_v25, %v12024_v6  ;;  %v2216_v14 = vmul.f32 %v8490_v36, %v12019_v11  ;;  %v12028_v34 = vld [vmem:[#allocation142_spill] sm:$0xff]  ;;  %v12080_v36 = vld [vmem:[#allocation28_spill] sm:$0xff] }
 0x1f9   :  { %v2161_v4 = vadd.f32 %v2153_v26, %v2137_v21  ;;  %v2297_v33 = vadd.f32 %v2289_v38, %v2273_v49  ;;  %v2064_v8 = vadd.f32 %v2056_v13, %v2040_v24  ;;  %v2200_v9 = vadd.f32 %v2192_v10, %v2176_v60  ;;  %v12027_v26 = vld [vmem:[#allocation100_spill] sm:$0xff]  ;;  %v12029_v60 = vld [vmem:[#allocation101_spill] sm:$0xff]  ;;  %v12086_v20 = vld [vmem:[#allocation22_spill] sm:$0xff] }
 0x1fa   :  { %v2240_v55 = vmul.f32 %v8497_v7, %v12021_v63  ;;  %v2264_v53 = vmul.f32 %v8500_v18, %v12022_v2  ;;  %v1991_v39 = vmul.f32 %v12007_v1, %v12025_v47  ;;  %v2007_v23 = vmul.f32 %v8528_v27, %v12026_v52 }
 0x1fb   :  { %2947 = vmatpush1.msra.mxu0 %v2161_v4  ;;  %v2321_v29 = vadd.f32 %v2313_v17, %v2297_v33  ;;  %v2088_v12 = vadd.f32 %v2080_v59, %v2064_v8  ;;  %v2224_v11 = vadd.f32 %v2216_v14, %v2200_v9  ;;  %v2031_v38 = vmul.f32 %v8538_v56, %v12027_v26  ;;  %v12030_v17 = vld [vmem:[#allocation123_spill] sm:$0xff] }
 0x1fc   :  { %v2152_v13 = vmul.f32 %v12011_v32, %v12028_v34  ;;  %v2015_v63 = vadd.f32 %v2007_v23, %v1991_v39  ;;  %v2055_v2 = vmul.f32 %v8541_v15, %v12029_v60  ;;  %v2288_v10 = vmul.f32 %v8522_v30, %v12023_v31  ;;  %v12063_v32 = vld [vmem:[#allocation27_spill] sm:$0xff] }
 0x1fd   :  { %v2345_v21 = vadd.f32 %v2337_v19, %v2321_v29  ;;  %v2112_v49 = vadd.f32 %v2104_v5, %v2088_v12  ;;  %v2248_v24 = vadd.f32 %v2240_v55, %v2224_v11  ;;  %v2079_v59 = vmul.f32 %v8559_v28, %v12030_v17  ;;  %v12031_v55 = vld [vmem:[#allocation124_spill] sm:$0xff]  ;;  %v12032_v11 = vld [vmem:[#allocation139_spill] sm:$0xff] }
 0x1fe   :  { %v2039_v4 = vadd.f32 %v2031_v38, %v2015_v63  ;;  %v2175_v14 = vmul.f32 %v8576_v44, %v12025_v47  ;;  %v2191_v33 = vmul.f32 %v8579_v54, %v12026_v52  ;;  %v2312_v19 = vmul.f32 %v8533_v16, %v12024_v6 }
 0x1ff   :  { %3036 = vmatpush1.msra.mxu1 %v2345_v21  ;;  %v2136_v8 = vadd.f32 %v2128_v0, %v2112_v49  ;;  %v2272_v9 = vadd.f32 %v2264_v53, %v2248_v24  ;;  %v2215_v5 = vmul.f32 %v8587_v57, %v12027_v26  ;;  %v2103_v39 = vmul.f32 %v8584_v51, %v12031_v55 }
 0x200   :  { %v2063_v31 = vadd.f32 %v2055_v2, %v2039_v4  ;;  %v2199_v23 = vadd.f32 %v2191_v33, %v2175_v14  ;;  %v2239_v47 = vmul.f32 %v8597_v41, %v12029_v60  ;;  %v2127_v0 = vmul.f32 %v8590_v3, %v12032_v11  ;;  %v12033_v2 = vld [vmem:[#allocation140_spill] sm:$0xff]  ;;  %v12034_v33 = vld [vmem:[#allocation137_spill] sm:$0xff] }
 0x201   :  { %v2160_v29 = vadd.f32 %v2152_v13, %v2136_v8  ;;  %v2296_v12 = vadd.f32 %v2288_v10, %v2272_v9  ;;  %v2263_v6 = vmul.f32 %v8617_v43, %v12030_v17  ;;  %v2336_v38 = vmul.f32 %v8554_v37, %v12028_v34 }
 0x202   :  { %v2087_v52 = vadd.f32 %v2079_v59, %v2063_v31  ;;  %v2223_v53 = vadd.f32 %v2215_v5, %v2199_v23  ;;  %v2151_v21 = vmul.f32 %v8612_v61, %v12033_v2  ;;  %v2287_v13 = vmul.f32 %v8624_v40, %v12031_v55  ;;  %v12037_v5 = vld [vmem:[#allocation136_spill] sm:$0xff]  ;;  %v12038_v31 = vld [vmem:[#allocation95_spill] sm:$0xff]  ;;  %v2450_v55 = vpop.f32.mrf.mxu0  ;;  %v2539_v23 = vpop.f32.mrf.mxu1 }
 0x203   :  { %2948 = vmatprep.subr.mxu0 %v2160_v29  ;;  %v2320_v26 = vadd.f32 %v2312_v19, %v2296_v12  ;;  %v2311_v4 = vmul.f32 %v8630_v42, %v12032_v11  ;;  %v2335_v34 = vmul.f32 %v8636_v45, %v12033_v2  ;;  %v12035_v9 = vmov 0.0   ;;  %v12036_v19 = vld [vmem:[#allocation119_spill] sm:$0xff] }
 0x204   :  { %v2111_v63 = vadd.f32 %v2103_v39, %v2087_v52  ;;  %v2247_v60 = vadd.f32 %v2239_v47, %v2223_v53  ;;  %v2452_v39 = vpop.f32.mrf.mxu0  ;;  %v2541_v29 = vpop.f32.mrf.mxu1 }
 0x205   :  { %v2344_v49 = vadd.f32 %v2336_v38, %v2320_v26 }
 0x206   :  { %v2135_v24 = vadd.f32 %v2127_v0, %v2111_v63  ;;  %v2271_v10 = vadd.f32 %v2263_v6, %v2247_v60  ;;  %v2456_v47 = vpop.f32.mrf.mxu0  ;;  %v2545_v52 = vpop.f32.mrf.mxu1 }
 0x207   :  { %3037 = vmatprep.subr.mxu1 %v2344_v49 }
 0x208   :  { %v2159_v17 = vadd.f32 %v2151_v21, %v2135_v24  ;;  %v2295_v59 = vadd.f32 %v2287_v13, %v2271_v10  ;;  %v2458_v12 = vpop.f32.mrf.mxu0  ;;  %v2547_v0 = vpop.f32.mrf.mxu1 }
 0x209   :  { %v8871_v24 = vpop.permute.xlu1 %2363 }
 0x20a   :  { %2949 = vmatpush1.msra.mxu0 %v2159_v17  ;;  %v2319_v14 = vadd.f32 %v2311_v4, %v2295_v59  ;;  %v2462_v11 = vpop.f32.mrf.mxu0  ;;  %v2551_v6 = vpop.f32.mrf.mxu1  ;;  %12039 = vst [vmem:[#allocation117_spill] sm:$0xff] %v8871_v24 }
 0x20b   :  { %6494 = vmatmul.mubr.msk.f32.vlgmr.msra.gmra.mxu0 %vm2371_vm1, %v12034_v33  ;;  %v2463_v44 = vadd.f32 %v2462_v11, %v8871_v24 }
 0x20c   :  { %v2343_v8 = vadd.f32 %v2335_v34, %v2319_v14  ;;  %2988 = vmatprep.mubr.f32.mxu0 %v12035_v9  ;;  %v2464_v53 = vpop.f32.mrf.mxu0  ;;  %v2553_v38 = vpop.f32.mrf.mxu1 }
 0x20d   :  { %v2465_v28 = vadd.f32 %v2464_v53, %v8871_v24 }
 0x20e   :  { %3038 = vmatpush1.msra.mxu1 %v2343_v8  ;;  %v2468_v26 = vpop.f32.mrf.mxu0  ;;  %v2557_v2 = vpop.f32.mrf.mxu1 }
 0x20f   :  { %6498 = vmatmul.mubr.msk.f32.vlgmr.msra.gmra.mxu1 %vm2371_vm1, %v12034_v33  ;;  %6495 = vmatmul.mubr.msk.f32.gmra.mxu0 %vm2371_vm1, %v12036_v19  ;;  %v8873_v33 = vpop.permute.xlu0 %2368  ;;  %v8875_v8 = vpop.permute.xlu1 %2353 }
 0x210   :  { %3077 = vmatprep.mubr.f32.mxu1 %v12035_v9  ;;  %2994 = vmatprep.mubr.f32.mxu0 %v12035_v9  ;;  %v2470_v63 = vpop.f32.mrf.mxu0  ;;  %v2559_v60 = vpop.f32.mrf.mxu1  ;;  %12040 = vst [vmem:[#allocation152_spill] sm:$0xff] %v8873_v33  ;;  %12041 = vst [vmem:[#allocation118_spill] sm:$0xff] %v8875_v8  ;;  %v2453_v45 = vadd.f32 %v2452_v39, %v8875_v8  ;;  %v2540_v41 = vadd.f32 %v2539_v23, %v8875_v8 }
 0x211   :  { %v2542_v51 = vadd.f32 %v2541_v29, %v8875_v8  ;;  %v2560_v23 = vadd.f32 %v2559_v60, %v8873_v33  ;;  %v2469_v15 = vadd.f32 %v2468_v26, %v8873_v33 }
 0x212   :  { %v8884_v3 = vmax.f32 %v2453_v45, 0.0  ;;  %v2471_v45 = vadd.f32 %v2470_v63, %v8873_v33 }
 0x213   :  { %6499 = vmatmul.mubr.msk.f32.gmra.mxu1 %vm2371_vm1, %v12036_v19  ;;  %6496 = vmatmul.mubr.msk.f32.gmra.mxu0 %vm2371_vm1, %v12037_v5  ;;  %v8879_v61 = vpop.permute.xlu0 %2358  ;;  %v8902_v11 = vmax.f32 %v2542_v51, 0.0  ;;  %v8921_v51 = vmax.f32 %v2560_v23, 0.0 }
 0x214   :  { %3083 = vmatprep.mubr.f32.mxu1 %v12035_v9  ;;  %3000 = vmatprep.mubr.f32.mxu0 %v12035_v9  ;;  %12042 = vst [vmem:[#allocation133_spill] sm:$0xff] %v8879_v61  ;;  %12044 = vst [vmem:[#allocation149_spill] sm:$0xff] %v8884_v3  ;;  %v2457_v57 = vadd.f32 %v2456_v47, %v8879_v61  ;;  %v2546_v54 = vadd.f32 %v2545_v52, %v8879_v61 }
 0x215   :  { %v2548_v39 = vadd.f32 %v2547_v0, %v8879_v61  ;;  %v2554_v47 = vadd.f32 %v2553_v38, %v8871_v24  ;;  %v2558_v52 = vadd.f32 %v2557_v2, %v8873_v33  ;;  %v8900_v0 = vmax.f32 %v2540_v41, 0.0  ;;  %12046 = vst [vmem:[#allocation92_spill] sm:$0xff] %v8902_v11  ;;  %12055 = vst [vmem:[#allocation148_spill] sm:$0xff] %v8921_v51 }
 0x216   :  { %v8907_v63 = vmax.f32 %v2546_v54, 0.0  ;;  %v8913_v38 = vmax.f32 %v2463_v44, 0.0  ;;  %v8917_v2 = vmax.f32 %v2465_v28, 0.0 }
 0x217   :  { %6500 = vmatmul.mubr.msk.f32.gmra.mxu1 %vm2371_vm1, %v12037_v5  ;;  %6497 = vmatmul.mubr.msk.f32.gmra.mxu0 %vm2371_vm1, %v12038_v31  ;;  %12045 = vst [vmem:[#allocation150_spill] sm:$0xff] %v8900_v0  ;;  %v8911_v16 = vmax.f32 %v2548_v39, 0.0  ;;  %v8923_v41 = vmax.f32 %v2554_v47, 0.0  ;;  %v8927_v54 = vmax.f32 %v2558_v52, 0.0 }
 0x218   :  { %3089 = vmatprep.mubr.f32.mxu1 %v12035_v9  ;;  %4224 = vmatprep.mubr.f32.mxu0 %v12035_v9  ;;  %12048 = vst [vmem:[#allocation114_spill] sm:$0xff] %v8907_v63  ;;  %12051 = vst [vmem:[#allocation132_spill] sm:$0xff] %v8913_v38 }
 0x219   :  { %12050 = vst [vmem:[#allocation131_spill] sm:$0xff] %v8911_v16  ;;  %12053 = vst [vmem:[#allocation90_spill] sm:$0xff] %v8917_v2  ;;  %v3302_v22 = vmul.f32 %v8927_v54, %v12086_v20 }
 0x21a   :  { %12056 = vst [vmem:[#allocation111_spill] sm:$0xff] %v8923_v41  ;;  %12058 = vst [vmem:[#allocation129_spill] sm:$0xff] %v8927_v54 }
 0x21b   :  { %6501 = vmatmul.mubr.msk.f32.gmra.mxu1 %vm2371_vm1, %v12038_v31  ;;  %v2451_v31 = vadd.f32 %v2450_v55, %v8875_v8  ;;  %v2459_v55 = vadd.f32 %v2458_v12, %v8879_v61 }
 0x21c   :  { %4313 = vmatprep.mubr.f32.mxu1 %v12035_v9 }
 0x21d   :  { %v8881_v43 = vmax.f32 %v2451_v31, 0.0  ;;  %v2552_v31 = vadd.f32 %v2551_v6, %v8871_v24  ;;  %v8904_v6 = vmax.f32 %v2457_v57, 0.0  ;;  %v8909_v60 = vmax.f32 %v2459_v55, 0.0 }
 0x21f   :  { %12043 = vst [vmem:[#allocation134_spill] sm:$0xff] %v8881_v43  ;;  %12047 = vst [vmem:[#allocation93_spill] sm:$0xff] %v8904_v6  ;;  %v8915_v26 = vmax.f32 %v2552_v31, 0.0 }
 0x220   :  { %12049 = vst [vmem:[#allocation115_spill] sm:$0xff] %v8909_v60 }
 0x221   :  { %12052 = vst [vmem:[#allocation147_spill] sm:$0xff] %v8915_v26 }
 0x23b   :  { %v2628_v21 = vpop.f32.mrf.mxu0 }
 0x23c   :  { %v2629_v53 = vadd.f32 %v2628_v21, %v8875_v8  ;;  %v8925_v21 = vmax.f32 %v2469_v15, 0.0 }
 0x23d   :  { %v2630_v13 = vpop.f32.mrf.mxu0 }
 0x23e   :  { %12057 = vst [vmem:[#allocation112_spill] sm:$0xff] %v8925_v21  ;;  %v8931_v39 = vmax.f32 %v2629_v53, 0.0  ;;  %v2631_v28 = vadd.f32 %v2630_v13, %v8875_v8  ;;  %v12061_v53 = vld [vmem:[#allocation19_spill] sm:$0xff]  ;;  %v3294_v50 = vmul.f32 %v8925_v21, %v12085_v58 }
 0x23f   :  { %v2717_v49 = vpop.f32.mrf.mxu1 }
 0x240   :  { %12060 = vst [vmem:[#allocation105_spill] sm:$0xff] %v8931_v39  ;;  %v2718_v44 = vadd.f32 %v2717_v49, %v8875_v8  ;;  %v12062_v49 = vld [vmem:[#allocation20_spill] sm:$0xff] }
 0x241   :  { %v2719_v10 = vpop.f32.mrf.mxu1  ;;  %v3183_v13 = vmul.f32 %v8921_v51, %v12062_v49 }
 0x242   :  { %v2634_v4 = vpop.f32.mrf.mxu0  ;;  %v2720_v31 = vadd.f32 %v2719_v10, %v8875_v8 }
 0x244   :  { %v2636_v59 = vpop.f32.mrf.mxu0 }
 0x245   :  { %v2723_v17 = vpop.f32.mrf.mxu1  ;;  %v2637_v52 = vadd.f32 %v2636_v59, %v8879_v61  ;;  %v8953_v59 = vmax.f32 %v2631_v28, 0.0 }
 0x246   :  { %v2724_v23 = vadd.f32 %v2723_v17, %v8879_v61 }
 0x247   :  { %v2725_v34 = vpop.f32.mrf.mxu1  ;;  %12065 = vst [vmem:[#allocation106_spill] sm:$0xff] %v8953_v59 }
 0x248   :  { %v2640_v14 = vpop.f32.mrf.mxu0  ;;  %v8964_v18 = vmax.f32 %v2724_v23, 0.0  ;;  %v12078_v23 = vld [vmem:[#allocation25_spill] sm:$0xff] }
 0x249   :  { %v2641_v10 = vadd.f32 %v2640_v14, %v8871_v24 }
 0x24a   :  { %v2729_v19 = vpop.f32.mrf.mxu1  ;;  %v2642_v5 = vpop.f32.mrf.mxu0  ;;  %12070 = vst [vmem:[#allocation84_spill] sm:$0xff] %v8964_v18 }
 0x24b   :  { %v2643_v17 = vadd.f32 %v2642_v5, %v8871_v24  ;;  %v8966_v5 = vmax.f32 %v2637_v52, 0.0  ;;  %v8971_v28 = vmax.f32 %v2641_v10, 0.0  ;;  %v3303_v52 = vmul.f32 %v8921_v51, %v12078_v23  ;;  %v12081_v10 = vld [vmem:[#allocation16_spill] sm:$0xff] }
 0x24c   :  { %v2731_v40 = vpop.f32.mrf.mxu1 }
 0x24d   :  { %v2732_v56 = vadd.f32 %v2731_v40, %v8871_v24  ;;  %12071 = vst [vmem:[#allocation144_spill] sm:$0xff] %v8966_v5  ;;  %12073 = vst [vmem:[#allocation103_spill] sm:$0xff] %v8971_v28  ;;  %v8975_v40 = vmax.f32 %v2643_v17, 0.0  ;;  %v12082_v17 = vld [vmem:[#allocation17_spill] sm:$0xff] }
 0x24f   :  { %v2646_v42 = vpop.f32.mrf.mxu0  ;;  %12075 = vst [vmem:[#allocation126_spill] sm:$0xff] %v8975_v40 }
 0x250   :  { %v2735_v29 = vpop.f32.mrf.mxu1  ;;  %v2647_v47 = vadd.f32 %v2646_v42, %v8873_v33 }
 0x251   :  { %v2648_v37 = vpop.f32.mrf.mxu0 }
 0x252   :  { %v2649_v12 = vadd.f32 %v2648_v37, %v8873_v33  ;;  %v8919_v37 = vmax.f32 %v2471_v45, 0.0  ;;  %v2737_v57 = vpop.f32.mrf.mxu1  ;;  %v2635_v45 = vadd.f32 %v2634_v4, %v8879_v61  ;;  %v2730_v4 = vadd.f32 %v2729_v19, %v8871_v24 }
 0x253   :  { %v2738_v15 = vadd.f32 %v2737_v57, %v8873_v33  ;;  %v8951_v57 = vmax.f32 %v2718_v44, 0.0  ;;  %v8960_v1 = vmax.f32 %v2647_v47, 0.0  ;;  %v2736_v44 = vadd.f32 %v2735_v29, %v8873_v33 }
 0x254   :  { %12054 = vst [vmem:[#allocation91_spill] sm:$0xff] %v8919_v37  ;;  %v8929_v55 = vmax.f32 %v2649_v12, 0.0  ;;  %v2726_v12 = vadd.f32 %v2725_v34, %v8879_v61  ;;  %v3175_v30 = vmul.f32 %v8919_v37, %v12061_v53  ;;  %v8955_v34 = vmax.f32 %v2720_v31, 0.0 }
 0x255   :  { %12064 = vst [vmem:[#allocation146_spill] sm:$0xff] %v8951_v57  ;;  %v8958_v27 = vmax.f32 %v2635_v45, 0.0  ;;  %12068 = vst [vmem:[#allocation143_spill] sm:$0xff] %v8960_v1  ;;  %v8962_v14 = vmax.f32 %v2738_v15, 0.0  ;;  %v8973_v31 = vmax.f32 %v2730_v4, 0.0  ;;  %v8977_v47 = vmax.f32 %v2732_v56, 0.0 }
 0x256   :  { %12059 = vst [vmem:[#allocation88_spill] sm:$0xff] %v8929_v55  ;;  %v3199_v42 = vmul.f32 %v8929_v55, %v12063_v32  ;;  %12066 = vst [vmem:[#allocation127_spill] sm:$0xff] %v8955_v34  ;;  %v3191_v19 = vadd.f32 %v3183_v13, %v3175_v30  ;;  %v8968_v7 = vmax.f32 %v2726_v12, 0.0  ;;  %v12077_v15 = vld [vmem:[#allocation24_spill] sm:$0xff]  ;;  %v3174_v4 = vmul.f32 %v8925_v21, %v12081_v10  ;;  %v12083_v56 = vld [vmem:[#allocation26_spill] sm:$0xff] }
 0x257   :  { %12067 = vst [vmem:[#allocation128_spill] sm:$0xff] %v8958_v27  ;;  %12069 = vst [vmem:[#allocation83_spill] sm:$0xff] %v8962_v14  ;;  %v3295_v30 = vmul.f32 %v8919_v37, %v12077_v15  ;;  %v12079_v13 = vld [vmem:[#allocation32_spill] sm:$0xff]  ;;  %v3215_v29 = vmul.f32 %v8962_v14, %v12080_v36  ;;  %v8993_v25 = vmax.f32 %v2736_v44, 0.0  ;;  %v3318_v9 = vmul.f32 %v8960_v1, %v12088_v35 }
 0x258   :  { %12072 = vst [vmem:[#allocation102_spill] sm:$0xff] %v8968_v7  ;;  %12074 = vst [vmem:[#allocation125_spill] sm:$0xff] %v8973_v31  ;;  %v3207_v45 = vadd.f32 %v3199_v42, %v3191_v19  ;;  %v3319_v12 = vmul.f32 %v8929_v55, %v12079_v13  ;;  %v3182_v42 = vmul.f32 %v8927_v54, %v12082_v17 }
 0x259   :  { %12076 = vst [vmem:[#allocation141_spill] sm:$0xff] %v8977_v47  ;;  %v3198_v19 = vmul.f32 %v8960_v1, %v12083_v56  ;;  %12084 = vst [vmem:[#allocation75_spill] sm:$0xff] %v8993_v25  ;;  %v3311_v62 = vadd.f32 %v3303_v52, %v3295_v30  ;;  %v3173_v33 = vmul.f32 %v8917_v2, %v12061_v53  ;;  %v12089_v52 = vld [vmem:[#allocation33_spill] sm:$0xff] }
 0x25a   :  { %v8999_v48 = vadd.f32 %v3215_v29, %v3207_v45  ;;  %v3190_v46 = vadd.f32 %v3182_v42, %v3174_v4  ;;  %v3310_v61 = vadd.f32 %v3302_v22, %v3294_v50  ;;  %v3181_v44 = vmul.f32 %v8923_v41, %v12062_v49  ;;  %v12090_v42 = vld [vmem:[#allocation34_spill] sm:$0xff]  ;;  %v12092_v1 = vld [vmem:[#allocation37_spill] sm:$0xff] }
 0x25b   :  { %v3327_v24 = vadd.f32 %v3319_v12, %v3311_v62  ;;  %v3197_v30 = vmul.f32 %v8975_v40, %v12063_v32  ;;  %v3335_v8 = vmul.f32 %v8962_v14, %v12089_v52  ;;  %v3293_v29 = vmul.f32 %v8917_v2, %v12077_v15 }
 0x25c   :  { %12087 = vst [vmem:[#allocation76_spill] sm:$0xff] %v8999_v48  ;;  %v3206_v45 = vadd.f32 %v3198_v19, %v3190_v46  ;;  %v3301_v4 = vmul.f32 %v8923_v41, %v12078_v23  ;;  %v3214_v62 = vmul.f32 %v8993_v25, %v12090_v42  ;;  %v3326_v50 = vadd.f32 %v3318_v9, %v3310_v61 }
 0x25d   :  { %v3189_v22 = vadd.f32 %v3181_v44, %v3173_v33  ;;  %v3317_v12 = vmul.f32 %v8975_v40, %v12079_v13  ;;  %v9019_v48 = vadd.f32 %v3335_v8, %v3327_v24  ;;  %v3334_v14 = vmul.f32 %v8993_v25, %v12092_v1 }
 0x25e   :  { %v3213_v46 = vmul.f32 %v8977_v47, %v12080_v36  ;;  %v3172_v19 = vmul.f32 %v8913_v38, %v12081_v10  ;;  %v3309_v2 = vadd.f32 %v3301_v4, %v3293_v29  ;;  %v3180_v61 = vmul.f32 %v8915_v26, %v12082_v17 }
 0x25f   :  { %12091 = vst [vmem:[#allocation100_spill] sm:$0xff] %v9019_v48  ;;  %v3205_v41 = vadd.f32 %v3197_v30, %v3189_v22  ;;  %v3196_v9 = vmul.f32 %v8971_v28, %v12083_v56  ;;  %v9031_v33 = vadd.f32 %v3214_v62, %v3206_v45  ;;  %v3333_v24 = vmul.f32 %v8977_v47, %v12089_v52 }
 0x260   :  { %v3292_v8 = vmul.f32 %v8913_v38, %v12085_v58  ;;  %v3300_v44 = vmul.f32 %v8915_v26, %v12086_v20  ;;  %v9039_v48 = vadd.f32 %v3334_v14, %v3326_v50  ;;  %v3325_v30 = vadd.f32 %v3317_v12, %v3309_v2 }
 0x261   :  { %12093 = vst [vmem:[#allocation142_spill] sm:$0xff] %v9031_v33  ;;  %v3188_v29 = vadd.f32 %v3180_v61, %v3172_v19  ;;  %v3316_v4 = vmul.f32 %v8971_v28, %v12088_v35  ;;  %v3212_v45 = vmul.f32 %v8973_v31, %v12090_v42  ;;  %v3171_v22 = vmul.f32 %v8909_v60, %v12061_v53 }
 0x262   :  { %v3308_v62 = vadd.f32 %v3300_v44, %v3292_v8  ;;  %v3179_v33 = vmul.f32 %v8911_v16, %v12062_v49  ;;  %v9049_v38 = vadd.f32 %v3213_v46, %v3205_v41  ;;  %v3195_v2 = vmul.f32 %v8966_v5, %v12063_v32 }
 0x263   :  { %v3204_v26 = vadd.f32 %v3196_v9, %v3188_v29  ;;  %v3291_v14 = vmul.f32 %v8909_v60, %v12077_v15  ;;  %v3299_v19 = vmul.f32 %v8911_v16, %v12078_v23  ;;  %v3315_v61 = vmul.f32 %v8966_v5, %v12079_v13 }
 0x264   :  { %v3324_v50 = vadd.f32 %v3316_v4, %v3308_v62  ;;  %v3187_v12 = vadd.f32 %v3179_v33, %v3171_v22  ;;  %v9059_v8 = vadd.f32 %v3333_v24, %v3325_v30  ;;  %v3332_v41 = vmul.f32 %v8973_v31, %v12092_v1 }
 0x265   :  { %v3170_v46 = vmul.f32 %v8904_v6, %v12081_v10  ;;  %v3178_v9 = vmul.f32 %v8907_v63, %v12082_v17  ;;  %v3211_v33 = vmul.f32 %v8968_v7, %v12080_v36  ;;  %v3307_v29 = vadd.f32 %v3299_v19, %v3291_v14 }
 0x266   :  { %v3203_v44 = vadd.f32 %v3195_v2, %v3187_v12  ;;  %v3194_v4 = vmul.f32 %v8958_v27, %v12083_v56  ;;  %v9071_v62 = vadd.f32 %v3212_v45, %v3204_v26  ;;  %v3331_v24 = vmul.f32 %v8968_v7, %v12089_v52 }
 0x267   :  { %v3290_v30 = vmul.f32 %v8904_v6, %v12085_v58  ;;  %v3298_v22 = vmul.f32 %v8907_v63, %v12086_v20  ;;  %v9079_v5 = vadd.f32 %v3332_v41, %v3324_v50  ;;  %v3323_v2 = vadd.f32 %v3315_v61, %v3307_v29 }
 0x268   :  { %v3186_v12 = vadd.f32 %v3178_v9, %v3170_v46  ;;  %v3314_v14 = vmul.f32 %v8958_v27, %v12088_v35  ;;  %v3210_v26 = vmul.f32 %v8964_v18, %v12090_v42  ;;  %v3169_v19 = vmul.f32 %v8884_v3, %v12061_v53 }
 0x269   :  { %v3306_v45 = vadd.f32 %v3298_v22, %v3290_v30  ;;  %v3177_v6 = vmul.f32 %v8902_v11, %v12062_v49  ;;  %v9089_v7 = vadd.f32 %v3211_v33, %v3203_v44  ;;  %v3193_v50 = vmul.f32 %v8953_v59, %v12063_v32 }
 0x26a   :  { %v3202_v63 = vadd.f32 %v3194_v4, %v3186_v12  ;;  %v3289_v61 = vmul.f32 %v8884_v3, %v12077_v15  ;;  %v3330_v46 = vmul.f32 %v8964_v18, %v12092_v1  ;;  %v3297_v53 = vmul.f32 %v8902_v11, %v12078_v23  ;;  %v12095_v12 = vld [vmem:[#allocation53_spill] sm:$0xff]  ;;  %v12119_v3 = vld [vmem:[#allocation36_spill] sm:$0xff] }
 0x26b   :  { %v3322_v41 = vadd.f32 %v3314_v14, %v3306_v45  ;;  %v3185_v9 = vadd.f32 %v3177_v6, %v3169_v19  ;;  %v9099_v29 = vadd.f32 %v3331_v24, %v3323_v2  ;;  %v3313_v49 = vmul.f32 %v8953_v59, %v12079_v13  ;;  %v12094_v2 = vld [vmem:[#allocation52_spill] sm:$0xff]  ;;  %v12097_v19 = vld [vmem:[#allocation54_spill] sm:$0xff]  ;;  %v12121_v18 = vld [vmem:[#allocation133_spill] sm:$0xff] }
 0x26c   :  { %v3168_v44 = vmul.f32 %v8881_v43, %v12081_v10  ;;  %v3176_v32 = vmul.f32 %v8900_v0, %v12082_v17  ;;  %v3209_v33 = vmul.f32 %v8955_v34, %v12080_v36  ;;  %v3305_v4 = vadd.f32 %v3297_v53, %v3289_v61  ;;  %v12099_v53 = vld [vmem:[#allocation61_spill] sm:$0xff] }
 0x26d   :  { %v3201_v15 = vadd.f32 %v3193_v50, %v3185_v9  ;;  %v3192_v6 = vmul.f32 %v8931_v39, %v12083_v56  ;;  %v9111_v23 = vadd.f32 %v3210_v26, %v3202_v63  ;;  %v3329_v24 = vmul.f32 %v8955_v34, %v12089_v52  ;;  %v12096_v26 = vld [vmem:[#allocation59_spill] sm:$0xff] }
 0x26e   :  { %v3288_v13 = vmul.f32 %v8881_v43, %v12085_v58  ;;  %v3296_v10 = vmul.f32 %v8900_v0, %v12086_v20  ;;  %v9119_v17 = vadd.f32 %v3330_v46, %v3322_v41  ;;  %v3321_v30 = vadd.f32 %v3313_v49, %v3305_v4  ;;  %v12098_v41 = vld [vmem:[#allocation55_spill] sm:$0xff]  ;;  %v12110_v43 = vld [vmem:[#allocation90_spill] sm:$0xff] }
 0x26f   :  { %v3184_v22 = vadd.f32 %v3176_v32, %v3168_v44  ;;  %v3312_v36 = vmul.f32 %v8931_v39, %v12088_v35  ;;  %v3208_v63 = vmul.f32 %v8951_v57, %v12090_v42  ;;  %v3415_v52 = vmul.f32 %v8919_v37, %v12094_v2  ;;  %v12100_v44 = vld [vmem:[#allocation56_spill] sm:$0xff]  ;;  %v12108_v39 = vld [vmem:[#allocation65_spill] sm:$0xff] }
 0x270   :  { %v3304_v56 = vadd.f32 %v3296_v10, %v3288_v13  ;;  %v3423_v58 = vmul.f32 %v8921_v51, %v12095_v12  ;;  %v9129_v14 = vadd.f32 %v3209_v33, %v3201_v15  ;;  %v3439_v45 = vmul.f32 %v8929_v55, %v12096_v26  ;;  %v12101_v15 = vld [vmem:[#allocation57_spill] sm:$0xff]  ;;  %v12103_v13 = vld [vmem:[#allocation83_spill] sm:$0xff] }
 0x271   :  { %v3200_v20 = vadd.f32 %v3192_v6, %v3184_v22  ;;  %v3535_v50 = vmul.f32 %v8919_v37, %v12097_v19  ;;  %v3328_v42 = vmul.f32 %v8951_v57, %v12092_v1  ;;  %v3543_v46 = vmul.f32 %v8921_v51, %v12098_v41  ;;  %v12102_v6 = vld [vmem:[#allocation60_spill] sm:$0xff]  ;;  %v12104_v22 = vld [vmem:[#allocation66_spill] sm:$0xff] }
 0x272   :  { %v3320_v35 = vadd.f32 %v3312_v36, %v3304_v56  ;;  %v3431_v61 = vadd.f32 %v3423_v58, %v3415_v52  ;;  %v9139_v9 = vadd.f32 %v3329_v24, %v3321_v30  ;;  %v3559_v49 = vmul.f32 %v8929_v55, %v12099_v53  ;;  %v12105_v36 = vld [vmem:[#allocation143_spill] sm:$0xff]  ;;  %v12106_v30 = vld [vmem:[#allocation58_spill] sm:$0xff] }
 0x273   :  { %v3414_v32 = vmul.f32 %v8925_v21, %v12100_v44  ;;  %v3422_v33 = vmul.f32 %v8927_v54, %v12101_v15  ;;  %v3455_v10 = vmul.f32 %v12103_v13, %v12102_v6  ;;  %v3551_v1 = vadd.f32 %v3543_v46, %v3535_v50  ;;  %v12107_v55 = vld [vmem:[#allocation62_spill] sm:$0xff] }
 0x274   :  { %v3447_v4 = vadd.f32 %v3439_v45, %v3431_v61  ;;  %v3438_v56 = vmul.f32 %v12105_v36, %v12104_v22  ;;  %v3216_v52 = vadd.f32 %v3208_v63, %v3200_v20  ;;  %v3534_v58 = vmul.f32 %v8925_v21, %v12106_v30  ;;  %v12109_v61 = vld [vmem:[#allocation70_spill] sm:$0xff]  ;;  %v12111_v20 = vld [vmem:[#allocation111_spill] sm:$0xff] }
 0x275   :  { %v3430_v24 = vadd.f32 %v3422_v33, %v3414_v32  ;;  %v3542_v51 = vmul.f32 %v8927_v54, %v12107_v55  ;;  %v3336_v37 = vadd.f32 %v3328_v42, %v3320_v35  ;;  %v3567_v57 = vadd.f32 %v3559_v49, %v3551_v1  ;;  %v12112_v54 = vld [vmem:[#allocation69_spill] sm:$0xff]  ;;  %v12113_v1 = vld [vmem:[#allocation118_spill] sm:$0xff] }
 0x276   :  { %v3575_v45 = vmul.f32 %v12103_v13, %v12108_v39  ;;  %v3558_v0 = vmul.f32 %v12105_v36, %v12109_v61  ;;  %v3413_v63 = vmul.f32 %v12110_v43, %v12094_v2  ;;  %v3421_v32 = vmul.f32 %v12111_v20, %v12095_v12 }
 0x277   :  { %v3446_v50 = vadd.f32 %v3438_v56, %v3430_v24  ;;  %v3550_v46 = vadd.f32 %v3542_v51, %v3534_v58  ;;  %v9163_v21 = vadd.f32 %v3455_v10, %v3447_v4  ;;  %v3454_v35 = vmul.f32 %v8993_v25, %v12112_v54  ;;  %v12114_v24 = vld [vmem:[#allocation74_spill] sm:$0xff] }
 0x278   :  { %v3437_v42 = vmul.f32 %v8975_v40, %v12096_v26  ;;  %v3533_v49 = vmul.f32 %v12110_v43, %v12097_v19  ;;  %v3574_v58 = vmul.f32 %v8993_v25, %v12114_v24  ;;  %v3429_v36 = vadd.f32 %v3421_v32, %v3413_v63  ;;  %v12140_v26 = vld [vmem:[#allocation152_spill] sm:$0xff] }
 0x279   :  { %v3566_v56 = vadd.f32 %v3558_v0, %v3550_v46  ;;  %v9174_v34 = vadd.f32 %v3575_v45, %v3567_v57  ;;  %v3453_v4 = vmul.f32 %v8977_v47, %v12102_v6  ;;  %v3541_v10 = vmul.f32 %v12111_v20, %v12098_v41  ;;  %v12116_v45 = vld [vmem:[#allocation132_spill] sm:$0xff]  ;;  %v12117_v20 = vld [vmem:[#allocation147_spill] sm:$0xff]  ;;  %v12136_v41 = vld [vmem:[#allocation41_spill] sm:$0xff] }
 0x27a   :  { %v3557_v59 = vmul.f32 %v8975_v40, %v12099_v53  ;;  %v9185_v46 = vadd.f32 %v3454_v35, %v3446_v50  ;;  %v3573_v57 = vmul.f32 %v8977_v47, %v12108_v39  ;;  %v3412_v25 = vmul.f32 %v12116_v45, %v12100_v44 }
 0x27b   :  { %v3549_v32 = vadd.f32 %v3541_v10, %v3533_v49  ;;  %v3420_v11 = vmul.f32 %v12117_v20, %v12101_v15  ;;  %v9198_v50 = vadd.f32 %v3574_v58, %v3566_v56  ;;  %v9204_v47 = vmul.f32 %v8971_v28, %v12104_v22  ;;  %v12122_v56 = vld [vmem:[#allocation35_spill] sm:$0xff] }
 0x27d   :  { %v3565_v10 = vadd.f32 %v3557_v59, %v3549_v32  ;;  %v9220_v44 = vadd.f32 %v3420_v11, %v3412_v25 }
 0x27f   :  { %v9239_v11 = vadd.f32 %v3573_v57, %v3565_v10 }
 0x283   :  { %v2806_v33 = vpop.f32.mrf.mxu0 }
 0x284   :  { %v2807_v51 = vadd.f32 %v2806_v33, %v12113_v1  ;;  %v3445_v33 = vadd.f32 %v3437_v42, %v3429_v36  ;;  %v12120_v42 = vld [vmem:[#allocation38_spill] sm:$0xff] }
 0x285   :  { %v2808_v13 = vpop.f32.mrf.mxu0 }
 0x286   :  { %v9182_v43 = vmax.f32 %v2807_v51, 0.0  ;;  %v2809_v0 = vadd.f32 %v2808_v13, %v12113_v1  ;;  %v9214_v15 = vadd.f32 %v3453_v4, %v3445_v33 }
 0x287   :  { %v2895_v63 = vpop.f32.mrf.mxu1 }
 0x288   :  { %12115 = vst [vmem:[#allocation101_spill] sm:$0xff] %v9182_v43  ;;  %v2896_v40 = vadd.f32 %v2895_v63, %v12113_v1  ;;  %v9194_v51 = vmax.f32 %v2809_v0, 0.0  ;;  %v3224_v13 = vmul.f32 %v9182_v43, %v12119_v3  ;;  %v3344_v49 = vmul.f32 %v9182_v43, %v12120_v42  ;;  %v12124_v43 = vld [vmem:[#allocation40_spill] sm:$0xff] }
 0x289   :  { %v2897_v36 = vpop.f32.mrf.mxu1  ;;  %v9208_v63 = vmul.f32 %v8973_v31, %v12112_v54  ;;  %v9224_v54 = vmul.f32 %v12116_v45, %v12106_v30  ;;  %v12135_v30 = vld [vmem:[#allocation39_spill] sm:$0xff] }
 0x28a   :  { %12118 = vst [vmem:[#allocation123_spill] sm:$0xff] %v9194_v51  ;;  %v2812_v35 = vpop.f32.mrf.mxu0  ;;  %v2898_v0 = vadd.f32 %v2897_v36, %v12113_v1  ;;  %v3225_v58 = vmul.f32 %v9194_v51, %v12122_v56  ;;  %v9216_v39 = vmax.f32 %v2896_v40, 0.0  ;;  %v3345_v22 = vmul.f32 %v9194_v51, %v12124_v43 }
 0x28b   :  { %v2813_v27 = vadd.f32 %v2812_v35, %v12121_v18  ;;  %12125 = vst [vmem:[#allocation139_spill] sm:$0xff] %v9224_v54  ;;  %v9230_v33 = vadd.f32 %v3224_v13, %v3216_v52  ;;  %v9237_v25 = vadd.f32 %v3344_v49, %v3336_v37  ;;  %v12131_v37 = vld [vmem:[#allocation42_spill] sm:$0xff]  ;;  %v12132_v49 = vld [vmem:[#allocation45_spill] sm:$0xff] }
 0x28c   :  { %12123 = vst [vmem:[#allocation124_spill] sm:$0xff] %v9216_v39  ;;  %v2814_v32 = vpop.f32.mrf.mxu0  ;;  %v9232_v40 = vmax.f32 %v2898_v0, 0.0  ;;  %v9235_v53 = vadd.f32 %v3225_v58, %v9129_v14  ;;  %v9247_v52 = vadd.f32 %v3345_v22, %v9139_v9  ;;  %v12130_v0 = vld [vmem:[#allocation117_spill] sm:$0xff]  ;;  %v9254_v57 = vmul.f32 %v9216_v39, %v12131_v37 }
 0x28d   :  { %v2901_v59 = vpop.f32.mrf.mxu1  ;;  %v9226_v36 = vmax.f32 %v2813_v27, 0.0  ;;  %v2815_v4 = vadd.f32 %v2814_v32, %v12121_v18  ;;  %v9258_v10 = vmul.f32 %v9216_v39, %v12132_v49 }
 0x28e   :  { %v2902_v35 = vadd.f32 %v2901_v59, %v12121_v18  ;;  %12127 = vst [vmem:[#allocation137_spill] sm:$0xff] %v9232_v40  ;;  %v3241_v39 = vmul.f32 %v9232_v40, %v12135_v30 }
 0x28f   :  { %12126 = vst [vmem:[#allocation140_spill] sm:$0xff] %v9226_v36  ;;  %v2903_v1 = vpop.f32.mrf.mxu1  ;;  %v9241_v45 = vmax.f32 %v2815_v4, 0.0  ;;  %v3226_v59 = vmul.f32 %v9226_v36, %v12119_v3  ;;  %v3346_v22 = vmul.f32 %v9226_v36, %v12120_v42 }
 0x290   :  { %v2904_v27 = vadd.f32 %v2903_v1, %v12121_v18  ;;  %v9249_v13 = vmax.f32 %v2902_v35, 0.0 }
 0x291   :  { %12128 = vst [vmem:[#allocation119_spill] sm:$0xff] %v9241_v45  ;;  %v2818_v51 = vpop.f32.mrf.mxu0  ;;  %v3227_v9 = vmul.f32 %v9241_v45, %v12122_v56  ;;  %v3347_v19 = vmul.f32 %v9241_v45, %v12124_v43  ;;  %v3234_v36 = vadd.f32 %v3226_v59, %v9111_v23 }
 0x292   :  { %12129 = vst [vmem:[#allocation136_spill] sm:$0xff] %v9249_v13  ;;  %v2819_v14 = vadd.f32 %v2818_v51, %v12130_v0  ;;  %v2907_v58 = vpop.f32.mrf.mxu1  ;;  %v9260_v1 = vmax.f32 %v2904_v27, 0.0  ;;  %v3361_v27 = vmul.f32 %v9232_v40, %v12136_v41  ;;  %v3242_v40 = vmul.f32 %v9249_v13, %v12131_v37 }
 0x293   :  { %v2908_v32 = vadd.f32 %v2907_v58, %v12130_v0  ;;  %v2820_v4 = vpop.f32.mrf.mxu0  ;;  %v3235_v24 = vadd.f32 %v3227_v9, %v9089_v7  ;;  %v3355_v60 = vadd.f32 %v3347_v19, %v9099_v29 }
 0x294   :  { %12133 = vst [vmem:[#allocation95_spill] sm:$0xff] %v9260_v1  ;;  %v9267_v51 = vmax.f32 %v2819_v14, 0.0  ;;  %v2821_v35 = vadd.f32 %v2820_v4, %v12130_v0  ;;  %v2909_v18 = vpop.f32.mrf.mxu1  ;;  %v3243_v23 = vmul.f32 %v9260_v1, %v12135_v30 }
 0x295   :  { %v9274_v6 = vmax.f32 %v2908_v32, 0.0  ;;  %v2910_v58 = vadd.f32 %v2909_v18, %v12130_v0 }
 0x296   :  { %12134 = vst [vmem:[#allocation19_spill] sm:$0xff] %v9267_v51  ;;  %v9280_v14 = vmax.f32 %v2821_v35, 0.0  ;;  %v3228_v4 = vmul.f32 %v9267_v51, %v12119_v3  ;;  %v3348_v45 = vmul.f32 %v9267_v51, %v12120_v42 }
 0x297   :  { %12137 = vst [vmem:[#allocation20_spill] sm:$0xff] %v9274_v6  ;;  %v2824_v31 = vpop.f32.mrf.mxu0  ;;  %v9287_v32 = vmax.f32 %v2910_v58, 0.0  ;;  %v3244_v54 = vmul.f32 %v9274_v6, %v12131_v37  ;;  %v3364_v61 = vmul.f32 %v9274_v6, %v12132_v49 }
 0x298   :  { %12138 = vst [vmem:[#allocation27_spill] sm:$0xff] %v9280_v14  ;;  %v2825_v18 = vadd.f32 %v2824_v31, %v12140_v26  ;;  %v3229_v7 = vmul.f32 %v9280_v14, %v12122_v56  ;;  %v3349_v9 = vmul.f32 %v9280_v14, %v12124_v43  ;;  %v3236_v58 = vadd.f32 %v3228_v4, %v9071_v62 }
 0x299   :  { %12139 = vst [vmem:[#allocation24_spill] sm:$0xff] %v9287_v32  ;;  %v2913_v0 = vpop.f32.mrf.mxu1  ;;  %v2826_v35 = vpop.f32.mrf.mxu0  ;;  %v3245_v29 = vmul.f32 %v9287_v32, %v12135_v30 }
 0x29a   :  { %v2914_v59 = vadd.f32 %v2913_v0, %v12140_v26  ;;  %v9300_v16 = vmax.f32 %v2825_v18, 0.0  ;;  %v2827_v31 = vadd.f32 %v2826_v35, %v12140_v26  ;;  %v3237_v28 = vadd.f32 %v3229_v7, %v9049_v38  ;;  %v12146_v7 = vld [vmem:[#allocation142_spill] sm:$0xff] }
 0x29b   :  { %v2915_v12 = vpop.f32.mrf.mxu1  ;;  %v3365_v38 = vmul.f32 %v9287_v32, %v12136_v41 }
 0x29c   :  { %12141 = vst [vmem:[#allocation25_spill] sm:$0xff] %v9300_v16  ;;  %v9306_v0 = vmax.f32 %v2914_v59, 0.0  ;;  %v2916_v2 = vadd.f32 %v2915_v12, %v12140_v26  ;;  %v9312_v62 = vmax.f32 %v2827_v31, 0.0  ;;  %v3230_v4 = vmul.f32 %v9300_v16, %v12119_v3 }
 0x29d   :  { %v3350_v18 = vmul.f32 %v9300_v16, %v12120_v42  ;;  %v3357_v12 = vadd.f32 %v3349_v9, %v9059_v8  ;;  %v9325_v59 = vadd.f32 %v3244_v54, %v3236_v58  ;;  %v9337_v9 = vadd.f32 %v3245_v29, %v3237_v28  ;;  %v12148_v58 = vld [vmem:[#allocation76_spill] sm:$0xff] }
 0x29e   :  { %12142 = vst [vmem:[#allocation32_spill] sm:$0xff] %v9306_v0  ;;  %12143 = vst [vmem:[#allocation28_spill] sm:$0xff] %v9312_v62  ;;  %v9320_v19 = vmax.f32 %v2916_v2, 0.0  ;;  %v3231_v35 = vmul.f32 %v9312_v62, %v12122_v56  ;;  %v3351_v3 = vmul.f32 %v9312_v62, %v12124_v43  ;;  %v3238_v42 = vadd.f32 %v3230_v4, %v12146_v7  ;;  %v12149_v43 = vld [vmem:[#allocation100_spill] sm:$0xff] }
 0x29f   :  { %12145 = vst [vmem:[#allocation17_spill] sm:$0xff] %v9325_v59  ;;  %v3358_v31 = vadd.f32 %v3350_v18, %v9039_v48  ;;  %v3246_v2 = vmul.f32 %v9306_v0, %v12131_v37  ;;  %v3366_v8 = vmul.f32 %v9306_v0, %v12132_v49  ;;  %12147 = vst [vmem:[#allocation26_spill] sm:$0xff] %v9337_v9 }
 0x2a0   :  { %12144 = vst [vmem:[#allocation16_spill] sm:$0xff] %v9320_v19  ;;  %v3356_v54 = vadd.f32 %v3348_v45, %v9079_v5  ;;  %v3239_v59 = vadd.f32 %v3231_v35, %v12148_v58  ;;  %v3247_v56 = vmul.f32 %v9320_v19, %v12135_v30  ;;  %v3359_v26 = vadd.f32 %v3351_v3, %v12149_v43 }
 0x2a1   :  { %v3367_v48 = vmul.f32 %v9320_v19, %v12136_v41  ;;  %v9346_v4 = vadd.f32 %v3246_v2, %v3238_v42  ;;  %v9348_v37 = vadd.f32 %v3366_v8, %v3358_v31  ;;  %v9350_v18 = vadd.f32 %v3365_v38, %v3357_v12  ;;  %v12165_v8 = vld [vmem:[#allocation85_spill] sm:$0xff] }
 0x2a2   :  { %v3363_v28 = vmul.f32 %v9260_v1, %v12136_v41  ;;  %v9354_v5 = vadd.f32 %v3364_v61, %v3356_v54  ;;  %v9356_v45 = vadd.f32 %v3243_v23, %v3235_v24  ;;  %v9358_v29 = vadd.f32 %v3242_v40, %v3234_v36  ;;  %v12159_v36 = vld [vmem:[#allocation71_spill] sm:$0xff] }
 0x2a3   :  { %12150 = vst [vmem:[#allocation18_spill] sm:$0xff] %v9346_v4  ;;  %12151 = vst [vmem:[#allocation22_spill] sm:$0xff] %v9348_v37  ;;  %v3354_v30 = vadd.f32 %v3346_v22, %v9119_v17  ;;  %v9361_v35 = vadd.f32 %v3247_v56, %v3239_v59  ;;  %v9363_v3 = vadd.f32 %v3367_v48, %v3359_v26  ;;  %v12158_v17 = vld [vmem:[#allocation63_spill] sm:$0xff]  ;;  %v12195_v37 = vld [vmem:[#allocation66_spill] sm:$0xff] }
 0x2a4   :  { %12152 = vst [vmem:[#allocation30_spill] sm:$0xff] %v9350_v18  ;;  %12153 = vst [vmem:[#allocation33_spill] sm:$0xff] %v9354_v5  ;;  %v9365_v7 = vadd.f32 %v3363_v28, %v3355_v60  ;;  %v3362_v12 = vmul.f32 %v9249_v13, %v12132_v49  ;;  %v9370_v38 = vadd.f32 %v3241_v39, %v9235_v53  ;;  %v12160_v53 = vld [vmem:[#allocation78_spill] sm:$0xff]  ;;  %v12161_v49 = vld [vmem:[#allocation64_spill] sm:$0xff] }
 0x2a5   :  { %12154 = vst [vmem:[#allocation34_spill] sm:$0xff] %v9356_v45  ;;  %12155 = vst [vmem:[#allocation37_spill] sm:$0xff] %v9361_v35  ;;  %v9373_v41 = vadd.f32 %v3361_v27, %v9247_v52  ;;  %v9377_v61 = vadd.f32 %v9254_v57, %v9230_v33  ;;  %v3471_v24 = vmul.f32 %v9312_v62, %v12158_v17  ;;  %v12162_v57 = vld [vmem:[#allocation82_spill] sm:$0xff]  ;;  %v12196_v4 = vld [vmem:[#allocation128_spill] sm:$0xff] }
 0x2a6   :  { %12156 = vst [vmem:[#allocation62_spill] sm:$0xff] %v9363_v3  ;;  %12157 = vst [vmem:[#allocation36_spill] sm:$0xff] %v9365_v7  ;;  %v9381_v26 = vadd.f32 %v3362_v12, %v3354_v30  ;;  %v9385_v60 = vadd.f32 %v9258_v10, %v9237_v25  ;;  %v3591_v39 = vmul.f32 %v9312_v62, %v12159_v36  ;;  %v12163_v10 = vld [vmem:[#allocation72_spill] sm:$0xff]  ;;  %v12192_v3 = vld [vmem:[#allocation65_spill] sm:$0xff] }
 0x2a7   :  { %v3470_v40 = vmul.f32 %v9300_v16, %v12160_v53  ;;  %v3479_v52 = vadd.f32 %v3471_v24, %v9163_v21  ;;  %v3487_v33 = vmul.f32 %v9320_v19, %v12161_v49  ;;  %v3590_v22 = vmul.f32 %v9300_v16, %v12162_v57  ;;  %v12164_v21 = vld [vmem:[#allocation79_spill] sm:$0xff]  ;;  %v12170_v24 = vld [vmem:[#allocation70_spill] sm:$0xff]  ;;  %v12198_v7 = vld [vmem:[#allocation69_spill] sm:$0xff] }
 0x2a8   :  { %v3469_v27 = vmul.f32 %v9280_v14, %v12158_v17  ;;  %v3599_v25 = vadd.f32 %v3591_v39, %v9174_v34  ;;  %v3607_v23 = vmul.f32 %v9320_v19, %v12163_v10  ;;  %v3589_v42 = vmul.f32 %v9280_v14, %v12159_v36  ;;  %v12171_v39 = vld [vmem:[#allocation103_spill] sm:$0xff]  ;;  %v12199_v45 = vld [vmem:[#allocation84_spill] sm:$0xff] }
 0x2a9   :  { %v3478_v59 = vadd.f32 %v3470_v40, %v9185_v46  ;;  %v3486_v31 = vmul.f32 %v9306_v0, %v12164_v21  ;;  %v3598_v2 = vadd.f32 %v3590_v22, %v9198_v50  ;;  %v3606_v54 = vmul.f32 %v9306_v0, %v12165_v8  ;;  %v12175_v22 = vld [vmem:[#allocation115_spill] sm:$0xff] }
 0x2aa   :  { %v3477_v58 = vadd.f32 %v3469_v27, %v9214_v15  ;;  %v9410_v56 = vadd.f32 %v3487_v33, %v3479_v52  ;;  %v3485_v34 = vmul.f32 %v9287_v32, %v12161_v49  ;;  %v3597_v46 = vadd.f32 %v3589_v42, %v9239_v11  ;;  %v12174_v33 = vld [vmem:[#allocation52_spill] sm:$0xff]  ;;  %v12178_v42 = vld [vmem:[#allocation131_spill] sm:$0xff] }
 0x2ab   :  { %v3444_v43 = vadd.f32 %v9204_v47, %v9220_v44  ;;  %v9417_v48 = vadd.f32 %v3607_v23, %v3599_v25  ;;  %v9419_v28 = vadd.f32 %v3486_v31, %v3478_v59  ;;  %v3605_v50 = vmul.f32 %v9287_v32, %v12163_v10  ;;  %v12176_v23 = vld [vmem:[#allocation139_spill] sm:$0xff]  ;;  %v12185_v32 = vld [vmem:[#allocation102_spill] sm:$0xff] }
 0x2ac   :  { %12166 = vst [vmem:[#allocation38_spill] sm:$0xff] %v9410_v56  ;;  %v3468_v15 = vmul.f32 %v9267_v51, %v12160_v53  ;;  %v9425_v30 = vadd.f32 %v3606_v54, %v3598_v2  ;;  %v3540_v11 = vmul.f32 %v12117_v20, %v12107_v55  ;;  %v3556_v47 = vmul.f32 %v12171_v39, %v12170_v24  ;;  %v12179_v2 = vld [vmem:[#allocation59_spill] sm:$0xff]  ;;  %v12180_v54 = vld [vmem:[#allocation144_spill] sm:$0xff]  ;;  %v12181_v39 = vld [vmem:[#allocation74_spill] sm:$0xff] }
 0x2ad   :  { %12167 = vst [vmem:[#allocation35_spill] sm:$0xff] %v9417_v48  ;;  %12168 = vst [vmem:[#allocation40_spill] sm:$0xff] %v9419_v28  ;;  %v3460_v12 = vadd.f32 %v9208_v63, %v3444_v43  ;;  %v9432_v44 = vadd.f32 %v3485_v34, %v3477_v58  ;;  %v9434_v40 = vadd.f32 %v3605_v50, %v3597_v46  ;;  %v12177_v63 = vld [vmem:[#allocation53_spill] sm:$0xff]  ;;  %v12183_v20 = vld [vmem:[#allocation54_spill] sm:$0xff] }
 0x2ae   :  { %12169 = vst [vmem:[#allocation42_spill] sm:$0xff] %v9425_v30  ;;  %v3484_v52 = vmul.f32 %v9274_v6, %v12164_v21  ;;  %v3411_v27 = vmul.f32 %v12175_v22, %v12174_v33  ;;  %v3548_v59 = vadd.f32 %v3540_v11, %v12176_v23  ;;  %v3419_v31 = vmul.f32 %v12178_v42, %v12177_v63  ;;  %v12182_v58 = vld [vmem:[#allocation125_spill] sm:$0xff]  ;;  %v12184_v23 = vld [vmem:[#allocation60_spill] sm:$0xff] }
 0x2af   :  { %12172 = vst [vmem:[#allocation45_spill] sm:$0xff] %v9432_v44  ;;  %12173 = vst [vmem:[#allocation39_spill] sm:$0xff] %v9434_v40  ;;  %v3476_v25 = vadd.f32 %v3468_v15, %v3460_v12  ;;  %v3435_v43 = vmul.f32 %v12180_v54, %v12179_v2  ;;  %v3572_v34 = vmul.f32 %v12182_v58, %v12181_v39  ;;  %v12186_v40 = vld [vmem:[#allocation55_spill] sm:$0xff] }
 0x2b0   :  { %v3588_v46 = vmul.f32 %v9267_v51, %v12162_v57  ;;  %v3604_v50 = vmul.f32 %v9274_v6, %v12165_v8  ;;  %v3531_v15 = vmul.f32 %v12175_v22, %v12183_v20  ;;  %v3564_v12 = vadd.f32 %v3556_v47, %v3548_v59  ;;  %v12188_v58 = vld [vmem:[#allocation119_spill] sm:$0xff]  ;;  %v12189_v6 = vld [vmem:[#allocation61_spill] sm:$0xff]  ;;  %v12190_v59 = vld [vmem:[#allocation56_spill] sm:$0xff] }
 0x2b1   :  { %v3427_v11 = vadd.f32 %v3419_v31, %v3411_v27  ;;  %v3451_v14 = vmul.f32 %v12185_v32, %v12184_v23  ;;  %v3539_v44 = vmul.f32 %v12178_v42, %v12186_v40  ;;  %v9457_v30 = vadd.f32 %v3484_v52, %v3476_v25  ;;  %v12191_v31 = vld [vmem:[#allocation93_spill] sm:$0xff] }
 0x2b2   :  { %v3467_v28 = vmul.f32 %v12188_v58, %v12158_v17  ;;  %v3483_v51 = vmul.f32 %v9260_v1, %v12161_v49  ;;  %v3555_v48 = vmul.f32 %v12180_v54, %v12189_v6  ;;  %v3580_v22 = vadd.f32 %v3572_v34, %v3564_v12  ;;  %v12193_v25 = vld [vmem:[#allocation57_spill] sm:$0xff] }
 0x2b3   :  { %12187 = vst [vmem:[#allocation41_spill] sm:$0xff] %v9457_v30  ;;  %v3443_v47 = vadd.f32 %v3435_v43, %v3427_v11  ;;  %v3547_v27 = vadd.f32 %v3539_v44, %v3531_v15  ;;  %v3410_v56 = vmul.f32 %v12191_v31, %v12190_v59  ;;  %v3571_v42 = vmul.f32 %v12185_v32, %v12192_v3  ;;  %v12194_v30 = vld [vmem:[#allocation114_spill] sm:$0xff] }
 0x2b4   :  { %v3587_v52 = vmul.f32 %v12188_v58, %v12159_v36  ;;  %v3418_v35 = vmul.f32 %v12194_v30, %v12193_v25  ;;  %v3434_v18 = vmul.f32 %v12196_v4, %v12195_v37  ;;  %v3596_v9 = vadd.f32 %v3588_v46, %v3580_v22  ;;  %v12197_v15 = vld [vmem:[#allocation58_spill] sm:$0xff] }
 0x2b5   :  { %v3459_v54 = vadd.f32 %v3451_v14, %v3443_v47  ;;  %v3563_v34 = vadd.f32 %v3555_v48, %v3547_v27  ;;  %v3603_v44 = vmul.f32 %v9260_v1, %v12163_v10  ;;  %v3530_v12 = vmul.f32 %v12191_v31, %v12197_v15  ;;  %v12200_v14 = vld [vmem:[#allocation140_spill] sm:$0xff] }
 0x2b6   :  { %v3426_v43 = vadd.f32 %v3418_v35, %v3410_v56  ;;  %v3538_v11 = vmul.f32 %v12194_v30, %v12107_v55  ;;  %v3554_v58 = vmul.f32 %v12196_v4, %v12170_v24  ;;  %v3450_v22 = vmul.f32 %v12199_v45, %v12198_v7 }
 0x2b7   :  { %v3475_v32 = vadd.f32 %v3467_v28, %v3459_v54  ;;  %v3579_v5 = vadd.f32 %v3571_v42, %v3563_v34  ;;  %v3466_v48 = vmul.f32 %v12200_v14, %v12160_v53  ;;  %v9487_v46 = vadd.f32 %v3604_v50, %v3596_v9  ;;  %v12201_v28 = vld [vmem:[#allocation149_spill] sm:$0xff]  ;;  %v12202_v54 = vld [vmem:[#allocation92_spill] sm:$0xff] }
 0x2b8   :  { %v3442_v35 = vadd.f32 %v3434_v18, %v3426_v43  ;;  %v3482_v56 = vmul.f32 %v9249_v13, %v12164_v21  ;;  %v3546_v47 = vadd.f32 %v3538_v11, %v3530_v12  ;;  %v3570_v30 = vmul.f32 %v12199_v45, %v12181_v39  ;;  %v12203_v18 = vld [vmem:[#allocation106_spill] sm:$0xff]  ;;  %v12204_v12 = vld [vmem:[#allocation127_spill] sm:$0xff] }
 0x2b9   :  { %v3595_v27 = vadd.f32 %v3587_v52, %v3579_v5  ;;  %v3409_v42 = vmul.f32 %v12201_v28, %v12174_v33  ;;  %v3417_v34 = vmul.f32 %v12202_v54, %v12177_v63  ;;  %v3586_v9 = vmul.f32 %v12200_v14, %v12162_v57 }
 0x2ba   :  { %v3458_v4 = vadd.f32 %v3450_v22, %v3442_v35  ;;  %v3562_v31 = vadd.f32 %v3554_v58, %v3546_v47  ;;  %v3433_v50 = vmul.f32 %v12203_v18, %v12179_v2  ;;  %v9501_v43 = vadd.f32 %v3483_v51, %v3475_v32  ;;  %v12205_v51 = vld [vmem:[#allocation123_spill] sm:$0xff] }
 0x2bb   :  { %v3602_v5 = vmul.f32 %v9249_v13, %v12165_v8  ;;  %v3425_v52 = vadd.f32 %v3417_v34, %v3409_v42  ;;  %v3449_v33 = vmul.f32 %v12204_v12, %v12184_v23  ;;  %v3529_v63 = vmul.f32 %v12201_v28, %v12183_v20  ;;  %v12206_v23 = vld [vmem:[#allocation137_spill] sm:$0xff]  ;;  %v12238_v13 = vld [vmem:[#allocation171_spill] sm:$0xff] }
 0x2bc   :  { %v3474_v11 = vadd.f32 %v3466_v48, %v3458_v4  ;;  %v3578_v45 = vadd.f32 %v3570_v30, %v3562_v31  ;;  %v3537_v58 = vmul.f32 %v12202_v54, %v12186_v40  ;;  %v9511_v22 = vadd.f32 %v3603_v44, %v3595_v27  ;;  %v12207_v40 = vld [vmem:[#allocation134_spill] sm:$0xff] }
 0x2bd   :  { %v3441_v2 = vadd.f32 %v3433_v50, %v3425_v52  ;;  %v3465_v32 = vmul.f32 %v12205_v51, %v12158_v17  ;;  %v3553_v35 = vmul.f32 %v12203_v18, %v12189_v6  ;;  %v3481_v4 = vmul.f32 %v12206_v23, %v12161_v49  ;;  %v12208_v48 = vld [vmem:[#allocation150_spill] sm:$0xff]  ;;  %v12209_v17 = vld [vmem:[#allocation105_spill] sm:$0xff] }
 0x2be   :  { %v3594_v47 = vadd.f32 %v3586_v9, %v3578_v45  ;;  %v3545_v30 = vadd.f32 %v3537_v58, %v3529_v63  ;;  %v3569_v20 = vmul.f32 %v12204_v12, %v12192_v3  ;;  %v3408_v44 = vmul.f32 %v12207_v40, %v12190_v59  ;;  %v12210_v52 = vld [vmem:[#allocation146_spill] sm:$0xff]  ;;  %v12235_v18 = vld [vmem:[#allocation169_spill] sm:$0xff] }
 0x2bf   :  { %v3457_v31 = vadd.f32 %v3449_v33, %v3441_v2  ;;  %v3416_v27 = vmul.f32 %v12208_v48, %v12193_v25  ;;  %v3432_v42 = vmul.f32 %v12209_v17, %v12195_v37  ;;  %v9527_v34 = vadd.f32 %v3482_v56, %v3474_v11  ;;  %v12212_v11 = vld [vmem:[#allocation124_spill] sm:$0xff] }
 0x2c0   :  { %v3561_v6 = vadd.f32 %v3553_v35, %v3545_v30  ;;  %v3585_v45 = vmul.f32 %v12205_v51, %v12159_v36  ;;  %v3601_v49 = vmul.f32 %v12206_v23, %v12163_v10  ;;  %v9533_v3 = vadd.f32 %v3602_v5, %v3594_v47  ;;  %v12211_v10 = vld [vmem:[#allocation101_spill] sm:$0xff]  ;;  %v12215_v47 = vld [vmem:[#allocation108_spill] sm:$0xff]  ;;  %v12233_v23 = vld [vmem:[#allocation163_spill] sm:$0xff] }
 0x2c1   :  { %v3473_v9 = vadd.f32 %v3465_v32, %v3457_v31  ;;  %v3424_v50 = vadd.f32 %v3416_v27, %v3408_v44  ;;  %v3528_v59 = vmul.f32 %v12207_v40, %v12197_v15  ;;  %v3448_v37 = vmul.f32 %v12210_v52, %v12198_v7  ;;  %v12213_v32 = vld [vmem:[#allocation107_spill] sm:$0xff]  ;;  %v12217_v31 = vld [vmem:[#allocation116_spill] sm:$0xff] }
 0x2c2   :  { %v3577_v25 = vadd.f32 %v3569_v20, %v3561_v6  ;;  %v3536_v56 = vmul.f32 %v12208_v48, %v12107_v55  ;;  %v3552_v36 = vmul.f32 %v12209_v17, %v12170_v24  ;;  %v3464_v5 = vmul.f32 %v12211_v10, %v12160_v53  ;;  %v12214_v7 = vld [vmem:[#allocation91_spill] sm:$0xff]  ;;  %v12216_v55 = vld [vmem:[#allocation148_spill] sm:$0xff] }
 0x2c3   :  { %v3440_v33 = vadd.f32 %v3432_v42, %v3424_v50  ;;  %v3480_v63 = vmul.f32 %v12212_v11, %v12164_v21  ;;  %v3568_v15 = vmul.f32 %v12210_v52, %v12181_v39  ;;  %v3655_v35 = vmul.f32 %v12214_v7, %v12213_v32  ;;  %v12218_v44 = vld [vmem:[#allocation88_spill] sm:$0xff]  ;;  %v12219_v6 = vld [vmem:[#allocation155_spill] sm:$0xff] }
 0x2c4   :  { %v3593_v58 = vadd.f32 %v3585_v45, %v3577_v25  ;;  %v3544_v2 = vadd.f32 %v3536_v56, %v3528_v59  ;;  %v3663_v30 = vmul.f32 %v12216_v55, %v12215_v47  ;;  %v9553_v20 = vadd.f32 %v3481_v4, %v3473_v9  ;;  %v12220_v45 = vld [vmem:[#allocation83_spill] sm:$0xff]  ;;  %v12221_v25 = vld [vmem:[#allocation157_spill] sm:$0xff]  ;;  %v12222_v9 = vld [vmem:[#allocation158_spill] sm:$0xff] }
 0x2c5   :  { %v3456_v24 = vadd.f32 %v3448_v37, %v3440_v33  ;;  %v3584_v53 = vmul.f32 %v12211_v10, %v12162_v57  ;;  %v3679_v21 = vmul.f32 %v12218_v44, %v12217_v31  ;;  %v3600_v39 = vmul.f32 %v12212_v11, %v12165_v8  ;;  %v12223_v56 = vld [vmem:[#allocation161_spill] sm:$0xff]  ;;  %v12224_v10 = vld [vmem:[#allocation156_spill] sm:$0xff] }
 0x2c6   :  { %v3560_v27 = vadd.f32 %v3552_v36, %v3544_v2  ;;  %v3671_v42 = vadd.f32 %v3663_v30, %v3655_v35  ;;  %v3695_v50 = vmul.f32 %v12220_v45, %v12219_v6  ;;  %v3775_v4 = vmul.f32 %v12214_v7, %v12221_v25  ;;  %v12225_v35 = vld [vmem:[#allocation159_spill] sm:$0xff]  ;;  %v12227_v11 = vld [vmem:[#allocation165_spill] sm:$0xff]  ;;  %v12228_v52 = vld [vmem:[#allocation112_spill] sm:$0xff] }
 0x2c7   :  { %v3472_v59 = vadd.f32 %v3464_v5, %v3456_v24  ;;  %v3783_v37 = vmul.f32 %v12216_v55, %v12222_v9  ;;  %v3799_v57 = vmul.f32 %v12218_v44, %v12223_v56  ;;  %v9569_v33 = vadd.f32 %v3601_v49, %v3593_v58  ;;  %v12226_v24 = vld [vmem:[#allocation109_spill] sm:$0xff]  ;;  %v12229_v44 = vld [vmem:[#allocation166_spill] sm:$0xff] }
 0x2c8   :  { %v3576_v36 = vadd.f32 %v3568_v15, %v3560_v27  ;;  %v3687_v2 = vadd.f32 %v3679_v21, %v3671_v42  ;;  %v3711_v8 = vmul.f32 %v9312_v62, %v12224_v10  ;;  %v3727_v30 = vmul.f32 %v9320_v19, %v12225_v35  ;;  %v12230_v49 = vld [vmem:[#allocation129_spill] sm:$0xff]  ;;  %v12231_v15 = vld [vmem:[#allocation168_spill] sm:$0xff]  ;;  %v12232_v21 = vld [vmem:[#allocation143_spill] sm:$0xff] }
 0x2c9   :  { %v3791_v5 = vadd.f32 %v3783_v37, %v3775_v4  ;;  %v3815_v7 = vmul.f32 %v12220_v45, %v12226_v24  ;;  %v3654_v55 = vmul.f32 %v12228_v52, %v12227_v11  ;;  %v3662_v58 = vmul.f32 %v12230_v49, %v12229_v44  ;;  %v12234_v37 = vld [vmem:[#allocation164_spill] sm:$0xff] }
 0x2ca   :  { %v3592_v17 = vadd.f32 %v3584_v53, %v3576_v36  ;;  %v3703_v48 = vadd.f32 %v3695_v50, %v3687_v2  ;;  %v3678_v27 = vmul.f32 %v12232_v21, %v12231_v15  ;;  %v9583_v42 = vadd.f32 %v3480_v63, %v3472_v59  ;;  %v12236_v53 = vld [vmem:[#allocation75_spill] sm:$0xff]  ;;  %v12237_v36 = vld [vmem:[#allocation110_spill] sm:$0xff]  ;;  %v12239_v59 = vld [vmem:[#allocation172_spill] sm:$0xff] }
 0x2cb   :  { %v3807_v40 = vadd.f32 %v3799_v57, %v3791_v5  ;;  %v3831_v4 = vmul.f32 %v9312_v62, %v12233_v23  ;;  %v3847_v45 = vmul.f32 %v9320_v19, %v12234_v37  ;;  %v3670_v12 = vadd.f32 %v3662_v58, %v3654_v55  ;;  %v2984_v54 = vpop.f32.mrf.mxu0  ;;  %v12240_v5 = vld [vmem:[#allocation174_spill] sm:$0xff]  ;;  %v12242_v58 = vld [vmem:[#allocation173_spill] sm:$0xff]  ;;  %v12265_v37 = vld [vmem:[#allocation43_spill] sm:$0xff] }
 0x2cc   :  { %v3719_v51 = vadd.f32 %v3711_v8, %v3703_v48  ;;  %v3694_v50 = vmul.f32 %v12236_v53, %v12235_v18  ;;  %v3774_v2 = vmul.f32 %v12228_v52, %v12237_v36  ;;  %v3710_v63 = vmul.f32 %v9300_v16, %v12238_v13  ;;  %v12241_v19 = vld [vmem:[#allocation118_spill] sm:$0xff]  ;;  %v12245_v13 = vld [vmem:[#allocation176_spill] sm:$0xff] }
 0x2cd   :  { %v3823_v28 = vadd.f32 %v3815_v7, %v3807_v40  ;;  %v3782_v57 = vmul.f32 %v12230_v49, %v12239_v59  ;;  %v3798_v62 = vmul.f32 %v12232_v21, %v12240_v5  ;;  %v2985_v48 = vadd.f32 %v2984_v54, %v12241_v19  ;;  %v2986_v52 = vpop.f32.mrf.mxu0  ;;  %v12266_v15 = vld [vmem:[#allocation48_spill] sm:$0xff] }
 0x2ce   :  { %v9600_v55 = vadd.f32 %v3600_v39, %v3592_v17  ;;  %v3686_v8 = vadd.f32 %v3678_v27, %v3670_v12  ;;  %v9604_v14 = vmul.f32 %v9306_v0, %v12242_v58  ;;  %v9606_v40 = vadd.f32 %v3727_v30, %v3719_v51  ;;  %v12248_v17 = vld [vmem:[#allocation177_spill] sm:$0xff]  ;;  %v12250_v39 = vld [vmem:[#allocation90_spill] sm:$0xff] }
 0x2cf   :  { %v3839_v7 = vadd.f32 %v3831_v4, %v3823_v28  ;;  %v3790_v1 = vadd.f32 %v3782_v57, %v3774_v2  ;;  %v9610_v49 = vmul.f32 %v12236_v53, %v12245_v13  ;;  %v9612_v59 = vmax.f32 %v2985_v48, 0.0  ;;  %v3073_v51 = vpop.f32.mrf.mxu1  ;;  %v2990_v30 = vpop.f32.mrf.mxu0  ;;  %v12254_v57 = vld [vmem:[#allocation111_spill] sm:$0xff]  ;;  %v12283_v0 = vld [vmem:[#allocation30_spill] sm:$0xff] }
 0x2d0   :  { %12243 = vst [vmem:[#allocation142_spill] sm:$0xff] %v9604_v14  ;;  %12244 = vst [vmem:[#allocation76_spill] sm:$0xff] %v9606_v40  ;;  %v2987_v54 = vadd.f32 %v2986_v52, %v12241_v19  ;;  %v9617_v12 = vmul.f32 %v9300_v16, %v12248_v17  ;;  %v9621_v27 = vmul.f32 %v12250_v39, %v12213_v32  ;;  %v12257_v16 = vld [vmem:[#allocation133_spill] sm:$0xff]  ;;  %v12258_v17 = vld [vmem:[#allocation44_spill] sm:$0xff] }
 0x2d1   :  { %12246 = vst [vmem:[#allocation100_spill] sm:$0xff] %v9610_v49  ;;  %12247 = vst [vmem:[#allocation63_spill] sm:$0xff] %v9612_v59  ;;  %v9623_v28 = vadd.f32 %v3847_v45, %v3839_v7  ;;  %v3702_v4 = vadd.f32 %v3694_v50, %v3686_v8  ;;  %v9625_v2 = vadd.f32 %v3798_v62, %v3790_v1  ;;  %v3075_v13 = vpop.f32.mrf.mxu1  ;;  %v2992_v58 = vpop.f32.mrf.mxu0  ;;  %v12259_v45 = vld [vmem:[#allocation46_spill] sm:$0xff]  ;;  %v12260_v1 = vld [vmem:[#allocation80_spill] sm:$0xff] }
 0x2d2   :  { %12249 = vst [vmem:[#allocation71_spill] sm:$0xff] %v9617_v12  ;;  %12251 = vst [vmem:[#allocation78_spill] sm:$0xff] %v9621_v27  ;;  %v9629_v48 = vmul.f32 %v12254_v57, %v12215_v47  ;;  %v3074_v52 = vadd.f32 %v3073_v51, %v12241_v19  ;;  %v9632_v53 = vmax.f32 %v2987_v54, 0.0  ;;  %v2991_v21 = vadd.f32 %v2990_v30, %v12257_v16  ;;  %v12261_v8 = vld [vmem:[#allocation86_spill] sm:$0xff] }
 0x2d3   :  { %12252 = vst [vmem:[#allocation64_spill] sm:$0xff] %v9623_v28  ;;  %12253 = vst [vmem:[#allocation82_spill] sm:$0xff] %v9625_v2  ;;  %v3256_v32 = vmul.f32 %v9612_v59, %v12258_v17  ;;  %v3376_v50 = vmul.f32 %v9612_v59, %v12259_v45  ;;  %v9641_v62 = vmul.f32 %v9612_v59, %v12260_v1  ;;  %v3079_v36 = vpop.f32.mrf.mxu1  ;;  %v2996_v18 = vpop.f32.mrf.mxu0  ;;  %v12291_v2 = vld [vmem:[#allocation37_spill] sm:$0xff] }
 0x2d4   :  { %12255 = vst [vmem:[#allocation72_spill] sm:$0xff] %v9629_v48  ;;  %12256 = vst [vmem:[#allocation79_spill] sm:$0xff] %v9632_v53  ;;  %v9645_v7 = vmul.f32 %v9612_v59, %v12261_v8  ;;  %v9647_v54 = vadd.f32 %v3710_v63, %v3702_v4  ;;  %v9649_v51 = vmax.f32 %v3074_v52, 0.0  ;;  %v3076_v30 = vadd.f32 %v3075_v13, %v12241_v19  ;;  %v12278_v48 = vld [vmem:[#allocation17_spill] sm:$0xff] }
 0x2d5   :  { %v9652_v47 = vmax.f32 %v2991_v21, 0.0  ;;  %v2993_v5 = vadd.f32 %v2992_v58, %v12257_v16  ;;  %v3257_v23 = vmul.f32 %v9632_v53, %v12265_v37  ;;  %v3377_v44 = vmul.f32 %v9632_v53, %v12266_v15  ;;  %v12269_v21 = vld [vmem:[#allocation117_spill] sm:$0xff]  ;;  %v3081_v52 = vpop.f32.mrf.mxu1  ;;  %v2998_v11 = vpop.f32.mrf.mxu0 }
 0x2d6   :  { %12262 = vst [vmem:[#allocation85_spill] sm:$0xff] %v9647_v54  ;;  %12263 = vst [vmem:[#allocation70_spill] sm:$0xff] %v9649_v51  ;;  %v9660_v59 = vadd.f32 %v3256_v32, %v9377_v61  ;;  %v9663_v63 = vadd.f32 %v3376_v50, %v9385_v60  ;;  %v9665_v4 = vmax.f32 %v3076_v30, 0.0  ;;  %v3080_v13 = vadd.f32 %v3079_v36, %v12257_v16 }
 0x2d7   :  { %12264 = vst [vmem:[#allocation52_spill] sm:$0xff] %v9652_v47  ;;  %v9668_v19 = vmax.f32 %v2993_v5, 0.0  ;;  %v2997_v58 = vadd.f32 %v2996_v18, %v12269_v21  ;;  %v3258_v24 = vmul.f32 %v9652_v47, %v12258_v17  ;;  %v3378_v61 = vmul.f32 %v9652_v47, %v12259_v45  ;;  %v3085_v30 = vpop.f32.mrf.mxu1  ;;  %v3002_v56 = vpop.f32.mrf.mxu0 }
 0x2d8   :  { %12267 = vst [vmem:[#allocation139_spill] sm:$0xff] %v9665_v4  ;;  %v9676_v32 = vadd.f32 %v3257_v23, %v9370_v38  ;;  %v9679_v60 = vadd.f32 %v3377_v44, %v9373_v41  ;;  %v9681_v50 = vmax.f32 %v3080_v13, 0.0  ;;  %v3082_v36 = vadd.f32 %v3081_v52, %v12257_v16 }
 0x2d9   :  { %12268 = vst [vmem:[#allocation53_spill] sm:$0xff] %v9668_v19  ;;  %v9684_v5 = vmax.f32 %v2997_v58, 0.0  ;;  %v2999_v18 = vadd.f32 %v2998_v11, %v12269_v21  ;;  %v3259_v57 = vmul.f32 %v9668_v19, %v12265_v37  ;;  %v3379_v38 = vmul.f32 %v9668_v19, %v12266_v15  ;;  %v12273_v11 = vld [vmem:[#allocation152_spill] sm:$0xff]  ;;  %v3087_v52 = vpop.f32.mrf.mxu1  ;;  %v3004_v9 = vpop.f32.mrf.mxu0 }
 0x2da   :  { %12270 = vst [vmem:[#allocation59_spill] sm:$0xff] %v9681_v50  ;;  %v3266_v23 = vadd.f32 %v3258_v24, %v9358_v29  ;;  %v9693_v41 = vadd.f32 %v3378_v61, %v9381_v26  ;;  %v9695_v44 = vmax.f32 %v3082_v36, 0.0  ;;  %v3086_v16 = vadd.f32 %v3085_v30, %v12269_v21  ;;  %v12274_v29 = vld [vmem:[#allocation34_spill] sm:$0xff]  ;;  %v12275_v26 = vld [vmem:[#allocation36_spill] sm:$0xff] }
 0x2db   :  { %v9698_v13 = vmax.f32 %v2999_v18, 0.0  ;;  %v3003_v58 = vadd.f32 %v3002_v56, %v12273_v11  ;;  %v3260_v35 = vmul.f32 %v9684_v5, %v12258_v17  ;;  %v3380_v39 = vmul.f32 %v9684_v5, %v12259_v45  ;;  %v3091_v25 = vpop.f32.mrf.mxu1 }
 0x2dc   :  { %12271 = vst [vmem:[#allocation74_spill] sm:$0xff] %v9695_v44  ;;  %v3267_v24 = vadd.f32 %v3259_v57, %v12274_v29  ;;  %v3387_v61 = vadd.f32 %v3379_v38, %v12275_v26  ;;  %v9707_v36 = vmax.f32 %v3086_v16, 0.0  ;;  %v3088_v30 = vadd.f32 %v3087_v52, %v12269_v21  ;;  %v12279_v57 = vld [vmem:[#allocation33_spill] sm:$0xff]  ;;  %v12282_v26 = vld [vmem:[#allocation26_spill] sm:$0xff] }
 0x2dd   :  { %12272 = vst [vmem:[#allocation54_spill] sm:$0xff] %v9698_v13  ;;  %v9710_v18 = vmax.f32 %v3003_v58, 0.0  ;;  %v3005_v56 = vadd.f32 %v3004_v9, %v12273_v11  ;;  %v3261_v10 = vmul.f32 %v9698_v13, %v12265_v37  ;;  %v3381_v6 = vmul.f32 %v9698_v13, %v12266_v15  ;;  %v3093_v58 = vpop.f32.mrf.mxu1 }
 0x2de   :  { %12276 = vst [vmem:[#allocation60_spill] sm:$0xff] %v9707_v36  ;;  %v3268_v27 = vadd.f32 %v3260_v35, %v12278_v48  ;;  %v3388_v29 = vadd.f32 %v3380_v39, %v12279_v57  ;;  %v9719_v38 = vmax.f32 %v3088_v30, 0.0  ;;  %v3092_v16 = vadd.f32 %v3091_v25, %v12273_v11  ;;  %v12284_v35 = vld [vmem:[#allocation50_spill] sm:$0xff] }
 0x2df   :  { %12277 = vst [vmem:[#allocation55_spill] sm:$0xff] %v9710_v18  ;;  %v9722_v21 = vmax.f32 %v3005_v56, 0.0  ;;  %v3262_v9 = vmul.f32 %v9710_v18, %v12258_v17  ;;  %v3382_v52 = vmul.f32 %v9710_v18, %v12259_v45  ;;  %v3269_v12 = vadd.f32 %v3261_v10, %v12282_v26  ;;  %v12286_v56 = vld [vmem:[#allocation18_spill] sm:$0xff]  ;;  %v12288_v10 = vld [vmem:[#allocation47_spill] sm:$0xff] }
 0x2e0   :  { %12280 = vst [vmem:[#allocation61_spill] sm:$0xff] %v9719_v38  ;;  %v3389_v31 = vadd.f32 %v3381_v6, %v12283_v0  ;;  %v3276_v39 = vmul.f32 %v9707_v36, %v12284_v35  ;;  %v9732_v48 = vmax.f32 %v3092_v16, 0.0  ;;  %v3094_v25 = vadd.f32 %v3093_v58, %v12273_v11  ;;  %v12287_v45 = vld [vmem:[#allocation22_spill] sm:$0xff]  ;;  %v12289_v6 = vld [vmem:[#allocation49_spill] sm:$0xff] }
 0x2e1   :  { %12281 = vst [vmem:[#allocation56_spill] sm:$0xff] %v9722_v21  ;;  %v3263_v30 = vmul.f32 %v9722_v21, %v12265_v37  ;;  %v3383_v17 = vmul.f32 %v9722_v21, %v12266_v15  ;;  %v3270_v57 = vadd.f32 %v3262_v9, %v12286_v56  ;;  %v3390_v49 = vadd.f32 %v3382_v52, %v12287_v45  ;;  %v12292_v58 = vld [vmem:[#allocation62_spill] sm:$0xff]  ;;  %v12293_v15 = vld [vmem:[#allocation51_spill] sm:$0xff] }
 0x2e2   :  { %12285 = vst [vmem:[#allocation65_spill] sm:$0xff] %v9732_v48  ;;  %v3277_v0 = vmul.f32 %v9719_v38, %v12288_v10  ;;  %v3397_v26 = vmul.f32 %v9719_v38, %v12289_v6  ;;  %v9745_v16 = vmax.f32 %v3094_v25, 0.0  ;;  %v3278_v37 = vmul.f32 %v9732_v48, %v12284_v35 }
 0x2e3   :  { %v3271_v11 = vadd.f32 %v3263_v30, %v12291_v2  ;;  %v3391_v14 = vadd.f32 %v3383_v17, %v12292_v58  ;;  %v3398_v9 = vmul.f32 %v9732_v48, %v12293_v15  ;;  %v3284_v45 = vadd.f32 %v3276_v39, %v3268_v27 }
 0x2e4   :  { %12290 = vst [vmem:[#allocation57_spill] sm:$0xff] %v9745_v16  ;;  %v3285_v56 = vadd.f32 %v3277_v0, %v3269_v12  ;;  %v3405_v52 = vadd.f32 %v3397_v26, %v3389_v31  ;;  %v3279_v54 = vmul.f32 %v9745_v16, %v12288_v10  ;;  %v3399_v25 = vmul.f32 %v9745_v16, %v12289_v6 }
 0x2e5   :  { %v3286_v28 = vadd.f32 %v3278_v37, %v3270_v57  ;;  %v3396_v2 = vmul.f32 %v9707_v36, %v12293_v15  ;;  %v3406_v30 = vadd.f32 %v3398_v9, %v3390_v49  ;;  %v3275_v17 = vmul.f32 %v9695_v44, %v12288_v10 }
 0x2e6   :  { %v3395_v58 = vmul.f32 %v9695_v44, %v12289_v6  ;;  %v3274_v31 = vmul.f32 %v9681_v50, %v12284_v35  ;;  %v3287_v12 = vadd.f32 %v3279_v54, %v3271_v11  ;;  %v3407_v27 = vadd.f32 %v3399_v25, %v3391_v14  ;;  %v12297_v11 = vld [vmem:[#allocation73_spill] sm:$0xff]  ;;  %v12301_v25 = vld [vmem:[#allocation35_spill] sm:$0xff] }
 0x2e7   :  { %v3404_v39 = vadd.f32 %v3396_v2, %v3388_v29  ;;  %v3394_v0 = vmul.f32 %v9681_v50, %v12293_v15  ;;  %v3283_v57 = vadd.f32 %v3275_v17, %v3267_v24  ;;  %v3273_v49 = vmul.f32 %v9665_v4, %v12288_v10  ;;  %v12294_v24 = vld [vmem:[#allocation67_spill] sm:$0xff]  ;;  %v12295_v10 = vld [vmem:[#allocation68_spill] sm:$0xff] }
 0x2e8   :  { %v3403_v26 = vadd.f32 %v3395_v58, %v3387_v61  ;;  %v3282_v37 = vadd.f32 %v3274_v31, %v3266_v23  ;;  %4184 = vmatprep.subr.mxu0 %v3287_v12  ;;  %4273 = vmatprep.subr.mxu1 %v3407_v27  ;;  %v3393_v40 = vmul.f32 %v9665_v4, %v12289_v6  ;;  %v12302_v17 = vld [vmem:[#allocation40_spill] sm:$0xff]  ;;  %v12303_v31 = vld [vmem:[#allocation89_spill] sm:$0xff] }
 0x2e9   :  { %v3402_v9 = vadd.f32 %v3394_v0, %v9693_v41  ;;  %v3272_v14 = vmul.f32 %v9649_v51, %v12284_v35  ;;  %4185 = vmatpush1.msra.mxu0 %v3286_v28  ;;  %4274 = vmatpush1.msra.mxu1 %v3406_v30  ;;  %v3281_v54 = vadd.f32 %v3273_v49, %v9676_v32  ;;  %v12296_v32 = vld [vmem:[#allocation38_spill] sm:$0xff]  ;;  %v12305_v49 = vld [vmem:[#allocation45_spill] sm:$0xff] }
 0x2ea   :  { %v3392_v23 = vmul.f32 %v9649_v51, %v12293_v15  ;;  %v3503_v61 = vmul.f32 %v9722_v21, %v12294_v24  ;;  %4186 = vmatprep.subr.mxu0 %v3285_v56  ;;  %4275 = vmatprep.subr.mxu1 %v3405_v52  ;;  %v3401_v41 = vadd.f32 %v3393_v40, %v9679_v60  ;;  %v12298_v56 = vld [vmem:[#allocation77_spill] sm:$0xff]  ;;  %v12304_v0 = vld [vmem:[#allocation42_spill] sm:$0xff] }
 0x2eb   :  { %v3280_v29 = vadd.f32 %v3272_v14, %v9660_v59  ;;  %v3519_v6 = vmul.f32 %v9745_v16, %v12295_v10  ;;  %4187 = vmatpush1.msra.mxu0 %v3284_v45  ;;  %4276 = vmatpush1.msra.mxu1 %v3404_v39  ;;  %v3623_v15 = vmul.f32 %v9722_v21, %v12297_v11  ;;  %v12299_v40 = vld [vmem:[#allocation81_spill] sm:$0xff] }
 0x2ec   :  { %v3400_v28 = vadd.f32 %v3392_v23, %v9663_v63  ;;  %v3511_v35 = vadd.f32 %v3503_v61, %v12296_v32  ;;  %4188 = vmatprep.subr.mxu0 %v3283_v57  ;;  %4277 = vmatprep.subr.mxu1 %v3403_v26  ;;  %v3639_v52 = vmul.f32 %v9745_v16, %v12298_v56  ;;  %v9796_v63 = vld [vmem:[%s10752_s6] sm:$0xff]  ;;  %v12308_v32 = vmov 0.0  }
 0x2ed   :  { %v3502_v59 = vmul.f32 %v9710_v18, %v12260_v1  ;;  %v3518_v60 = vmul.f32 %v9732_v48, %v12299_v40  ;;  %4189 = vmatpush1.msra.mxu0 %v3282_v37  ;;  %4278 = vmatpush1.msra.mxu1 %v3402_v9  ;;  %12300 = vst [vmem:[#allocation66_spill] sm:$0xff] %v9796_v63 }
 0x2ee   :  { %v3527_v45 = vadd.f32 %v3519_v6, %v3511_v35  ;;  %v3631_v2 = vadd.f32 %v3623_v15, %v12301_v25  ;;  %v3622_v30 = vmul.f32 %v9710_v18, %v12261_v8  ;;  %4190 = vmatprep.subr.mxu0 %v3281_v54  ;;  %4279 = vmatprep.subr.mxu1 %v3401_v41  ;;  %v9823_v41 = vld [vmem:[%s10752_s6 + $0x8] sm:$0xff]  ;;  %v12307_v6 = vld [vmem:[#allocation39_spill] sm:$0xff]  ;;  %v12309_v15 = vld [vmem:[#allocation41_spill] sm:$0xff] }
 0x2ef   :  { %v3510_v58 = vadd.f32 %v3502_v59, %v12302_v17  ;;  %v3638_v12 = vmul.f32 %v9732_v48, %v12303_v31  ;;  %v3501_v27 = vmul.f32 %v9698_v13, %v12294_v24  ;;  %4191 = vmatpush1.msra.mxu0 %v3280_v29  ;;  %4280 = vmatpush1.msra.mxu1 %v3400_v28 }
 0x2f0   :  { %v3647_v39 = vadd.f32 %v3639_v52, %v3631_v2  ;;  %v3630_v57 = vadd.f32 %v3622_v30, %v12304_v0  ;;  %v3517_v26 = vmul.f32 %v9719_v38, %v12295_v10  ;;  %6502 = vmatmul.mubr.msk.f32.vlgmr.msra.gmra.mxu0 %vm2371_vm1, %v9796_v63  ;;  %6506 = vmatmul.mubr.msk.f32.vlgmr.msra.gmra.mxu1 %vm2371_vm1, %v9796_v63 }
 0x2f1   :  { %v3526_v37 = vadd.f32 %v3518_v60, %v3510_v58  ;;  %v3509_v9 = vadd.f32 %v3501_v27, %v12305_v49  ;;  %v3621_v14 = vmul.f32 %v9698_v13, %v12297_v11  ;;  %4362 = vmatprep.subr.mxu0 %v3527_v45  ;;  %v3637_v23 = vmul.f32 %v9719_v38, %v12298_v56 }
 0x2f2   :  { %4451 = vmatprep.subr.mxu1 %v3647_v39  ;;  %v3646_v54 = vadd.f32 %v3638_v12, %v3630_v57  ;;  %v3500_v61 = vmul.f32 %v9684_v5, %v12260_v1  ;;  %12306 = vst [vmem:[#allocation58_spill] sm:$0xff] %v9823_v41  ;;  %4230 = vmatprep.mubr.f32.mxu0 %v12308_v32 }
 0x2f3   :  { %4363 = vmatpush1.msra.mxu0 %v3526_v37  ;;  %v3525_v29 = vadd.f32 %v3517_v26, %v3509_v9  ;;  %v3629_v28 = vadd.f32 %v3621_v14, %v12307_v6  ;;  %v3516_v35 = vmul.f32 %v9707_v36, %v12299_v40  ;;  %4319 = vmatprep.mubr.f32.mxu1 %v12308_v32  ;;  %v12312_v6 = vld [vmem:[#allocation162_spill] sm:$0xff] }
 0x2f4   :  { %4452 = vmatpush1.msra.mxu1 %v3646_v54  ;;  %v3508_v52 = vadd.f32 %v3500_v61, %v12309_v15  ;;  %v3620_v59 = vmul.f32 %v9684_v5, %v12261_v8  ;;  %v3636_v60 = vmul.f32 %v9707_v36, %v12303_v31  ;;  %6503 = vmatmul.mubr.msk.f32.gmra.mxu0 %vm2371_vm1, %v9823_v41 }
 0x2f5   :  { %4364 = vmatprep.subr.mxu0 %v3525_v29  ;;  %v3645_v45 = vadd.f32 %v3637_v23, %v3629_v28  ;;  %v3499_v25 = vmul.f32 %v9668_v19, %v12294_v24  ;;  %v3515_v2 = vmul.f32 %v9695_v44, %v12295_v10  ;;  %6507 = vmatmul.mubr.msk.f32.gmra.mxu1 %vm2371_vm1, %v9823_v41 }
 0x2f6   :  { %v3524_v30 = vadd.f32 %v3516_v35, %v3508_v52  ;;  %v3628_v17 = vadd.f32 %v3620_v59, %v9487_v46  ;;  %v3619_v58 = vmul.f32 %v9668_v19, %v12297_v11  ;;  %v3635_v12 = vmul.f32 %v9695_v44, %v12298_v56  ;;  %4236 = vmatprep.mubr.f32.mxu0 %v12308_v32  ;;  %v12315_v52 = vld [vmem:[#allocation170_spill] sm:$0xff] }
 0x2f7   :  { %4453 = vmatprep.subr.mxu1 %v3645_v45  ;;  %v3507_v27 = vadd.f32 %v3499_v25, %v9501_v43  ;;  %v3498_v39 = vmul.f32 %v9652_v47, %v12260_v1  ;;  %v3514_v0 = vmul.f32 %v9681_v50, %v12299_v40  ;;  %v3618_v46 = vmul.f32 %v9652_v47, %v12261_v8  ;;  %v12316_v45 = vld [vmem:[#allocation64_spill] sm:$0xff] }
 0x2f8   :  { %4365 = vmatpush1.msra.mxu0 %v3524_v30  ;;  %v3644_v57 = vadd.f32 %v3636_v60, %v3628_v17  ;;  %v3627_v26 = vadd.f32 %v3619_v58, %v9511_v22  ;;  %v3634_v37 = vmul.f32 %v9681_v50, %v12303_v31  ;;  %v3497_v49 = vmul.f32 %v9632_v53, %v12294_v24  ;;  %v9902_v60 = vld [vmem:[%s10752_s6 + $0x18] sm:$0xff]  ;;  %v12319_v58 = vld [vmem:[#allocation175_spill] sm:$0xff] }
 0x2f9   :  { %v3523_v43 = vadd.f32 %v3515_v2, %v3507_v27  ;;  %v3506_v9 = vadd.f32 %v3498_v39, %v9527_v34  ;;  %v3626_v1 = vadd.f32 %v3618_v46, %v9533_v3  ;;  %v3513_v14 = vmul.f32 %v9665_v4, %v12295_v10  ;;  %4325 = vmatprep.mubr.f32.mxu1 %v12308_v32  ;;  %v9876_v10 = vld [vmem:[%s10752_s6 + $0x10] sm:$0xff]  ;;  %v12318_v30 = vld [vmem:[#allocation142_spill] sm:$0xff]  ;;  %v12364_v50 = vld [vmem:[#allocation115_spill] sm:$0xff] }
 0x2fa   :  { %4454 = vmatpush1.msra.mxu1 %v3644_v57  ;;  %v3643_v8 = vadd.f32 %v3635_v12, %v3627_v26  ;;  %v3505_v22 = vadd.f32 %v3497_v49, %v9553_v20  ;;  %v3617_v54 = vmul.f32 %v9632_v53, %v12297_v11  ;;  %v3633_v24 = vmul.f32 %v9665_v4, %v12298_v56  ;;  %v12317_v2 = vld [vmem:[#allocation85_spill] sm:$0xff]  ;;  %v12320_v39 = vld [vmem:[#allocation82_spill] sm:$0xff]  ;;  %v12322_v57 = vld [vmem:[#allocation116_spill] sm:$0xff] }
 0x2fb   :  { %4366 = vmatprep.subr.mxu0 %v3523_v43  ;;  %v3522_v23 = vadd.f32 %v3514_v0, %v3506_v9  ;;  %v3642_v34 = vadd.f32 %v3634_v37, %v3626_v1  ;;  %v3504_v3 = vadd.f32 %v9641_v62, %v9583_v42  ;;  %12310 = vst [vmem:[#allocation69_spill] sm:$0xff] %v9876_v10  ;;  %v12311_v62 = vld [vmem:[#allocation160_spill] sm:$0xff]  ;;  %v12323_v26 = vld [vmem:[#allocation126_spill] sm:$0xff] }
 0x2fc   :  { %4455 = vmatprep.subr.mxu1 %v3643_v8  ;;  %v3521_v20 = vadd.f32 %v3513_v14, %v3505_v22  ;;  %v3625_v11 = vadd.f32 %v3617_v54, %v9569_v33  ;;  %v3512_v56 = vmul.f32 %v9649_v51, %v12299_v40  ;;  %v3624_v61 = vadd.f32 %v9645_v7, %v9600_v55  ;;  %v12313_v40 = vld [vmem:[#allocation167_spill] sm:$0xff]  ;;  %v12321_v0 = vld [vmem:[#allocation100_spill] sm:$0xff]  ;;  %v12325_v14 = vld [vmem:[#allocation178_spill] sm:$0xff] }
 0x2fd   :  { %4367 = vmatpush1.msra.mxu0 %v3522_v23  ;;  %4456 = vmatpush1.msra.mxu1 %v3642_v34  ;;  %v3632_v42 = vmul.f32 %v9649_v51, %v12303_v31  ;;  %v3743_v29 = vmul.f32 %v9722_v21, %v12311_v62  ;;  %v3759_v28 = vmul.f32 %v9745_v16, %v12312_v6  ;;  %v12314_v31 = vld [vmem:[#allocation76_spill] sm:$0xff]  ;;  %v12327_v54 = vld [vmem:[#allocation71_spill] sm:$0xff] }
 0x2fe   :  { %4368 = vmatprep.subr.mxu0 %v3521_v20  ;;  %v3641_v35 = vadd.f32 %v3633_v24, %v3625_v11  ;;  %v3520_v33 = vadd.f32 %v3512_v56, %v3504_v3  ;;  %6504 = vmatmul.mubr.msk.f32.gmra.mxu0 %vm2371_vm1, %v9876_v10  ;;  %v3863_v55 = vmul.f32 %v9722_v21, %v12313_v40  ;;  %v12324_v9 = vld [vmem:[#allocation104_spill] sm:$0xff]  ;;  %v12328_v23 = vld [vmem:[#allocation179_spill] sm:$0xff]  ;;  %v12329_v3 = vld [vmem:[#allocation78_spill] sm:$0xff] }
 0x2ff   :  { %v3640_v7 = vadd.f32 %v3632_v42, %v3624_v61  ;;  %6508 = vmatmul.mubr.msk.f32.gmra.mxu1 %vm2371_vm1, %v9876_v10  ;;  %v3751_v15 = vadd.f32 %v3743_v29, %v12314_v31  ;;  %v3879_v59 = vmul.f32 %v9745_v16, %v12315_v52  ;;  %4242 = vmatprep.mubr.f32.mxu0 %v12308_v32  ;;  %v12326_v8 = vld [vmem:[#allocation32_spill] sm:$0xff]  ;;  %v12331_v56 = vld [vmem:[#allocation155_spill] sm:$0xff]  ;;  %v12332_v61 = vld [vmem:[#allocation141_spill] sm:$0xff] }
 0x300   :  { %4457 = vmatprep.subr.mxu1 %v3641_v35  ;;  %4369 = vmatpush1.msra.mxu0 %v3520_v33  ;;  %v3871_v25 = vadd.f32 %v3863_v55, %v12316_v45  ;;  %v3734_v17 = vadd.f32 %v12318_v30, %v12317_v2  ;;  %v3742_v12 = vmul.f32 %v9710_v18, %v12319_v58  ;;  %v12330_v20 = vld [vmem:[#allocation72_spill] sm:$0xff]  ;;  %v12335_v31 = vld [vmem:[#allocation157_spill] sm:$0xff]  ;;  %v12338_v2 = vld [vmem:[#allocation159_spill] sm:$0xff] }
 0x301   :  { %4458 = vmatpush1.msra.mxu1 %v3640_v7  ;;  %v3767_v27 = vadd.f32 %v3759_v28, %v3751_v15  ;;  %4331 = vmatprep.mubr.f32.mxu1 %v12308_v32  ;;  %v3822_v46 = vadd.f32 %v12321_v0, %v12320_v39  ;;  %v3677_v37 = vmul.f32 %v12323_v26, %v12322_v57  ;;  %v12333_v29 = vld [vmem:[#allocation156_spill] sm:$0xff]  ;;  %v12334_v28 = vld [vmem:[#allocation27_spill] sm:$0xff]  ;;  %v12336_v15 = vld [vmem:[#allocation90_spill] sm:$0xff] }
 0x302   :  { %v3887_v49 = vadd.f32 %v3879_v59, %v3871_v25  ;;  %6505 = vmatmul.mubr.msk.f32.gmra.mxu0 %vm2371_vm1, %v9902_v60  ;;  %v3750_v43 = vadd.f32 %v3742_v12, %v3734_v17  ;;  %v3758_v1 = vmul.f32 %v9732_v48, %v12324_v9  ;;  %v3846_v22 = vmul.f32 %v12326_v8, %v12325_v14  ;;  %v12337_v45 = vld [vmem:[#allocation180_spill] sm:$0xff]  ;;  %v12340_v12 = vld [vmem:[#allocation158_spill] sm:$0xff]  ;;  %v12342_v0 = vld [vmem:[#allocation161_spill] sm:$0xff] }
 0x303   :  { %4540 = vmatprep.subr.mxu0 %v3767_v27  ;;  %6509 = vmatmul.mubr.msk.f32.gmra.mxu1 %vm2371_vm1, %v9902_v60  ;;  %v3838_v24 = vadd.f32 %v12327_v54, %v3822_v46  ;;  %v3862_v34 = vmul.f32 %v9710_v18, %v12328_v23  ;;  %v3669_v11 = vadd.f32 %v12330_v20, %v12329_v3  ;;  %v12339_v30 = vld [vmem:[#allocation24_spill] sm:$0xff]  ;;  %v12341_v27 = vld [vmem:[#allocation111_spill] sm:$0xff]  ;;  %v12343_v54 = vld [vmem:[#allocation109_spill] sm:$0xff] }
 0x304   :  { %4629 = vmatprep.subr.mxu1 %v3887_v49  ;;  %4402 = vmatprep.mubr.f32.mxu0 %v12308_v32  ;;  %v3693_v42 = vmul.f32 %v12332_v61, %v12331_v56  ;;  %v3709_v35 = vmul.f32 %v12334_v28, %v12333_v29  ;;  %v3766_v33 = vadd.f32 %v3758_v1, %v3750_v43  ;;  %v12344_v3 = vld [vmem:[#allocation165_spill] sm:$0xff]  ;;  %v12345_v20 = vld [vmem:[#allocation132_spill] sm:$0xff] }
 0x305   :  { %4491 = vmatprep.mubr.f32.mxu1 %v12308_v32  ;;  %v3854_v55 = vadd.f32 %v3846_v22, %v3838_v24  ;;  %v3685_v7 = vadd.f32 %v3677_v37, %v3669_v11  ;;  %v3773_v59 = vmul.f32 %v12336_v15, %v12335_v31  ;;  %v3878_v25 = vmul.f32 %v9732_v48, %v12337_v45  ;;  %v12360_v4 = vld [vmem:[#allocation20_spill] sm:$0xff] }
 0x306   :  { %6510 = vmatmul.mubr.msk.f32.vlgmr.msra.gmra.mxu0 %vm2371_vm1, %v9796_v63  ;;  %v3725_v17 = vmul.f32 %v12339_v30, %v12338_v2  ;;  %v3781_v39 = vmul.f32 %v12341_v27, %v12340_v12  ;;  %v3797_v46 = vmul.f32 %v12323_v26, %v12342_v0  ;;  %v3741_v43 = vmul.f32 %v9698_v13, %v12311_v62  ;;  %v12361_v53 = vld [vmem:[#allocation176_spill] sm:$0xff] }
 0x307   :  { %6514 = vmatmul.mubr.msk.f32.vlgmr.msra.gmra.mxu1 %vm2371_vm1, %v9796_v63  ;;  %4541 = vmatpush1.msra.mxu0 %v3766_v33  ;;  %v3870_v37 = vadd.f32 %v3862_v34, %v3854_v55  ;;  %v3701_v49 = vadd.f32 %v3693_v42, %v3685_v7  ;;  %v3757_v1 = vmul.f32 %v9719_v38, %v12312_v6  ;;  %v12346_v33 = vld [vmem:[#allocation166_spill] sm:$0xff]  ;;  %v12347_v34 = vld [vmem:[#allocation147_spill] sm:$0xff]  ;;  %v12348_v55 = vld [vmem:[#allocation168_spill] sm:$0xff] }
 0x308   :  { %v3789_v22 = vadd.f32 %v3781_v39, %v3773_v59  ;;  %v3813_v24 = vmul.f32 %v12332_v61, %v12343_v54  ;;  %v3652_v11 = vmul.f32 %v12345_v20, %v12344_v3  ;;  %4408 = vmatprep.mubr.f32.mxu0 %v12308_v32  ;;  %v3660_v42 = vmul.f32 %v12347_v34, %v12346_v33  ;;  %v12349_v7 = vld [vmem:[#allocation103_spill] sm:$0xff]  ;;  %v12351_v61 = vld [vmem:[#allocation164_spill] sm:$0xff] }
 0x309   :  { %v3886_v26 = vadd.f32 %v3878_v25, %v3870_v37  ;;  %v3717_v48 = vadd.f32 %v3709_v35, %v3701_v49  ;;  %v3676_v27 = vmul.f32 %v12349_v7, %v12348_v55  ;;  %4497 = vmatprep.mubr.f32.mxu1 %v12308_v32  ;;  %v12350_v59 = vld [vmem:[#allocation163_spill] sm:$0xff]  ;;  %v3845_v18 = vmul.f32 %v12339_v30, %v12351_v61  ;;  %v12352_v49 = vld [vmem:[#allocation169_spill] sm:$0xff]  ;;  %v12355_v30 = vld [vmem:[#allocation172_spill] sm:$0xff] }
 0x30a   :  { %v3805_v15 = vadd.f32 %v3797_v46, %v3789_v22  ;;  %v3829_v39 = vmul.f32 %v12334_v28, %v12350_v59  ;;  %v3861_v8 = vmul.f32 %v9698_v13, %v12313_v40  ;;  %6511 = vmatmul.mubr.msk.f32.gmra.mxu0 %vm2371_vm1, %v9823_v41  ;;  %v3877_v25 = vmul.f32 %v9719_v38, %v12315_v52  ;;  %v12353_v46 = vld [vmem:[#allocation125_spill] sm:$0xff]  ;;  %v12354_v28 = vld [vmem:[#allocation110_spill] sm:$0xff] }
 0x30b   :  { %4630 = vmatpush1.msra.mxu1 %v3886_v26  ;;  %v3733_v35 = vadd.f32 %v3725_v17, %v3717_v48  ;;  %v3668_v37 = vadd.f32 %v3660_v42, %v3652_v11  ;;  %v3692_v22 = vmul.f32 %v12353_v46, %v12352_v49  ;;  %v3772_v16 = vmul.f32 %v12345_v20, %v12354_v28  ;;  %v12356_v13 = vld [vmem:[#allocation174_spill] sm:$0xff]  ;;  %v12357_v17 = vld [vmem:[#allocation171_spill] sm:$0xff]  ;;  %v12359_v38 = vld [vmem:[#allocation173_spill] sm:$0xff] }
 0x30c   :  { %v3821_v63 = vadd.f32 %v3813_v24, %v3805_v15  ;;  %v3780_v21 = vmul.f32 %v12347_v34, %v12355_v30  ;;  %v3796_v51 = vmul.f32 %v12349_v7, %v12356_v13  ;;  %6515 = vmatmul.mubr.msk.f32.gmra.mxu1 %vm2371_vm1, %v9823_v41  ;;  %v12358_v11 = vld [vmem:[#allocation19_spill] sm:$0xff]  ;;  %v3724_v15 = vmul.f32 %v12360_v4, %v12359_v38 }
 0x30d   :  { %v3749_v48 = vadd.f32 %v3741_v43, %v3733_v35  ;;  %v3684_v26 = vadd.f32 %v3676_v27, %v3668_v37  ;;  %v3708_v42 = vmul.f32 %v12358_v11, %v12357_v17  ;;  %4414 = vmatprep.mubr.f32.mxu0 %v12308_v32  ;;  %v3740_v34 = vmul.f32 %v9684_v5, %v12319_v58  ;;  %v12362_v35 = vld [vmem:[#allocation177_spill] sm:$0xff]  ;;  %v12363_v41 = vld [vmem:[#allocation107_spill] sm:$0xff]  ;;  %v12365_v58 = vld [vmem:[#allocation108_spill] sm:$0xff] }
 0x30e   :  { %v3837_v24 = vadd.f32 %v3829_v39, %v3821_v63  ;;  %v3788_v20 = vadd.f32 %v3780_v21, %v3772_v16  ;;  %v3812_v7 = vmul.f32 %v12353_v46, %v12361_v53  ;;  %4503 = vmatprep.mubr.f32.mxu1 %v12308_v32  ;;  %v3828_v37 = vmul.f32 %v12358_v11, %v12362_v35  ;;  %v12366_v21 = vld [vmem:[#allocation131_spill] sm:$0xff]  ;;  %v12367_v46 = vld [vmem:[#allocation144_spill] sm:$0xff] }
 0x30f   :  { %v3765_v43 = vadd.f32 %v3757_v1, %v3749_v48  ;;  %v3700_v27 = vadd.f32 %v3692_v22, %v3684_v26  ;;  %v3651_v47 = vmul.f32 %v12364_v50, %v12363_v41  ;;  %6512 = vmatmul.mubr.msk.f32.gmra.mxu0 %vm2371_vm1, %v9876_v10  ;;  %v3659_v16 = vmul.f32 %v12366_v21, %v12365_v58 }
 0x310   :  { %v3853_v63 = vadd.f32 %v3845_v18, %v3837_v24  ;;  %v3804_v39 = vadd.f32 %v3796_v51, %v3788_v20  ;;  %v3675_v53 = vmul.f32 %v12367_v46, %v12322_v57  ;;  %6516 = vmatmul.mubr.msk.f32.gmra.mxu1 %vm2371_vm1, %v9876_v10  ;;  %v3756_v22 = vmul.f32 %v9707_v36, %v12324_v9  ;;  %v12368_v24 = vld [vmem:[#allocation102_spill] sm:$0xff] }
 0x311   :  { %4542 = vmatprep.subr.mxu0 %v3765_v43  ;;  %v3716_v1 = vadd.f32 %v3708_v42, %v3700_v27  ;;  %v3844_v48 = vmul.f32 %v12360_v4, %v12325_v14  ;;  %v3860_v51 = vmul.f32 %v9684_v5, %v12328_v23  ;;  %v3667_v26 = vadd.f32 %v3659_v16, %v3651_v47  ;;  %v12369_v42 = vld [vmem:[#allocation119_spill] sm:$0xff] }
 0x312   :  { %v3869_v18 = vadd.f32 %v3861_v8, %v3853_v63  ;;  %v3820_v20 = vadd.f32 %v3812_v7, %v3804_v39  ;;  %v3691_v11 = vmul.f32 %v12368_v24, %v12331_v56  ;;  %4420 = vmatprep.mubr.f32.mxu0 %v12308_v32  ;;  %v3707_v43 = vmul.f32 %v12369_v42, %v12333_v29  ;;  %v12370_v16 = vld [vmem:[#allocation95_spill] sm:$0xff] }
 0x313   :  { %v3732_v10 = vadd.f32 %v3724_v15, %v3716_v1  ;;  %v3771_v27 = vmul.f32 %v12364_v50, %v12335_v31  ;;  %v3779_v4 = vmul.f32 %v12366_v21, %v12340_v12  ;;  %4509 = vmatprep.mubr.f32.mxu1 %v12308_v32  ;;  %v3683_v47 = vadd.f32 %v3675_v53, %v3667_v26  ;;  %v12371_v26 = vld [vmem:[#allocation93_spill] sm:$0xff] }
 0x314   :  { %v3885_v8 = vadd.f32 %v3877_v25, %v3869_v18  ;;  %v3836_v7 = vadd.f32 %v3828_v37, %v3820_v20  ;;  %v3795_v63 = vmul.f32 %v12367_v46, %v12342_v0  ;;  %6513 = vmatmul.mubr.msk.f32.gmra.mxu0 %vm2371_vm1, %v9902_v60  ;;  %v3876_v39 = vmul.f32 %v9707_v36, %v12337_v45 }
 0x315   :  { %v3748_v15 = vadd.f32 %v3740_v34, %v3732_v10  ;;  %v3723_v1 = vmul.f32 %v12370_v16, %v12338_v2  ;;  %v3787_v50 = vadd.f32 %v3779_v4, %v3771_v27  ;;  %6517 = vmatmul.mubr.msk.f32.gmra.mxu1 %vm2371_vm1, %v9902_v60  ;;  %v3699_v53 = vadd.f32 %v3691_v11, %v3683_v47  ;;  %v12372_v11 = vld [vmem:[#allocation114_spill] sm:$0xff] }
 0x316   :  { %4631 = vmatprep.subr.mxu1 %v3885_v8  ;;  %v3852_v25 = vadd.f32 %v3844_v48, %v3836_v7  ;;  %v3739_v37 = vmul.f32 %v9668_v19, %v12311_v62  ;;  %v3811_v18 = vmul.f32 %v12368_v24, %v12343_v54  ;;  %v3827_v20 = vmul.f32 %v12369_v42, %v12350_v59  ;;  %v12373_v7 = vld [vmem:[#allocation128_spill] sm:$0xff] }
 0x317   :  { %v3764_v10 = vadd.f32 %v3756_v22, %v3748_v15  ;;  %v3803_v34 = vadd.f32 %v3795_v63, %v3787_v50  ;;  %v3650_v4 = vmul.f32 %v12371_v26, %v12344_v3  ;;  %4580 = vmatprep.mubr.f32.mxu0 %v12308_v32  ;;  %v3715_v8 = vadd.f32 %v3707_v43, %v3699_v53  ;;  %v12374_v24 = vld [vmem:[#allocation84_spill] sm:$0xff] }
 0x318   :  { %v3868_v27 = vadd.f32 %v3860_v51, %v3852_v25  ;;  %v3658_v48 = vmul.f32 %v12372_v11, %v12346_v33  ;;  %v3674_v47 = vmul.f32 %v12373_v7, %v12348_v55  ;;  %4669 = vmatprep.mubr.f32.mxu1 %v12308_v32  ;;  %v3755_v50 = vmul.f32 %v9695_v44, %v12312_v6 }
 0x319   :  { %4543 = vmatpush1.msra.mxu0 %v3764_v10  ;;  %v3819_v22 = vadd.f32 %v3811_v18, %v3803_v34  ;;  %v3843_v63 = vmul.f32 %v12370_v16, %v12351_v61  ;;  %v3859_v51 = vmul.f32 %v9668_v19, %v12313_v40  ;;  %v3731_v15 = vadd.f32 %v3723_v1, %v3715_v8 }
 0x31a   :  { %v3884_v43 = vadd.f32 %v3876_v39, %v3868_v27  ;;  %v3875_v25 = vmul.f32 %v9695_v44, %v12315_v52  ;;  %v3666_v53 = vadd.f32 %v3658_v48, %v3650_v4  ;;  %v3690_v10 = vmul.f32 %v12374_v24, %v12352_v49  ;;  %v12375_v39 = vld [vmem:[#allocation140_spill] sm:$0xff]  ;;  %v12377_v48 = vld [vmem:[#allocation175_spill] sm:$0xff] }
 0x31b   :  { %v3835_v42 = vadd.f32 %v3827_v20, %v3819_v22  ;;  %v3770_v46 = vmul.f32 %v12371_v26, %v12354_v28  ;;  %v3778_v18 = vmul.f32 %v12372_v11, %v12355_v30  ;;  %v3747_v34 = vadd.f32 %v3739_v37, %v3731_v15  ;;  %v12376_v20 = vld [vmem:[#allocation136_spill] sm:$0xff] }
 0x31c   :  { %4632 = vmatpush1.msra.mxu1 %v3884_v43  ;;  %v3682_v16 = vadd.f32 %v3674_v47, %v3666_v53  ;;  %v3706_v1 = vmul.f32 %v12375_v39, %v12357_v17  ;;  %v3794_v27 = vmul.f32 %v12373_v7, %v12356_v13  ;;  %v3722_v8 = vmul.f32 %v12376_v20, %v12359_v38  ;;  %v12378_v22 = vld [vmem:[#allocation52_spill] sm:$0xff]  ;;  %v12380_v53 = vld [vmem:[#allocation149_spill] sm:$0xff] }
 0x31d   :  { %v3851_v4 = vadd.f32 %v3843_v63, %v3835_v42  ;;  %v3738_v44 = vmul.f32 %v12378_v22, %v12377_v48  ;;  %v3786_v26 = vadd.f32 %v3778_v18, %v3770_v46  ;;  %v3763_v19 = vadd.f32 %v3755_v50, %v3747_v34  ;;  %v12379_v11 = vld [vmem:[#allocation176_spill] sm:$0xff]  ;;  %v12382_v46 = vld [vmem:[#allocation59_spill] sm:$0xff] }
 0x31e   :  { %v3698_v36 = vadd.f32 %v3690_v10, %v3682_v16  ;;  %v3810_v37 = vmul.f32 %v12374_v24, %v12379_v11  ;;  %v3826_v47 = vmul.f32 %v12375_v39, %v12362_v35  ;;  %v3649_v42 = vmul.f32 %v12380_v53, %v12363_v41  ;;  %v12381_v63 = vld [vmem:[#allocation92_spill] sm:$0xff]  ;;  %v12383_v10 = vld [vmem:[#allocation106_spill] sm:$0xff]  ;;  %v12456_v24 = vld [vmem:[#allocation147_spill] sm:$0xff] }
 0x31f   :  { %v3867_v43 = vadd.f32 %v3859_v51, %v3851_v4  ;;  %v3802_v15 = vadd.f32 %v3794_v27, %v3786_v26  ;;  %v3657_v7 = vmul.f32 %v12381_v63, %v12365_v58  ;;  %4544 = vmatprep.subr.mxu0 %v3763_v19  ;;  %v3754_v50 = vmul.f32 %v12382_v46, %v12324_v9  ;;  %v12384_v58 = vld [vmem:[#allocation127_spill] sm:$0xff] }
 0x320   :  { %v3714_v21 = vadd.f32 %v3706_v1, %v3698_v36  ;;  %v3842_v16 = vmul.f32 %v12376_v20, %v12325_v14  ;;  %v3673_v18 = vmul.f32 %v12383_v10, %v12322_v57  ;;  %v3858_v26 = vmul.f32 %v12378_v22, %v12328_v23  ;;  %v12385_v36 = vld [vmem:[#allocation123_spill] sm:$0xff] }
 0x321   :  { %v3883_v34 = vadd.f32 %v3875_v25, %v3867_v43  ;;  %v3818_v51 = vadd.f32 %v3810_v37, %v3802_v15  ;;  %v3665_v41 = vadd.f32 %v3657_v7, %v3649_v42  ;;  %v3689_v19 = vmul.f32 %v12384_v58, %v12331_v56  ;;  %v12386_v56 = vld [vmem:[#allocation137_spill] sm:$0xff] }
 0x322   :  { %v3730_v27 = vadd.f32 %v3722_v8, %v3714_v21  ;;  %v3705_v1 = vmul.f32 %v12385_v36, %v12333_v29  ;;  %v3769_v4 = vmul.f32 %v12380_v53, %v12335_v31  ;;  %v3777_v57 = vmul.f32 %v12381_v63, %v12340_v12  ;;  %v12387_v29 = vld [vmem:[#allocation79_spill] sm:$0xff] }
 0x323   :  { %4633 = vmatprep.subr.mxu1 %v3883_v34  ;;  %v3834_v20 = vadd.f32 %v3826_v47, %v3818_v51  ;;  %v3681_v39 = vadd.f32 %v3673_v18, %v3665_v41  ;;  %v3793_v25 = vmul.f32 %v12383_v10, %v12342_v0  ;;  %v3874_v21 = vmul.f32 %v12382_v46, %v12337_v45  ;;  %v12389_v18 = vld [vmem:[#allocation150_spill] sm:$0xff]  ;;  %v12450_v53 = vld [vmem:[#allocation27_spill] sm:$0xff] }
 0x324   :  { %v3746_v7 = vadd.f32 %v3738_v44, %v3730_v27  ;;  %v3721_v8 = vmul.f32 %v12386_v56, %v12338_v2  ;;  %v3737_v37 = vmul.f32 %v12387_v29, %v12311_v62  ;;  %v3785_v47 = vadd.f32 %v3777_v57, %v3769_v4  ;;  %v12388_v44 = vld [vmem:[#allocation134_spill] sm:$0xff]  ;;  %v12390_v62 = vld [vmem:[#allocation105_spill] sm:$0xff] }
 0x325   :  { %v3850_v31 = vadd.f32 %v3842_v16, %v3834_v20  ;;  %v3697_v43 = vadd.f32 %v3689_v19, %v3681_v39  ;;  %v3809_v15 = vmul.f32 %v12384_v58, %v12343_v54  ;;  %v3825_v0 = vmul.f32 %v12385_v36, %v12350_v59  ;;  %v12391_v20 = vld [vmem:[#allocation139_spill] sm:$0xff]  ;;  %v12443_v46 = vld [vmem:[#allocation58_spill] sm:$0xff] }
 0x326   :  { %v3762_v12 = vadd.f32 %v3754_v50, %v3746_v7  ;;  %v3648_v42 = vmul.f32 %v12388_v44, %v12344_v3  ;;  %v3656_v34 = vmul.f32 %v12389_v18, %v12346_v33  ;;  %v3801_v41 = vadd.f32 %v3793_v25, %v3785_v47  ;;  %v12442_v58 = vld [vmem:[#allocation111_spill] sm:$0xff] }
 0x327   :  { %v3866_v2 = vadd.f32 %v3858_v26, %v3850_v31  ;;  %v3713_v51 = vadd.f32 %v3705_v1, %v3697_v43  ;;  %v3672_v39 = vmul.f32 %v12390_v62, %v12348_v55  ;;  %v3753_v54 = vmul.f32 %v12391_v20, %v12312_v6  ;;  %v12392_v26 = vld [vmem:[#allocation146_spill] sm:$0xff]  ;;  %v12393_v55 = vld [vmem:[#allocation101_spill] sm:$0xff] }
 0x328   :  { %4545 = vmatpush1.msra.mxu0 %v3762_v12  ;;  %v3841_v50 = vmul.f32 %v12386_v56, %v12351_v61  ;;  %v3857_v59 = vmul.f32 %v12387_v29, %v12313_v40  ;;  %v3664_v3 = vadd.f32 %v3656_v34, %v3648_v42  ;;  %v3817_v33 = vadd.f32 %v3809_v15, %v3801_v41  ;;  %v12396_v12 = vld [vmem:[#allocation113_spill] sm:$0xff]  ;;  %v12398_v42 = vld [vmem:[#allocation130_spill] sm:$0xff]  ;;  %v12399_v34 = vld [vmem:[#allocation148_spill] sm:$0xff] }
 0x329   :  { %v3882_v16 = vadd.f32 %v3874_v21, %v3866_v2  ;;  %v3729_v27 = vadd.f32 %v3721_v8, %v3713_v51  ;;  %v3688_v19 = vmul.f32 %v12392_v26, %v12352_v49  ;;  %v3704_v4 = vmul.f32 %v12393_v55, %v12357_v17  ;;  %v12394_v21 = vld [vmem:[#allocation124_spill] sm:$0xff]  ;;  %v12395_v17 = vld [vmem:[#allocation63_spill] sm:$0xff] }
 0x32a   :  { %v3680_v1 = vadd.f32 %v3672_v39, %v3664_v3  ;;  %v3768_v6 = vmul.f32 %v12388_v44, %v12354_v28  ;;  %v3776_v61 = vmul.f32 %v12389_v18, %v12355_v30  ;;  %v3833_v40 = vadd.f32 %v3825_v0, %v3817_v33  ;;  %v12402_v39 = vld [vmem:[#allocation88_spill] sm:$0xff]  ;;  %v12403_v33 = vld [vmem:[#allocation87_spill] sm:$0xff] }
 0x32b   :  { %4634 = vmatpush1.msra.mxu1 %v3882_v16  ;;  %v3745_v57 = vadd.f32 %v3737_v37, %v3729_v27  ;;  %v3873_v25 = vmul.f32 %v12391_v20, %v12315_v52  ;;  %v3792_v7 = vmul.f32 %v12390_v62, %v12356_v13  ;;  %v3720_v8 = vmul.f32 %v12394_v21, %v12359_v38  ;;  %v12397_v13 = vld [vmem:[#allocation91_spill] sm:$0xff]  ;;  %v12429_v20 = vld [vmem:[#allocation97_spill] sm:$0xff] }
 0x32c   :  { %v3696_v49 = vadd.f32 %v3688_v19, %v3680_v1  ;;  %v3736_v31 = vmul.f32 %v12395_v17, %v12377_v48  ;;  %v3784_v28 = vadd.f32 %v3776_v61, %v3768_v6  ;;  %v3849_v47 = vadd.f32 %v3841_v50, %v3833_v40  ;;  %v12400_v48 = vld [vmem:[#allocation70_spill] sm:$0xff]  ;;  %v12404_v19 = vld [vmem:[#allocation83_spill] sm:$0xff]  ;;  %v12430_v62 = vld [vmem:[#allocation25_spill] sm:$0xff] }
 0x32d   :  { %v3761_v43 = vadd.f32 %v3753_v54, %v3745_v57  ;;  %v3808_v30 = vmul.f32 %v12392_v26, %v12379_v11  ;;  %v3824_v37 = vmul.f32 %v12393_v55, %v12362_v35  ;;  %v3895_v0 = vmul.f32 %v12397_v13, %v12396_v12  ;;  %v12401_v11 = vld [vmem:[#allocation145_spill] sm:$0xff]  ;;  %v12426_v55 = vld [vmem:[#allocation66_spill] sm:$0xff]  ;;  %v12438_v56 = vld [vmem:[#allocation55_spill] sm:$0xff] }
 0x32e   :  { %v3712_v52 = vadd.f32 %v3704_v4, %v3696_v49  ;;  %v3800_v15 = vadd.f32 %v3792_v7, %v3784_v28  ;;  %v3903_v38 = vmul.f32 %v12399_v34, %v12398_v42  ;;  %v3865_v2 = vadd.f32 %v3857_v59, %v3849_v47  ;;  %v12405_v59 = vld [vmem:[#allocation12_spill] sm:$0xff]  ;;  %v12408_v7 = vld [vmem:[#allocation14_spill] sm:$0xff] }
 0x32f   :  { %4546 = vmatprep.subr.mxu0 %v3761_v43  ;;  %v3752_v51 = vmul.f32 %v12400_v48, %v12324_v9  ;;  %v3840_v41 = vmul.f32 %v12394_v21, %v12325_v14  ;;  %v3919_v54 = vmul.f32 %v12402_v39, %v12401_v11  ;;  %v3856_v3 = vmul.f32 %v12395_v17, %v12328_v23  ;;  %v12406_v4 = vld [vmem:[#allocation28_spill] sm:$0xff]  ;;  %v12407_v9 = vld [vmem:[#allocation13_spill] sm:$0xff]  ;;  %v12411_v43 = vld [vmem:[#allocation99_spill] sm:$0xff] }
 0x330   :  { %v3728_v35 = vadd.f32 %v3720_v8, %v3712_v52  ;;  %v3816_v50 = vadd.f32 %v3808_v30, %v3800_v15  ;;  %v3911_v16 = vadd.f32 %v3903_v38, %v3895_v0  ;;  %v3881_v27 = vadd.f32 %v3873_v25, %v3865_v2  ;;  %v12409_v25 = vld [vmem:[#allocation98_spill] sm:$0xff]  ;;  %v12410_v8 = vld [vmem:[#allocation16_spill] sm:$0xff]  ;;  %v12413_v52 = vld [vmem:[#allocation15_spill] sm:$0xff] }
 0x331   :  { %v3935_v1 = vmul.f32 %v12404_v19, %v12403_v33  ;;  %v3951_v6 = vmul.f32 %v12406_v4, %v12405_v59  ;;  %v4015_v61 = vmul.f32 %v12397_v13, %v12407_v9  ;;  %v4023_v49 = vmul.f32 %v12399_v34, %v12408_v7  ;;  %v12412_v47 = vld [vmem:[#allocation56_spill] sm:$0xff]  ;;  %v12414_v38 = vld [vmem:[#allocation21_spill] sm:$0xff]  ;;  %v12415_v2 = vld [vmem:[#allocation122_spill] sm:$0xff] }
 0x332   :  { %v3744_v14 = vadd.f32 %v3736_v31, %v3728_v35  ;;  %v3832_v57 = vadd.f32 %v3824_v37, %v3816_v50  ;;  %v3927_v40 = vadd.f32 %v3919_v54, %v3911_v16  ;;  %4635 = vmatprep.subr.mxu1 %v3881_v27  ;;  %v3872_v23 = vmul.f32 %v12400_v48, %v12337_v45  ;;  %v12416_v45 = vld [vmem:[#allocation29_spill] sm:$0xff]  ;;  %v12417_v35 = vld [vmem:[#allocation112_spill] sm:$0xff]  ;;  %v12418_v16 = vld [vmem:[#allocation31_spill] sm:$0xff] }
 0x333   :  { %v3967_v28 = vmul.f32 %v12410_v8, %v12409_v25  ;;  %v3983_v30 = vmul.f32 %v12412_v47, %v12411_v43  ;;  %v4039_v15 = vmul.f32 %v12402_v39, %v12413_v52  ;;  %v4031_v0 = vadd.f32 %v4023_v49, %v4015_v61  ;;  %v12419_v27 = vld [vmem:[#allocation129_spill] sm:$0xff] }
 0x334   :  { %v3760_v13 = vadd.f32 %v3752_v51, %v3744_v14  ;;  %v3848_v31 = vadd.f32 %v3840_v41, %v3832_v57  ;;  %v3943_v37 = vadd.f32 %v3935_v1, %v3927_v40  ;;  %v4055_v34 = vmul.f32 %v12404_v19, %v12414_v38  ;;  %v12420_v51 = vld [vmem:[#allocation153_spill] sm:$0xff]  ;;  %v12421_v41 = vld [vmem:[#allocation143_spill] sm:$0xff] }
 0x335   :  { %v4071_v54 = vmul.f32 %v12406_v4, %v12415_v2  ;;  %v3894_v50 = vmul.f32 %v12417_v35, %v12416_v45  ;;  %v3902_v48 = vmul.f32 %v12419_v27, %v12418_v16  ;;  %v4047_v39 = vadd.f32 %v4039_v15, %v4031_v0  ;;  %v12422_v61 = vld [vmem:[#allocation121_spill] sm:$0xff]  ;;  %v12424_v19 = vld [vmem:[#allocation23_spill] sm:$0xff]  ;;  %v12425_v4 = vld [vmem:[#allocation138_spill] sm:$0xff] }
 0x336   :  { %4547 = vmatpush1.msra.mxu0 %v3760_v13  ;;  %v3864_v17 = vadd.f32 %v3856_v3, %v3848_v31  ;;  %v3959_v21 = vadd.f32 %v3951_v6, %v3943_v37  ;;  %v3918_v1 = vmul.f32 %v12421_v41, %v12420_v51  ;;  %v12423_v14 = vld [vmem:[#allocation57_spill] sm:$0xff]  ;;  %v4087_v40 = vmul.f32 %v12410_v8, %v12424_v19  ;;  %v12427_v15 = vld [vmem:[#allocation154_spill] sm:$0xff]  ;;  %v12428_v31 = vld [vmem:[#allocation75_spill] sm:$0xff] }
 0x337   :  { %v3999_v57 = vmul.f32 %v12423_v14, %v12422_v61  ;;  %v4103_v49 = vmul.f32 %v12412_v47, %v12425_v4  ;;  %6518 = vmatmul.mubr.msk.f32.vlgmr.msra.gmra.mxu0 %vm2371_vm1, %v12426_v55  ;;  %v3910_v26 = vadd.f32 %v3902_v48, %v3894_v50  ;;  %v4063_v6 = vadd.f32 %v4055_v34, %v4047_v39  ;;  %v12431_v8 = vld [vmem:[#allocation120_spill] sm:$0xff]  ;;  %v12432_v47 = vld [vmem:[#allocation135_spill] sm:$0xff]  ;;  %v12435_v50 = vld [vmem:[#allocation181_spill] sm:$0xff] }
 0x338   :  { %v3880_v13 = vadd.f32 %v3872_v23, %v3864_v17  ;;  %v3975_v3 = vadd.f32 %v3967_v28, %v3959_v21  ;;  %v3934_v37 = vmul.f32 %v12428_v31, %v12427_v15  ;;  %4586 = vmatprep.mubr.f32.mxu0 %v12308_v32  ;;  %v3950_v18 = vmul.f32 %v12430_v62, %v12429_v20  ;;  %v12433_v21 = vld [vmem:[#allocation96_spill] sm:$0xff]  ;;  %v12434_v28 = vld [vmem:[#allocation182_spill] sm:$0xff] }
 0x339   :  { %v3926_v0 = vadd.f32 %v3918_v1, %v3910_v26  ;;  %v4014_v44 = vmul.f32 %v12417_v35, %v12431_v8  ;;  %v4022_v29 = vmul.f32 %v12419_v27, %v12432_v47  ;;  %v4079_v17 = vadd.f32 %v4071_v54, %v4063_v6  ;;  %v12436_v39 = vld [vmem:[#allocation32_spill] sm:$0xff]  ;;  %v12437_v35 = vld [vmem:[#allocation183_spill] sm:$0xff] }
 0x33a   :  { %4636 = vmatpush1.msra.mxu1 %v3880_v13  ;;  %v3991_v48 = vadd.f32 %v3983_v30, %v3975_v3  ;;  %v4119_v23 = vmul.f32 %v12423_v14, %v12433_v21  ;;  %v4038_v34 = vmul.f32 %v12421_v41, %v12434_v28  ;;  %v3966_v1 = vmul.f32 %v12436_v39, %v12435_v50  ;;  %v12439_v54 = vld [vmem:[#allocation184_spill] sm:$0xff]  ;;  %v12440_v14 = vld [vmem:[#allocation186_spill] sm:$0xff] }
 0x33b   :  { %6522 = vmatmul.mubr.msk.f32.vlgmr.msra.gmra.mxu1 %vm2371_vm1, %v12426_v55  ;;  %v3942_v26 = vadd.f32 %v3934_v37, %v3926_v0  ;;  %v3982_v36 = vmul.f32 %v12438_v56, %v12437_v35  ;;  %v4030_v27 = vadd.f32 %v4022_v29, %v4014_v44  ;;  %v4095_v30 = vadd.f32 %v4087_v40, %v4079_v17  ;;  %v12441_v37 = vld [vmem:[#allocation90_spill] sm:$0xff]  ;;  %v12444_v44 = vld [vmem:[#allocation185_spill] sm:$0xff] }
 0x33c   :  { %v4007_v13 = vadd.f32 %v3999_v57, %v3991_v48  ;;  %v4054_v3 = vmul.f32 %v12428_v31, %v12439_v54  ;;  %v4070_v6 = vmul.f32 %v12430_v62, %v12440_v14  ;;  %4675 = vmatprep.mubr.f32.mxu1 %v12308_v32  ;;  %v3893_v0 = vmul.f32 %v12441_v37, %v12396_v12  ;;  %v12445_v57 = vld [vmem:[#allocation65_spill] sm:$0xff]  ;;  %v12446_v31 = vld [vmem:[#allocation151_spill] sm:$0xff] }
 0x33d   :  { %v3958_v41 = vadd.f32 %v3950_v18, %v3942_v26  ;;  %v4046_v55 = vadd.f32 %v4038_v34, %v4030_v27  ;;  %v3901_v10 = vmul.f32 %v12442_v58, %v12398_v42  ;;  %6519 = vmatmul.mubr.msk.f32.gmra.mxu0 %vm2371_vm1, %v12443_v46  ;;  %v4111_v29 = vadd.f32 %v4103_v49, %v4095_v30  ;;  %v12447_v18 = vld [vmem:[#allocation126_spill] sm:$0xff]  ;;  %v12448_v26 = vld [vmem:[#allocation187_spill] sm:$0xff]  ;;  %v12449_v49 = vld [vmem:[#allocation141_spill] sm:$0xff] }
 0x33e   :  { %4718 = vmatprep.subr.mxu0 %v4007_v13  ;;  %v3998_v40 = vmul.f32 %v12445_v57, %v12444_v44  ;;  %v4086_v62 = vmul.f32 %v12436_v39, %v12446_v31  ;;  %v3917_v48 = vmul.f32 %v12447_v18, %v12401_v11  ;;  %v4102_v27 = vmul.f32 %v12438_v56, %v12448_v26 }
 0x33f   :  { %v3974_v17 = vadd.f32 %v3966_v1, %v3958_v41  ;;  %v4062_v34 = vadd.f32 %v4054_v3, %v4046_v55  ;;  %v3909_v63 = vadd.f32 %v3901_v10, %v3893_v0  ;;  %6523 = vmatmul.mubr.msk.f32.gmra.mxu1 %vm2371_vm1, %v12443_v46  ;;  %v4127_v13 = vadd.f32 %v4119_v23, %v4111_v29  ;;  %v12451_v46 = vld [vmem:[#allocation94_spill] sm:$0xff]  ;;  %v12452_v23 = vld [vmem:[#allocation24_spill] sm:$0xff] }
 0x340   :  { %v3933_v30 = vmul.f32 %v12449_v49, %v12403_v33  ;;  %v3949_v22 = vmul.f32 %v12450_v53, %v12405_v59  ;;  %v4013_v39 = vmul.f32 %v12441_v37, %v12407_v9  ;;  %4592 = vmatprep.mubr.f32.mxu0 %v12308_v32  ;;  %v4021_v10 = vmul.f32 %v12442_v58, %v12408_v7  ;;  %v12453_v0 = vld [vmem:[#allocation54_spill] sm:$0xff]  ;;  %v12454_v58 = vld [vmem:[#allocation69_spill] sm:$0xff] }
 0x341   :  { %v3990_v1 = vadd.f32 %v3982_v36, %v3974_v17  ;;  %v4078_v3 = vadd.f32 %v4070_v6, %v4062_v34  ;;  %v3925_v41 = vadd.f32 %v3917_v48, %v3909_v63  ;;  %4681 = vmatprep.mubr.f32.mxu1 %v12308_v32  ;;  %4807 = vmatprep.subr.mxu1 %v4127_v13  ;;  %v12455_v34 = vld [vmem:[#allocation132_spill] sm:$0xff] }
 0x342   :  { %v4118_v56 = vmul.f32 %v12445_v57, %v12451_v46  ;;  %v3965_v55 = vmul.f32 %v12452_v23, %v12409_v25  ;;  %v3981_v37 = vmul.f32 %v12453_v0, %v12411_v43  ;;  %v4037_v36 = vmul.f32 %v12447_v18, %v12413_v52  ;;  %6520 = vmatmul.mubr.msk.f32.gmra.mxu0 %vm2371_vm1, %v12454_v58 }
 0x343   :  { %v4006_v6 = vadd.f32 %v3998_v40, %v3990_v1  ;;  %v4094_v63 = vadd.f32 %v4086_v62, %v4078_v3  ;;  %v3941_v29 = vadd.f32 %v3933_v30, %v3925_v41  ;;  %v4029_v48 = vadd.f32 %v4021_v10, %v4013_v39  ;;  %6524 = vmatmul.mubr.msk.f32.gmra.mxu1 %vm2371_vm1, %v12454_v58  ;;  %v12457_v30 = vld [vmem:[#allocation103_spill] sm:$0xff] }
 0x344   :  { %v4053_v17 = vmul.f32 %v12449_v49, %v12414_v38  ;;  %v4069_v57 = vmul.f32 %v12450_v53, %v12415_v2  ;;  %v3892_v13 = vmul.f32 %v12455_v34, %v12416_v45  ;;  %v3900_v43 = vmul.f32 %v12456_v24, %v12418_v16  ;;  %v12458_v49 = vld [vmem:[#allocation61_spill] sm:$0xff]  ;;  %4598 = vmatprep.mubr.f32.mxu0 %v12308_v32 }
 0x345   :  { %4719 = vmatpush1.msra.mxu0 %v4006_v6  ;;  %v4110_v40 = vadd.f32 %v4102_v27, %v4094_v63  ;;  %v3957_v62 = vadd.f32 %v3949_v22, %v3941_v29  ;;  %v4045_v18 = vadd.f32 %v4037_v36, %v4029_v48  ;;  %v3916_v39 = vmul.f32 %v12457_v30, %v12420_v51  ;;  %v12459_v22 = vld [vmem:[#allocation125_spill] sm:$0xff]  ;;  %v12460_v29 = vld [vmem:[#allocation19_spill] sm:$0xff] }
 0x346   :  { %v3997_v1 = vmul.f32 %v12458_v49, %v12422_v61  ;;  %v4085_v53 = vmul.f32 %v12452_v23, %v12424_v19  ;;  %v4101_v3 = vmul.f32 %v12453_v0, %v12425_v4  ;;  %v3908_v41 = vadd.f32 %v3900_v43, %v3892_v13  ;;  %4687 = vmatprep.mubr.f32.mxu1 %v12308_v32  ;;  %v12461_v13 = vld [vmem:[#allocation20_spill] sm:$0xff] }
 0x347   :  { %v4126_v10 = vadd.f32 %v4118_v56, %v4110_v40  ;;  %v3973_v6 = vadd.f32 %v3965_v55, %v3957_v62  ;;  %v4061_v27 = vadd.f32 %v4053_v17, %v4045_v18  ;;  %v3932_v36 = vmul.f32 %v12459_v22, %v12427_v15  ;;  %6521 = vmatmul.mubr.msk.f32.gmra.mxu0 %vm2371_vm1, %v9902_v60 }
 0x348   :  { %v3924_v63 = vadd.f32 %v3916_v39, %v3908_v41  ;;  %v3948_v48 = vmul.f32 %v12460_v29, %v12429_v20  ;;  %v4012_v23 = vmul.f32 %v12455_v34, %v12431_v8  ;;  %v4020_v43 = vmul.f32 %v12456_v24, %v12432_v47  ;;  %6525 = vmatmul.mubr.msk.f32.gmra.mxu1 %vm2371_vm1, %v9902_v60 }
 0x349   :  { %4808 = vmatpush1.msra.mxu1 %v4126_v10  ;;  %v3989_v56 = vadd.f32 %v3981_v37, %v3973_v6  ;;  %v4077_v55 = vadd.f32 %v4069_v57, %v4061_v27  ;;  %v4117_v0 = vmul.f32 %v12458_v49, %v12433_v21  ;;  %v4036_v58 = vmul.f32 %v12457_v30, %v12434_v28  ;;  %v12462_v49 = vld [vmem:[#allocation115_spill] sm:$0xff] }
 0x34a   :  { %v3940_v17 = vadd.f32 %v3932_v36, %v3924_v63  ;;  %v3964_v40 = vmul.f32 %v12461_v13, %v12435_v50  ;;  %v3980_v34 = vmul.f32 %v9684_v5, %v12437_v35  ;;  %v4028_v24 = vadd.f32 %v4020_v43, %v4012_v23  ;;  %4758 = vmatprep.mubr.f32.mxu0 %v12308_v32  ;;  %v12463_v10 = vld [vmem:[#allocation131_spill] sm:$0xff] }
 0x34b   :  { %v4005_v62 = vadd.f32 %v3997_v1, %v3989_v56  ;;  %v4093_v37 = vadd.f32 %v4085_v53, %v4077_v55  ;;  %v4052_v57 = vmul.f32 %v12459_v22, %v12439_v54  ;;  %v4068_v18 = vmul.f32 %v12460_v29, %v12440_v14  ;;  %4847 = vmatprep.mubr.f32.mxu1 %v12308_v32  ;;  %v12464_v1 = vld [vmem:[#allocation60_spill] sm:$0xff]  ;;  %v12466_v56 = vld [vmem:[#allocation102_spill] sm:$0xff] }
 0x34c   :  { %v3956_v30 = vadd.f32 %v3948_v48, %v3940_v17  ;;  %v4044_v39 = vadd.f32 %v4036_v58, %v4028_v24  ;;  %v3891_v41 = vmul.f32 %v12462_v49, %v12396_v12  ;;  %v3899_v6 = vmul.f32 %v12463_v10, %v12398_v42  ;;  %v12465_v22 = vld [vmem:[#allocation144_spill] sm:$0xff] }
 0x34d   :  { %4720 = vmatprep.subr.mxu0 %v4005_v62  ;;  %v4109_v60 = vadd.f32 %v4101_v3, %v4093_v37  ;;  %v3996_v53 = vmul.f32 %v12464_v1, %v12444_v44  ;;  %v4084_v27 = vmul.f32 %v12461_v13, %v12446_v31  ;;  %v3915_v36 = vmul.f32 %v12465_v22, %v12401_v11  ;;  %v12467_v3 = vld [vmem:[#allocation119_spill] sm:$0xff] }
 0x34e   :  { %v3972_v63 = vadd.f32 %v3964_v40, %v3956_v30  ;;  %v4060_v29 = vadd.f32 %v4052_v57, %v4044_v39  ;;  %v4100_v48 = vmul.f32 %v9684_v5, %v12448_v26  ;;  %v3907_v23 = vadd.f32 %v3899_v6, %v3891_v41  ;;  %v12469_v57 = vld [vmem:[#allocation99_spill] sm:$0xff]  ;;  %v12470_v30 = vld [vmem:[#allocation53_spill] sm:$0xff] }
 0x34f   :  { %v4125_v43 = vadd.f32 %v4117_v0, %v4109_v60  ;;  %v3931_v55 = vmul.f32 %v12466_v56, %v12403_v33  ;;  %v3947_v58 = vmul.f32 %v12467_v3, %v12405_v59  ;;  %v4011_v17 = vmul.f32 %v12462_v49, %v12407_v9  ;;  %v12468_v0 = vld [vmem:[#allocation95_spill] sm:$0xff] }
 0x350   :  { %v3988_v13 = vadd.f32 %v3980_v34, %v3972_v63  ;;  %v4076_v24 = vadd.f32 %v4068_v18, %v4060_v29  ;;  %v3923_v62 = vadd.f32 %v3915_v36, %v3907_v23  ;;  %v4019_v40 = vmul.f32 %v12463_v10, %v12408_v7  ;;  %v12472_v63 = vld [vmem:[#allocation114_spill] sm:$0xff] }
 0x351   :  { %4809 = vmatprep.subr.mxu1 %v4125_v43  ;;  %v4116_v5 = vmul.f32 %v12464_v1, %v12451_v46  ;;  %v3963_v37 = vmul.f32 %v12468_v0, %v12409_v25  ;;  %v3979_v39 = vmul.f32 %v12470_v30, %v12469_v57  ;;  %v4035_v41 = vmul.f32 %v12465_v22, %v12413_v52  ;;  %v12471_v1 = vld [vmem:[#allocation93_spill] sm:$0xff] }
 0x352   :  { %v4004_v49 = vadd.f32 %v3996_v53, %v3988_v13  ;;  %v4092_v34 = vadd.f32 %v4084_v27, %v4076_v24  ;;  %v3939_v18 = vadd.f32 %v3931_v55, %v3923_v62  ;;  %v4027_v6 = vadd.f32 %v4019_v40, %v4011_v17  ;;  %v12473_v53 = vld [vmem:[#allocation128_spill] sm:$0xff]  ;;  %v12474_v55 = vld [vmem:[#allocation74_spill] sm:$0xff] }
 0x353   :  { %v4051_v10 = vmul.f32 %v12466_v56, %v12414_v38  ;;  %v4067_v60 = vmul.f32 %v12467_v3, %v12415_v2  ;;  %v3890_v36 = vmul.f32 %v12471_v1, %v12416_v45  ;;  %v3898_v29 = vmul.f32 %v12472_v63, %v12418_v16 }
 0x354   :  { %4721 = vmatpush1.msra.mxu0 %v4004_v49  ;;  %v4108_v23 = vadd.f32 %v4100_v48, %v4092_v34  ;;  %v3955_v43 = vadd.f32 %v3947_v58, %v3939_v18  ;;  %v4043_v22 = vadd.f32 %v4035_v41, %v4027_v6  ;;  %v3914_v27 = vmul.f32 %v12473_v53, %v12420_v51  ;;  %v12475_v48 = vld [vmem:[#allocation84_spill] sm:$0xff] }
 0x355   :  { %v3995_v17 = vmul.f32 %v12474_v55, %v12422_v61  ;;  %v4083_v56 = vmul.f32 %v12468_v0, %v12424_v19  ;;  %v4099_v3 = vmul.f32 %v12470_v30, %v12425_v4  ;;  %v3906_v13 = vadd.f32 %v3898_v29, %v3890_v36  ;;  %v12476_v49 = vld [vmem:[#allocation140_spill] sm:$0xff] }
 0x356   :  { %v4124_v24 = vadd.f32 %v4116_v5, %v4108_v23  ;;  %v3971_v62 = vadd.f32 %v3963_v37, %v3955_v43  ;;  %v4059_v40 = vadd.f32 %v4051_v10, %v4043_v22  ;;  %v3930_v58 = vmul.f32 %v12475_v48, %v12427_v15  ;;  %v12477_v36 = vld [vmem:[#allocation136_spill] sm:$0xff] }
 0x357   :  { %v3922_v41 = vadd.f32 %v3914_v27, %v3906_v13  ;;  %v3946_v34 = vmul.f32 %v12476_v49, %v12429_v20  ;;  %v4010_v18 = vmul.f32 %v12471_v1, %v12431_v8  ;;  %v4018_v0 = vmul.f32 %v12472_v63, %v12432_v47  ;;  %v12478_v23 = vld [vmem:[#allocation52_spill] sm:$0xff] }
 0x358   :  { %4810 = vmatpush1.msra.mxu1 %v4124_v24  ;;  %v3987_v6 = vadd.f32 %v3979_v39, %v3971_v62  ;;  %v4075_v30 = vadd.f32 %v4067_v60, %v4059_v40  ;;  %v4115_v5 = vmul.f32 %v12474_v55, %v12433_v21  ;;  %v4034_v37 = vmul.f32 %v12473_v53, %v12434_v28  ;;  %v12479_v53 = vld [vmem:[#allocation149_spill] sm:$0xff]  ;;  %v12480_v24 = vld [vmem:[#allocation92_spill] sm:$0xff] }
 0x359   :  { %v3938_v10 = vadd.f32 %v3930_v58, %v3922_v41  ;;  %v3962_v29 = vmul.f32 %v12477_v36, %v12435_v50  ;;  %v3978_v43 = vmul.f32 %v12478_v23, %v12437_v35  ;;  %v4026_v1 = vadd.f32 %v4018_v0, %v4010_v18  ;;  %v12481_v58 = vld [vmem:[#allocation59_spill] sm:$0xff] }
 0x35a   :  { %v4003_v22 = vadd.f32 %v3995_v17, %v3987_v6  ;;  %v4091_v27 = vadd.f32 %v4083_v56, %v4075_v30  ;;  %v4050_v39 = vmul.f32 %v12475_v48, %v12439_v54  ;;  %v4066_v60 = vmul.f32 %v12476_v49, %v12440_v14  ;;  %v12482_v48 = vld [vmem:[#allocation106_spill] sm:$0xff] }
 0x35b   :  { %v3954_v63 = vadd.f32 %v3946_v34, %v3938_v10  ;;  %v4042_v55 = vadd.f32 %v4034_v37, %v4026_v1  ;;  %v3889_v13 = vmul.f32 %v12479_v53, %v12396_v12  ;;  %v3897_v62 = vmul.f32 %v12480_v24, %v12398_v42  ;;  %v12483_v42 = vld [vmem:[#allocation127_spill] sm:$0xff] }
 0x35c   :  { %4722 = vmatprep.subr.mxu0 %v4003_v22  ;;  %v4107_v40 = vadd.f32 %v4099_v3, %v4091_v27  ;;  %v3994_v17 = vmul.f32 %v12481_v58, %v12444_v44  ;;  %v4082_v56 = vmul.f32 %v12477_v36, %v12446_v31  ;;  %v3913_v41 = vmul.f32 %v12482_v48, %v12401_v11  ;;  %v12484_v3 = vld [vmem:[#allocation123_spill] sm:$0xff] }
 0x35d   :  { %v3970_v49 = vadd.f32 %v3962_v29, %v3954_v63  ;;  %v4058_v34 = vadd.f32 %v4050_v39, %v4042_v55  ;;  %v4098_v18 = vmul.f32 %v12478_v23, %v12448_v26  ;;  %v3905_v12 = vadd.f32 %v3897_v62, %v3889_v13  ;;  %v12487_v63 = vld [vmem:[#allocation134_spill] sm:$0xff] }
 0x35e   :  { %v4123_v0 = vadd.f32 %v4115_v5, %v4107_v40  ;;  %v3929_v6 = vmul.f32 %v12483_v42, %v12403_v33  ;;  %v3945_v30 = vmul.f32 %v12484_v3, %v12405_v59  ;;  %v4009_v37 = vmul.f32 %v12479_v53, %v12407_v9  ;;  %v12485_v5 = vld [vmem:[#allocation137_spill] sm:$0xff]  ;;  %v12486_v33 = vld [vmem:[#allocation79_spill] sm:$0xff] }
 0x35f   :  { %v3986_v10 = vadd.f32 %v3978_v43, %v3970_v49  ;;  %v4074_v36 = vadd.f32 %v4066_v60, %v4058_v34  ;;  %v3921_v1 = vadd.f32 %v3913_v41, %v3905_v12  ;;  %v4017_v11 = vmul.f32 %v12480_v24, %v12408_v7  ;;  %v12489_v24 = vld [vmem:[#allocation105_spill] sm:$0xff]  ;;  %v12490_v40 = vld [vmem:[#allocation139_spill] sm:$0xff] }
 0x360   :  { %4811 = vmatprep.subr.mxu1 %v4123_v0  ;;  %v4114_v29 = vmul.f32 %v12481_v58, %v12451_v46  ;;  %v3961_v23 = vmul.f32 %v12485_v5, %v12409_v25  ;;  %v3977_v22 = vmul.f32 %v12486_v33, %v12469_v57  ;;  %v4033_v59 = vmul.f32 %v12482_v48, %v12413_v52  ;;  %v12488_v25 = vld [vmem:[#allocation150_spill] sm:$0xff]  ;;  %v12492_v49 = vld [vmem:[#allocation101_spill] sm:$0xff] }
 0x361   :  { %v4002_v9 = vadd.f32 %v3994_v17, %v3986_v10  ;;  %v4090_v43 = vadd.f32 %v4082_v56, %v4074_v36  ;;  %v3937_v27 = vadd.f32 %v3929_v6, %v3921_v1  ;;  %v4025_v39 = vadd.f32 %v4017_v11, %v4009_v37  ;;  %v12491_v48 = vld [vmem:[#allocation146_spill] sm:$0xff] }
 0x362   :  { %v4049_v7 = vmul.f32 %v12483_v42, %v12414_v38  ;;  %v4065_v60 = vmul.f32 %v12484_v3, %v12415_v2  ;;  %v3888_v55 = vmul.f32 %v12487_v63, %v12416_v45  ;;  %v3896_v53 = vmul.f32 %v12488_v25, %v12418_v16 }
 0x363   :  { %4723 = vmatpush1.msra.mxu0 %v4002_v9  ;;  %v4106_v57 = vadd.f32 %v4098_v18, %v4090_v43  ;;  %v3953_v13 = vadd.f32 %v3945_v30, %v3937_v27  ;;  %v4041_v52 = vadd.f32 %v4033_v59, %v4025_v39  ;;  %v3912_v62 = vmul.f32 %v12489_v24, %v12420_v51 }
 0x364   :  { %v3993_v58 = vmul.f32 %v12490_v40, %v12422_v61  ;;  %v4081_v38 = vmul.f32 %v12485_v5, %v12424_v19  ;;  %v3904_v2 = vadd.f32 %v3896_v53, %v3888_v55  ;;  %v3928_v16 = vmul.f32 %v12491_v48, %v12427_v15 }
 0x365   :  { %v4122_v17 = vadd.f32 %v4114_v29, %v4106_v57  ;;  %v3969_v56 = vadd.f32 %v3961_v23, %v3953_v13  ;;  %v4057_v45 = vadd.f32 %v4049_v7, %v4041_v52  ;;  %v3944_v34 = vmul.f32 %v12492_v49, %v12429_v20  ;;  %v12493_v20 = vld [vmem:[#allocation124_spill] sm:$0xff]  ;;  %v10449_v52 = vpop.permute.xlu0 %4145 }
 0x366   :  { %v3920_v41 = vadd.f32 %v3912_v62, %v3904_v2  ;;  %v4008_v51 = vmul.f32 %v12487_v63, %v12431_v8  ;;  %v4016_v61 = vmul.f32 %v12488_v25, %v12432_v47  ;;  %v4097_v12 = vmul.f32 %v12486_v33, %v12425_v4  ;;  %v12494_v8 = vld [vmem:[#allocation63_spill] sm:$0xff] }
 0x367   :  { %4812 = vmatpush1.msra.mxu1 %v4122_v17  ;;  %v3985_v18 = vadd.f32 %v3977_v22, %v3969_v56  ;;  %v4073_v19 = vadd.f32 %v4065_v60, %v4057_v45  ;;  %v4032_v0 = vmul.f32 %v12489_v24, %v12434_v28  ;;  %v3960_v30 = vmul.f32 %v12493_v20, %v12435_v50  ;;  %v12495_v50 = vld [vmem:[#allocation70_spill] sm:$0xff] }
 0x368   :  { %v3936_v15 = vadd.f32 %v3928_v16, %v3920_v41  ;;  %v4024_v42 = vadd.f32 %v4016_v61, %v4008_v51  ;;  %v3976_v37 = vmul.f32 %v12494_v8, %v12437_v35  ;;  %v4048_v36 = vmul.f32 %v12491_v48, %v12439_v54 }
 0x369   :  { %v4001_v6 = vadd.f32 %v3993_v58, %v3985_v18  ;;  %v4089_v3 = vadd.f32 %v4081_v38, %v4073_v19  ;;  %v4064_v4 = vmul.f32 %v12492_v49, %v12440_v14  ;;  %v4113_v1 = vmul.f32 %v12490_v40, %v12433_v21  ;;  %v10451_v40 = vpop.permute.xlu1 %4140  ;;  %v10457_v41 = vpop.permute.xlu0 %4135 }
 0x36a   :  { %v3952_v47 = vadd.f32 %v3944_v34, %v3936_v15  ;;  %v4040_v10 = vadd.f32 %v4032_v0, %v4024_v42  ;;  %v3992_v23 = vmul.f32 %v12495_v50, %v12444_v44  ;;  %v4080_v22 = vmul.f32 %v12493_v20, %v12446_v31  ;;  %v6589_v44 = vld [vmem:[%s10752_s6] sm:$0xff]  ;;  %v6590_v31 = vld [vmem:[%s10752_s6 + $0x8] sm:$0xff] }
 0x36b   :  { %4724 = vmatprep.subr.mxu0 %v4001_v6  ;;  %v4105_v28 = vadd.f32 %v4097_v12, %v4089_v3  ;;  %v4096_v54 = vmul.f32 %v12494_v8, %v12448_v26  ;;  %v4112_v21 = vmul.f32 %v12495_v50, %v12451_v46  ;;  %v6591_v26 = vld [vmem:[%s10752_s6 + $0x10] sm:$0xff]  ;;  %v6592_v46 = vld [vmem:[%s10752_s6 + $0x18] sm:$0xff] }
 0x36c   :  { %v3968_v11 = vadd.f32 %v3960_v30, %v3952_v47  ;;  %v4056_v29 = vadd.f32 %v4048_v36, %v4040_v10 }
 0x36d   :  { %v4121_v5 = vadd.f32 %v4113_v1, %v4105_v28  ;;  %v10468_v15 = vpop.permute.xlu1 %4130 }
 0x36e   :  { %v3984_v35 = vadd.f32 %v3976_v37, %v3968_v11  ;;  %v4072_v33 = vadd.f32 %v4064_v4, %v4056_v29 }
 0x36f   :  { %4813 = vmatprep.subr.mxu1 %v4121_v5 }
 0x370   :  { %v4000_v14 = vadd.f32 %v3992_v23, %v3984_v35  ;;  %v4088_v59 = vadd.f32 %v4080_v22, %v4072_v33 }
 0x372   :  { %4725 = vmatpush1.msra.mxu0 %v4000_v14  ;;  %v4104_v9 = vadd.f32 %v4096_v54, %v4088_v59 }
 0x373   :  { %6526 = vmatmul.mubr.msk.f32.vlgmr.msra.gmra.mxu0 %vm2371_vm1, %v6589_v44 }
 0x374   :  { %v4120_v43 = vadd.f32 %v4112_v21, %v4104_v9  ;;  %4764 = vmatprep.mubr.f32.mxu0 %v12308_v32 }
 0x376   :  { %4814 = vmatpush1.msra.mxu1 %v4120_v43  ;;  %v10481_v43 = vld [vmem:[#allocation5] sm:$0xff] }
 0x377   :  { %6530 = vmatmul.mubr.msk.f32.vlgmr.msra.gmra.mxu1 %vm2371_vm1, %v6589_v44  ;;  %6527 = vmatmul.mubr.msk.f32.gmra.mxu0 %vm2371_vm1, %v6590_v31 }
 0x378   :  { %4853 = vmatprep.mubr.f32.mxu1 %v12308_v32  ;;  %4770 = vmatprep.mubr.f32.mxu0 %v12308_v32 }
 0x37b   :  { %6531 = vmatmul.mubr.msk.f32.gmra.mxu1 %vm2371_vm1, %v6590_v31  ;;  %6528 = vmatmul.mubr.msk.f32.gmra.mxu0 %vm2371_vm1, %v6591_v26 }
 0x37c   :  { %4859 = vmatprep.mubr.f32.mxu1 %v12308_v32  ;;  %4776 = vmatprep.mubr.f32.mxu0 %v12308_v32 }
 0x37f   :  { %6532 = vmatmul.mubr.msk.f32.gmra.mxu1 %vm2371_vm1, %v6591_v26  ;;  %6529 = vmatmul.mubr.msk.f32.gmra.mxu0 %vm2371_vm1, %v6592_v46 }
 0x380   :  { %4865 = vmatprep.mubr.f32.mxu1 %v12308_v32  ;;  %5040 = vmatprep.mubr.f32.mxu0 %v12308_v32 }
 0x383   :  { %6533 = vmatmul.mubr.msk.f32.gmra.mxu1 %vm2371_vm1, %v6592_v46 }
 0x384   :  { %5129 = vmatprep.mubr.f32.mxu1 %v12308_v32 }
 0x3b0   :  { %v4226_v27 = vpop.f32.mrf.mxu0  ;;  %v4315_v39 = vpop.f32.mrf.mxu1 }
 0x3b1   :  { %v4227_v4 = vadd.f32 %v4226_v27, %v10468_v15  ;;  %v4316_v5 = vadd.f32 %v4315_v39, %v10468_v15 }
 0x3b2   :  { %v4228_v7 = vpop.f32.mrf.mxu0  ;;  %v4317_v60 = vpop.f32.mrf.mxu1 }
 0x3b3   :  { %v4229_v8 = vadd.f32 %v4228_v7, %v10468_v15  ;;  %v4318_v28 = vadd.f32 %v4317_v60, %v10468_v15  ;;  %v4872_v9 = vmax.f32 %v4227_v4, 0.0  ;;  %v4874_v31 = vmax.f32 %v4316_v5, 0.0  ;;  %v10488_v7 = vld [vmem:[#allocation5 + $0x8] sm:$0xff] }
 0x3b4   :  { %v4232_v63 = vpop.f32.mrf.mxu0 }
 0x3b5   :  { %v4321_v55 = vpop.f32.mrf.mxu1  ;;  %v4233_v42 = vadd.f32 %v4232_v63, %v10457_v41  ;;  %v4873_v14 = vmax.f32 %v4229_v8, 0.0  ;;  %v4875_v21 = vmax.f32 %v4318_v28, 0.0 }
 0x3b6   :  { %v4234_v25 = vpop.f32.mrf.mxu0  ;;  %v4322_v37 = vadd.f32 %v4321_v55, %v10457_v41 }
 0x3b7   :  { %v4323_v53 = vpop.f32.mrf.mxu1  ;;  %v4235_v18 = vadd.f32 %v4234_v25, %v10457_v41  ;;  %v4888_v35 = vmax.f32 %v4233_v42, 0.0 }
 0x3b8   :  { %v4324_v6 = vadd.f32 %v4323_v53, %v10457_v41  ;;  %v4890_v59 = vmax.f32 %v4322_v37, 0.0  ;;  %v10497_v53 = vld [vmem:[#allocation5 + $0x10] sm:$0xff] }
 0x3b9   :  { %v4889_v50 = vmax.f32 %v4235_v18, 0.0 }
 0x3ba   :  { %v4891_v33 = vmax.f32 %v4324_v6, 0.0 }
 0x3be   :  { %v4238_v57 = vpop.f32.mrf.mxu0 }
 0x3bf   :  { %v4327_v13 = vpop.f32.mrf.mxu1  ;;  %v4239_v49 = vadd.f32 %v4238_v57, %v10451_v40 }
 0x3c0   :  { %v4240_v24 = vpop.f32.mrf.mxu0  ;;  %v4328_v19 = vadd.f32 %v4327_v13, %v10451_v40 }
 0x3c1   :  { %v4329_v62 = vpop.f32.mrf.mxu1  ;;  %v4241_v56 = vadd.f32 %v4240_v24, %v10451_v40  ;;  %v4904_v1 = vmax.f32 %v4239_v49, 0.0 }
 0x3c2   :  { %v4244_v58 = vpop.f32.mrf.mxu0  ;;  %v4330_v34 = vadd.f32 %v4329_v62, %v10451_v40  ;;  %v4906_v23 = vmax.f32 %v4328_v19, 0.0 }
 0x3c3   :  { %v4333_v38 = vpop.f32.mrf.mxu1  ;;  %v4245_v2 = vadd.f32 %v4244_v58, %v10449_v52  ;;  %v4905_v47 = vmax.f32 %v4241_v56, 0.0 }
 0x3c4   :  { %v4246_v17 = vpop.f32.mrf.mxu0  ;;  %v4334_v45 = vadd.f32 %v4333_v38, %v10449_v52  ;;  %v4907_v11 = vmax.f32 %v4330_v34, 0.0 }
 0x3c5   :  { %v4247_v48 = vadd.f32 %v4246_v17, %v10449_v52  ;;  %v4335_v16 = vpop.f32.mrf.mxu1  ;;  %v4920_v3 = vmax.f32 %v4245_v2, 0.0 }
 0x3c6   :  { %v4336_v51 = vadd.f32 %v4335_v16, %v10449_v52  ;;  %v10462_v61 = vpop.f32.mrf.mxu0  ;;  %v4922_v10 = vmax.f32 %v4334_v45, 0.0 }
 0x3c7   :  { %v4921_v12 = vmax.f32 %v4247_v48, 0.0  ;;  %v10466_v0 = vpop.f32.mrf.mxu1 }
 0x3c8   :  { %v4923_v20 = vmax.f32 %v4336_v51, 0.0  ;;  %v10472_v30 = vpop.f32.mrf.mxu0 }
 0x3c9   :  { %v10476_v36 = vpop.f32.mrf.mxu1  ;;  %5000 = vmatprep.subr.mxu0 %v4921_v12  ;;  %v4407_v19 = vadd.f32 %v10472_v30, %v10468_v15  ;;  %v4494_v30 = vadd.f32 %v10466_v0, %v10468_v15 }
 0x3ca   :  { %5089 = vmatprep.subr.mxu1 %v4923_v20  ;;  %v4410_v29 = vpop.f32.mrf.mxu0  ;;  %5001 = vmatpush1.msra.mxu0 %v4920_v3  ;;  %v10519_v3 = vld [vmem:[#allocation5 + $0x18] sm:$0xff]  ;;  %v4405_v20 = vadd.f32 %v10462_v61, %v10468_v15  ;;  %v4496_v8 = vadd.f32 %v10476_v36, %v10468_v15 }
 0x3cb   :  { %5090 = vmatpush1.msra.mxu1 %v4922_v10  ;;  %5002 = vmatprep.subr.mxu0 %v4905_v47  ;;  %v4411_v49 = vadd.f32 %v4410_v29, %v10457_v41  ;;  %v4877_v28 = vmax.f32 %v4407_v19, 0.0  ;;  %v4878_v0 = vmax.f32 %v4494_v30, 0.0 }
 0x3cc   :  { %v4499_v22 = vpop.f32.mrf.mxu1  ;;  %5091 = vmatprep.subr.mxu1 %v4907_v11  ;;  %v4412_v54 = vpop.f32.mrf.mxu0  ;;  %5003 = vmatpush1.msra.mxu0 %v4904_v1  ;;  %v4876_v36 = vmax.f32 %v4405_v20, 0.0  ;;  %v4879_v1 = vmax.f32 %v4496_v8, 0.0 }
 0x3cd   :  { %5092 = vmatpush1.msra.mxu1 %v4906_v23  ;;  %5004 = vmatprep.subr.mxu0 %v4889_v50  ;;  %v4413_v45 = vadd.f32 %v4412_v54, %v10457_v41  ;;  %v4500_v12 = vadd.f32 %v4499_v22, %v10457_v41  ;;  %v4892_v10 = vmax.f32 %v4411_v49, 0.0 }
 0x3ce   :  { %v4501_v44 = vpop.f32.mrf.mxu1  ;;  %5093 = vmatprep.subr.mxu1 %v4891_v33  ;;  %5005 = vmatpush1.msra.mxu0 %v4888_v35 }
 0x3cf   :  { %v4416_v26 = vpop.f32.mrf.mxu0  ;;  %5094 = vmatpush1.msra.mxu1 %v4890_v59  ;;  %5006 = vmatprep.subr.mxu0 %v4873_v14  ;;  %v4502_v34 = vadd.f32 %v4501_v44, %v10457_v41  ;;  %v4893_v47 = vmax.f32 %v4413_v45, 0.0  ;;  %v4894_v61 = vmax.f32 %v4500_v12, 0.0 }
 0x3d0   :  { %v4505_v46 = vpop.f32.mrf.mxu1  ;;  %5095 = vmatprep.subr.mxu1 %v4875_v21  ;;  %5007 = vmatpush1.msra.mxu0 %v4872_v9  ;;  %v4417_v58 = vadd.f32 %v4416_v26, %v10451_v40 }
 0x3d1   :  { %v4418_v27 = vpop.f32.mrf.mxu0  ;;  %5096 = vmatpush1.msra.mxu1 %v4874_v31  ;;  %6534 = vmatmul.mubr.msk.f32.vlgmr.msra.gmra.mxu0 %vm2371_vm1, %v10481_v43  ;;  %v4506_v17 = vadd.f32 %v4505_v46, %v10451_v40  ;;  %v4895_v4 = vmax.f32 %v4502_v34, 0.0 }
 0x3d2   :  { %v4507_v39 = vpop.f32.mrf.mxu1  ;;  %6538 = vmatmul.mubr.msk.f32.vlgmr.msra.gmra.mxu1 %vm2371_vm1, %v10481_v43  ;;  %5046 = vmatprep.mubr.f32.mxu0 %v12308_v32  ;;  %v4419_v57 = vadd.f32 %v4418_v27, %v10451_v40  ;;  %v4908_v42 = vmax.f32 %v4417_v58, 0.0 }
 0x3d3   :  { %5135 = vmatprep.mubr.f32.mxu1 %v12308_v32  ;;  %v4508_v38 = vadd.f32 %v4507_v39, %v10451_v40  ;;  %v4910_v37 = vmax.f32 %v4506_v17, 0.0 }
 0x3d4   :  { %v4422_v60 = vpop.f32.mrf.mxu0  ;;  %v4909_v51 = vmax.f32 %v4419_v57, 0.0 }
 0x3d5   :  { %v4511_v63 = vpop.f32.mrf.mxu1  ;;  %6535 = vmatmul.mubr.msk.f32.gmra.mxu0 %vm2371_vm1, %v10488_v7  ;;  %v4423_v55 = vadd.f32 %v4422_v60, %v10449_v52  ;;  %v4911_v6 = vmax.f32 %v4508_v38, 0.0 }
 0x3d6   :  { %v4424_v25 = vpop.f32.mrf.mxu0  ;;  %6539 = vmatmul.mubr.msk.f32.gmra.mxu1 %vm2371_vm1, %v10488_v7  ;;  %5052 = vmatprep.mubr.f32.mxu0 %v12308_v32  ;;  %v4512_v13 = vadd.f32 %v4511_v63, %v10449_v52 }
 0x3d7   :  { %v4425_v24 = vadd.f32 %v4424_v25, %v10449_v52  ;;  %v4513_v62 = vpop.f32.mrf.mxu1  ;;  %5141 = vmatprep.mubr.f32.mxu1 %v12308_v32  ;;  %v4924_v48 = vmax.f32 %v4423_v55, 0.0 }
 0x3d8   :  { %v4514_v2 = vadd.f32 %v4513_v62, %v10449_v52  ;;  %v4926_v18 = vmax.f32 %v4512_v13, 0.0 }
 0x3d9   :  { %v4925_v56 = vmax.f32 %v4425_v24, 0.0  ;;  %6536 = vmatmul.mubr.msk.f32.gmra.mxu0 %vm2371_vm1, %v10497_v53 }
 0x3da   :  { %v4927_v16 = vmax.f32 %v4514_v2, 0.0  ;;  %6540 = vmatmul.mubr.msk.f32.gmra.mxu1 %vm2371_vm1, %v10497_v53  ;;  %5058 = vmatprep.mubr.f32.mxu0 %v12308_v32 }
 0x3db   :  { %5178 = vmatprep.subr.mxu0 %v4925_v56  ;;  %5147 = vmatprep.mubr.f32.mxu1 %v12308_v32 }
 0x3dc   :  { %5267 = vmatprep.subr.mxu1 %v4927_v16  ;;  %5179 = vmatpush1.msra.mxu0 %v4924_v48 }
 0x3dd   :  { %5268 = vmatpush1.msra.mxu1 %v4926_v18  ;;  %5180 = vmatprep.subr.mxu0 %v4909_v51 }
 0x3de   :  { %5269 = vmatprep.subr.mxu1 %v4911_v6  ;;  %5181 = vmatpush1.msra.mxu0 %v4908_v42 }
 0x3df   :  { %5270 = vmatpush1.msra.mxu1 %v4910_v37  ;;  %6537 = vmatmul.mubr.msk.f32.gmra.mxu0 %vm2371_vm1, %v10519_v3 }
 0x3e0   :  { %6541 = vmatmul.mubr.msk.f32.gmra.mxu1 %vm2371_vm1, %v10519_v3  ;;  %5182 = vmatprep.subr.mxu0 %v4893_v47 }
 0x3e1   :  { %5271 = vmatprep.subr.mxu1 %v4895_v4  ;;  %5183 = vmatpush1.msra.mxu0 %v4892_v10 }
 0x3e2   :  { %5272 = vmatpush1.msra.mxu1 %v4894_v61  ;;  %5184 = vmatprep.subr.mxu0 %v4877_v28 }
 0x3e3   :  { %5273 = vmatprep.subr.mxu1 %v4879_v1  ;;  %5185 = vmatpush1.msra.mxu0 %v4876_v36 }
 0x3e4   :  { %5218 = vmatprep.mubr.f32.mxu0 %v12308_v32  ;;  %5274 = vmatpush1.msra.mxu1 %v4878_v0 }
 0x3e5   :  { %5307 = vmatprep.mubr.f32.mxu1 %v12308_v32  ;;  %6542 = vmatmul.mubr.msk.f32.vlgmr.msra.gmra.mxu0 %vm2371_vm1, %v10481_v43 }
 0x3e6   :  { %6546 = vmatmul.mubr.msk.f32.vlgmr.msra.gmra.mxu1 %vm2371_vm1, %v10481_v43  ;;  %5224 = vmatprep.mubr.f32.mxu0 %v12308_v32 }
 0x3e7   :  { %5313 = vmatprep.mubr.f32.mxu1 %v12308_v32 }
 0x3e9   :  { %6543 = vmatmul.mubr.msk.f32.gmra.mxu0 %vm2371_vm1, %v10488_v7 }
 0x3ea   :  { %6547 = vmatmul.mubr.msk.f32.gmra.mxu1 %vm2371_vm1, %v10488_v7  ;;  %5230 = vmatprep.mubr.f32.mxu0 %v12308_v32 }
 0x3eb   :  { %5319 = vmatprep.mubr.f32.mxu1 %v12308_v32 }
 0x3ed   :  { %6544 = vmatmul.mubr.msk.f32.gmra.mxu0 %vm2371_vm1, %v10497_v53 }
 0x3ee   :  { %6548 = vmatmul.mubr.msk.f32.gmra.mxu1 %vm2371_vm1, %v10497_v53  ;;  %5236 = vmatprep.mubr.f32.mxu0 %v12308_v32 }
 0x3ef   :  { %5325 = vmatprep.mubr.f32.mxu1 %v12308_v32 }
 0x3f1   :  { %6545 = vmatmul.mubr.msk.f32.gmra.mxu0 %vm2371_vm1, %v10519_v3 }
 0x3f2   :  { %6549 = vmatmul.mubr.msk.f32.gmra.mxu1 %vm2371_vm1, %v10519_v3  ;;  %5396 = vmatprep.mubr.f32.mxu0 %v12308_v32 }
 0x3f3   :  { %5485 = vmatprep.mubr.f32.mxu1 %v12308_v32 }
 0x3f7   :  { %v4582_v11 = vpop.f32.mrf.mxu0 }
 0x3f8   :  { %v4583_v45 = vadd.f32 %v4582_v11, %v10468_v15 }
 0x3f9   :  { %v4584_v29 = vpop.f32.mrf.mxu0 }
 0x3fa   :  { %v4585_v38 = vadd.f32 %v4584_v29, %v10468_v15  ;;  %v4880_v8 = vmax.f32 %v4583_v45, 0.0 }
 0x3fb   :  { %v4671_v5 = vpop.f32.mrf.mxu1 }
 0x3fc   :  { %v4672_v19 = vadd.f32 %v4671_v5, %v10468_v15  ;;  %v4881_v6 = vmax.f32 %v4585_v38, 0.0 }
 0x3fd   :  { %v4673_v50 = vpop.f32.mrf.mxu1  ;;  %v4588_v23 = vpop.f32.mrf.mxu0 }
 0x3fe   :  { %v4589_v24 = vadd.f32 %v4588_v23, %v10457_v41  ;;  %v4674_v34 = vadd.f32 %v4673_v50, %v10468_v15  ;;  %v4882_v47 = vmax.f32 %v4672_v19, 0.0 }
 0x3ff   :  { %v4677_v35 = vpop.f32.mrf.mxu1  ;;  %v4590_v33 = vpop.f32.mrf.mxu0 }
 0x400   :  { %v4591_v55 = vadd.f32 %v4590_v33, %v10457_v41  ;;  %v4678_v48 = vadd.f32 %v4677_v35, %v10457_v41  ;;  %v4896_v12 = vmax.f32 %v4589_v24, 0.0  ;;  %v4883_v30 = vmax.f32 %v4674_v34, 0.0 }
 0x401   :  { %v4679_v22 = vpop.f32.mrf.mxu1 }
 0x402   :  { %v4594_v54 = vpop.f32.mrf.mxu0  ;;  %v4680_v2 = vadd.f32 %v4679_v22, %v10457_v41  ;;  %v4897_v51 = vmax.f32 %v4591_v55, 0.0  ;;  %v4898_v37 = vmax.f32 %v4678_v48, 0.0 }
 0x403   :  { %v4683_v14 = vpop.f32.mrf.mxu1  ;;  %v4595_v39 = vadd.f32 %v4594_v54, %v10451_v40 }
 0x404   :  { %v4596_v59 = vpop.f32.mrf.mxu0  ;;  %v4684_v62 = vadd.f32 %v4683_v14, %v10451_v40  ;;  %v4899_v20 = vmax.f32 %v4680_v2, 0.0 }
 0x405   :  { %v4685_v9 = vpop.f32.mrf.mxu1  ;;  %v4597_v46 = vadd.f32 %v4596_v59, %v10451_v40  ;;  %v4912_v16 = vmax.f32 %v4595_v39, 0.0 }
 0x406   :  { %v4686_v25 = vadd.f32 %v4685_v9, %v10451_v40  ;;  %v4914_v42 = vmax.f32 %v4684_v62, 0.0 }
 0x407   :  { %v4600_v21 = vpop.f32.mrf.mxu0  ;;  %v4913_v17 = vmax.f32 %v4597_v46, 0.0 }
 0x408   :  { %v4601_v44 = vadd.f32 %v4600_v21, %v10449_v52  ;;  %v4689_v31 = vpop.f32.mrf.mxu1  ;;  %v4915_v18 = vmax.f32 %v4686_v25, 0.0 }
 0x409   :  { %v4602_v26 = vpop.f32.mrf.mxu0  ;;  %v4690_v60 = vadd.f32 %v4689_v31, %v10449_v52 }
 0x40a   :  { %v4603_v27 = vadd.f32 %v4602_v26, %v10449_v52  ;;  %v4691_v63 = vpop.f32.mrf.mxu1  ;;  %v4928_v58 = vmax.f32 %v4601_v44, 0.0 }
 0x40b   :  { %v4692_v13 = vadd.f32 %v4691_v63, %v10449_v52  ;;  %v4930_v49 = vmax.f32 %v4690_v60, 0.0 }
 0x40c   :  { %v4929_v57 = vmax.f32 %v4603_v27, 0.0 }
 0x40d   :  { %v4931_v56 = vmax.f32 %v4692_v13, 0.0 }
 0x40e   :  { %5356 = vmatprep.subr.mxu0 %v4929_v57 }
 0x40f   :  { %5357 = vmatpush1.msra.mxu0 %v4928_v58  ;;  %5445 = vmatprep.subr.mxu1 %v4931_v56 }
 0x410   :  { %5358 = vmatprep.subr.mxu0 %v4913_v17  ;;  %5446 = vmatpush1.msra.mxu1 %v4930_v49 }
 0x411   :  { %5359 = vmatpush1.msra.mxu0 %v4912_v16  ;;  %5447 = vmatprep.subr.mxu1 %v4915_v18 }
 0x412   :  { %5360 = vmatprep.subr.mxu0 %v4897_v51  ;;  %5448 = vmatpush1.msra.mxu1 %v4914_v42 }
 0x413   :  { %5361 = vmatpush1.msra.mxu0 %v4896_v12  ;;  %5449 = vmatprep.subr.mxu1 %v4899_v20 }
 0x414   :  { %5362 = vmatprep.subr.mxu0 %v4881_v6  ;;  %5450 = vmatpush1.msra.mxu1 %v4898_v37 }
 0x415   :  { %5363 = vmatpush1.msra.mxu0 %v4880_v8  ;;  %5451 = vmatprep.subr.mxu1 %v4883_v30  ;;  %v10637_v30 = vpop.permute.xlu0 %4961 }
 0x416   :  { %6550 = vmatmul.mubr.msk.f32.vlgmr.msra.gmra.mxu0 %vm2371_vm1, %v10481_v43  ;;  %5452 = vmatpush1.msra.mxu1 %v4882_v47  ;;  %v10639_v47 = vpop.permute.xlu1 %4956 }
 0x417   :  { %5402 = vmatprep.mubr.f32.mxu0 %v12308_v32  ;;  %6554 = vmatmul.mubr.msk.f32.vlgmr.msra.gmra.mxu1 %vm2371_vm1, %v10481_v43 }
 0x418   :  { %5491 = vmatprep.mubr.f32.mxu1 %v12308_v32 }
 0x41a   :  { %6551 = vmatmul.mubr.msk.f32.gmra.mxu0 %vm2371_vm1, %v10488_v7 }
 0x41b   :  { %5408 = vmatprep.mubr.f32.mxu0 %v12308_v32  ;;  %6555 = vmatmul.mubr.msk.f32.gmra.mxu1 %vm2371_vm1, %v10488_v7 }
 0x41c   :  { %5497 = vmatprep.mubr.f32.mxu1 %v12308_v32 }
 0x41e   :  { %6552 = vmatmul.mubr.msk.f32.gmra.mxu0 %vm2371_vm1, %v10497_v53 }
 0x41f   :  { %5414 = vmatprep.mubr.f32.mxu0 %v12308_v32  ;;  %6556 = vmatmul.mubr.msk.f32.gmra.mxu1 %vm2371_vm1, %v10497_v53 }
 0x420   :  { %5503 = vmatprep.mubr.f32.mxu1 %v12308_v32 }
 0x422   :  { %6553 = vmatmul.mubr.msk.f32.gmra.mxu0 %vm2371_vm1, %v10519_v3 }
 0x423   :  { %5574 = vmatprep.mubr.f32.mxu0 %v12308_v32  ;;  %6557 = vmatmul.mubr.msk.f32.gmra.mxu1 %vm2371_vm1, %v10519_v3 }
 0x424   :  { %5663 = vmatprep.mubr.f32.mxu1 %v12308_v32 }
 0x433   :  { %v4760_v10 = vpop.f32.mrf.mxu0 }
 0x434   :  { %v4761_v25 = vadd.f32 %v4760_v10, %v10468_v15 }
 0x435   :  { %v4762_v4 = vpop.f32.mrf.mxu0 }
 0x436   :  { %v4763_v39 = vadd.f32 %v4762_v4, %v10468_v15  ;;  %v4884_v48 = vmax.f32 %v4761_v25, 0.0 }
 0x437   :  { %v4849_v28 = vpop.f32.mrf.mxu1  ;;  %v4766_v61 = vpop.f32.mrf.mxu0 }
 0x438   :  { %v4767_v31 = vadd.f32 %v4766_v61, %v10457_v41  ;;  %v4885_v56 = vmax.f32 %v4763_v39, 0.0 }
 0x439   :  { %v4851_v36 = vpop.f32.mrf.mxu1  ;;  %v4768_v1 = vpop.f32.mrf.mxu0 }
 0x43a   :  { %v4769_v21 = vadd.f32 %v4768_v1, %v10457_v41  ;;  %v4900_v38 = vmax.f32 %v4767_v31, 0.0 }
 0x43b   :  { %v4855_v0 = vpop.f32.mrf.mxu1  ;;  %v4772_v11 = vpop.f32.mrf.mxu0 }
 0x43c   :  { %v4773_v59 = vadd.f32 %v4772_v11, %v10451_v40  ;;  %v4901_v24 = vmax.f32 %v4769_v21, 0.0  ;;  %v4856_v2 = vadd.f32 %v4855_v0, %v10457_v41  ;;  %v10645_v11 = vpop.permute.xlu0 %4951 }
 0x43d   :  { %v4857_v29 = vpop.f32.mrf.mxu1  ;;  %v4774_v5 = vpop.f32.mrf.mxu0 }
 0x43e   :  { %v4775_v54 = vadd.f32 %v4774_v5, %v10451_v40  ;;  %v4916_v57 = vmax.f32 %v4773_v59, 0.0  ;;  %v4858_v62 = vadd.f32 %v4857_v29, %v10457_v41  ;;  %v4902_v34 = vmax.f32 %v4856_v2, 0.0 }
 0x43f   :  { %v4861_v50 = vpop.f32.mrf.mxu1  ;;  %v4778_v23 = vpop.f32.mrf.mxu0 }
 0x440   :  { %v4779_v33 = vadd.f32 %v4778_v23, %v10449_v52  ;;  %v4917_v60 = vmax.f32 %v4775_v54, 0.0  ;;  %v4862_v13 = vadd.f32 %v4861_v50, %v10451_v40  ;;  %v4903_v49 = vmax.f32 %v4858_v62, 0.0 }
 0x441   :  { %v4863_v35 = vpop.f32.mrf.mxu1  ;;  %v4780_v22 = vpop.f32.mrf.mxu0 }
 0x442   :  { %v4781_v14 = vadd.f32 %v4780_v22, %v10449_v52  ;;  %v4932_v26 = vmax.f32 %v4779_v33, 0.0  ;;  %v4864_v63 = vadd.f32 %v4863_v35, %v10451_v40  ;;  %v4850_v40 = vadd.f32 %v4849_v28, %v10468_v15  ;;  %v10652_v22 = vpop.permute.xlu1 %4946 }
 0x443   :  { %v4867_v9 = vpop.f32.mrf.mxu1  ;;  %v4918_v16 = vmax.f32 %v4862_v13, 0.0 }
 0x444   :  { %v4933_v44 = vmax.f32 %v4781_v14, 0.0  ;;  %v4868_v46 = vadd.f32 %v4867_v9, %v10449_v52  ;;  %v4919_v45 = vmax.f32 %v4864_v63, 0.0  ;;  %v4886_v51 = vmax.f32 %v4850_v40, 0.0 }
 0x445   :  { %v4869_v27 = vpop.f32.mrf.mxu1 }
 0x446   :  { %v4870_v55 = vadd.f32 %v4869_v27, %v10449_v52  ;;  %5534 = vmatprep.subr.mxu0 %v4933_v44  ;;  %v4934_v17 = vmax.f32 %v4868_v46, 0.0  ;;  %v4852_v52 = vadd.f32 %v4851_v36, %v10468_v15 }
 0x447   :  { %5535 = vmatpush1.msra.mxu0 %v4932_v26 }
 0x448   :  { %v4935_v58 = vmax.f32 %v4870_v55, 0.0  ;;  %5536 = vmatprep.subr.mxu0 %v4917_v60  ;;  %v4887_v41 = vmax.f32 %v4852_v52, 0.0 }
 0x449   :  { %5537 = vmatpush1.msra.mxu0 %v4916_v57 }
 0x44a   :  { %5623 = vmatprep.subr.mxu1 %v4935_v58  ;;  %5538 = vmatprep.subr.mxu0 %v4901_v24 }
 0x44b   :  { %5624 = vmatpush1.msra.mxu1 %v4934_v17  ;;  %5539 = vmatpush1.msra.mxu0 %v4900_v38 }
 0x44c   :  { %5625 = vmatprep.subr.mxu1 %v4919_v45  ;;  %5540 = vmatprep.subr.mxu0 %v4885_v56 }
 0x44d   :  { %5626 = vmatpush1.msra.mxu1 %v4918_v16  ;;  %5541 = vmatpush1.msra.mxu0 %v4884_v48  ;;  %v10668_v16 = vld [vmem:[%s10756_s10] sm:$0x3]  ;;  %s6667_s10 = smov [#allocation7]  }
 0x44e   :  { %5627 = vmatprep.subr.mxu1 %v4903_v49  ;;  %6558 = vmatmul.mubr.msk.f32.vlgmr.msra.gmra.mxu0 %vm2371_vm1, %v10481_v43  ;;  %s6428_s18 = sshll.u32 %s6667_s10, 4  ;;  %s6429_s18 = int_to_ptr.vmem [resolvable:$true] %s6428_s18 }
 0x44f   :  { %5628 = vmatpush1.msra.mxu1 %v4902_v34  ;;  %5580 = vmatprep.mubr.f32.mxu0 %v12308_v32  ;;  %s6633_s19 = scalar_lea.vmem %s6429_s18, 512  ;;  %p6638_p11 = scmp.lt.s32.totalorder %s6429_s18, %s6429_s18 }
 0x450   :  { %5629 = vmatprep.subr.mxu1 %v4887_v41  ;;  %p6634_p10 = scmp.ne.s32.totalorder %s6429_s18, %s6633_s19  ;;  %p6639_p12 = scmp.lt.s32.totalorder %s6633_s19, %s6633_s19 }
 0x451   :  { %5630 = vmatpush1.msra.mxu1 %v4886_v51 }
 0x452   :  { %6562 = vmatmul.mubr.msk.f32.vlgmr.msra.gmra.mxu1 %vm2371_vm1, %v10481_v43  ;;  %6559 = vmatmul.mubr.msk.f32.gmra.mxu0 %vm2371_vm1, %v10488_v7  ;;  %p6640_p13 = por %p6639_p12, %p6638_p11 }
 0x453   :  { %5669 = vmatprep.mubr.f32.mxu1 %v12308_v32  ;;  %5586 = vmatprep.mubr.f32.mxu0 %v12308_v32 }
 0x454   :  { %p6641_p0 = pnand %p6640_p13, %p6634_p10 }
 0x456   :  { %6563 = vmatmul.mubr.msk.f32.gmra.mxu1 %vm2371_vm1, %v10488_v7  ;;  %6560 = vmatmul.mubr.msk.f32.gmra.mxu0 %vm2371_vm1, %v10497_v53 }
 0x457   :  { %5675 = vmatprep.mubr.f32.mxu1 %v12308_v32  ;;  %5592 = vmatprep.mubr.f32.mxu0 %v12308_v32 }
 0x45a   :  { %6564 = vmatmul.mubr.msk.f32.gmra.mxu1 %vm2371_vm1, %v10497_v53  ;;  %6561 = vmatmul.mubr.msk.f32.gmra.mxu0 %vm2371_vm1, %v10519_v3 }
 0x45b   :  { %5681 = vmatprep.mubr.f32.mxu1 %v12308_v32  ;;  %5826 = vmatprep.mubr.f32.mxu0 %v12308_v32 }
 0x45e   :  { %6565 = vmatmul.mubr.msk.f32.gmra.mxu1 %vm2371_vm1, %v10519_v3 }
 0x45f   :  { %5897 = vmatprep.mubr.f32.mxu1 %v12308_v32 }
 0x491   :  { %v5042_v15 = vpop.f32.mrf.mxu0 }
 0x492   :  { %v5131_v43 = vpop.f32.mrf.mxu1  ;;  %v5043_v39 = vadd.f32 %v5042_v15, %v10652_v22 }
 0x493   :  { %v5044_v7 = vpop.f32.mrf.mxu0  ;;  %v5132_v57 = vadd.f32 %v5131_v43, %v10652_v22 }
 0x494   :  { %v5133_v18 = vpop.f32.mrf.mxu1  ;;  %v5045_v44 = vadd.f32 %v5044_v7, %v10652_v22  ;;  %v5688_v45 = vmax.f32 %v5043_v39, 0.0 }
 0x495   :  { %v5048_v19 = vpop.f32.mrf.mxu0  ;;  %v5134_v60 = vadd.f32 %v5133_v18, %v10652_v22  ;;  %v5690_v49 = vmax.f32 %v5132_v57, 0.0 }
 0x496   :  { %v5137_v12 = vpop.f32.mrf.mxu1  ;;  %v5049_v54 = vadd.f32 %v5048_v19, %v10645_v11  ;;  %v5689_v17 = vmax.f32 %v5045_v44, 0.0 }
 0x497   :  { %v5050_v42 = vpop.f32.mrf.mxu0  ;;  %v5138_v31 = vadd.f32 %v5137_v12, %v10645_v11  ;;  %v5691_v48 = vmax.f32 %v5134_v60, 0.0 }
 0x498   :  { %v5139_v53 = vpop.f32.mrf.mxu1  ;;  %v5051_v23 = vadd.f32 %v5050_v42, %v10645_v11  ;;  %v5704_v58 = vmax.f32 %v5049_v54, 0.0 }
 0x499   :  { %v5054_v6 = vpop.f32.mrf.mxu0  ;;  %v5140_v14 = vadd.f32 %v5139_v53, %v10645_v11  ;;  %v5706_v56 = vmax.f32 %v5138_v31, 0.0 }
 0x49a   :  { %v5143_v20 = vpop.f32.mrf.mxu1  ;;  %v5055_v29 = vadd.f32 %v5054_v6, %v10639_v47  ;;  %v5705_v13 = vmax.f32 %v5051_v23, 0.0 }
 0x49b   :  { %v5056_v8 = vpop.f32.mrf.mxu0  ;;  %v5144_v35 = vadd.f32 %v5143_v20, %v10639_v47  ;;  %v5707_v38 = vmax.f32 %v5140_v14, 0.0 }
 0x49c   :  { %v5145_v37 = vpop.f32.mrf.mxu1  ;;  %v5057_v61 = vadd.f32 %v5056_v8, %v10639_v47  ;;  %v5720_v63 = vmax.f32 %v5055_v29, 0.0 }
 0x49d   :  { %v5146_v5 = vadd.f32 %v5145_v37, %v10639_v47  ;;  %v5722_v24 = vmax.f32 %v5144_v35, 0.0 }
 0x49e   :  { %v5721_v26 = vmax.f32 %v5057_v61, 0.0 }
 0x49f   :  { %v5060_v10 = vpop.f32.mrf.mxu0  ;;  %v5723_v55 = vmax.f32 %v5146_v5, 0.0 }
 0x4a0   :  { %v5149_v3 = vpop.f32.mrf.mxu1  ;;  %v5061_v4 = vadd.f32 %v5060_v10, %v10637_v30 }
 0x4a1   :  { %v5062_v28 = vpop.f32.mrf.mxu0  ;;  %v5150_v36 = vadd.f32 %v5149_v3, %v10637_v30 }
 0x4a2   :  { %v5063_v1 = vadd.f32 %v5062_v28, %v10637_v30  ;;  %v5151_v0 = vpop.f32.mrf.mxu1  ;;  %v5736_v59 = vmax.f32 %v5061_v4, 0.0 }
 0x4a3   :  { %v5152_v50 = vadd.f32 %v5151_v0, %v10637_v30  ;;  %v5738_v46 = vmax.f32 %v5150_v36, 0.0 }
 0x4a4   :  { %v5737_v33 = vmax.f32 %v5063_v1, 0.0 }
 0x4a5   :  { %v5739_v9 = vmax.f32 %v5152_v50, 0.0  ;;  %v10656_v21 = vpop.f32.mrf.mxu0 }
 0x4a6   :  { %v10660_v27 = vpop.f32.mrf.mxu1  ;;  %5786 = vmatprep.subr.mxu0 %v5737_v33  ;;  %v5221_v35 = vadd.f32 %v10656_v21, %v10652_v22 }
 0x4a7   :  { %v5222_v25 = vpop.f32.mrf.mxu0  ;;  %5857 = vmatprep.subr.mxu1 %v5739_v9  ;;  %5787 = vmatpush1.msra.mxu0 %v5736_v59  ;;  %v5310_v59 = vadd.f32 %v10660_v27, %v10652_v22 }
 0x4a8   :  { %v5311_v62 = vpop.f32.mrf.mxu1  ;;  %5858 = vmatpush1.msra.mxu1 %v5738_v46  ;;  %5788 = vmatprep.subr.mxu0 %v5721_v26  ;;  %v5223_v29 = vadd.f32 %v5222_v25, %v10652_v22  ;;  %v5692_v21 = vmax.f32 %v5221_v35, 0.0 }
 0x4a9   :  { %v5226_v2 = vpop.f32.mrf.mxu0  ;;  %5859 = vmatprep.subr.mxu1 %v5723_v55  ;;  %5789 = vmatpush1.msra.mxu0 %v5720_v63  ;;  %v5312_v33 = vadd.f32 %v5311_v62, %v10652_v22  ;;  %v5694_v63 = vmax.f32 %v5310_v59, 0.0 }
 0x4aa   :  { %v5315_v52 = vpop.f32.mrf.mxu1  ;;  %5860 = vmatpush1.msra.mxu1 %v5722_v24  ;;  %5790 = vmatprep.subr.mxu0 %v5705_v13  ;;  %v5227_v61 = vadd.f32 %v5226_v2, %v10645_v11  ;;  %v5693_v46 = vmax.f32 %v5223_v29, 0.0 }
 0x4ab   :  { %v5228_v40 = vpop.f32.mrf.mxu0  ;;  %5861 = vmatprep.subr.mxu1 %v5707_v38  ;;  %5791 = vmatpush1.msra.mxu0 %v5704_v58  ;;  %v5316_v5 = vadd.f32 %v5315_v52, %v10645_v11  ;;  %v5695_v60 = vmax.f32 %v5312_v33, 0.0 }
 0x4ac   :  { %v5317_v34 = vpop.f32.mrf.mxu1  ;;  %5862 = vmatpush1.msra.mxu1 %v5706_v56  ;;  %5792 = vmatprep.subr.mxu0 %v5689_v17  ;;  %v5229_v3 = vadd.f32 %v5228_v40, %v10645_v11  ;;  %v5708_v31 = vmax.f32 %v5227_v61, 0.0 }
 0x4ad   :  { %v5232_v41 = vpop.f32.mrf.mxu0  ;;  %5863 = vmatprep.subr.mxu1 %v5691_v48  ;;  %5793 = vmatpush1.msra.mxu0 %v5688_v45  ;;  %v5318_v36 = vadd.f32 %v5317_v34, %v10645_v11  ;;  %v5710_v39 = vmax.f32 %v5316_v5, 0.0 }
 0x4ae   :  { %v5321_v51 = vpop.f32.mrf.mxu1  ;;  %5864 = vmatpush1.msra.mxu1 %v5690_v49  ;;  %6566 = vmatmul.mubr.msk.f32.vlgmr.msra.gmra.mxu0 %vm2371_vm1, %v10668_v16  ;;  %v5233_v8 = vadd.f32 %v5232_v41, %v10639_v47  ;;  %v5709_v9 = vmax.f32 %v5229_v3, 0.0 }
 0x4af   :  { %v5234_v15 = vpop.f32.mrf.mxu0  ;;  %6567 = vmatmul.mubr.msk.f32.vlgmr.msra.gmra.mxu1 %vm2371_vm1, %v10668_v16  ;;  %5968 = vmatprep.mubr.f32.mxu0 %v12308_v32  ;;  %v5322_v4 = vadd.f32 %v5321_v51, %v10639_v47  ;;  %v5711_v26 = vmax.f32 %v5318_v36, 0.0 }
 0x4b0   :  { %v5323_v43 = vpop.f32.mrf.mxu1  ;;  %6039 = vmatprep.mubr.f32.mxu1 %v12308_v32  ;;  %v5235_v42 = vadd.f32 %v5234_v15, %v10639_v47  ;;  %v5724_v54 = vmax.f32 %v5233_v8, 0.0 }
 0x4b1   :  { %v5238_v7 = vpop.f32.mrf.mxu0  ;;  %v5324_v37 = vadd.f32 %v5323_v43, %v10639_v47  ;;  %v5726_v44 = vmax.f32 %v5322_v4, 0.0 }
 0x4b2   :  { %v5327_v18 = vpop.f32.mrf.mxu1  ;;  %v5239_v19 = vadd.f32 %v5238_v7, %v10637_v30  ;;  %v5725_v50 = vmax.f32 %v5235_v42, 0.0 }
 0x4b3   :  { %v5240_v12 = vpop.f32.mrf.mxu0  ;;  %v5328_v53 = vadd.f32 %v5327_v18, %v10637_v30  ;;  %v5727_v14 = vmax.f32 %v5324_v37, 0.0 }
 0x4b4   :  { %v5241_v6 = vadd.f32 %v5240_v12, %v10637_v30  ;;  %v5329_v20 = vpop.f32.mrf.mxu1  ;;  %v5740_v1 = vmax.f32 %v5239_v19, 0.0 }
 0x4b5   :  { %v5330_v10 = vadd.f32 %v5329_v20, %v10637_v30  ;;  %v5742_v23 = vmax.f32 %v5328_v53, 0.0 }
 0x4b6   :  { %v5741_v28 = vmax.f32 %v5241_v6, 0.0 }
 0x4b7   :  { %v5743_v0 = vmax.f32 %v5330_v10, 0.0 }
 0x4b8   :  { %5928 = vmatprep.subr.mxu0 %v5741_v28 }
 0x4b9   :  { %5999 = vmatprep.subr.mxu1 %v5743_v0  ;;  %5929 = vmatpush1.msra.mxu0 %v5740_v1 }
 0x4ba   :  { %6000 = vmatpush1.msra.mxu1 %v5742_v23  ;;  %5930 = vmatprep.subr.mxu0 %v5725_v50 }
 0x4bb   :  { %6001 = vmatprep.subr.mxu1 %v5727_v14  ;;  %5931 = vmatpush1.msra.mxu0 %v5724_v54 }
 0x4bc   :  { %6002 = vmatpush1.msra.mxu1 %v5726_v44  ;;  %5932 = vmatprep.subr.mxu0 %v5709_v9 }
 0x4bd   :  { %6003 = vmatprep.subr.mxu1 %v5711_v26  ;;  %5933 = vmatpush1.msra.mxu0 %v5708_v31 }
 0x4be   :  { %6004 = vmatpush1.msra.mxu1 %v5710_v39  ;;  %5934 = vmatprep.subr.mxu0 %v5693_v46 }
 0x4bf   :  { %6005 = vmatprep.subr.mxu1 %v5695_v60  ;;  %5935 = vmatpush1.msra.mxu0 %v5692_v21 }
 0x4c0   :  { %6006 = vmatpush1.msra.mxu1 %v5694_v63  ;;  %6568 = vmatmul.mubr.msk.f32.vlgmr.msra.gmra.mxu0 %vm2371_vm1, %v10668_v16 }
 0x4c1   :  { %6569 = vmatmul.mubr.msk.f32.vlgmr.msra.gmra.mxu1 %vm2371_vm1, %v10668_v16  ;;  %6110 = vmatprep.mubr.f32.mxu0 %v12308_v32 }
 0x4c2   :  { %6181 = vmatprep.mubr.f32.mxu1 %v12308_v32 }
 0x4d6   :  { %v5398_v27 = vpop.f32.mrf.mxu0 }
 0x4d7   :  { %v5487_v55 = vpop.f32.mrf.mxu1  ;;  %v5399_v10 = vadd.f32 %v5398_v27, %v10652_v22 }
 0x4d8   :  { %v5400_v25 = vpop.f32.mrf.mxu0  ;;  %v5488_v0 = vadd.f32 %v5487_v55, %v10652_v22 }
 0x4d9   :  { %v5489_v57 = vpop.f32.mrf.mxu1  ;;  %v5401_v6 = vadd.f32 %v5400_v25, %v10652_v22  ;;  %v5696_v35 = vmax.f32 %v5399_v10, 0.0 }
 0x4da   :  { %v5404_v13 = vpop.f32.mrf.mxu0  ;;  %v5490_v61 = vadd.f32 %v5489_v57, %v10652_v22  ;;  %v5698_v14 = vmax.f32 %v5488_v0, 0.0 }
 0x4db   :  { %v5493_v24 = vpop.f32.mrf.mxu1  ;;  %v5405_v12 = vadd.f32 %v5404_v13, %v10645_v11  ;;  %v5697_v50 = vmax.f32 %v5401_v6, 0.0 }
 0x4dc   :  { %v5406_v62 = vpop.f32.mrf.mxu0  ;;  %v5494_v3 = vadd.f32 %v5493_v24, %v10645_v11  ;;  %v5699_v54 = vmax.f32 %v5490_v61, 0.0 }
 0x4dd   :  { %v5495_v58 = vpop.f32.mrf.mxu1  ;;  %v5407_v43 = vadd.f32 %v5406_v62, %v10645_v11  ;;  %v5712_v29 = vmax.f32 %v5405_v12, 0.0 }
 0x4de   :  { %v5410_v38 = vpop.f32.mrf.mxu0  ;;  %v5496_v20 = vadd.f32 %v5495_v58, %v10645_v11  ;;  %v5714_v33 = vmax.f32 %v5494_v3, 0.0 }
 0x4df   :  { %v5499_v2 = vpop.f32.mrf.mxu1  ;;  %v5411_v41 = vadd.f32 %v5410_v38, %v10639_v47  ;;  %v5713_v36 = vmax.f32 %v5407_v43, 0.0 }
 0x4e0   :  { %v5412_v17 = vpop.f32.mrf.mxu0  ;;  %v5500_v42 = vadd.f32 %v5499_v2, %v10639_v47  ;;  %v5715_v23 = vmax.f32 %v5496_v20, 0.0 }
 0x4e1   :  { %v5501_v56 = vpop.f32.mrf.mxu1  ;;  %v5413_v49 = vadd.f32 %v5412_v17, %v10639_v47  ;;  %v5728_v4 = vmax.f32 %v5411_v41, 0.0 }
 0x4e2   :  { %v5416_v52 = vpop.f32.mrf.mxu0  ;;  %v5502_v7 = vadd.f32 %v5501_v56, %v10639_v47  ;;  %v5730_v5 = vmax.f32 %v5500_v42, 0.0 }
 0x4e3   :  { %v5417_v45 = vadd.f32 %v5416_v52, %v10637_v30  ;;  %v5505_v48 = vpop.f32.mrf.mxu1  ;;  %v5729_v8 = vmax.f32 %v5413_v49, 0.0 }
 0x4e4   :  { %v5418_v40 = vpop.f32.mrf.mxu0  ;;  %v5506_v51 = vadd.f32 %v5505_v48, %v10637_v30  ;;  %v5731_v1 = vmax.f32 %v5502_v7, 0.0 }
 0x4e5   :  { %v5419_v34 = vadd.f32 %v5418_v40, %v10637_v30  ;;  %v5507_v15 = vpop.f32.mrf.mxu1  ;;  %v5744_v53 = vmax.f32 %v5417_v45, 0.0 }
 0x4e6   :  { %v5508_v19 = vadd.f32 %v5507_v15, %v10637_v30  ;;  %v5746_v28 = vmax.f32 %v5506_v51, 0.0 }
 0x4e7   :  { %v5745_v18 = vmax.f32 %v5419_v34, 0.0 }
 0x4e8   :  { %v5747_v37 = vmax.f32 %v5508_v19, 0.0 }
 0x4e9   :  { %6070 = vmatprep.subr.mxu0 %v5745_v18 }
 0x4ea   :  { %6071 = vmatpush1.msra.mxu0 %v5744_v53  ;;  %6141 = vmatprep.subr.mxu1 %v5747_v37 }
 0x4eb   :  { %6072 = vmatprep.subr.mxu0 %v5729_v8  ;;  %6142 = vmatpush1.msra.mxu1 %v5746_v28 }
 0x4ec   :  { %6073 = vmatpush1.msra.mxu0 %v5728_v4  ;;  %6143 = vmatprep.subr.mxu1 %v5731_v1  ;;  %v5757_v1 = vpop.permute.xlu0 %5756 }
 0x4ed   :  { %6074 = vmatprep.subr.mxu0 %v5713_v36  ;;  %6144 = vmatpush1.msra.mxu1 %v5730_v5 }
 0x4ee   :  { %6075 = vmatpush1.msra.mxu0 %v5712_v29  ;;  %6145 = vmatprep.subr.mxu1 %v5715_v23 }
 0x4ef   :  { %6076 = vmatprep.subr.mxu0 %v5697_v50  ;;  %6146 = vmatpush1.msra.mxu1 %v5714_v33  ;;  %v12496_v50 = vld [vmem:[#allocation11_spill] sm:$0xff] }
 0x4f0   :  { %6077 = vmatpush1.msra.mxu0 %v5696_v35  ;;  %6147 = vmatprep.subr.mxu1 %v5699_v54 }
 0x4f1   :  { %6570 = vmatmul.mubr.msk.f32.vlgmr.msra.gmra.mxu0 %vm2371_vm1, %v10668_v16  ;;  %6148 = vmatpush1.msra.mxu1 %v5698_v14 }
 0x4f2   :  { %6252 = vmatprep.mubr.f32.mxu0 %v12308_v32  ;;  %6571 = vmatmul.mubr.msk.f32.vlgmr.msra.gmra.mxu1 %vm2371_vm1, %v10668_v16 }
 0x4f3   :  { %6323 = vmatprep.mubr.f32.mxu1 %v12308_v32 }
 0x50e   :  { %v5576_v59 = vpop.f32.mrf.mxu0 }
 0x50f   :  { %v5577_v41 = vadd.f32 %v5576_v59, %v10652_v22 }
 0x510   :  { %v5578_v9 = vpop.f32.mrf.mxu0 }
 0x511   :  { %v5579_v48 = vadd.f32 %v5578_v9, %v10652_v22  ;;  %v5700_v20 = vmax.f32 %v5577_v41, 0.0 }
 0x512   :  { %v5665_v44 = vpop.f32.mrf.mxu1  ;;  %v5582_v31 = vpop.f32.mrf.mxu0 }
 0x513   :  { %v5583_v17 = vadd.f32 %v5582_v31, %v10645_v11  ;;  %v5701_v53 = vmax.f32 %v5579_v48, 0.0 }
 0x514   :  { %v5667_v26 = vpop.f32.mrf.mxu1  ;;  %v5584_v46 = vpop.f32.mrf.mxu0 }
 0x515   :  { %v5585_v38 = vadd.f32 %v5584_v46, %v10645_v11  ;;  %v5716_v19 = vmax.f32 %v5583_v17, 0.0 }
 0x516   :  { %v5671_v39 = vpop.f32.mrf.mxu1  ;;  %v5588_v21 = vpop.f32.mrf.mxu0 }
 0x517   :  { %v5589_v62 = vadd.f32 %v5588_v21, %v10639_v47  ;;  %v5717_v43 = vmax.f32 %v5585_v38, 0.0  ;;  %v5672_v12 = vadd.f32 %v5671_v39, %v10645_v11 }
 0x518   :  { %v5673_v60 = vpop.f32.mrf.mxu1  ;;  %v5590_v63 = vpop.f32.mrf.mxu0 }
 0x519   :  { %v5591_v24 = vadd.f32 %v5590_v63, %v10639_v47  ;;  %v5732_v51 = vmax.f32 %v5589_v62, 0.0  ;;  %v5674_v7 = vadd.f32 %v5673_v60, %v10645_v11  ;;  %v5718_v10 = vmax.f32 %v5672_v12, 0.0 }
 0x51a   :  { %v5677_v27 = vpop.f32.mrf.mxu1  ;;  %v5594_v55 = vpop.f32.mrf.mxu0 }
 0x51b   :  { %v5595_v57 = vadd.f32 %v5594_v55, %v10637_v30  ;;  %v5733_v40 = vmax.f32 %v5591_v24, 0.0  ;;  %v5678_v15 = vadd.f32 %v5677_v27, %v10639_v47  ;;  %v5719_v37 = vmax.f32 %v5674_v7, 0.0 }
 0x51c   :  { %v5679_v25 = vpop.f32.mrf.mxu1  ;;  %v5596_v13 = vpop.f32.mrf.mxu0 }
 0x51d   :  { %v5597_v32 = vadd.f32 %v5596_v13, %v10637_v30  ;;  %v5748_v56 = vmax.f32 %v5595_v57, 0.0  ;;  %v5680_v49 = vadd.f32 %v5679_v25, %v10639_v47  ;;  %v5666_v47 = vadd.f32 %v5665_v44, %v10652_v22 }
 0x51e   :  { %v5683_v58 = vpop.f32.mrf.mxu1  ;;  %v5734_v8 = vmax.f32 %v5678_v15, 0.0 }
 0x51f   :  { %v5749_v2 = vmax.f32 %v5597_v32, 0.0  ;;  %v5684_v52 = vadd.f32 %v5683_v58, %v10637_v30  ;;  %v5735_v6 = vmax.f32 %v5680_v49, 0.0  ;;  %v5702_v3 = vmax.f32 %v5666_v47, 0.0 }
 0x520   :  { %v5685_v45 = vpop.f32.mrf.mxu1 }
 0x521   :  { %v5686_v34 = vadd.f32 %v5685_v45, %v10637_v30  ;;  %6212 = vmatprep.subr.mxu0 %v5749_v2  ;;  %v5750_v42 = vmax.f32 %v5684_v52, 0.0  ;;  %v5668_v30 = vadd.f32 %v5667_v26, %v10652_v22  ;;  %v6666_v22 = vmov 1983009808  }
 0x522   :  { %6213 = vmatpush1.msra.mxu0 %v5748_v56  ;;  %v6349_v4 = vunpack.c.l.s4 %v6666_v22 }
 0x523   :  { %v5751_v18 = vmax.f32 %v5686_v34, 0.0  ;;  %6214 = vmatprep.subr.mxu0 %v5733_v40  ;;  %v5703_v11 = vmax.f32 %v5668_v30, 0.0 }
 0x524   :  { %6215 = vmatpush1.msra.mxu0 %v5732_v51  ;;  %v6350_v28 = vunpack.c.0.s8 %v6349_v4 }
 0x525   :  { %6283 = vmatprep.subr.mxu1 %v5751_v18  ;;  %6216 = vmatprep.subr.mxu0 %v5717_v43 }
 0x526   :  { %6284 = vmatpush1.msra.mxu1 %v5750_v42  ;;  %6217 = vmatpush1.msra.mxu0 %v5716_v19  ;;  %v6353_v23 = vsub.s32 %v6350_v28, %v12496_v50 }
 0x527   :  { %6285 = vmatprep.subr.mxu1 %v5735_v6  ;;  %6218 = vmatprep.subr.mxu0 %v5701_v53 }
 0x528   :  { %6286 = vmatpush1.msra.mxu1 %v5734_v8  ;;  %6219 = vmatpush1.msra.mxu0 %v5700_v20 }
 0x529   :  { %6287 = vmatprep.subr.mxu1 %v5719_v37  ;;  %6572 = vmatmul.mubr.msk.f32.vlgmr.msra.gmra.mxu0 %vm2371_vm1, %v10668_v16 }
 0x52a   :  { %6288 = vmatpush1.msra.mxu1 %v5718_v10 }
 0x52b   :  { %6289 = vmatprep.subr.mxu1 %v5703_v11 }
 0x52c   :  { %6290 = vmatpush1.msra.mxu1 %v5702_v3 }
 0x52d   :  { %6573 = vmatmul.mubr.msk.f32.vlgmr.msra.gmra.mxu1 %vm2371_vm1, %v10668_v16 }
 0x56e   :  { %v5828_v61 = vpop.f32.mrf.mxu0 }
 0x56f   :  { %v5899_v36 = vpop.f32.mrf.mxu1  ;;  %v5829_v29 = vadd.f32 %v5828_v61, %v5757_v1 }
 0x570   :  { %v5830_v0 = vpop.f32.mrf.mxu0  ;;  %v5900_v33 = vadd.f32 %v5899_v36, %v5757_v1 }
 0x571   :  { %v5831_v5 = vadd.f32 %v5830_v0, %v5757_v1  ;;  %v5901_v35 = vpop.f32.mrf.mxu1 }
 0x572   :  { %v5902_v54 = vadd.f32 %v5901_v35, %v5757_v1 }
 0x573   :  { %v6346_v14 = vcombine.low %v5829_v29, %v5831_v5 }
 0x574   :  { %v6347_v59 = vcombine.low %v5900_v33, %v5902_v54 }
 0x575   :  { %v6354_v9 = vrot.slane %v6346_v14, %v6353_v23 }
 0x576   :  { %v6361_v44 = vrot.slane %v6347_v59, %v6353_v23 }
 0x578   :  { %v6362_v31 = vcombine.low %v6354_v9, %v6361_v44 }
 0x57a   :  { %6418 = vst [vmem:[#allocation7] sm:$0xff] %v6362_v31 }
 0x580   :  { %v5970_v16 = vpop.f32.mrf.mxu0 }
 0x581   :  { %v6041_v26 = vpop.f32.mrf.mxu1  ;;  %v5971_v39 = vadd.f32 %v5970_v16, %v5757_v1 }
 0x582   :  { %v5972_v46 = vpop.f32.mrf.mxu0  ;;  %v6042_v63 = vadd.f32 %v6041_v26, %v5757_v1 }
 0x583   :  { %v5973_v21 = vadd.f32 %v5972_v46, %v5757_v1  ;;  %v6043_v60 = vpop.f32.mrf.mxu1 }
 0x584   :  { %v6044_v27 = vadd.f32 %v6043_v60, %v5757_v1 }
 0x585   :  { %v6363_v55 = vcombine.low %v5971_v39, %v5973_v21 }
 0x586   :  { %v6364_v25 = vcombine.low %v6042_v63, %v6044_v27 }
 0x587   :  { %v6371_v57 = vrot.slane %v6363_v55, %v6353_v23 }
 0x588   :  { %v6378_v13 = vrot.slane %v6364_v25, %v6353_v23 }
 0x58a   :  { %v6379_v24 = vcombine.low %v6371_v57, %v6378_v13 }
 0x58c   :  { %6419 = vst [vmem:[#allocation7 + $0x8] sm:$0xff] %v6379_v24 }
 0x5b1   :  { %v6112_v32 = vpop.f32.mrf.mxu0 }
 0x5b2   :  { %v6183_v62 = vpop.f32.mrf.mxu1  ;;  %v6113_v38 = vadd.f32 %v6112_v32, %v5757_v1 }
 0x5b3   :  { %v6114_v58 = vpop.f32.mrf.mxu0  ;;  %v6184_v56 = vadd.f32 %v6183_v62, %v5757_v1 }
 0x5b4   :  { %v6115_v2 = vadd.f32 %v6114_v58, %v5757_v1  ;;  %v6185_v17 = vpop.f32.mrf.mxu1 }
 0x5b5   :  { %v6186_v45 = vadd.f32 %v6185_v17, %v5757_v1 }
 0x5b6   :  { %v6380_v52 = vcombine.low %v6113_v38, %v6115_v2 }
 0x5b7   :  { %v6381_v40 = vcombine.low %v6184_v56, %v6186_v45 }
 0x5b8   :  { %v6388_v48 = vrot.slane %v6380_v52, %v6353_v23 }
 0x5b9   :  { %v6395_v49 = vrot.slane %v6381_v40, %v6353_v23 }
 0x5bb   :  { %v6396_v34 = vcombine.low %v6388_v48, %v6395_v49 }
 0x5bd   :  { %6420 = vst [vmem:[#allocation7 + $0x10] sm:$0xff] %v6396_v34 }
 0x5e9   :  { %v6254_v41 = vpop.f32.mrf.mxu0 }
 0x5ea   :  { %v6255_v15 = vadd.f32 %v6254_v41, %v5757_v1 }
 0x5eb   :  { %v6256_v51 = vpop.f32.mrf.mxu0 }
 0x5ec   :  { %v6257_v43 = vadd.f32 %v6256_v51, %v5757_v1 }
 0x5ed   :  { %v6325_v7 = vpop.f32.mrf.mxu1 }
 0x5ee   :  { %v6397_v18 = vcombine.low %v6255_v15, %v6257_v43  ;;  %v6326_v12 = vadd.f32 %v6325_v7, %v5757_v1 }
 0x5ef   :  { %v6327_v19 = vpop.f32.mrf.mxu1 }
 0x5f0   :  { %v6328_v42 = vadd.f32 %v6327_v19, %v5757_v1  ;;  %v6405_v53 = vrot.slane %v6397_v18, %v6353_v23 }
 0x5f2   :  { %v6398_v30 = vcombine.low %v6326_v12, %v6328_v42 }
 0x5f4   :  { %v6412_v6 = vrot.slane %v6398_v30, %v6353_v23 }
 0x5f6   :  { %v6413_v20 = vcombine.low %v6405_v53, %v6412_v6 }
 0x5f8   :  { %6421 = vst [vmem:[#allocation7 + $0x18] sm:$0xff] %v6413_v20 }
 0x5f9   :  { %6644 = shalt.err (!%p6641_p0)
}
 0x5fa   :  { %6431 = dma.vmem_to_hbm [thread:$0]  %s6429_s18, 512, %s10758_s12, [#allocation4]  }
 0x5fb   :  { %6657 = dma.done.wait [#allocation4], 512  }
 0x5fc   :  { %6658 = vsyncadd [#allocation4], 4294966784 }
 0x5fd   :  { %6435 = vsyncpa [#allocation3], 1 }
 0x5fe   :  { %6436 = vsyncpa [#allocation6], 1 }
 0x5ff   :  { %6437 = vsyncpa [#allocation4], 1 }

</bundles_post_ra>
